<compile_context>
chip_gen: v6e
topology: v6e:2x2x1
jax: 0.10.0
libtpu: 0.0.40
codegen_flags: <defaults>
</compile_context>

<pallas_src>
import functools

import jax
import jax.numpy as jnp
import numpy as np
from jax.experimental import pallas as pl
from jax.experimental.pallas import tpu as pltpu


def _bconv_kernel(x_ref, w_ref, gsel_ref, o_ref, *, kern, stride, Ho, Wo, eps):
    # x_ref   : (Hp, Wp, Cin)   bf16, halo-padded NHWC image (one batch elem)
    # w_ref   : (KK, Cin, Cout) bf16, per-tap block-diagonal grouped weights,
    #                           L2-normalized and pre-scaled by sqrt(gamma)
    # gsel_ref: (Cin, Cout)     f32 group-membership indicator (norm reduce)
    # o_ref   : (Ho*Wo, Cout)   f32 output, flattened-NHWC layout
    M = Ho * Wo
    cout = o_ref.shape[-1]
    gsel = gsel_ref[...]

    conv = jnp.zeros((M, cout), jnp.float32)
    ss = jnp.zeros((M, cout), jnp.float32)

    for kh in range(kern):
        for kw in range(kern):
            if stride == 1:
                xs = x_ref[kh:kh + Ho, kw:kw + Wo, :]
            else:
                xs = x_ref[pl.ds(kh, Ho, stride), pl.ds(kw, Wo, stride), :]
            xs2 = xs.reshape(M, xs.shape[-1])                     # (M, Cin) bf16
            # grouped conv tap: one MXU matmul covers all groups
            conv = conv + jnp.dot(xs2, w_ref[kh * kern + kw],
                                  preferred_element_type=jnp.float32)
            # per-group sum-of-squares for the B-cos norm, also on the MXU,
            # accumulated in f32
            xf = xs2.astype(jnp.float32)
            ss = ss + jnp.dot(xf * xf, gsel,
                              preferred_element_type=jnp.float32)

    # norm = sqrt(ss + 1e-6);  out = conv * |conv| / norm   (gamma already
    # folded into the weights as sqrt(gamma))
    inv = jax.lax.rsqrt(ss + eps)
    o_ref[...] = (conv * jnp.abs(conv) * inv).astype(o_ref.dtype)


def bconv2d_group(x, weight, *, groups, kern=3, pad=1, stride=1, maxout=1,
                  gamma=90.0):
    # TODO(synk): maxout > 1 branch not implemented.
    assert maxout == 1
    N, Cin, H, W = x.shape
    Cout = weight.shape[0]
    G = groups
    C = Cin // G
    Og = Cout // G
    KK = kern * kern
    Ho = (H + 2 * pad - kern) // stride + 1
    Wo = (W + 2 * pad - kern) // stride + 1
    Hp, Wp = H + 2 * pad, W + 2 * pad

    # --- tiny parameter prep (stays in XLA) --------------------------------
    # F.normalize(weight, p=2, dim=(1,2,3)), then fold gamma as sqrt(gamma):
    # the B-cos output |conv|*conv/norm is quadratic in the weights.
    w = weight.astype(jnp.float32)
    wn = jnp.sqrt(jnp.sum(w * w, axis=(1, 2, 3), keepdims=True))
    w = w / jnp.maximum(wn, 1e-12)
    w = w * jnp.sqrt(jnp.asarray(gamma, jnp.float32))
    # (Cout, C, kh, kw) -> per-tap (KK, C, Cout) -> block-diagonal
    # (KK, Cin, Cout) so a single matmul per tap handles all groups.
    w_t = jnp.transpose(w, (2, 3, 1, 0)).reshape(KK, C, Cout)
    wbd = jnp.zeros((KK, Cin, Cout), jnp.float32)
    for g in range(G):
        wbd = wbd.at[:, g * C:(g + 1) * C, g * Og:(g + 1) * Og].set(
            w_t[:, :, g * Og:(g + 1) * Og])
    wbd = wbd.astype(jnp.bfloat16)
    # gsel[c, o] = 1 iff input channel c belongs to output channel o's group
    gsel = (jnp.arange(Cin)[:, None] // C ==
            jnp.arange(Cout)[None, :] // Og).astype(jnp.float32)

    # --- input: NCHW -> halo-padded NHWC, bf16 ------------------------------
    xh = jnp.transpose(x.astype(jnp.bfloat16), (0, 2, 3, 1))      # (N,H,W,Cin)
    xp = jnp.pad(xh, ((0, 0), (pad, pad), (pad, pad), (0, 0)))    # (N,Hp,Wp,Cin)

    out = pl.pallas_call(
        functools.partial(_bconv_kernel, kern=kern, stride=stride,
                          Ho=Ho, Wo=Wo, eps=1e-6),
        out_shape=jax.ShapeDtypeStruct((N, Ho * Wo, Cout), jnp.float32),
        grid_spec=pltpu.PrefetchScalarGridSpec(
            num_scalar_prefetch=0,
            grid=(N,),
            in_specs=[
                pl.BlockSpec((None, Hp, Wp, Cin), lambda n: (n, 0, 0, 0)),
                pl.BlockSpec((KK, Cin, Cout), lambda n: (0, 0, 0)),   # resident
                pl.BlockSpec((Cin, Cout), lambda n: (0, 0)),          # resident
            ],
            out_specs=pl.BlockSpec((None, Ho * Wo, Cout), lambda n: (n, 0, 0)),
        ),
        compiler_params=pltpu.CompilerParams(
            dimension_semantics=("parallel",),      # shards N across TCs (v7x)
            vmem_limit_bytes=32 * 1024 * 1024),
    )(xp, wbd, gsel)

    # flattened NHWC -> NCHW to match the torch module (single XLA pass)
    out = out.reshape(N, Ho, Wo, Cout)
    return jnp.transpose(out, (0, 3, 1, 2))


def _reference(x, weight, *, groups, kern, pad, stride, gamma):
    """Pure-JAX replica of the torch forward (for verification)."""
    w = weight.astype(jnp.float32)
    wn = jnp.sqrt(jnp.sum(w * w, axis=(1, 2, 3), keepdims=True))
    w = w / jnp.maximum(wn, 1e-12)
    out = jax.lax.conv_general_dilated(
        x.astype(jnp.float32), w, (stride, stride), ((pad, pad), (pad, pad)),
        dimension_numbers=("NCHW", "OIHW", "NCHW"),
        feature_group_count=groups, precision=jax.lax.Precision.HIGHEST)
    N, Cin, H, W = x.shape
    G, C, O = groups, x.shape[1] // groups, w.shape[0]
    x2 = (x.astype(jnp.float32) ** 2).reshape(N, G, C, H, W).sum(2)
    ones = jnp.ones((G, 1, kern, kern), jnp.float32)
    norm = jax.lax.conv_general_dilated(
        x2, ones, (stride, stride), ((pad, pad), (pad, pad)),
        dimension_numbers=("NCHW", "OIHW", "NCHW"),
        feature_group_count=G, precision=jax.lax.Precision.HIGHEST)
    norm = jnp.sqrt(norm + 1e-6)
    norm = jnp.repeat(norm, O // G, axis=1)
    scale = jnp.abs(out) / norm
    return scale * out * gamma


if __name__ == "__main__":
    key = jax.random.PRNGKey(0)
    kx, kw = jax.random.split(key)

    # BConv2dGroup(inp=8, out=8, groups=2, kern=3, pad=1, stride=1, maxout=1)
    N, Cin, H, W = 2, 8, 16, 16
    out_ch, groups, kern, pad, stride = 8, 2, 3, 1, 1

    x = jax.random.normal(kx, (N, Cin, H, W), jnp.float32)
    weight = jax.random.normal(kw, (out_ch, Cin // groups, kern, kern),
                               jnp.float32)

    y = bconv2d_group(x, weight, groups=groups, kern=kern, pad=pad,
                      stride=stride, maxout=1, gamma=90.0)
    y = jax.block_until_ready(y)

    y_ref = _reference(x, weight, groups=groups, kern=kern, pad=pad,
                       stride=stride, gamma=90.0)
    np.testing.assert_allclose(np.asarray(y), np.asarray(y_ref),
                               rtol=5e-2, atol=5e-2)
    print("KERNEL_OK")
</pallas_src>

<mosaic_0001>
module attributes {stable_mosaic.version = 11 : i64} {
  func.func @_bconv_kernel(%arg0: i32, %arg1: memref<1x18x18x8xbf16, #tpu.memory_space<vmem>>, %arg2: memref<9x8x8xbf16, #tpu.memory_space<vmem>>, %arg3: memref<8x8xf32, #tpu.memory_space<vmem>>, %arg4: memref<1x256x8xf32, #tpu.memory_space<vmem>>) attributes {dimension_semantics = [#tpu.dimension_semantics<parallel>], iteration_bounds = array<i64: 2>, scalar_prefetch = 0 : i64, scratch_operands = 0 : i64, tpu.core_type = #tpu.core_type<tc>, window_params = [{transform_indices = @transform_0, window_bounds = array<i64: 1, 18, 18, 8>}, {pipeline_mode = #tpu.pipeline_mode<synchronous>, transform_indices = @transform_1, window_bounds = array<i64: 9, 8, 8>}, {pipeline_mode = #tpu.pipeline_mode<synchronous>, transform_indices = @transform_2, window_bounds = array<i64: 8, 8>}, {transform_indices = @transform_3, window_bounds = array<i64: 1, 256, 8>}]} {
    %c0 = arith.constant 0 : index
    %c0_0 = arith.constant 0 : index
    %0 = vector.load %arg3[%c0, %c0_0] : memref<8x8xf32, #tpu.memory_space<vmem>>, vector<8x8xf32>
    %cst = arith.constant 0.000000e+00 : f32
    %1 = vector.broadcast %cst : f32 to vector<256x8xf32>
    %cst_1 = arith.constant 0.000000e+00 : f32
    %2 = vector.broadcast %cst_1 : f32 to vector<256x8xf32>
    %c0_2 = arith.constant 0 : index
    %c0_3 = arith.constant 0 : index
    %c0_4 = arith.constant 0 : index
    %c0_5 = arith.constant 0 : index
    %3 = vector.load %arg1[%c0_2, %c0_3, %c0_4, %c0_5] : memref<1x18x18x8xbf16, #tpu.memory_space<vmem>>, vector<1x16x16x8xbf16>
    %4 = vector.shape_cast %3 : vector<1x16x16x8xbf16> to vector<16x16x8xbf16>
    %5 = vector.shape_cast %4 : vector<16x16x8xbf16> to vector<256x8xbf16>
    %c0_6 = arith.constant 0 : index
    %c0_7 = arith.constant 0 : index
    %c0_8 = arith.constant 0 : index
    %6 = vector.load %arg2[%c0_6, %c0_7, %c0_8] : memref<9x8x8xbf16, #tpu.memory_space<vmem>>, vector<1x8x8xbf16>
    %7 = vector.shape_cast %6 : vector<1x8x8xbf16> to vector<8x8xbf16>
    %cst_9 = arith.constant dense<0.000000e+00> : vector<256x8xf32>
    %8 = tpu.matmul %5, %7, %cst_9 {dimension_numbers = #tpu.dot_dimension_numbers<[1], [0], [0], [1], [0, 0, 1, 1], [], []>} : vector<256x8xbf16>, vector<8x8xbf16>, vector<256x8xf32> -> vector<256x8xf32>
    %9 = arith.addf %1, %8 : vector<256x8xf32>
    %10 = arith.extf %5 : vector<256x8xbf16> to vector<256x8xf32>
    %11 = arith.mulf %10, %10 : vector<256x8xf32>
    %cst_10 = arith.constant dense<0.000000e+00> : vector<256x8xf32>
    %12 = tpu.matmul %11, %0, %cst_10 {dimension_numbers = #tpu.dot_dimension_numbers<[1], [0], [0], [1], [0, 0, 1, 1], [], []>} : vector<256x8xf32>, vector<8x8xf32>, vector<256x8xf32> -> vector<256x8xf32>
    %13 = arith.addf %2, %12 : vector<256x8xf32>
    %c0_11 = arith.constant 0 : index
    %c0_12 = arith.constant 0 : index
    %c1 = arith.constant 1 : index
    %c0_13 = arith.constant 0 : index
    %14 = vector.load %arg1[%c0_11, %c0_12, %c1, %c0_13] : memref<1x18x18x8xbf16, #tpu.memory_space<vmem>>, vector<1x16x16x8xbf16>
    %15 = vector.shape_cast %14 : vector<1x16x16x8xbf16> to vector<16x16x8xbf16>
    %16 = vector.shape_cast %15 : vector<16x16x8xbf16> to vector<256x8xbf16>
    %c1_14 = arith.constant 1 : index
    %c0_15 = arith.constant 0 : index
    %c0_16 = arith.constant 0 : index
    %17 = vector.load %arg2[%c1_14, %c0_15, %c0_16] : memref<9x8x8xbf16, #tpu.memory_space<vmem>>, vector<1x8x8xbf16>
    %18 = vector.shape_cast %17 : vector<1x8x8xbf16> to vector<8x8xbf16>
    %cst_17 = arith.constant dense<0.000000e+00> : vector<256x8xf32>
    %19 = tpu.matmul %16, %18, %cst_17 {dimension_numbers = #tpu.dot_dimension_numbers<[1], [0], [0], [1], [0, 0, 1, 1], [], []>} : vector<256x8xbf16>, vector<8x8xbf16>, vector<256x8xf32> -> vector<256x8xf32>
    %20 = arith.addf %9, %19 : vector<256x8xf32>
    %21 = arith.extf %16 : vector<256x8xbf16> to vector<256x8xf32>
    %22 = arith.mulf %21, %21 : vector<256x8xf32>
    %cst_18 = arith.constant dense<0.000000e+00> : vector<256x8xf32>
    %23 = tpu.matmul %22, %0, %cst_18 {dimension_numbers = #tpu.dot_dimension_numbers<[1], [0], [0], [1], [0, 0, 1, 1], [], []>} : vector<256x8xf32>, vector<8x8xf32>, vector<256x8xf32> -> vector<256x8xf32>
    %24 = arith.addf %13, %23 : vector<256x8xf32>
    %c0_19 = arith.constant 0 : index
    %c0_20 = arith.constant 0 : index
    %c2 = arith.constant 2 : index
    %c0_21 = arith.constant 0 : index
    %25 = vector.load %arg1[%c0_19, %c0_20, %c2, %c0_21] : memref<1x18x18x8xbf16, #tpu.memory_space<vmem>>, vector<1x16x16x8xbf16>
    %26 = vector.shape_cast %25 : vector<1x16x16x8xbf16> to vector<16x16x8xbf16>
    %27 = vector.shape_cast %26 : vector<16x16x8xbf16> to vector<256x8xbf16>
    %c2_22 = arith.constant 2 : index
    %c0_23 = arith.constant 0 : index
    %c0_24 = arith.constant 0 : index
    %28 = vector.load %arg2[%c2_22, %c0_23, %c0_24] : memref<9x8x8xbf16, #tpu.memory_space<vmem>>, vector<1x8x8xbf16>
    %29 = vector.shape_cast %28 : vector<1x8x8xbf16> to vector<8x8xbf16>
    %cst_25 = arith.constant dense<0.000000e+00> : vector<256x8xf32>
    %30 = tpu.matmul %27, %29, %cst_25 {dimension_numbers = #tpu.dot_dimension_numbers<[1], [0], [0], [1], [0, 0, 1, 1], [], []>} : vector<256x8xbf16>, vector<8x8xbf16>, vector<256x8xf32> -> vector<256x8xf32>
    %31 = arith.addf %20, %30 : vector<256x8xf32>
    %32 = arith.extf %27 : vector<256x8xbf16> to vector<256x8xf32>
    %33 = arith.mulf %32, %32 : vector<256x8xf32>
    %cst_26 = arith.constant dense<0.000000e+00> : vector<256x8xf32>
    %34 = tpu.matmul %33, %0, %cst_26 {dimension_numbers = #tpu.dot_dimension_numbers<[1], [0], [0], [1], [0, 0, 1, 1], [], []>} : vector<256x8xf32>, vector<8x8xf32>, vector<256x8xf32> -> vector<256x8xf32>
    %35 = arith.addf %24, %34 : vector<256x8xf32>
    %c0_27 = arith.constant 0 : index
    %c1_28 = arith.constant 1 : index
    %c0_29 = arith.constant 0 : index
    %c0_30 = arith.constant 0 : index
    %36 = vector.load %arg1[%c0_27, %c1_28, %c0_29, %c0_30] : memref<1x18x18x8xbf16, #tpu.memory_space<vmem>>, vector<1x16x16x8xbf16>
    %37 = vector.shape_cast %36 : vector<1x16x16x8xbf16> to vector<16x16x8xbf16>
    %38 = vector.shape_cast %37 : vector<16x16x8xbf16> to vector<256x8xbf16>
    %c3 = arith.constant 3 : index
    %c0_31 = arith.constant 0 : index
    %c0_32 = arith.constant 0 : index
    %39 = vector.load %arg2[%c3, %c0_31, %c0_32] : memref<9x8x8xbf16, #tpu.memory_space<vmem>>, vector<1x8x8xbf16>
    %40 = vector.shape_cast %39 : vector<1x8x8xbf16> to vector<8x8xbf16>
    %cst_33 = arith.constant dense<0.000000e+00> : vector<256x8xf32>
    %41 = tpu.matmul %38, %40, %cst_33 {dimension_numbers = #tpu.dot_dimension_numbers<[1], [0], [0], [1], [0, 0, 1, 1], [], []>} : vector<256x8xbf16>, vector<8x8xbf16>, vector<256x8xf32> -> vector<256x8xf32>
    %42 = arith.addf %31, %41 : vector<256x8xf32>
    %43 = arith.extf %38 : vector<256x8xbf16> to vector<256x8xf32>
    %44 = arith.mulf %43, %43 : vector<256x8xf32>
    %cst_34 = arith.constant dense<0.000000e+00> : vector<256x8xf32>
    %45 = tpu.matmul %44, %0, %cst_34 {dimension_numbers = #tpu.dot_dimension_numbers<[1], [0], [0], [1], [0, 0, 1, 1], [], []>} : vector<256x8xf32>, vector<8x8xf32>, vector<256x8xf32> -> vector<256x8xf32>
    %46 = arith.addf %35, %45 : vector<256x8xf32>
    %c0_35 = arith.constant 0 : index
    %c1_36 = arith.constant 1 : index
    %c1_37 = arith.constant 1 : index
    %c0_38 = arith.constant 0 : index
    %47 = vector.load %arg1[%c0_35, %c1_36, %c1_37, %c0_38] : memref<1x18x18x8xbf16, #tpu.memory_space<vmem>>, vector<1x16x16x8xbf16>
    %48 = vector.shape_cast %47 : vector<1x16x16x8xbf16> to vector<16x16x8xbf16>
    %49 = vector.shape_cast %48 : vector<16x16x8xbf16> to vector<256x8xbf16>
    %c4 = arith.constant 4 : index
    %c0_39 = arith.constant 0 : index
    %c0_40 = arith.constant 0 : index
    %50 = vector.load %arg2[%c4, %c0_39, %c0_40] : memref<9x8x8xbf16, #tpu.memory_space<vmem>>, vector<1x8x8xbf16>
    %51 = vector.shape_cast %50 : vector<1x8x8xbf16> to vector<8x8xbf16>
    %cst_41 = arith.constant dense<0.000000e+00> : vector<256x8xf32>
    %52 = tpu.matmul %49, %51, %cst_41 {dimension_numbers = #tpu.dot_dimension_numbers<[1], [0], [0], [1], [0, 0, 1, 1], [], []>} : vector<256x8xbf16>, vector<8x8xbf16>, vector<256x8xf32> -> vector<256x8xf32>
    %53 = arith.addf %42, %52 : vector<256x8xf32>
    %54 = arith.extf %49 : vector<256x8xbf16> to vector<256x8xf32>
    %55 = arith.mulf %54, %54 : vector<256x8xf32>
    %cst_42 = arith.constant dense<0.000000e+00> : vector<256x8xf32>
    %56 = tpu.matmul %55, %0, %cst_42 {dimension_numbers = #tpu.dot_dimension_numbers<[1], [0], [0], [1], [0, 0, 1, 1], [], []>} : vector<256x8xf32>, vector<8x8xf32>, vector<256x8xf32> -> vector<256x8xf32>
    %57 = arith.addf %46, %56 : vector<256x8xf32>
    %c0_43 = arith.constant 0 : index
    %c1_44 = arith.constant 1 : index
    %c2_45 = arith.constant 2 : index
    %c0_46 = arith.constant 0 : index
    %58 = vector.load %arg1[%c0_43, %c1_44, %c2_45, %c0_46] : memref<1x18x18x8xbf16, #tpu.memory_space<vmem>>, vector<1x16x16x8xbf16>
    %59 = vector.shape_cast %58 : vector<1x16x16x8xbf16> to vector<16x16x8xbf16>
    %60 = vector.shape_cast %59 : vector<16x16x8xbf16> to vector<256x8xbf16>
    %c5 = arith.constant 5 : index
    %c0_47 = arith.constant 0 : index
    %c0_48 = arith.constant 0 : index
    %61 = vector.load %arg2[%c5, %c0_47, %c0_48] : memref<9x8x8xbf16, #tpu.memory_space<vmem>>, vector<1x8x8xbf16>
    %62 = vector.shape_cast %61 : vector<1x8x8xbf16> to vector<8x8xbf16>
    %cst_49 = arith.constant dense<0.000000e+00> : vector<256x8xf32>
    %63 = tpu.matmul %60, %62, %cst_49 {dimension_numbers = #tpu.dot_dimension_numbers<[1], [0], [0], [1], [0, 0, 1, 1], [], []>} : vector<256x8xbf16>, vector<8x8xbf16>, vector<256x8xf32> -> vector<256x8xf32>
    %64 = arith.addf %53, %63 : vector<256x8xf32>
    %65 = arith.extf %60 : vector<256x8xbf16> to vector<256x8xf32>
    %66 = arith.mulf %65, %65 : vector<256x8xf32>
    %cst_50 = arith.constant dense<0.000000e+00> : vector<256x8xf32>
    %67 = tpu.matmul %66, %0, %cst_50 {dimension_numbers = #tpu.dot_dimension_numbers<[1], [0], [0], [1], [0, 0, 1, 1], [], []>} : vector<256x8xf32>, vector<8x8xf32>, vector<256x8xf32> -> vector<256x8xf32>
    %68 = arith.addf %57, %67 : vector<256x8xf32>
    %c0_51 = arith.constant 0 : index
    %c2_52 = arith.constant 2 : index
    %c0_53 = arith.constant 0 : index
    %c0_54 = arith.constant 0 : index
    %69 = vector.load %arg1[%c0_51, %c2_52, %c0_53, %c0_54] : memref<1x18x18x8xbf16, #tpu.memory_space<vmem>>, vector<1x16x16x8xbf16>
    %70 = vector.shape_cast %69 : vector<1x16x16x8xbf16> to vector<16x16x8xbf16>
    %71 = vector.shape_cast %70 : vector<16x16x8xbf16> to vector<256x8xbf16>
    %c6 = arith.constant 6 : index
    %c0_55 = arith.constant 0 : index
    %c0_56 = arith.constant 0 : index
    %72 = vector.load %arg2[%c6, %c0_55, %c0_56] : memref<9x8x8xbf16, #tpu.memory_space<vmem>>, vector<1x8x8xbf16>
    %73 = vector.shape_cast %72 : vector<1x8x8xbf16> to vector<8x8xbf16>
    %cst_57 = arith.constant dense<0.000000e+00> : vector<256x8xf32>
    %74 = tpu.matmul %71, %73, %cst_57 {dimension_numbers = #tpu.dot_dimension_numbers<[1], [0], [0], [1], [0, 0, 1, 1], [], []>} : vector<256x8xbf16>, vector<8x8xbf16>, vector<256x8xf32> -> vector<256x8xf32>
    %75 = arith.addf %64, %74 : vector<256x8xf32>
    %76 = arith.extf %71 : vector<256x8xbf16> to vector<256x8xf32>
    %77 = arith.mulf %76, %76 : vector<256x8xf32>
    %cst_58 = arith.constant dense<0.000000e+00> : vector<256x8xf32>
    %78 = tpu.matmul %77, %0, %cst_58 {dimension_numbers = #tpu.dot_dimension_numbers<[1], [0], [0], [1], [0, 0, 1, 1], [], []>} : vector<256x8xf32>, vector<8x8xf32>, vector<256x8xf32> -> vector<256x8xf32>
    %79 = arith.addf %68, %78 : vector<256x8xf32>
    %c0_59 = arith.constant 0 : index
    %c2_60 = arith.constant 2 : index
    %c1_61 = arith.constant 1 : index
    %c0_62 = arith.constant 0 : index
    %80 = vector.load %arg1[%c0_59, %c2_60, %c1_61, %c0_62] : memref<1x18x18x8xbf16, #tpu.memory_space<vmem>>, vector<1x16x16x8xbf16>
    %81 = vector.shape_cast %80 : vector<1x16x16x8xbf16> to vector<16x16x8xbf16>
    %82 = vector.shape_cast %81 : vector<16x16x8xbf16> to vector<256x8xbf16>
    %c7 = arith.constant 7 : index
    %c0_63 = arith.constant 0 : index
    %c0_64 = arith.constant 0 : index
    %83 = vector.load %arg2[%c7, %c0_63, %c0_64] : memref<9x8x8xbf16, #tpu.memory_space<vmem>>, vector<1x8x8xbf16>
    %84 = vector.shape_cast %83 : vector<1x8x8xbf16> to vector<8x8xbf16>
    %cst_65 = arith.constant dense<0.000000e+00> : vector<256x8xf32>
    %85 = tpu.matmul %82, %84, %cst_65 {dimension_numbers = #tpu.dot_dimension_numbers<[1], [0], [0], [1], [0, 0, 1, 1], [], []>} : vector<256x8xbf16>, vector<8x8xbf16>, vector<256x8xf32> -> vector<256x8xf32>
    %86 = arith.addf %75, %85 : vector<256x8xf32>
    %87 = arith.extf %82 : vector<256x8xbf16> to vector<256x8xf32>
    %88 = arith.mulf %87, %87 : vector<256x8xf32>
    %cst_66 = arith.constant dense<0.000000e+00> : vector<256x8xf32>
    %89 = tpu.matmul %88, %0, %cst_66 {dimension_numbers = #tpu.dot_dimension_numbers<[1], [0], [0], [1], [0, 0, 1, 1], [], []>} : vector<256x8xf32>, vector<8x8xf32>, vector<256x8xf32> -> vector<256x8xf32>
    %90 = arith.addf %79, %89 : vector<256x8xf32>
    %c0_67 = arith.constant 0 : index
    %c2_68 = arith.constant 2 : index
    %c2_69 = arith.constant 2 : index
    %c0_70 = arith.constant 0 : index
    %91 = vector.load %arg1[%c0_67, %c2_68, %c2_69, %c0_70] : memref<1x18x18x8xbf16, #tpu.memory_space<vmem>>, vector<1x16x16x8xbf16>
    %92 = vector.shape_cast %91 : vector<1x16x16x8xbf16> to vector<16x16x8xbf16>
    %93 = vector.shape_cast %92 : vector<16x16x8xbf16> to vector<256x8xbf16>
    %c8 = arith.constant 8 : index
    %c0_71 = arith.constant 0 : index
    %c0_72 = arith.constant 0 : index
    %94 = vector.load %arg2[%c8, %c0_71, %c0_72] : memref<9x8x8xbf16, #tpu.memory_space<vmem>>, vector<1x8x8xbf16>
    %95 = vector.shape_cast %94 : vector<1x8x8xbf16> to vector<8x8xbf16>
    %cst_73 = arith.constant dense<0.000000e+00> : vector<256x8xf32>
    %96 = tpu.matmul %93, %95, %cst_73 {dimension_numbers = #tpu.dot_dimension_numbers<[1], [0], [0], [1], [0, 0, 1, 1], [], []>} : vector<256x8xbf16>, vector<8x8xbf16>, vector<256x8xf32> -> vector<256x8xf32>
    %97 = arith.addf %86, %96 : vector<256x8xf32>
    %98 = arith.extf %93 : vector<256x8xbf16> to vector<256x8xf32>
    %99 = arith.mulf %98, %98 : vector<256x8xf32>
    %cst_74 = arith.constant dense<0.000000e+00> : vector<256x8xf32>
    %100 = tpu.matmul %99, %0, %cst_74 {dimension_numbers = #tpu.dot_dimension_numbers<[1], [0], [0], [1], [0, 0, 1, 1], [], []>} : vector<256x8xf32>, vector<8x8xf32>, vector<256x8xf32> -> vector<256x8xf32>
    %101 = arith.addf %90, %100 : vector<256x8xf32>
    %cst_75 = arith.constant 9.99999997E-7 : f32
    %102 = vector.broadcast %cst_75 : f32 to vector<256x8xf32>
    %103 = arith.addf %101, %102 : vector<256x8xf32>
    %104 = math.rsqrt %103 : vector<256x8xf32>
    %105 = math.absf %97 : vector<256x8xf32>
    %106 = arith.mulf %97, %105 : vector<256x8xf32>
    %107 = arith.mulf %106, %104 : vector<256x8xf32>
    %c0_76 = arith.constant 0 : index
    %c0_77 = arith.constant 0 : index
    %c0_78 = arith.constant 0 : index
    %108 = vector.load %arg4[%c0_76, %c0_77, %c0_78] : memref<1x256x8xf32, #tpu.memory_space<vmem>>, vector<1x256x8xf32>
    %109 = vector.shape_cast %108 : vector<1x256x8xf32> to vector<256x8xf32>
    %110 = vector.shape_cast %107 : vector<256x8xf32> to vector<1x256x8xf32>
    tpu.vector_store %arg4[%c0_76, %c0_77, %c0_78], %110 {strides = array<i32>} : memref<1x256x8xf32, #tpu.memory_space<vmem>>, vector<1x256x8xf32>,
    return
  }
  func.func @transform_0(%arg0: i32) -> (i32, i32, i32, i32) {
    %c0_i32 = arith.constant 0 : i32
    %c0_i32_0 = arith.constant 0 : i32
    %c0_i32_1 = arith.constant 0 : i32
    %c0_i32_2 = arith.constant 0 : i32
    return %arg0, %c0_i32, %c0_i32_0, %c0_i32_1 : i32, i32, i32, i32
  }
  func.func @transform_1(%arg0: i32) -> (i32, i32, i32) {
    %c0_i32 = arith.constant 0 : i32
    %c0_i32_0 = arith.constant 0 : i32
    %c0_i32_1 = arith.constant 0 : i32
    %c0_i32_2 = arith.constant 0 : i32
    return %c0_i32, %c0_i32_0, %c0_i32_1 : i32, i32, i32
  }
  func.func @transform_2(%arg0: i32) -> (i32, i32) {
    %c0_i32 = arith.constant 0 : i32
    %c0_i32_0 = arith.constant 0 : i32
    %c0_i32_1 = arith.constant 0 : i32
    return %c0_i32, %c0_i32_0 : i32, i32
  }
  func.func @transform_3(%arg0: i32) -> (i32, i32, i32) {
    %c0_i32 = arith.constant 0 : i32
    %c0_i32_0 = arith.constant 0 : i32
    %c0_i32_1 = arith.constant 0 : i32
    return %arg0, %c0_i32, %c0_i32_0 : i32, i32, i32
  }
}

</mosaic_0001>

<bundles_post_ra>
// kernel: tpu_custom_call.1
= control target key start
LH: loop header
LB: loop body
LE: loop exit
PB: predicated region body
PF: predicated region fallthrough
CT: control target
= control target key end

     0   :  { %s11150_s12 = smov 0   ;;  %s15872_s0 = inlined_call_operand.vmem [shape: bf16[2,18,18,8], index: 0, kind: input, shape index: {}]   ;;  %s15873_s1 = inlined_call_operand.vmem [shape: bf16[9,8,8], index: 1, kind: input, shape index: {}]   ;;  %s15874_s2 = inlined_call_operand.vmem [shape: f32[8,8], index: 2, kind: input, shape index: {}]   ;;  %s15875_s3 = inlined_call_operand.vmem [shape: f32[2,256,8], index: 3, kind: output, shape index: {}]  }
   0x1 LB: > { %s8860_s13 = sadd.s32 4294967295, %s11128_s12   ;;  %p8864_p0 = scmp.ge.s32.totalorder %s11128_s12, 1  ;;  %s11128_s12 = sphi %s11150_s12, %s13_s12  }
   0x2   : > { %p137_p1 = scmp.lt.s32.totalorder %s11128_s12, 3 }
   0x4   : > { %p138_p2 = pnand %p8864_p0, %p137_p1 }
   0x6   : > { %141 = sbr.rel (%p138_p2) target bundleno = 823 (0x337), region = 32 }
   0xb   : > { %v205_v0 = vld [vmem:[%s15873_s1] sm:$0xf]  ;;  %vm804_vm0 = vcmask 1043456   ;;  %p161_p3 = scmp.lt.s32.totalorder %s8860_s13, 1  ;;  %v8868_v3 = vld [vmem:[%s15873_s1 + $0x4] sm:$0xf] }
   0xc   : > { %v11164_v1 = vld [vmem:[%s15874_s2] sm:$0xff]  ;;  %10902 = vmatprep.subr.msk.bf16.mxu1 %vm804_vm0, %v205_v0  ;;  %v1098_v2 = vsel %vm804_vm0, %v205_v0, 0  ;;  %10901 = vmatprep.subr.msk.bf16.mxu0 %vm804_vm0, %v8868_v3  ;;  %v806_v4 = vsel %vm804_vm0, %v8868_v3, 0  ;;  %vm755_vm1 = vcmask 64512   ;;  %vm286_vm2 = vsmask.f32 3328 }
   0xd   : > { %10180 = vmatpush3.bf16.msra.mxu1 %v1098_v2  ;;  %s16708_s13 = smov (!%p161_p3, %s8860_s13), 1  ;;  %10146 = vmatpush3.bf16.msra.mxu0 %v806_v4  ;;  %vm287_vm3 = vsmask.f32 7440  ;;  %v15967_v35 = vmov 0  ;;  %vm2015_vm5 = vcmask 1042432   ;;  %vm2016_vm6 = vcmask 1046532  }
   0xe   : > { %10263 = vmatprep.subr.mxu1 %v11164_v1  ;;  %s10910_s20 = smul.u32 216, %s16708_s13  ;;  %10213 = vmatprep.subr.mxu0 %v11164_v1  ;;  %vm11233_vm4 = vmor %vm286_vm2, %vm287_vm3  ;;  %s9694_s19 = sshll.u32 %s16708_s13, 8 }
   0xf   : > { %v15968_v35 = vsel %vm11233_vm4, 4294967295, %v15967_v35  ;;  %vm11743_vm7 = vmor %vm2015_vm5, %vm2016_vm6  ;;  %s15733_s21 = scalar_lea.vmem %s15875_s3, %s9694_s19 }
  0x10   : > { %s11181_s23 = scalar_lea.vmem %s15872_s0, %s10910_s20  ;;  %15969 = vst [vmem:[#allocation3_spill] sm:$0xff] %v15968_v35 }
  0x11   : > { %v11184_v5 = vld [vmem:[%s11181_s23] sm:$0xf]  ;;  %v174_v6 = vld [vmem:[%s11181_s23 + $0x4] sm:$0xf]  ;;  %v11188_v7 = vld [vmem:[%s11181_s23 + $0xc] sm:$0xf] }
  0x12   : > { %v290_v8 = vshrl.u32 %v11184_v5, 16  ;;  %v293_v9 = vshll.u32 %v11184_v5, 16  ;;  %v8901_v10 = vcombine.low %v11184_v5, %v174_v6  ;;  %v11194_v11 = vld [vmem:[%s11181_s23 + $0x10] sm:$0xf]  ;;  %v11197_v12 = vld [vmem:[%s11181_s23 + $0x18] sm:$0xf]  ;;  %v207_v26 = vunpack.c.l.bf16 %v174_v6 }
  0x13   : > { %v314_v13 = vshrl.u32 %v11188_v7, 16  ;;  %v8902_v14 = vcombine.low %v11188_v7, %v11194_v11  ;;  %v11203_v15 = vld [vmem:[%s11181_s23 + $0x1c] sm:$0xf]  ;;  %v317_v16 = vshll.u32 %v11188_v7, 16  ;;  %v11210_v18 = vld [vmem:[%s11181_s23 + $0x8] sm:$0x1] }
  0x14   : > { %10181 = vmatprep.mubr.msk.bf16.mxu1 %vm755_vm1, %v8901_v10  ;;  %v8903_v17 = vcombine.low %v11197_v12, %v11203_v15  ;;  %15966 = vst [vmem:[#allocation2_spill] sm:$0xff] %v11210_v18  ;;  %v292_v19 = vrot.slane %v290_v8, 4  ;;  %v11213_v20 = vld [vmem:[%s11181_s23 + $0x24] sm:$0xf]  ;;  %v295_v21 = vrot.slane %v293_v9, 5  ;;  %v299_v22 = vshll.u32 %v174_v6, 16 }
  0x15   : > { %10182 = vmatmul.mubr.msk.bf16.vlgmr.msra.gmra.mxu1 %vm755_vm1, %v8902_v14  ;;  %v303_v23 = vshrl.u32 %v174_v6, 16  ;;  %v309_v24 = vshll.u32 %v11210_v18, 16  ;;  %v11218_v25 = vld [vmem:[%s11181_s23 + $0x28] sm:$0xf]  ;;  %v338_v27 = vshrl.u32 %v11197_v12, 16  ;;  %v341_v28 = vshll.u32 %v11197_v12, 16 }
  0x16   : > { %10264 = vmatpush3.msra.mxu1 %v11164_v1  ;;  %10185 = vmatprep.mubr.msk.bf16.mxu1 %vm755_vm1, %v8903_v17  ;;  %v271_v29 = vld [vmem:[%s11181_s23 + $0x14] sm:$0x1]  ;;  %v296_v30 = vor.u32 %v295_v21, %v292_v19  ;;  %v301_v31 = vrot.slane %v299_v22, 5  ;;  %v8904_v33 = vcombine.low %v11213_v20, %v11218_v25  ;;  %v11228_v34 = vld [vmem:[%s11181_s23 + $0x30] sm:$0xf]  ;;  %v316_v36 = vrot.slane %v314_v13, 4 }
  0x17   : > { %v305_v32 = vrot.slane %v303_v23, 4  ;;  %10347 = vmatprep.subr.mxu1 %v11164_v1  ;;  %v319_v37 = vrot.slane %v317_v16, 5  ;;  %v323_v38 = vshll.u32 %v11194_v11, 16  ;;  %v327_v39 = vshrl.u32 %v11194_v11, 16  ;;  %v11240_v40 = vld [vmem:[%s11181_s23 + $0x34] sm:$0xf] }
  0x18   : > { %v297_v41 = vrot.slane %v296_v30, 4  ;;  %v311_v43 = vrot.slane %v309_v24, 5  ;;  %v333_v44 = vshll.u32 %v271_v29, 16  ;;  %v11242_v45 = vmul.f32 %v207_v26, %v207_v26  ;;  %v272_v56 = vld [vmem:[%s11181_s23 + $0x20] sm:$0x1] }
  0x19   : > { %v306_v42 = vor.u32 %v305_v32, %v301_v31  ;;  %v320_v46 = vor.u32 %v319_v37, %v316_v36  ;;  %v325_v47 = vrot.slane %v323_v38, 5  ;;  %v329_v48 = vrot.slane %v327_v39, 4  ;;  %v11260_v62 = vld [vmem:[%s11181_s23 + $0x3c] sm:$0xf]  ;;  %v11272_v4 = vld [vmem:[%s11181_s23 + $0x40] sm:$0xf] }
  0x1a   : > { %v11246_v49 = vsel %vm11233_vm4, %v297_v41, %v301_v31  ;;  %v362_v51 = vshrl.u32 %v11213_v20, 16  ;;  %v8905_v52 = vcombine.low %v11228_v34, %v11240_v40  ;;  %v335_v55 = vrot.slane %v333_v44, 5  ;;  %v273_v24 = vld [vmem:[%s11181_s23 + $0x2c] sm:$0x1]  ;;  %v11286_v26 = vld [vmem:[%s11181_s23 + $0x48] sm:$0xf] }
  0x1b   : > { %v307_v50 = vrot.slane %v306_v42, 4  ;;  %v321_v53 = vrot.slane %v320_v46, 4  ;;  %v330_v54 = vor.u32 %v329_v48, %v325_v47  ;;  %v340_v57 = vrot.slane %v338_v27, 4  ;;  %v11291_v31 = vld [vmem:[%s11181_s23 + $0x4c] sm:$0xf] }
  0x1c   : > { %v343_v59 = vrot.slane %v341_v28, 5  ;;  %v347_v60 = vshll.u32 %v11203_v15, 16  ;;  %v351_v61 = vshrl.u32 %v11203_v15, 16  ;;  %v365_v0 = vshll.u32 %v11213_v20, 16  ;;  %v11302_v38 = vld [vmem:[%s15873_s1 + $0x8] sm:$0xf] }
  0x1d   : > { %v11254_v58 = vsel %vm11233_vm4, %v307_v50, %v311_v43  ;;  %10186 = vmatmul.mubr.msk.bf16.gmra.mxu1 %vm755_vm1, %v8904_v33  ;;  %v11267_v2 = vsel %vm11233_vm4, %v321_v53, %v325_v47  ;;  %v386_v3 = vshrl.u32 %v11228_v34, 16  ;;  %v331_v6 = vrot.slane %v330_v54, 4  ;;  %v11316_v50 = vld [vmem:[%s11181_s23 + $0x38] sm:$0x1]  ;;  %v11450_v18 = vld [vmem:[%s11181_s23 + $0x74] sm:$0x1] }
  0x1e   : > { %v8869_v63 = vcombine.low %v11246_v49, %v11254_v58  ;;  %10189 = vmatprep.mubr.msk.bf16.mxu1 %vm755_vm1, %v8905_v52  ;;  %v344_v8 = vor.u32 %v343_v59, %v340_v57  ;;  %v349_v9 = vrot.slane %v347_v60, 5  ;;  %v353_v10 = vrot.slane %v351_v61, 4  ;;  %15970 = vst [vmem:[#allocation4_spill] sm:$0xff] %v11316_v50  ;;  %v11329_v61 = vld [vmem:[%s11181_s23 + $0x58] sm:$0xf]  ;;  %15982 = vst [vmem:[#allocation16_spill] sm:$0xff] %v11450_v18 }
  0x1f   : > { %v389_v13 = vshll.u32 %v11228_v34, 16  ;;  %v357_v14 = vshll.u32 %v272_v56, 16  ;;  %v410_v16 = vshrl.u32 %v11260_v62, 16  ;;  %v413_v17 = vshll.u32 %v11260_v62, 16  ;;  %v9293_v35 = vld [vmem:[%s11181_s23 + $0x48] sm:$0xe] }
  0x20   : > { %10147 = vmatprep.mubr.msk.bf16.mxu0 %vm755_vm1, %v8869_v63  ;;  %v11280_v19 = vsel %vm11233_vm4, %v331_v6, %v335_v55  ;;  %v345_v21 = vrot.slane %v344_v8, 4  ;;  %v354_v22 = vor.u32 %v353_v10, %v349_v9  ;;  %v8906_v23 = vcombine.low %v11260_v62, %v11272_v4 }
  0x21   : > { %v8870_v27 = vcombine.low %v11267_v2, %v11280_v19  ;;  %v359_v28 = vrot.slane %v357_v14, 5  ;;  %v364_v29 = vrot.slane %v362_v51, 4  ;;  %v367_v30 = vrot.slane %v365_v0, 5  ;;  %v11319_v51 = vld [vmem:[%s11181_s23 + $0x54] sm:$0xf] }
  0x22   : > { %v11295_v32 = vsel %vm11233_vm4, %v345_v21, %v349_v9  ;;  %v355_v33 = vrot.slane %v354_v22, 4  ;;  %v371_v36 = vshll.u32 %v11218_v25, 16  ;;  %v375_v37 = vshrl.u32 %v11218_v25, 16  ;;  %v11340_v14 = vld [vmem:[%s11181_s23 + $0x44] sm:$0x1] }
  0x23   : > { %10148 = vmatmul.mubr.msk.bf16.vlgmr.msra.gmra.mxu0 %vm755_vm1, %v8870_v27  ;;  %v368_v39 = vor.u32 %v367_v30, %v364_v29  ;;  %v381_v41 = vshll.u32 %v273_v24, 16  ;;  %v434_v42 = vshrl.u32 %v11286_v26, 16  ;;  %v437_v43 = vshll.u32 %v11286_v26, 16  ;;  %15971 = vst [vmem:[#allocation5_spill] sm:$0xff] %v11340_v14  ;;  %v11345_v27 = vld [vmem:[%s11181_s23 + $0x60] sm:$0xf] }
  0x24   : > { %10214 = vmatpush3.msra.mxu0 %v11164_v1  ;;  %v11310_v44 = vsel %vm11233_vm4, %v355_v33, %v359_v28  ;;  %v373_v46 = vrot.slane %v371_v36, 5  ;;  %v377_v47 = vrot.slane %v375_v37, 4  ;;  %v8907_v48 = vcombine.low %v11286_v26, %v11291_v31 }
  0x25   : > { %10190 = vmatmul.mubr.msk.bf16.gmra.mxu1 %vm755_vm1, %v8906_v23  ;;  %v8871_v52 = vcombine.low %v11295_v32, %v11310_v44  ;;  %v369_v53 = vrot.slane %v368_v39, 4  ;;  %v383_v54 = vrot.slane %v381_v41, 5  ;;  %v388_v55 = vrot.slane %v386_v3, 4  ;;  %10903 = vmatprep.subr.msk.bf16.mxu0 %vm804_vm0, %v11302_v38 }
  0x26   : > { %v378_v56 = vor.u32 %v377_v47, %v373_v46  ;;  %10193 = vmatprep.mubr.msk.bf16.mxu1 %vm755_vm1, %v8907_v48  ;;  %v391_v57 = vrot.slane %v389_v13, 5  ;;  %v395_v59 = vshll.u32 %v11240_v40, 16  ;;  %v399_v60 = vshrl.u32 %v11240_v40, 16 }
  0x27   : > { %10151 = vmatprep.mubr.msk.bf16.mxu0 %vm755_vm1, %v8871_v52  ;;  %v11334_v63 = vsel %vm11233_vm4, %v369_v53, %v373_v46  ;;  %v405_v0 = vshll.u32 %v11316_v50, 16  ;;  %v458_v3 = vshrl.u32 %v11319_v51, 16  ;;  %v461_v6 = vshll.u32 %v11319_v51, 16  ;;  %v11366_v52 = vld [vmem:[%s11181_s23 + $0x50] sm:$0x1] }
  0x28   : > { %v379_v8 = vrot.slane %v378_v56, 4  ;;  %v392_v9 = vor.u32 %v391_v57, %v388_v55  ;;  %v397_v10 = vrot.slane %v395_v59, 5  ;;  %v401_v13 = vrot.slane %v399_v60, 4  ;;  %15972 = vst [vmem:[#allocation6_spill] sm:$0xff] %v11366_v52  ;;  %v11371_v57 = vld [vmem:[%s11181_s23 + $0x6c] sm:$0xf] }
  0x29   : > { %v407_v21 = vrot.slane %v405_v0, 5  ;;  %v8908_v22 = vcombine.low %v11319_v51, %v11329_v61  ;;  %v412_v23 = vrot.slane %v410_v16, 4  ;;  %v415_v24 = vrot.slane %v413_v17, 5  ;;  %v11357_v17 = vld [vmem:[%s11181_s23 + $0x64] sm:$0xf] }
  0x2a   : > { %v11349_v28 = vsel %vm11233_vm4, %v379_v8, %v383_v54  ;;  %v393_v29 = vrot.slane %v392_v9, 4  ;;  %v402_v30 = vor.u32 %v401_v13, %v397_v10  ;;  %v419_v33 = vshll.u32 %v11272_v4, 16  ;;  %v11380_v9 = vld [vmem:[%s11181_s23 + $0x70] sm:$0xf] }
  0x2b   : > { %v8872_v36 = vcombine.low %v11334_v63, %v11349_v28  ;;  %v416_v37 = vor.u32 %v415_v24, %v412_v23  ;;  %v423_v39 = vshrl.u32 %v11272_v4, 16  ;;  %v429_v16 = vshll.u32 %v11340_v14, 16 }
  0x2c   : > { %v11361_v41 = vsel %vm11233_vm4, %v393_v29, %v397_v10  ;;  %v403_v46 = vrot.slane %v402_v30, 4  ;;  %v421_v47 = vrot.slane %v419_v33, 5  ;;  %v482_v48 = vshrl.u32 %v11345_v27, 16 }
  0x2d   : > { %10194 = vmatmul.mubr.msk.bf16.gmra.mxu1 %vm755_vm1, %v8908_v22  ;;  %10152 = vmatmul.mubr.msk.bf16.gmra.mxu0 %vm755_vm1, %v8872_v36  ;;  %v417_v53 = vrot.slane %v416_v37, 4  ;;  %v425_v54 = vrot.slane %v423_v39, 4  ;;  %v431_v55 = vrot.slane %v429_v16, 5  ;;  %v485_v56 = vshll.u32 %v11345_v27, 16  ;;  %v11398_v37 = vld [vmem:[%s11181_s23 + $0x5c] sm:$0x1] }
  0x2e   : > { %v11375_v59 = vsel %vm11233_vm4, %v403_v46, %v407_v21  ;;  %v8909_v60 = vcombine.low %v11345_v27, %v11357_v17  ;;  %v436_v0 = vrot.slane %v434_v42, 4  ;;  %v439_v8 = vrot.slane %v437_v43, 5  ;;  %15973 = vst [vmem:[#allocation7_spill] sm:$0xff] %v11398_v37 }
  0x2f   : > { %v8873_v10 = vcombine.low %v11361_v41, %v11375_v59  ;;  %v11386_v13 = vsel %vm11233_vm4, %v417_v53, %v421_v47  ;;  %v426_v22 = vor.u32 %v425_v54, %v421_v47  ;;  %v443_v23 = vshll.u32 %v11291_v31, 16  ;;  %v11401_v53 = vld [vmem:[%s11181_s23 + $0x78] sm:$0xf] }
  0x30   : > { %10197 = vmatprep.mubr.msk.bf16.mxu1 %vm755_vm1, %v8909_v60  ;;  %v440_v21 = vor.u32 %v439_v8, %v436_v0  ;;  %v447_v42 = vshrl.u32 %v11291_v31, 16  ;;  %v453_v43 = vshll.u32 %v11366_v52, 16  ;;  %v506_v24 = vshrl.u32 %v11371_v57, 16  ;;  %15974 = vst [vmem:[#allocation8_spill] sm:$0xff] %v11401_v53 }
  0x31   : > { %10155 = vmatprep.mubr.msk.bf16.mxu0 %vm755_vm1, %v8873_v10  ;;  %v427_v29 = vrot.slane %v426_v22, 4  ;;  %v445_v30 = vrot.slane %v443_v23, 5  ;;  %v509_v33 = vshll.u32 %v11371_v57, 16  ;;  %v8910_v36 = vcombine.low %v11371_v57, %v11380_v9  ;;  %v11410_v10 = vld [vmem:[%s11181_s23 + $0x7c] sm:$0xf] }
  0x32   : > { %v441_v39 = vrot.slane %v440_v21, 4  ;;  %v449_v16 = vrot.slane %v447_v42, 4  ;;  %v455_v46 = vrot.slane %v453_v43, 5  ;;  %v460_v47 = vrot.slane %v458_v3, 4  ;;  %15975 = vst [vmem:[#allocation9_spill] sm:$0xff] %v11410_v10 }
  0x33   : > { %v11405_v54 = vsel %vm11233_vm4, %v427_v29, %v431_v55  ;;  %v463_v60 = vrot.slane %v461_v6, 5  ;;  %v467_v0 = vshll.u32 %v11329_v61, 16  ;;  %v471_v8 = vshrl.u32 %v11329_v61, 16  ;;  %v11422_v29 = vld [vmem:[%s11181_s23 + $0x68] sm:$0x1] }
  0x34   : > { %v8874_v22 = vcombine.low %v11386_v13, %v11405_v54  ;;  %v11416_v3 = vsel %vm11233_vm4, %v441_v39, %v445_v30  ;;  %v450_v23 = vor.u32 %v449_v16, %v445_v30  ;;  %v477_v55 = vshll.u32 %v11398_v37, 16  ;;  %15977 = vst [vmem:[#allocation11_spill] sm:$0xff] %v11422_v29 }
  0x35   : > { %15976 = vst [vmem:[#allocation10_spill] sm:$0xff] %v11416_v3  ;;  %10198 = vmatmul.mubr.msk.bf16.gmra.mxu1 %vm755_vm1, %v8910_v36  ;;  %v464_v6 = vor.u32 %v463_v60, %v460_v47  ;;  %v469_v21 = vrot.slane %v467_v0, 5  ;;  %v473_v42 = vrot.slane %v471_v8, 4  ;;  %v530_v43 = vshrl.u32 %v11401_v53, 16  ;;  %v11429_v60 = vld [vmem:[%s11181_s23 + $0x84] sm:$0xf] }
  0x36   : > { %10156 = vmatmul.mubr.msk.bf16.gmra.mxu0 %vm755_vm1, %v8874_v22  ;;  %v451_v52 = vrot.slane %v450_v23, 4  ;;  %v479_v14 = vrot.slane %v477_v55, 5  ;;  %v533_v39 = vshll.u32 %v11401_v53, 16  ;;  %v8911_v30 = vcombine.low %v11401_v53, %v11410_v10  ;;  %15978 = vst [vmem:[#allocation12_spill] sm:$0xff] %v11429_v60  ;;  %v11440_v55 = vld [vmem:[%s11181_s23 + $0x88] sm:$0xf] }
  0x37   : > { %v465_v36 = vrot.slane %v464_v6, 4  ;;  %v474_v16 = vor.u32 %v473_v42, %v469_v21  ;;  %v484_v37 = vrot.slane %v482_v48, 4  ;;  %v487_v47 = vrot.slane %v485_v56, 5  ;;  %15980 = vst [vmem:[#allocation14_spill] sm:$0xff] %v11440_v55  ;;  %v11485_v53 = vld [vmem:[%s11181_s23 + $0x9c] sm:$0xf] }
  0x38   : > { %v11433_v0 = vsel %vm11233_vm4, %v451_v52, %v455_v46  ;;  %10201 = vmatprep.mubr.msk.bf16.mxu1 %vm755_vm1, %v8911_v30  ;;  %v491_v8 = vshll.u32 %v11357_v17, 16  ;;  %v495_v22 = vshrl.u32 %v11357_v17, 16  ;;  %v501_v23 = vshll.u32 %v11422_v29, 16  ;;  %15988 = vst [vmem:[#allocation22_spill] sm:$0xff] %v11485_v53 }
  0x39   : > { %15979 = vst [vmem:[#allocation13_spill] sm:$0xff] %v11433_v0  ;;  %v8875_v48 = vcombine.low %v11416_v3, %v11433_v0  ;;  %v11446_v56 = vsel %vm11233_vm4, %v465_v36, %v469_v21  ;;  %v475_v52 = vrot.slane %v474_v16, 4  ;;  %v488_v46 = vor.u32 %v487_v47, %v484_v37  ;;  %v11461_v36 = vld [vmem:[%s11181_s23 + $0x90] sm:$0xf] }
  0x3a   : > { %15981 = vst [vmem:[#allocation15_spill] sm:$0xff] %v11446_v56  ;;  %v493_v6 = vrot.slane %v491_v8, 5  ;;  %v497_v42 = vrot.slane %v495_v22, 4  ;;  %v503_v30 = vrot.slane %v501_v23, 5  ;;  %v554_v50 = vshrl.u32 %v11429_v60, 16  ;;  %15984 = vst [vmem:[#allocation18_spill] sm:$0xff] %v11461_v36 }
  0x3b   : > { %10159 = vmatprep.mubr.msk.bf16.mxu0 %vm755_vm1, %v8875_v48  ;;  %v11455_v29 = vsel %vm11233_vm4, %v475_v52, %v479_v14  ;;  %v489_v0 = vrot.slane %v488_v46, 4  ;;  %v557_v21 = vshll.u32 %v11429_v60, 16  ;;  %v8912_v37 = vcombine.low %v11429_v60, %v11440_v55  ;;  %v11466_v23 = vld [vmem:[%s11181_s23 + $0x94] sm:$0xf]  ;;  %v11480_v60 = vld [vmem:[%s11181_s23 + $0x80] sm:$0x1] }
  0x3c   : > { %15983 = vst [vmem:[#allocation17_spill] sm:$0xff] %v11455_v29  ;;  %v8876_v16 = vcombine.low %v11446_v56, %v11455_v29  ;;  %v498_v47 = vor.u32 %v497_v42, %v493_v6  ;;  %v508_v8 = vrot.slane %v506_v24, 4  ;;  %v511_v22 = vrot.slane %v509_v33, 5  ;;  %15985 = vst [vmem:[#allocation19_spill] sm:$0xff] %v11466_v23 }
  0x3d   : > { %v11470_v14 = vsel %vm11233_vm4, %v489_v0, %v493_v6  ;;  %10202 = vmatmul.mubr.msk.bf16.gmra.mxu1 %vm755_vm1, %v8912_v37  ;;  %v515_v48 = vshll.u32 %v11380_v9, 16  ;;  %v519_v52 = vshrl.u32 %v11380_v9, 16  ;;  %v525_v46 = vshll.u32 %v11450_v18, 16  ;;  %15987 = vst [vmem:[#allocation21_spill] sm:$0xff] %v11480_v60 }
  0x3e   : > { %15986 = vst [vmem:[#allocation20_spill] sm:$0xff] %v11470_v14  ;;  %10160 = vmatmul.mubr.msk.bf16.gmra.mxu0 %vm755_vm1, %v8876_v16  ;;  %v499_v42 = vrot.slane %v498_v47, 4  ;;  %v512_v24 = vor.u32 %v511_v22, %v508_v8  ;;  %v578_v33 = vshrl.u32 %v11461_v36, 16  ;;  %v581_v29 = vshll.u32 %v11461_v36, 16 }
  0x3f   : > { %v517_v0 = vrot.slane %v515_v48, 5  ;;  %v521_v6 = vrot.slane %v519_v52, 4  ;;  %v527_v37 = vrot.slane %v525_v46, 5  ;;  %v8913_v56 = vcombine.low %v11461_v36, %v11466_v23  ;;  %v11497_v46 = vld [vmem:[%s11181_s23 + $0xa0] sm:$0xf] }
  0x40   : > { %v11489_v16 = vsel %vm11233_vm4, %v499_v42, %v503_v30  ;;  %v513_v47 = vrot.slane %v512_v24, 4  ;;  %v532_v8 = vrot.slane %v530_v43, 4  ;;  %v535_v22 = vrot.slane %v533_v39, 5  ;;  %v11508_v36 = vld [vmem:[%s11181_s23 + $0x8c] sm:$0x1] }
  0x41   : > { %15989 = vst [vmem:[#allocation23_spill] sm:$0xff] %v11489_v16  ;;  %v8877_v18 = vcombine.low %v11470_v14, %v11489_v16  ;;  %v522_v3 = vor.u32 %v521_v6, %v517_v0  ;;  %10205 = vmatprep.mubr.msk.bf16.mxu1 %vm755_vm1, %v8913_v56  ;;  %v539_v48 = vshll.u32 %v11410_v10, 16  ;;  %v543_v52 = vshrl.u32 %v11410_v10, 16  ;;  %15991 = vst [vmem:[#allocation25_spill] sm:$0xff] %v11508_v36 }
  0x42   : > { %v11501_v30 = vsel %vm11233_vm4, %v513_v47, %v517_v0  ;;  %v536_v43 = vor.u32 %v535_v22, %v532_v8  ;;  %v549_v39 = vshll.u32 %v11480_v60, 16  ;;  %v602_v42 = vshrl.u32 %v11485_v53, 16  ;;  %v11513_v8 = vld [vmem:[%s11181_s23 + $0xa8] sm:$0xf] }
  0x43   : > { %15990 = vst [vmem:[#allocation24_spill] sm:$0xff] %v11501_v30  ;;  %10163 = vmatprep.mubr.msk.bf16.mxu0 %vm755_vm1, %v8877_v18  ;;  %v523_v56 = vrot.slane %v522_v3, 4  ;;  %v541_v24 = vrot.slane %v539_v48, 5  ;;  %v545_v6 = vrot.slane %v543_v52, 4  ;;  %v605_v16 = vshll.u32 %v11485_v53, 16  ;;  %15992 = vst [vmem:[#allocation26_spill] sm:$0xff] %v11513_v8 }
  0x44   : > { %v537_v14 = vrot.slane %v536_v43, 4  ;;  %v551_v10 = vrot.slane %v549_v39, 5  ;;  %v8914_v0 = vcombine.low %v11485_v53, %v11497_v46  ;;  %v556_v47 = vrot.slane %v554_v50, 4  ;;  %v11521_v52 = vld [vmem:[%s11181_s23 + $0xac] sm:$0xf] }
  0x45   : > { %v11517_v22 = vsel %vm11233_vm4, %v523_v56, %v527_v37  ;;  %v546_v18 = vor.u32 %v545_v6, %v541_v24  ;;  %v559_v3 = vrot.slane %v557_v21, 5  ;;  %v563_v48 = vshll.u32 %v11440_v55, 16  ;;  %v11534_v53 = vld [vmem:[%s11181_s23 + $0x98] sm:$0x1] }
  0x46   : > { %15993 = vst [vmem:[#allocation27_spill] sm:$0xff] %v11517_v22  ;;  %v8878_v43 = vcombine.low %v11501_v30, %v11517_v22  ;;  %v11527_v50 = vsel %vm11233_vm4, %v537_v14, %v541_v24  ;;  %10206 = vmatmul.mubr.msk.bf16.gmra.mxu1 %vm755_vm1, %v8914_v0  ;;  %v567_v39 = vshrl.u32 %v11440_v55, 16  ;;  %v573_v37 = vshll.u32 %v11508_v36, 16  ;;  %15995 = vst [vmem:[#allocation29_spill] sm:$0xff] %v11534_v53  ;;  %v11541_v0 = vld [vmem:[%s11181_s23 + $0xb4] sm:$0xf] }
  0x47   : > { %15994 = vst [vmem:[#allocation28_spill] sm:$0xff] %v11527_v50  ;;  %v547_v56 = vrot.slane %v546_v18, 4  ;;  %v560_v21 = vor.u32 %v559_v3, %v556_v47  ;;  %v565_v6 = vrot.slane %v563_v48, 5  ;;  %v626_v60 = vshrl.u32 %v11513_v8, 16  ;;  %15996 = vst [vmem:[#allocation30_spill] sm:$0xff] %v11541_v0 }
  0x48   : > { %10164 = vmatmul.mubr.msk.bf16.gmra.mxu0 %vm755_vm1, %v8878_v43  ;;  %v569_v22 = vrot.slane %v567_v39, 4  ;;  %v575_v30 = vrot.slane %v573_v37, 5  ;;  %v629_v14 = vshll.u32 %v11513_v8, 16  ;;  %v8915_v24 = vcombine.low %v11513_v8, %v11521_v52  ;;  %v11553_v8 = vld [vmem:[%s11181_s23 + $0xb8] sm:$0xf] }
  0x49   : > { %v11545_v47 = vsel %vm11233_vm4, %v547_v56, %v551_v10  ;;  %v561_v18 = vrot.slane %v560_v21, 4  ;;  %v580_v3 = vrot.slane %v578_v33, 4  ;;  %v583_v48 = vrot.slane %v581_v29, 5 }
  0x4a   : > { %15997 = vst [vmem:[#allocation31_spill] sm:$0xff] %v11545_v47  ;;  %v8879_v43 = vcombine.low %v11527_v50, %v11545_v47  ;;  %v570_v39 = vor.u32 %v569_v22, %v565_v6  ;;  %10209 = vmatprep.mubr.msk.bf16.mxu1 %vm755_vm1, %v8915_v24  ;;  %v587_v37 = vshll.u32 %v11466_v23, 16  ;;  %v591_v36 = vshrl.u32 %v11466_v23, 16  ;;  %v11564_v50 = vld [vmem:[%s11181_s23 + $0xa4] sm:$0x1] }
  0x4b   : > { %v11557_v10 = vsel %vm11233_vm4, %v561_v18, %v565_v6  ;;  %v584_v56 = vor.u32 %v583_v48, %v580_v3  ;;  %v597_v29 = vshll.u32 %v11534_v53, 16  ;;  %v650_v33 = vshrl.u32 %v11541_v0, 16  ;;  %15998 = vst [vmem:[#allocation32_spill] sm:$0xff] %v11564_v50 }
  0x4c   : > { %10167 = vmatprep.mubr.msk.bf16.mxu0 %vm755_vm1, %v8879_v43  ;;  %v571_v22 = vrot.slane %v570_v39, 4  ;;  %v589_v21 = vrot.slane %v587_v37, 5  ;;  %v593_v24 = vrot.slane %v591_v36, 4  ;;  %v653_v47 = vshll.u32 %v11541_v0, 16 }
  0x4d   : > { %v585_v23 = vrot.slane %v584_v56, 4  ;;  %v599_v55 = vrot.slane %v597_v29, 5  ;;  %v8916_v6 = vcombine.low %v11541_v0, %v11553_v8  ;;  %v604_v18 = vrot.slane %v602_v42, 4 }
  0x4e   : > { %v11570_v3 = vsel %vm11233_vm4, %v571_v22, %v575_v30  ;;  %v594_v48 = vor.u32 %v593_v24, %v589_v21  ;;  %v607_v43 = vrot.slane %v605_v16, 5  ;;  %v611_v39 = vshll.u32 %v11497_v46, 16 }
  0x4f   : > { %15999 = vst [vmem:[#allocation33_spill] sm:$0xff] %v11570_v3  ;;  %v8880_v36 = vcombine.low %v11557_v10, %v11570_v3  ;;  %v11577_v37 = vsel %vm11233_vm4, %v585_v23, %v589_v21  ;;  %10210 = vmatmul.mubr.msk.bf16.gmra.mxu1 %vm755_vm1, %v8916_v6  ;;  %v615_v42 = vshrl.u32 %v11497_v46, 16  ;;  %v621_v56 = vshll.u32 %v11564_v50, 16  ;;  %v11585_v3 = vld [vmem:[%s11181_s23 + $0xb0] sm:$0x1] }
  0x50   : > { %v595_v30 = vrot.slane %v594_v48, 4  ;;  %v608_v29 = vor.u32 %v607_v43, %v604_v18  ;;  %v613_v22 = vrot.slane %v611_v39, 5  ;;  %v206_v16 = vunpack.c.l.bf16 %v11184_v5 }
  0x51   : > { %10168 = vmatmul.mubr.msk.bf16.gmra.mxu0 %vm755_vm1, %v8880_v36  ;;  %v617_v24 = vrot.slane %v615_v42, 4  ;;  %v623_v53 = vrot.slane %v621_v56, 5  ;;  %v628_v23 = vrot.slane %v626_v60, 4  ;;  %v631_v21 = vrot.slane %v629_v14, 5  ;;  %v11596_v36 = vld [vmem:[%s11181_s23 + $0xbc] sm:$0x1] }
  0x52   : > { %v11589_v6 = vsel %vm11233_vm4, %v595_v30, %v599_v55  ;;  %v609_v0 = vrot.slane %v608_v29, 4  ;;  %v238_v50 = vmul.f32 %v206_v16, %v206_v16  ;;  %v635_v18 = vshll.u32 %v11521_v52, 16 }
  0x53   : > { %v8881_v48 = vcombine.low %v11577_v37, %v11589_v6  ;;  %v618_v5 = vor.u32 %v617_v24, %v613_v22  ;;  %v632_v43 = vor.u32 %v631_v21, %v628_v23  ;;  %v639_v39 = vshrl.u32 %v11521_v52, 16 }
  0x54   : > { %v11600_v60 = vsel %vm11233_vm4, %v609_v0, %v613_v22  ;;  %10265 = vmatprep.mubr.msk.f32.mxu1 %vm755_vm1, %v238_v50  ;;  %v637_v55 = vrot.slane %v635_v18, 5  ;;  %v645_v14 = vshll.u32 %v11585_v3, 16  ;;  %v652_v42 = vrot.slane %v650_v33, 4 }
  0x55   : > { %10171 = vmatprep.mubr.msk.bf16.mxu0 %vm755_vm1, %v8881_v48  ;;  %v619_v56 = vrot.slane %v618_v5, 4  ;;  %v633_v30 = vrot.slane %v632_v43, 4  ;;  %v641_v29 = vrot.slane %v639_v39, 4  ;;  %v655_v16 = vrot.slane %v653_v47, 5 }
  0x56   : > { %v1261_v24 = vunpack.c.l.bf16 %v11246_v49  ;;  %v659_v23 = vshll.u32 %v11553_v8, 16  ;;  %v663_v21 = vshrl.u32 %v11553_v8, 16  ;;  %v669_v0 = vshll.u32 %v11596_v36, 16 }
  0x57   : > { %v11611_v50 = vsel %vm11233_vm4, %v619_v56, %v623_v53  ;;  %v642_v22 = vor.u32 %v641_v29, %v637_v55  ;;  %v647_v33 = vrot.slane %v645_v14, 5  ;;  %10266 = vmatmul.mubr.msk.f32.vlgmr.msra.gmra.mxu1 %vm755_vm1, %v11242_v45  ;;  %v656_v18 = vor.u32 %v655_v16, %v652_v42 }
  0x58   : > { %v8882_v47 = vcombine.low %v11600_v60, %v11611_v50  ;;  %v11619_v49 = vsel %vm11233_vm4, %v633_v30, %v637_v55  ;;  %10348 = vmatpush3.msra.mxu1 %v11164_v1  ;;  %v661_v48 = vrot.slane %v659_v23, 5  ;;  %v665_v5 = vrot.slane %v663_v21, 4 }
  0x59   : > { %v643_v43 = vrot.slane %v642_v22, 4  ;;  %v657_v53 = vrot.slane %v656_v18, 4  ;;  %v208_v39 = vunpack.c.l.bf16 %v11188_v7  ;;  %v209_v14 = vunpack.c.l.bf16 %v11194_v11  ;;  %10431 = vmatprep.subr.mxu1 %v11164_v1 }
  0x5a   : > { %10172 = vmatmul.mubr.msk.bf16.gmra.mxu0 %vm755_vm1, %v8882_v47  ;;  %v666_v45 = vor.u32 %v665_v5, %v661_v48  ;;  %v671_v42 = vrot.slane %v669_v0, 5  ;;  %v210_v56 = vunpack.c.l.bf16 %v11197_v12  ;;  %v211_v55 = vunpack.c.l.bf16 %v11203_v15 }
  0x5b   : > { %v11630_v30 = vsel %vm11233_vm4, %v643_v43, %v647_v33  ;;  %v240_v29 = vmul.f32 %v208_v39, %v208_v39  ;;  %v241_v16 = vmul.f32 %v209_v14, %v209_v14  ;;  %v212_v7 = vunpack.c.l.bf16 %v11213_v20 }
  0x5c   : > { %v8883_v11 = vcombine.low %v11619_v49, %v11630_v30  ;;  %v11637_v1 = vsel %vm11233_vm4, %v657_v53, %v661_v48  ;;  %v667_v23 = vrot.slane %v666_v45, 4  ;;  %v242_v21 = vmul.f32 %v210_v56, %v210_v56 }
  0x5d   : > { %10268 = vmatprep.mubr.msk.f32.mxu1 %vm755_vm1, %v240_v29  ;;  %v243_v15 = vmul.f32 %v211_v55, %v211_v55  ;;  %v213_v20 = vunpack.c.l.bf16 %v11218_v25  ;;  %v1293_v0 = vmul.f32 %v1261_v24, %v1261_v24  ;;  %v244_v33 = vmul.f32 %v212_v7, %v212_v7 }
  0x5e   : > { %10175 = vmatprep.mubr.msk.bf16.mxu0 %vm755_vm1, %v8883_v11  ;;  %v11643_v12 = vsel %vm11233_vm4, %v667_v23, %v671_v42  ;;  %10269 = vmatmul.mubr.msk.f32.gmra.mxu1 %vm755_vm1, %v241_v16  ;;  %v214_v18 = vunpack.c.l.bf16 %v11228_v34  ;;  %v1262_v47 = vunpack.c.l.bf16 %v11254_v58  ;;  %v215_v5 = vunpack.c.l.bf16 %v11240_v40 }
  0x5f   : > { %v8884_v22 = vcombine.low %v11637_v1, %v11643_v12  ;;  %10271 = vmatprep.mubr.msk.f32.mxu1 %vm755_vm1, %v242_v21  ;;  %v245_v48 = vmul.f32 %v213_v20, %v213_v20  ;;  %v1263_v25 = vunpack.c.l.bf16 %v11267_v2  ;;  %v216_v43 = vunpack.c.l.bf16 %v11260_v62 }
  0x60   : > { %v246_v24 = vmul.f32 %v214_v18, %v214_v18  ;;  %v1294_v53 = vmul.f32 %v1262_v47, %v1262_v47  ;;  %v1264_v34 = vunpack.c.l.bf16 %v11280_v19  ;;  %v247_v58 = vmul.f32 %v215_v5, %v215_v5  ;;  %v16000_v47 = vld [vmem:[#allocation10_spill] sm:$0xff]  ;;  %v16001_v5 = vld [vmem:[#allocation8_spill] sm:$0xff] }
  0x61   : > { %v217_v39 = vunpack.c.l.bf16 %v11272_v4  ;;  %v1295_v14 = vmul.f32 %v1263_v25, %v1263_v25  ;;  %v1265_v40 = vunpack.c.l.bf16 %v11295_v32  ;;  %v218_v45 = vunpack.c.l.bf16 %v11286_v26  ;;  %v11674_v32 = vld [vmem:[%s15873_s1 + $0xc] sm:$0xf] }
  0x62   : > { %10176 = vmatmul.mubr.msk.bf16.gmra.mxu0 %vm755_vm1, %v8884_v22  ;;  %10272 = vmatmul.mubr.msk.f32.gmra.mxu1 %vm755_vm1, %v243_v15  ;;  %v2261_v2 = vsel %vm804_vm0, %v11302_v38, 0  ;;  %v248_v42 = vmul.f32 %v216_v43, %v216_v43  ;;  %v1296_v62 = vmul.f32 %v1264_v34, %v1264_v34  ;;  %v1266_v19 = vunpack.c.l.bf16 %v11310_v44 }
  0x63   : > { %10215 = vmatprep.mubr.msk.f32.mxu0 %vm755_vm1, %v1293_v0  ;;  %10274 = vmatprep.mubr.msk.f32.mxu1 %vm755_vm1, %v244_v33  ;;  %v249_v56 = vmul.f32 %v217_v39, %v217_v39  ;;  %v219_v4 = vunpack.c.l.bf16 %v11291_v31  ;;  %v1297_v26 = vmul.f32 %v1265_v40, %v1265_v40  ;;  %v1267_v38 = vunpack.c.l.bf16 %v11334_v63  ;;  %v16005_v40 = vld [vmem:[#allocation12_spill] sm:$0xff] }
  0x64   : > { %v250_v55 = vmul.f32 %v218_v45, %v218_v45  ;;  %v220_v29 = vunpack.c.l.bf16 %v11319_v51  ;;  %v1298_v31 = vmul.f32 %v1266_v19, %v1266_v19  ;;  %v1268_v44 = vunpack.c.l.bf16 %v11349_v28 }
  0x65   : > { %v251_v16 = vmul.f32 %v219_v4, %v219_v4  ;;  %v221_v7 = vunpack.c.l.bf16 %v11329_v61  ;;  %v1299_v63 = vmul.f32 %v1267_v38, %v1267_v38  ;;  %v1269_v51 = vunpack.c.l.bf16 %v11361_v41  ;;  %v16008_v38 = vld [vmem:[#allocation20_spill] sm:$0xff] }
  0x66   : > { %10275 = vmatmul.mubr.msk.f32.gmra.mxu1 %vm755_vm1, %v245_v48  ;;  %v252_v11 = vmul.f32 %v220_v29, %v220_v29  ;;  %v222_v23 = vunpack.c.l.bf16 %v11345_v27  ;;  %v1300_v21 = vmul.f32 %v1268_v44, %v1268_v44  ;;  %v1270_v28 = vunpack.c.l.bf16 %v11375_v59 }
  0x67   : > { %10277 = vmatprep.mubr.msk.f32.mxu1 %vm755_vm1, %v246_v24  ;;  %v253_v15 = vmul.f32 %v221_v7, %v221_v7  ;;  %v223_v61 = vunpack.c.l.bf16 %v11357_v17  ;;  %v1301_v20 = vmul.f32 %v1269_v51, %v1269_v51  ;;  %v1271_v41 = vunpack.c.l.bf16 %v11386_v13  ;;  %v16002_v24 = vld [vmem:[#allocation13_spill] sm:$0xff]  ;;  %v16011_v51 = vld [vmem:[#allocation24_spill] sm:$0xff] }
  0x68   : > { %v254_v0 = vmul.f32 %v222_v23, %v222_v23  ;;  %v224_v27 = vunpack.c.l.bf16 %v11371_v57  ;;  %v1302_v22 = vmul.f32 %v1270_v28, %v1270_v28  ;;  %v1272_v59 = vunpack.c.l.bf16 %v11405_v54 }
  0x69   : > { %v255_v33 = vmul.f32 %v223_v61, %v223_v61  ;;  %v225_v17 = vunpack.c.l.bf16 %v11380_v9  ;;  %v1303_v18 = vmul.f32 %v1271_v41, %v1271_v41  ;;  %v1273_v13 = vunpack.c.l.bf16 %v16000_v47 }
  0x6a   : > { %10216 = vmatmul.mubr.msk.f32.vlgmr.msra.gmra.mxu0 %vm755_vm1, %v1294_v53  ;;  %10278 = vmatmul.mubr.msk.f32.gmra.mxu1 %vm755_vm1, %v247_v58  ;;  %v256_v48 = vmul.f32 %v224_v27, %v224_v27  ;;  %v226_v57 = vunpack.c.l.bf16 %v16001_v5  ;;  %v1304_v25 = vmul.f32 %v1272_v59, %v1272_v59  ;;  %v1274_v54 = vunpack.c.l.bf16 %v16002_v24  ;;  %v16003_v53 = vld [vmem:[#allocation9_spill] sm:$0xff]  ;;  %v16004_v58 = vld [vmem:[#allocation15_spill] sm:$0xff]  ;;  %v16016_v5 = vld [vmem:[#allocation26_spill] sm:$0xff] }
  0x6b   : > { %10218 = vmatprep.mubr.msk.f32.mxu0 %vm755_vm1, %v1295_v14  ;;  %10314 = vmatpush3.bf16.msra.mxu0 %v2261_v2  ;;  %v257_v43 = vmul.f32 %v225_v17, %v225_v17  ;;  %v227_v9 = vunpack.c.l.bf16 %v16003_v53  ;;  %v1305_v34 = vmul.f32 %v1273_v13, %v1273_v13  ;;  %v1275_v39 = vunpack.c.l.bf16 %v16004_v58  ;;  %v16015_v17 = vld [vmem:[#allocation28_spill] sm:$0xff]  ;;  %v11063_v24 = vld [vmem:[%s11181_s23 + $0x4] sm:$0xf] }
  0x6c   : > { %10280 = vmatprep.mubr.msk.f32.mxu1 %vm755_vm1, %v248_v42  ;;  %10904 = vmatprep.subr.msk.bf16.mxu0 %vm804_vm0, %v11674_v32  ;;  %v258_v14 = vmul.f32 %v226_v57, %v226_v57  ;;  %v228_v45 = vunpack.c.l.bf16 %v16005_v40  ;;  %v1306_v2 = vmul.f32 %v1274_v54, %v1274_v54  ;;  %v16006_v42 = vld [vmem:[#allocation17_spill] sm:$0xff]  ;;  %v233_v13 = vunpack.c.l.bf16 %v11497_v46 }
  0x6d   : > { %v259_v19 = vmul.f32 %v227_v9, %v227_v9  ;;  %v234_v57 = vunpack.c.l.bf16 %v16016_v5  ;;  %v2020_v54 = vrot.slane %v11063_v24, 5  ;;  %v16018_v9 = vmov 0  ;;  %v11067_v24 = vld [vmem:[%s11181_s23 + $0x20] sm:$0x1] }
  0x6e   : > { %10219 = vmatmul.mubr.msk.f32.gmra.mxu0 %vm755_vm1, %v1296_v62  ;;  %10281 = vmatmul.mubr.msk.f32.gmra.mxu1 %vm755_vm1, %v249_v56  ;;  %v1276_v62 = vunpack.c.l.bf16 %v16006_v42  ;;  %v16007_v56 = vld [vmem:[#allocation14_spill] sm:$0xff]  ;;  %v260_v29 = vmul.f32 %v228_v45, %v228_v45  ;;  %v16019_v9 = vsel %vm11743_vm7, 4294967295, %v16018_v9  ;;  %v265_v45 = vmul.f32 %v233_v13, %v233_v13 }
  0x6f   : > { %10221 = vmatprep.mubr.msk.f32.mxu0 %vm755_vm1, %v1297_v26  ;;  %10283 = vmatprep.mubr.msk.f32.mxu1 %vm755_vm1, %v250_v55  ;;  %v229_v4 = vunpack.c.l.bf16 %v16007_v56  ;;  %v1307_v26 = vmul.f32 %v1275_v39, %v1275_v39  ;;  %v1277_v55 = vunpack.c.l.bf16 %v16008_v38  ;;  %16020 = vst [vmem:[#allocation10_spill] sm:$0xff] %v16019_v9  ;;  %v16022_v42 = vld [vmem:[#allocation30_spill] sm:$0xff]  ;;  %v11064_v38 = vld [vmem:[%s11181_s23 + $0x10] sm:$0xf]  ;;  %v1287_v13 = vunpack.c.l.bf16 %v11600_v60 }
  0x71   : > { %v261_v23 = vmul.f32 %v229_v4, %v229_v4  ;;  %v266_v4 = vmul.f32 %v234_v57, %v234_v57 }
  0x72   : > { %10222 = vmatmul.mubr.msk.f32.gmra.mxu0 %vm755_vm1, %v1298_v31  ;;  %10284 = vmatmul.mubr.msk.f32.gmra.mxu1 %vm755_vm1, %v251_v16  ;;  %v16009_v31 = vld [vmem:[#allocation18_spill] sm:$0xff]  ;;  %v16010_v16 = vld [vmem:[#allocation23_spill] sm:$0xff] }
  0x73   : > { %10224 = vmatprep.mubr.msk.f32.mxu0 %vm755_vm1, %v1299_v63  ;;  %10286 = vmatprep.mubr.msk.f32.mxu1 %vm755_vm1, %v252_v11  ;;  %v230_v44 = vunpack.c.l.bf16 %v16009_v31  ;;  %v1278_v7 = vunpack.c.l.bf16 %v16010_v16  ;;  %v1308_v63 = vmul.f32 %v1276_v62, %v1276_v62  ;;  %v1279_v11 = vunpack.c.l.bf16 %v16011_v51  ;;  %v1969_v51 = vld [vmem:[%s11181_s23 + $0x18] sm:$0xe] }
  0x74   : > { %v236_v62 = vunpack.c.l.bf16 %v16022_v42 }
  0x75   : > { %v262_v61 = vmul.f32 %v230_v44, %v230_v44  ;;  %v1310_v27 = vmul.f32 %v1278_v7, %v1278_v7  ;;  %v16023_v44 = vld [vmem:[#allocation33_spill] sm:$0xff]  ;;  %v1285_v7 = vunpack.c.l.bf16 %v11577_v37 }
  0x76   : > { %10225 = vmatmul.mubr.msk.f32.gmra.mxu0 %vm755_vm1, %v1300_v21  ;;  %10287 = vmatmul.mubr.msk.f32.gmra.mxu1 %vm755_vm1, %v253_v15  ;;  %v16012_v21 = vld [vmem:[#allocation19_spill] sm:$0xff]  ;;  %v1309_v15 = vmul.f32 %v1277_v55, %v1277_v55  ;;  %v2027_v55 = vrot.slane %v11064_v38, 5  ;;  %v1284_v16 = vunpack.c.l.bf16 %v16023_v44 }
  0x77   : > { %10227 = vmatprep.mubr.msk.f32.mxu0 %vm755_vm1, %v1301_v20  ;;  %10289 = vmatprep.mubr.msk.f32.mxu1 %vm755_vm1, %v254_v0  ;;  %v231_v28 = vunpack.c.l.bf16 %v16012_v21  ;;  %v16013_v20 = vld [vmem:[#allocation22_spill] sm:$0xff]  ;;  %v11070_v38 = vld [vmem:[%s11181_s23 + $0x2c] sm:$0x1] }
  0x78   : > { %v232_v41 = vunpack.c.l.bf16 %v16013_v20  ;;  %v1967_v0 = vld [vmem:[%s11181_s23] sm:$0xe]  ;;  %v11065_v20 = vld [vmem:[%s11181_s23 + $0x14] sm:$0x1] }
  0x79   : > { %v263_v47 = vmul.f32 %v231_v28, %v231_v28  ;;  %v237_v28 = vunpack.c.l.bf16 %v11553_v8 }
  0x7a   : > { %10228 = vmatmul.mubr.msk.f32.gmra.mxu0 %vm755_vm1, %v1302_v22  ;;  %10290 = vmatmul.mubr.msk.f32.gmra.mxu1 %vm755_vm1, %v255_v33  ;;  %v16014_v22 = vld [vmem:[#allocation27_spill] sm:$0xff]  ;;  %v1311_v33 = vmul.f32 %v1279_v11, %v1279_v11 }
  0x7b   : > { %10230 = vmatprep.mubr.msk.f32.mxu0 %vm755_vm1, %v1303_v18  ;;  %10292 = vmatprep.mubr.msk.f32.mxu1 %vm755_vm1, %v256_v48  ;;  %v1280_v59 = vunpack.c.l.bf16 %v16014_v22  ;;  %v1281_v18 = vunpack.c.l.bf16 %v16015_v17  ;;  %v264_v48 = vmul.f32 %v232_v41, %v232_v41  ;;  %v2030_v41 = vrot.slane %v11065_v20, 5  ;;  %v1972_v20 = vld [vmem:[%s11181_s23 + $0x3c] sm:$0xe] }
  0x7c   : > { %v8999_v22 = vrot.slane %v1969_v51, 9  ;;  %v1286_v17 = vunpack.c.l.bf16 %v11589_v6  ;;  %v1291_v51 = vunpack.c.l.bf16 %v11637_v1 }
  0x7d   : > { %v1312_v39 = vmul.f32 %v1280_v59, %v1280_v59  ;;  %v1313_v40 = vmul.f32 %v1281_v18, %v1281_v18  ;;  %v1316_v59 = vmul.f32 %v1284_v16, %v1284_v16 }
  0x7e   : > { %10231 = vmatmul.mubr.msk.f32.gmra.mxu0 %vm755_vm1, %v1304_v25  ;;  %10293 = vmatmul.mubr.msk.f32.gmra.mxu1 %vm755_vm1, %v257_v43  ;;  %v8997_v25 = vrot.slane %v1967_v0, 9  ;;  %v16017_v43 = vld [vmem:[#allocation31_spill] sm:$0xff]  ;;  %v11066_v0 = vld [vmem:[%s11181_s23 + $0x1c] sm:$0xf] }
  0x7f   : > { %10233 = vmatprep.mubr.msk.f32.mxu0 %vm755_vm1, %v1305_v34  ;;  %10295 = vmatprep.mubr.msk.f32.mxu1 %vm755_vm1, %v258_v14  ;;  %v1282_v53 = vunpack.c.l.bf16 %v16017_v43  ;;  %v16021_v34 = vld [vmem:[#allocation2_spill] sm:$0xff]  ;;  %v1283_v14 = vunpack.c.l.bf16 %v11557_v10  ;;  %v11068_v43 = vld [vmem:[%s11181_s23 + $0x28] sm:$0xf] }
  0x80   : > { %v2023_v58 = vrot.slane %v16021_v34, 5  ;;  %v11758_v10 = vsel %vm11743_vm7, %v8997_v25, %v2020_v54 }
  0x81   : > { %v1315_v31 = vmul.f32 %v1283_v14, %v1283_v14  ;;  %v1288_v14 = vunpack.c.l.bf16 %v11611_v50 }
  0x82   : > { %10234 = vmatmul.mubr.msk.f32.gmra.mxu0 %vm755_vm1, %v1306_v2  ;;  %10296 = vmatmul.mubr.msk.f32.gmra.mxu1 %vm755_vm1, %v259_v19  ;;  %v235_v2 = vunpack.c.l.bf16 %v11521_v52  ;;  %v1968_v19 = vld [vmem:[%s11181_s23 + $0xc] sm:$0xe] }
  0x83   : > { %10236 = vmatprep.mubr.msk.f32.mxu0 %vm755_vm1, %v1307_v26  ;;  %10298 = vmatprep.mubr.msk.f32.mxu1 %vm755_vm1, %v260_v29  ;;  %v2022_v26 = vrot.slane %v2020_v54, 4  ;;  %v1314_v29 = vmul.f32 %v1282_v53, %v1282_v53  ;;  %v2037_v54 = vrot.slane %v11067_v24, 5  ;;  %v2041_v53 = vrot.slane %v11068_v43, 5  ;;  %v11073_v24 = vld [vmem:[%s11181_s23 + $0x4c] sm:$0xf] }
  0x84   : > { %v267_v11 = vmul.f32 %v235_v2, %v235_v2  ;;  %v1319_v2 = vmul.f32 %v1287_v13, %v1287_v13  ;;  %v1320_v16 = vmul.f32 %v1288_v14, %v1288_v14  ;;  %v9002_v13 = vrot.slane %v1972_v20, 9 }
  0x85   : > { %v11772_v37 = vsel %vm11743_vm7, %v2022_v26, %v2023_v58 }
  0x86   : > { %10237 = vmatmul.mubr.msk.f32.gmra.mxu0 %vm755_vm1, %v1308_v63  ;;  %10299 = vmatmul.mubr.msk.f32.gmra.mxu1 %vm755_vm1, %v261_v23  ;;  %v8998_v63 = vrot.slane %v1968_v19, 9  ;;  %v268_v23 = vmul.f32 %v236_v62, %v236_v62  ;;  %v2457_v57 = vunpack.c.l.bf16 %v11772_v37  ;;  %v11069_v19 = vld [vmem:[%s11181_s23 + $0x34] sm:$0xf] }
  0x87   : > { %10239 = vmatprep.mubr.msk.f32.mxu0 %vm755_vm1, %v1309_v15  ;;  %10301 = vmatprep.mubr.msk.f32.mxu1 %vm755_vm1, %v262_v61  ;;  %v2456_v15 = vunpack.c.l.bf16 %v11758_v10  ;;  %v2029_v61 = vrot.slane %v2027_v55, 4 }
  0x88   : > { %v11779_v18 = vsel %vm11743_vm7, %v8998_v63, %v2027_v55  ;;  %v2489_v42 = vmul.f32 %v2457_v57, %v2457_v57  ;;  %v2044_v55 = vrot.slane %v11070_v38, 5  ;;  %v1290_v63 = vunpack.c.l.bf16 %v11630_v30  ;;  %v11829_v30 = vld [vmem:[%s15874_s2] sm:$0xff] }
  0x89   : > { %v2488_v5 = vmul.f32 %v2456_v15, %v2456_v15  ;;  %v11790_v6 = vsel %vm11743_vm7, %v2029_v61, %v2030_v41  ;;  %v2458_v60 = vunpack.c.l.bf16 %v11779_v18  ;;  %v16024_v15 = vld [vmem:[#allocation4_spill] sm:$0xff]  ;;  %v9014_v38 = vcombine.low %v11758_v10, %v11772_v37  ;;  %v1975_v37 = vld [vmem:[%s11181_s23 + $0x60] sm:$0xe] }
  0x8a   : > { %10240 = vmatmul.mubr.msk.f32.gmra.mxu0 %vm755_vm1, %v1310_v27  ;;  %10302 = vmatmul.mubr.msk.f32.gmra.mxu1 %vm755_vm1, %v263_v47  ;;  %v2034_v27 = vrot.slane %v11066_v0, 5  ;;  %v1970_v47 = vld [vmem:[%s11181_s23 + $0x24] sm:$0xe]  ;;  %v2459_v62 = vunpack.c.l.bf16 %v11790_v6  ;;  %v2051_v61 = vrot.slane %v16024_v15, 5 }
  0x8b   : > { %10242 = vmatprep.mubr.msk.f32.mxu0 %vm755_vm1, %v1311_v33  ;;  %10304 = vmatprep.mubr.msk.f32.mxu1 %vm755_vm1, %v264_v48  ;;  %v1317_v33 = vmul.f32 %v1285_v7, %v1285_v7  ;;  %v269_v48 = vmul.f32 %v237_v28, %v237_v28  ;;  %v9000_v58 = vrot.slane %v1970_v47, 9  ;;  %v1292_v47 = vunpack.c.l.bf16 %v11643_v12 }
  0x8c   : > { %v2036_v25 = vrot.slane %v2034_v27, 4  ;;  %v11797_v34 = vsel %vm11743_vm7, %v8999_v22, %v2034_v27  ;;  %v11072_v27 = vld [vmem:[%s11181_s23 + $0x40] sm:$0xf] }
  0x8d   : > { %v2460_v26 = vunpack.c.l.bf16 %v11797_v34  ;;  %v2055_v22 = vrot.slane %v11072_v27, 5  ;;  %v1324_v14 = vmul.f32 %v1292_v47, %v1292_v47 }
  0x8e   : > { %10243 = vmatmul.mubr.msk.f32.gmra.mxu0 %vm755_vm1, %v1312_v39  ;;  %10305 = vmatmul.mubr.msk.f32.gmra.mxu1 %vm755_vm1, %v265_v45  ;;  %v1318_v39 = vmul.f32 %v1286_v17, %v1286_v17  ;;  %v1971_v45 = vld [vmem:[%s11181_s23 + $0x30] sm:$0xe]  ;;  %v11811_v50 = vsel %vm11743_vm7, %v2036_v25, %v2037_v54  ;;  %v1323_v17 = vmul.f32 %v1291_v51, %v1291_v51  ;;  %v2062_v54 = vrot.slane %v11073_v24, 5 }
  0x8f   : > { %10245 = vmatprep.mubr.msk.f32.mxu0 %vm755_vm1, %v1313_v40  ;;  %10307 = vmatprep.mubr.msk.f32.mxu1 %vm755_vm1, %v266_v4  ;;  %v1289_v40 = vunpack.c.l.bf16 %v11619_v49  ;;  %v2048_v4 = vrot.slane %v11069_v19, 5  ;;  %v2043_v49 = vrot.slane %v2041_v53, 4  ;;  %v9001_v44 = vrot.slane %v1971_v45, 9  ;;  %v16026_v19 = vld [vmem:[#allocation6_spill] sm:$0xff] }
  0x90   : > { %v2492_v1 = vmul.f32 %v2460_v26, %v2460_v26  ;;  %v11861_v45 = vsel %vm11743_vm7, %v9002_v13, %v2055_v22  ;;  %v11074_v26 = vld [vmem:[%s11181_s23 + $0x58] sm:$0xf]  ;;  %v11076_v13 = vld [vmem:[%s11181_s23 + $0x70] sm:$0xf] }
  0x91   : > { %v1321_v7 = vmul.f32 %v1289_v40, %v1289_v40  ;;  %v2050_v28 = vrot.slane %v2048_v4, 4  ;;  %v11835_v0 = vsel %vm11743_vm7, %v2043_v49, %v2044_v55  ;;  %v2069_v49 = vrot.slane %v11074_v26, 5  ;;  %v1978_v26 = vld [vmem:[%s11181_s23 + $0x84] sm:$0xe] }
  0x92   : > { %10246 = vmatmul.mubr.msk.f32.gmra.mxu0 %vm755_vm1, %v1314_v29  ;;  %10308 = vmatmul.mubr.msk.f32.gmra.mxu1 %vm755_vm1, %v267_v11  ;;  %v2490_v29 = vmul.f32 %v2458_v60, %v2458_v60  ;;  %v2491_v11 = vmul.f32 %v2459_v62, %v2459_v62  ;;  %v2463_v57 = vunpack.c.l.bf16 %v11835_v0  ;;  %v16025_v60 = vld [vmem:[#allocation5_spill] sm:$0xff]  ;;  %v2064_v62 = vrot.slane %v2062_v54, 4 }
  0x93   : > { %10248 = vmatprep.mubr.msk.f32.mxu0 %vm755_vm1, %v1315_v31  ;;  %10310 = vmatprep.mubr.msk.f32.mxu1 %vm755_vm1, %v268_v23  ;;  %v11816_v31 = vsel %vm11743_vm7, %v9000_v58, %v2041_v53  ;;  %v2461_v23 = vunpack.c.l.bf16 %v11811_v50  ;;  %v11851_v25 = vsel %vm11743_vm7, %v2050_v28, %v2051_v61  ;;  %v2057_v53 = vrot.slane %v2055_v22, 4  ;;  %v16027_v28 = vld [vmem:[#allocation7_spill] sm:$0xff]  ;;  %v11075_v61 = vld [vmem:[%s11181_s23 + $0x64] sm:$0xf] }
  0x94   : > { %v2462_v41 = vunpack.c.l.bf16 %v11816_v31  ;;  %v2058_v58 = vrot.slane %v16025_v60, 5  ;;  %v2465_v40 = vunpack.c.l.bf16 %v11851_v25  ;;  %v2072_v15 = vrot.slane %v16027_v28, 5 }
  0x95   : > { %v2076_v20 = vrot.slane %v11075_v61, 5  ;;  %v9017_v60 = vcombine.low %v11816_v31, %v11835_v0  ;;  %v2097_v28 = vrot.slane %v16007_v56, 5  ;;  %v16031_v56 = vld [vmem:[#allocation25_spill] sm:$0xff] }
  0x96   : > { %10249 = vmatmul.mubr.msk.f32.gmra.mxu0 %vm755_vm1, %v1316_v59  ;;  %10311 = vmatmul.mubr.msk.f32.gmra.mxu1 %vm755_vm1, %v269_v48  ;;  %v11841_v59 = vsel %vm11743_vm7, %v9001_v44, %v2048_v4  ;;  %v1973_v48 = vld [vmem:[%s11181_s23 + $0x48] sm:$0xe]  ;;  %v2494_v12 = vmul.f32 %v2462_v41, %v2462_v41  ;;  %v2065_v4 = vrot.slane %v16026_v19, 5  ;;  %v2466_v44 = vunpack.c.l.bf16 %v11861_v45  ;;  %v11077_v19 = vld [vmem:[%s11181_s23 + $0x7c] sm:$0xf] }
  0x97   : > { %10251 = vmatprep.mubr.msk.f32.mxu0 %vm755_vm1, %v1317_v33  ;;  %10349 = vmatprep.mubr.msk.f32.mxu1 %vm755_vm1, %v2488_v5  ;;  %v1322_v33 = vmul.f32 %v1290_v63, %v1290_v63  ;;  %v2493_v5 = vmul.f32 %v2461_v23, %v2461_v23  ;;  %v2464_v43 = vunpack.c.l.bf16 %v11841_v59  ;;  %v9015_v63 = vcombine.low %v11779_v18, %v11790_v6 }
  0x98   : > { %v2497_v10 = vmul.f32 %v2465_v40, %v2465_v40  ;;  %v2071_v23 = vrot.slane %v2069_v49, 4  ;;  %v9016_v18 = vcombine.low %v11797_v34, %v11811_v50  ;;  %v3037_v41 = vsel %vm804_vm0, %v11674_v32, 0  ;;  %v11909_v34 = vld [vmem:[%s15873_s1 + $0x10] sm:$0xf] }
  0x99   : > { %v2496_v55 = vmul.f32 %v2464_v43, %v2464_v43  ;;  %v2498_v27 = vmul.f32 %v2466_v44, %v2466_v44  ;;  %v2078_v24 = vrot.slane %v2076_v20, 4 }
  0x9a   : > { %10252 = vmatmul.mubr.msk.f32.gmra.mxu0 %vm755_vm1, %v1318_v39  ;;  %10350 = vmatmul.mubr.msk.f32.vlgmr.msra.gmra.mxu1 %vm755_vm1, %v2489_v42  ;;  %v9003_v39 = vrot.slane %v1973_v48, 9  ;;  %v2495_v42 = vmul.f32 %v2463_v57, %v2463_v57  ;;  %v11915_v32 = vsel %vm11743_vm7, %v2071_v23, %v2072_v15  ;;  %v2083_v48 = vrot.slane %v11076_v13, 5  ;;  %v1979_v15 = vld [vmem:[%s11181_s23 + $0x90] sm:$0xe] }
  0x9b   : > { %10254 = vmatprep.mubr.msk.f32.mxu0 %vm755_vm1, %v1319_v2  ;;  %10432 = vmatpush3.msra.mxu1 %v11829_v30  ;;  %v1974_v2 = vld [vmem:[%s11181_s23 + $0x54] sm:$0xe]  ;;  %v9008_v23 = vrot.slane %v1978_v26, 9 }
  0x9c   : > { %10352 = vmatprep.mubr.msk.f32.mxu1 %vm755_vm1, %v2490_v29  ;;  %10515 = vmatprep.subr.mxu1 %v11829_v30  ;;  %v11874_v29 = vsel %vm11743_vm7, %v2057_v53, %v2058_v58  ;;  %v1977_v53 = vld [vmem:[%s11181_s23 + $0x78] sm:$0xe]  ;;  %v9018_v58 = vcombine.low %v11841_v59, %v11851_v25 }
  0x9d   : > { %v2467_v51 = vunpack.c.l.bf16 %v11874_v29  ;;  %v9007_v25 = vrot.slane %v1977_v53, 9 }
  0x9e   : > { %10255 = vmatmul.mubr.msk.f32.gmra.mxu0 %vm755_vm1, %v1320_v16  ;;  %10353 = vmatmul.mubr.msk.f32.gmra.mxu1 %vm755_vm1, %v2491_v11  ;;  %v11879_v16 = vsel %vm11743_vm7, %v9003_v39, %v2062_v54  ;;  %v11889_v11 = vsel %vm11743_vm7, %v2064_v62, %v2065_v4  ;;  %v16028_v54 = vld [vmem:[#allocation11_spill] sm:$0xff]  ;;  %v2090_v4 = vrot.slane %v11077_v19, 5 }
  0x9f   : > { %10257 = vmatprep.mubr.msk.f32.mxu0 %vm755_vm1, %v1321_v7  ;;  %10355 = vmatprep.mubr.msk.f32.mxu1 %vm755_vm1, %v2492_v1  ;;  %v9004_v7 = vrot.slane %v1974_v2, 9  ;;  %v2468_v6 = vunpack.c.l.bf16 %v11879_v16  ;;  %v1976_v1 = vld [vmem:[%s11181_s23 + $0x6c] sm:$0xe]  ;;  %v2499_v50 = vmul.f32 %v2467_v51, %v2467_v51  ;;  %v2085_v2 = vrot.slane %v2083_v48, 4 }
  0xa0   : > { %v9006_v47 = vrot.slane %v1976_v1, 9  ;;  %v11961_v51 = vsel %vm11743_vm7, %v9007_v25, %v2090_v4 }
  0xa1   : > { %v11903_v22 = vsel %vm11743_vm7, %v9004_v7, %v2069_v49  ;;  %v2092_v7 = vrot.slane %v2090_v4, 4  ;;  %v2118_v4 = vrot.slane %v11521_v52, 5 }
  0xa2   : > { %10258 = vmatmul.mubr.msk.f32.gmra.mxu0 %vm755_vm1, %v1322_v33  ;;  %10356 = vmatmul.mubr.msk.f32.gmra.mxu1 %vm755_vm1, %v2493_v5  ;;  %v9005_v33 = vrot.slane %v1975_v37, 9  ;;  %v2500_v5 = vmul.f32 %v2468_v6, %v2468_v6  ;;  %v2470_v57 = vunpack.c.l.bf16 %v11903_v22  ;;  %v11937_v40 = vsel %vm11743_vm7, %v9006_v47, %v2083_v48 }
  0xa3   : > { %10260 = vmatprep.mubr.msk.f32.mxu0 %vm755_vm1, %v1323_v17  ;;  %10358 = vmatprep.mubr.msk.f32.mxu1 %vm755_vm1, %v2494_v12  ;;  %v2469_v17 = vunpack.c.l.bf16 %v11889_v11  ;;  %v2079_v12 = vrot.slane %v16028_v54, 5  ;;  %v9020_v6 = vcombine.low %v11879_v16, %v11889_v11  ;;  %v9009_v16 = vrot.slane %v1979_v15, 9 }
  0xa4   : > { %v11924_v43 = vsel %vm11743_vm7, %v9005_v33, %v2076_v20  ;;  %v2502_v31 = vmul.f32 %v2470_v57, %v2470_v57  ;;  %v2100_v33 = vrot.slane %v16031_v56, 5  ;;  %v2104_v11 = vrot.slane %v16012_v21, 5 }
  0xa5   : > { %v2501_v39 = vmul.f32 %v2469_v17, %v2469_v17  ;;  %v2472_v0 = vunpack.c.l.bf16 %v11924_v43  ;;  %v11945_v59 = vsel %vm11743_vm7, %v2078_v24, %v2079_v12  ;;  %v1980_v17 = vld [vmem:[%s11181_s23 + $0x9c] sm:$0xe]  ;;  %v2111_v57 = vrot.slane %v11497_v46, 5 }
  0xa6   : > { %10261 = vmatmul.mubr.msk.f32.gmra.mxu0 %vm755_vm1, %v1324_v14  ;;  %10359 = vmatmul.mubr.msk.f32.gmra.mxu1 %vm755_vm1, %v2495_v42  ;;  %v2471_v14 = vunpack.c.l.bf16 %v11915_v32  ;;  %v16029_v42 = vld [vmem:[#allocation16_spill] sm:$0xff]  ;;  %v11997_v24 = vsel %vm11743_vm7, %v9009_v16, %v2104_v11  ;;  %v2106_v54 = vrot.slane %v2104_v11, 4  ;;  %v16032_v12 = vld [vmem:[#allocation29_spill] sm:$0xff]  ;;  %v9022_v46 = vcombine.low %v11924_v43, %v11945_v59 }
  0xa7   : > { %10315 = vmatprep.mubr.msk.bf16.mxu0 %vm755_vm1, %v9014_v38  ;;  %10361 = vmatprep.mubr.msk.f32.mxu1 %vm755_vm1, %v2496_v55  ;;  %v2086_v62 = vrot.slane %v16029_v42, 5  ;;  %v2474_v38 = vunpack.c.l.bf16 %v11937_v40  ;;  %v2473_v55 = vunpack.c.l.bf16 %v11945_v59  ;;  %v2504_v37 = vmul.f32 %v2472_v0, %v2472_v0  ;;  %v16033_v43 = vld [vmem:[#allocation32_spill] sm:$0xff] }
  0xa8   : > { %v2503_v49 = vmul.f32 %v2471_v14, %v2471_v14  ;;  %v2107_v53 = vrot.slane %v16032_v12, 5  ;;  %v2480_v42 = vunpack.c.l.bf16 %v11997_v24  ;;  %v2114_v19 = vrot.slane %v16033_v43, 5  ;;  %v1982_v0 = vld [vmem:[%s11181_s23 + $0xb4] sm:$0xe] }
  0xa9   : > { %v11954_v44 = vsel %vm11743_vm7, %v2085_v2, %v2086_v62  ;;  %v2506_v61 = vmul.f32 %v2474_v38, %v2474_v38  ;;  %v2505_v1 = vmul.f32 %v2473_v55, %v2473_v55  ;;  %v2120_v55 = vrot.slane %v2118_v4, 4 }
  0xaa   : > { %10316 = vmatmul.mubr.msk.bf16.vlgmr.msra.gmra.mxu0 %vm755_vm1, %v9015_v63  ;;  %10362 = vmatmul.mubr.msk.f32.gmra.mxu1 %vm755_vm1, %v2497_v10  ;;  %v16030_v63 = vld [vmem:[#allocation21_spill] sm:$0xff]  ;;  %v2475_v20 = vunpack.c.l.bf16 %v11954_v44  ;;  %v2512_v38 = vmul.f32 %v2480_v42, %v2480_v42  ;;  %v2128_v15 = vrot.slane %v11596_v36, 5 }
  0xab   : > { %10398 = vmatpush3.bf16.msra.mxu0 %v3037_v41  ;;  %10319 = vmatprep.mubr.msk.bf16.mxu0 %vm755_vm1, %v9016_v18  ;;  %v2093_v10 = vrot.slane %v16030_v63, 5  ;;  %v9019_v18 = vcombine.low %v11861_v45, %v11874_v29  ;;  %v2476_v41 = vunpack.c.l.bf16 %v11961_v51  ;;  %v11980_v45 = vsel %vm11743_vm7, %v9008_v23, %v2097_v28  ;;  %v12057_v36 = vld [vmem:[%s11181_s23 + $0x18] sm:$0xff]  }
  0xac   : > { %10364 = vmatprep.mubr.msk.f32.mxu1 %vm755_vm1, %v2498_v27  ;;  %10905 = vmatprep.subr.msk.bf16.mxu0 %vm804_vm0, %v11909_v34  ;;  %v2099_v29 = vrot.slane %v2097_v28, 4  ;;  %v2478_v48 = vunpack.c.l.bf16 %v11980_v45  ;;  %v3234_v11 = vunpack.c.l.bf16 %v12057_v36 }
  0xad   : > { %v11974_v27 = vsel %vm11743_vm7, %v2092_v7, %v2093_v10  ;;  %v2508_v13 = vmul.f32 %v2476_v41, %v2476_v41  ;;  %v2121_v7 = vrot.slane %v11585_v3, 5  ;;  %v9012_v10 = vrot.slane %v1982_v0, 9 }
  0xae   : > { %10365 = vmatmul.mubr.msk.f32.gmra.mxu1 %vm755_vm1, %v2499_v50  ;;  %v2507_v50 = vmul.f32 %v2475_v20, %v2475_v20  ;;  %v2477_v47 = vunpack.c.l.bf16 %v11974_v27  ;;  %v11993_v21 = vsel %vm11743_vm7, %v2099_v29, %v2100_v33  ;;  %v2510_v14 = vmul.f32 %v2478_v48, %v2478_v48  ;;  %v12071_v33 = vld [vmem:[%s11181_s23 + $0x24] sm:$0xff]  }
  0xaf   : > { %10367 = vmatprep.mubr.msk.f32.mxu1 %vm755_vm1, %v2500_v5  ;;  %v9010_v5 = vrot.slane %v1980_v17, 9  ;;  %v2479_v2 = vunpack.c.l.bf16 %v11993_v21  ;;  %v9024_v3 = vcombine.low %v11961_v51, %v11974_v27  ;;  %v9025_v29 = vcombine.low %v11980_v45, %v11993_v21  ;;  %v12078_v17 = vld [vmem:[%s11181_s23 + $0x30] sm:$0xff]  }
  0xb0   : > { %v3235_v48 = vunpack.c.h.bf16 %v12057_v36  ;;  %v3236_v21 = vunpack.c.l.bf16 %v12071_v33  ;;  %v3237_v12 = vunpack.c.h.bf16 %v12071_v33 }
  0xb1   : > { %v12010_v62 = vsel %vm11743_vm7, %v9010_v5, %v2111_v57  ;;  %v2511_v59 = vmul.f32 %v2479_v2, %v2479_v2  ;;  %v12103_v2 = vld [vmem:[%s11181_s23 + $0x54] sm:$0xff]  }
  0xb2   : > { %10320 = vmatmul.mubr.msk.bf16.gmra.mxu0 %vm755_vm1, %v9017_v60  ;;  %10368 = vmatmul.mubr.msk.f32.gmra.mxu1 %vm755_vm1, %v2501_v39  ;;  %v9021_v60 = vcombine.low %v11903_v22, %v11915_v32  ;;  %v1981_v39 = vld [vmem:[%s11181_s23 + $0xa8] sm:$0xe]  ;;  %v12015_v22 = vsel %vm11743_vm7, %v2106_v54, %v2107_v53  ;;  %v2113_v32 = vrot.slane %v2111_v57, 4  ;;  %v2482_v26 = vunpack.c.l.bf16 %v12010_v62  ;;  %v12091_v54 = vld [vmem:[%s11181_s23 + $0x3c] sm:$0xff]  }
  0xb3   : > { %10323 = vmatprep.mubr.msk.bf16.mxu0 %vm755_vm1, %v9018_v58  ;;  %10370 = vmatprep.mubr.msk.f32.mxu1 %vm755_vm1, %v2502_v31  ;;  %v2509_v58 = vmul.f32 %v2477_v47, %v2477_v47  ;;  %v9011_v31 = vrot.slane %v1981_v39, 9  ;;  %v2481_v25 = vunpack.c.l.bf16 %v12015_v22  ;;  %v3238_v53 = vunpack.c.l.bf16 %v12078_v17 }
  0xb4   : > { %v12029_v52 = vsel %vm11743_vm7, %v2113_v32, %v2114_v19  ;;  %v3266_v39 = vmul.f32 %v3234_v11, %v3234_v11  ;;  %v12109_v32 = vld [vmem:[%s11181_s23 + $0x60] sm:$0xff]   ;;  %v12113_v43 = vmul.f32 %v3236_v21, %v3236_v21  ;;  %v12117_v19 = vsel %vm804_vm0, %v11909_v34, 0  ;;  %v9176_v21 = vld [vmem:[%s11181_s23 + $0x10] sm:$0xf] }
  0xb5   : > { %v12034_v63 = vsel %vm11743_vm7, %v9011_v31, %v2118_v4  ;;  %v2483_v23 = vunpack.c.l.bf16 %v12029_v52  ;;  %v9027_v47 = vcombine.low %v12010_v62, %v12029_v52  ;;  %v12105_v62 = vmul.f32 %v3235_v48, %v3235_v48 }
  0xb6   : > { %10371 = vmatmul.mubr.msk.f32.gmra.mxu1 %vm755_vm1, %v2503_v49  ;;  %v2125_v49 = vrot.slane %v11553_v8, 5  ;;  %v9023_v8 = vcombine.low %v11937_v40, %v11954_v44  ;;  %v12047_v40 = vsel %vm11743_vm7, %v2120_v55, %v2121_v7  ;;  %v12050_v44 = vld [vmem:[%s11181_s23 + $0xc] sm:$0xff]   ;;  %v3241_v4 = vunpack.c.h.bf16 %v12091_v54  ;;  %v12139_v7 = vld [vmem:[%s11181_s23 + $0x78] sm:$0xff]  }
  0xb7   : > { %10373 = vmatprep.mubr.msk.f32.mxu1 %vm755_vm1, %v2504_v37  ;;  %v2513_v37 = vmul.f32 %v2481_v25, %v2481_v25  ;;  %v2515_v51 = vmul.f32 %v2483_v23, %v2483_v23  ;;  %v2485_v20 = vunpack.c.l.bf16 %v12047_v40  ;;  %v3232_v41 = vunpack.c.l.bf16 %v12050_v44  ;;  %16034 = vst [vmem:[#allocation8_spill] sm:$0xff] %v12139_v7 }
  0xb8   : > { %v2127_v28 = vrot.slane %v2125_v49, 4  ;;  %v3233_v16 = vunpack.c.h.bf16 %v12050_v44  ;;  %v9028_v57 = vcombine.low %v12034_v63, %v12047_v40  ;;  %v12123_v0 = vmul.f32 %v3237_v12, %v3237_v12 }
  0xb9   : > { %v2517_v45 = vmul.f32 %v2485_v20, %v2485_v20  ;;  %v3264_v5 = vmul.f32 %v3232_v41, %v3232_v41  ;;  %v3245_v52 = vunpack.c.h.bf16 %v12103_v2  ;;  %v3246_v55 = vunpack.c.l.bf16 %v12109_v32  ;;  %v9175_v41 = vld [vmem:[%s11181_s23 + $0xc] sm:$0xf] }
  0xba   : > { %10324 = vmatmul.mubr.msk.bf16.gmra.mxu0 %vm755_vm1, %v9019_v18  ;;  %10374 = vmatmul.mubr.msk.f32.gmra.mxu1 %vm755_vm1, %v2505_v1  ;;  %v2514_v18 = vmul.f32 %v2482_v26, %v2482_v26  ;;  %v12064_v1 = vsel %vm11743_vm7, %v2127_v28, %v2128_v15  ;;  %v3244_v26 = vunpack.c.l.bf16 %v12103_v2  ;;  %v12150_v28 = vmul.f32 %v3241_v4, %v3241_v4 }
  0xbb   : > { %10327 = vmatprep.mubr.msk.bf16.mxu0 %vm755_vm1, %v9020_v6  ;;  %10376 = vmatprep.mubr.msk.f32.mxu1 %vm755_vm1, %v2506_v61  ;;  %v2484_v6 = vunpack.c.l.bf16 %v12034_v63  ;;  %v12054_v61 = vsel %vm11743_vm7, %v9012_v10, %v2125_v49  ;;  %v12130_v49 = vld [vmem:[%s11181_s23 + $0x6c] sm:$0xff]   ;;  %v3250_v20 = vunpack.c.l.bf16 %v12139_v7  ;;  %v3701_v12 = vshll.u32 %v9175_v41, 16 }
  0xbc   : > { %v2486_v56 = vunpack.c.l.bf16 %v12054_v61 }
  0xbd   : > { %v2516_v27 = vmul.f32 %v2484_v6, %v2484_v6 }
  0xbe   : > { %10377 = vmatmul.mubr.msk.f32.gmra.mxu1 %vm755_vm1, %v2507_v50  ;;  %v9026_v50 = vcombine.low %v11997_v24, %v12015_v22  ;;  %v2518_v24 = vmul.f32 %v2486_v56, %v2486_v56  ;;  %v3240_v22 = vunpack.c.l.bf16 %v12091_v54  ;;  %v12165_v56 = vmul.f32 %v3245_v52, %v3245_v52 }
  0xbf   : > { %10379 = vmatprep.mubr.msk.f32.mxu1 %vm755_vm1, %v2508_v13  ;;  %v2487_v13 = vunpack.c.l.bf16 %v12064_v1 }
  0xc0   : > { %v12141_v10 = vmul.f32 %v3240_v22, %v3240_v22 }
  0xc1   : > { %v2519_v42 = vmul.f32 %v2487_v13, %v2487_v13  ;;  %v12174_v13 = vld [vmem:[%s11181_s23 + $0x90] sm:$0xff]  }
  0xc2   : > { %10328 = vmatmul.mubr.msk.bf16.gmra.mxu0 %vm755_vm1, %v9021_v60  ;;  %10380 = vmatmul.mubr.msk.f32.gmra.mxu1 %vm755_vm1, %v2509_v58  ;;  %v12097_v60 = vld [vmem:[%s11181_s23 + $0x48] sm:$0xff]   ;;  %16036 = vst [vmem:[#allocation9_spill] sm:$0xff] %v12174_v13  ;;  %v3254_v63 = vunpack.c.l.bf16 %v12174_v13  ;;  %v3255_v40 = vunpack.c.h.bf16 %v12174_v13 }
  0xc3   : > { %10331 = vmatprep.mubr.msk.bf16.mxu0 %vm755_vm1, %v9022_v46  ;;  %10382 = vmatprep.mubr.msk.f32.mxu1 %vm755_vm1, %v2510_v14  ;;  %v3265_v46 = vmul.f32 %v3233_v16, %v3233_v16  ;;  %v3239_v14 = vunpack.c.h.bf16 %v12078_v17  ;;  %v3242_v31 = vunpack.c.l.bf16 %v12097_v60  ;;  %v3243_v25 = vunpack.c.h.bf16 %v12097_v60 }
  0xc4   : > { %v3251_v16 = vunpack.c.h.bf16 %v12139_v7 }
  0xc5   : > { %v12152_v15 = vmul.f32 %v3242_v31, %v3242_v31  ;;  %v12157_v6 = vmul.f32 %v3243_v25, %v3243_v25  ;;  %v9181_v31 = vld [vmem:[%s11181_s23 + $0x24] sm:$0xf]  ;;  %v3707_v25 = vshll.u32 %v9176_v21, 16 }
  0xc6   : > { %10383 = vmatmul.mubr.msk.f32.gmra.mxu1 %vm755_vm1, %v2511_v59  ;;  %v12125_v59 = vmul.f32 %v3238_v53, %v3238_v53  ;;  %v9178_v53 = vld [vmem:[%s11181_s23 + $0x18] sm:$0xf]  ;;  %v12198_v22 = vmul.f32 %v3251_v16, %v3251_v16 }
  0xc7   : > { %10385 = vmatprep.mubr.msk.f32.mxu1 %vm755_vm1, %v2512_v38  ;;  %v12134_v38 = vmul.f32 %v3239_v14, %v3239_v14  ;;  %v9179_v14 = vld [vmem:[%s11181_s23 + $0x1c] sm:$0xf]  ;;  %v3722_v52 = vshrl.u32 %v9178_v53, 16 }
  0xc9   : > { %v3724_v13 = vrot.slane %v3722_v52, 4 }
  0xca   : > { %10332 = vmatmul.mubr.msk.bf16.gmra.mxu0 %vm755_vm1, %v9023_v8  ;;  %10386 = vmatmul.mubr.msk.f32.gmra.mxu1 %vm755_vm1, %v2513_v37  ;;  %v3247_v8 = vunpack.c.h.bf16 %v12109_v32  ;;  %v12145_v37 = vld [vmem:[%s11181_s23 + $0x84] sm:$0xff]  }
  0xcb   : > { %10335 = vmatprep.mubr.msk.bf16.mxu0 %vm755_vm1, %v9024_v3  ;;  %10388 = vmatprep.mubr.msk.f32.mxu1 %vm755_vm1, %v2514_v18  ;;  %16035 = vst [vmem:[#allocation13_spill] sm:$0xff] %v12145_v37  ;;  %v3248_v3 = vunpack.c.l.bf16 %v12130_v49  ;;  %v3249_v18 = vunpack.c.h.bf16 %v12130_v49  ;;  %v3252_v11 = vunpack.c.l.bf16 %v12145_v37 }
  0xcd   : > { %v12200_v4 = vmul.f32 %v3252_v11, %v3252_v11  ;;  %v3746_v11 = vshrl.u32 %v9181_v31, 16 }
  0xce   : > { %10389 = vmatmul.mubr.msk.f32.gmra.mxu1 %vm755_vm1, %v2515_v51  ;;  %v12159_v51 = vmul.f32 %v3244_v26, %v3244_v26  ;;  %v3711_v26 = vshrl.u32 %v9176_v21, 16  ;;  %v3749_v21 = vshll.u32 %v9181_v31, 16 }
  0xcf   : > { %10391 = vmatprep.mubr.msk.f32.mxu1 %vm755_vm1, %v2516_v27 }
  0xd2   : > { %10336 = vmatmul.mubr.msk.bf16.gmra.mxu0 %vm755_vm1, %v9025_v29  ;;  %10392 = vmatmul.mubr.msk.f32.gmra.mxu1 %vm755_vm1, %v2517_v45  ;;  %v12167_v29 = vmul.f32 %v3246_v55, %v3246_v55  ;;  %v12180_v45 = vmul.f32 %v3248_v3, %v3248_v3  ;;  %v3725_v55 = vshll.u32 %v9178_v53, 16 }
  0xd3   : > { %10339 = vmatprep.mubr.msk.bf16.mxu0 %vm755_vm1, %v9026_v50  ;;  %10394 = vmatprep.mubr.msk.f32.mxu1 %vm755_vm1, %v2518_v24  ;;  %v12171_v50 = vmul.f32 %v3247_v8, %v3247_v8  ;;  %v3698_v24 = vshrl.u32 %v9175_v41, 16  ;;  %v3735_v41 = vshrl.u32 %v9179_v14, 16 }
  0xd5   : > { %v12132_v34 = vpop.f32.mrf.mxu1  ;;  %v3700_v3 = vrot.slane %v3698_v24, 4  ;;  %v12223_v24 = vld [vmem:[%s11181_s23 + $0xa8] sm:$0xff]  }
  0xd6   : > { %10395 = vmatmul.mubr.msk.f32.gmra.mxu1 %vm755_vm1, %v2519_v42 }
  0xd7   : > { %v12148_v23 = vpop.f32.mrf.mxu1  ;;  %10433 = vmatprep.mubr.msk.f32.mxu1 %vm755_vm1, %v3264_v5  ;;  %v12182_v5 = vmul.f32 %v3249_v18, %v3249_v18  ;;  %v3703_v18 = vrot.slane %v3701_v12, 5  ;;  %v3709_v12 = vrot.slane %v3707_v25, 5 }
  0xd9   : > { %v12163_v27 = vpop.f32.mrf.mxu1 }
  0xda   : > { %10340 = vmatmul.mubr.msk.bf16.gmra.mxu0 %vm755_vm1, %v9027_v47  ;;  %10434 = vmatmul.mubr.msk.f32.vlgmr.msra.gmra.mxu1 %vm755_vm1, %v3265_v46  ;;  %v12191_v47 = vmul.f32 %v3250_v20, %v3250_v20  ;;  %v3253_v46 = vunpack.c.h.bf16 %v12145_v37  ;;  %v3731_v20 = vshll.u32 %v9179_v14, 16  ;;  %v3713_v14 = vrot.slane %v3711_v26, 4 }
  0xdb   : > { %v12178_v48 = vpop.f32.mrf.mxu1  ;;  %10343 = vmatprep.mubr.msk.bf16.mxu0 %vm755_vm1, %v9028_v57  ;;  %10516 = vmatpush3.msra.mxu1 %v11829_v30  ;;  %v12205_v57 = vld [vmem:[%s11181_s23 + $0x9c] sm:$0xff]   ;;  %v3704_v37 = vor.u32 %v3703_v18, %v3700_v3  ;;  %v3737_v26 = vrot.slane %v3735_v41, 4  ;;  %v3258_v18 = vunpack.c.l.bf16 %v12223_v24 }
  0xdc   : > { %10436 = vmatprep.mubr.msk.f32.mxu1 %vm755_vm1, %v3266_v39  ;;  %16037 = vst [vmem:[#allocation15_spill] sm:$0xff] %v12205_v57  ;;  %10599 = vmatprep.subr.mxu1 %v11829_v30  ;;  %v9182_v39 = vld [vmem:[%s11181_s23 + $0x28] sm:$0xf]  ;;  %v12216_v30 = vmul.f32 %v3253_v46, %v3253_v46  ;;  %v3256_v16 = vunpack.c.l.bf16 %v12205_v57  ;;  %v16038_v46 = vcombine.low %v12054_v61, %v12064_v1  ;;  %v12236_v25 = vrot.slane %v3731_v20, 5  ;;  %v9180_v1 = vld [vmem:[%s11181_s23 + $0x20] sm:$0x1] }
  0xdd   : > { %v12196_v42 = vpop.f32.mrf.mxu1  ;;  %v3755_v58 = vshll.u32 %v9182_v39, 16  ;;  %v3759_v9 = vshrl.u32 %v9182_v39, 16  ;;  %v9177_v39 = vld [vmem:[%s11181_s23 + $0x14] sm:$0x1]  ;;  %v12242_v61 = vmul.f32 %v3255_v40, %v3255_v40  ;;  %v3714_v40 = vor.u32 %v3713_v14, %v3709_v12 }
  0xde   : > { %10437 = vmatmul.mubr.msk.f32.gmra.mxu1 %vm755_vm1, %v12105_v62  ;;  %v3257_v62 = vunpack.c.h.bf16 %v12205_v57  ;;  %v12233_v57 = vmul.f32 %v3254_v63, %v3254_v63  ;;  %v12252_v20 = vld [vmem:[%s11181_s23 + $0xb4] sm:$0xff]   ;;  %v3717_v7 = vshll.u32 %v9177_v39, 16  ;;  %v12281_v39 = vld [vmem:[%s11181_s23 + $0xc0] sm:$0xff]  }
  0xdf   : > { %v12212_v8 = vpop.f32.mrf.mxu1  ;;  %10439 = vmatprep.mubr.msk.f32.mxu1 %vm755_vm1, %v12113_v43  ;;  %v3727_v43 = vrot.slane %v3725_v55, 5  ;;  %16039 = vst [vmem:[#allocation12_spill] sm:$0xff] %v12242_v61  ;;  %v3751_v55 = vrot.slane %v3749_v21, 5  ;;  %v3761_v41 = vrot.slane %v3759_v9, 4  ;;  %v3741_v9 = vshll.u32 %v9180_v1, 16  ;;  %16043 = vst [vmem:[#allocation18_spill] sm:$0xff] %v12281_v39 }
  0xe1   : > { %v12219_v53 = vpop.f32.mrf.mxu1  ;;  %v3728_v61 = vor.u32 %v3727_v43, %v3724_v13  ;;  %v3259_v13 = vunpack.c.h.bf16 %v12223_v24 }
  0xe2   : > { %10344 = vmatmul.mubr.msk.bf16.gmra.mxu0 %vm755_vm1, %v16038_v46  ;;  %10440 = vmatmul.mubr.msk.f32.gmra.mxu1 %vm755_vm1, %v12123_v0  ;;  %v3748_v0 = vrot.slane %v3746_v11, 4  ;;  %v9183_v11 = vld [vmem:[%s11181_s23 + $0x2c] sm:$0x1] }
  0xe3   : > { %v12231_v31 = vpop.f32.mrf.mxu1  ;;  %10399 = vmatprep.mubr.msk.bf16.mxu0 %vm755_vm1, %v12050_v44  ;;  %v10149_v52 = vpop.f32.mrf.mxu0  ;;  %10442 = vmatprep.mubr.msk.f32.mxu1 %vm755_vm1, %v12125_v59  ;;  %v12254_v44 = vrot.slane %v3755_v58, 5  ;;  %v12256_v59 = vmul.f32 %v3256_v16, %v3256_v16  ;;  %v3738_v58 = vor.u32 %v3737_v26, %v12236_v25  ;;  %v12269_v16 = vmul.f32 %v3257_v62, %v3257_v62 }
  0xe4   : > { %v12246_v63 = vadd.f32 %v12132_v34, %v10149_v52  ;;  %v3705_v52 = vrot.slane %v3704_v37, 4  ;;  %v3752_v14 = vor.u32 %v3751_v55, %v3748_v0  ;;  %v12278_v37 = vmul.f32 %v3258_v18, %v3258_v18  ;;  %v12287_v0 = vld [vmem:[%s15873_s1 + $0x14] sm:$0xf] }
  0xe5   : > { %v12248_v3 = vpop.f32.mrf.mxu1  ;;  %v842_v46 = vpop.f32.mrf.mxu0  ;;  %v3762_v26 = vor.u32 %v3761_v41, %v12254_v44  ;;  %v3765_v1 = vshll.u32 %v9183_v11, 16  ;;  %v3715_v62 = vrot.slane %v3714_v40, 4  ;;  %v3263_v18 = vunpack.c.h.bf16 %v12281_v39  ;;  %v9184_v41 = vld [vmem:[%s11181_s23 + $0x30] sm:$0xf] }
  0xe6   : > { %16040 = vst [vmem:[#allocation17_spill] sm:$0xff] %v12246_v63  ;;  %v12260_v34 = vadd.f32 %v12148_v23, %v842_v46  ;;  %10443 = vmatmul.mubr.msk.f32.gmra.mxu1 %vm755_vm1, %v12134_v38  ;;  %v3260_v23 = vunpack.c.l.bf16 %v12252_v20  ;;  %v3719_v46 = vrot.slane %v3717_v7, 5  ;;  %v12300_v7 = vsel %vm11233_vm4, %v3705_v52, %v3709_v12 }
  0xe7   : > { %v12264_v21 = vpop.f32.mrf.mxu1  ;;  %v10150_v63 = vpop.f32.mrf.mxu0  ;;  %10445 = vmatprep.mubr.msk.f32.mxu1 %vm755_vm1, %v12141_v10  ;;  %16045 = vst [vmem:[#allocation24_spill] sm:$0xff] %v12300_v7  ;;  %v12313_v40 = vmul.f32 %v3259_v13, %v3259_v13  ;;  %v3767_v11 = vrot.slane %v3765_v1, 5  ;;  %v3770_v1 = vshrl.u32 %v9184_v41, 16 }
  0xe8   : > { %16041 = vst [vmem:[#allocation14_spill] sm:$0xff] %v12260_v34  ;;  %v12274_v43 = vadd.f32 %v12163_v27, %v10150_v63  ;;  %v3729_v34 = vrot.slane %v3728_v61, 4  ;;  %v3739_v61 = vrot.slane %v3738_v58, 4  ;;  %v3743_v63 = vrot.slane %v3741_v9, 5 }
  0xe9   : > { %v12276_v38 = vpop.f32.mrf.mxu1  ;;  %v845_v10 = vpop.f32.mrf.mxu0  ;;  %v12317_v52 = vmul.f32 %v3260_v23, %v3260_v23  ;;  %v12321_v58 = vsel %vm11233_vm4, %v3715_v62, %v3719_v46  ;;  %v4407_v9 = vunpack.c.l.bf16 %v12300_v7 }
  0xea   : > { %16042 = vst [vmem:[#allocation20_spill] sm:$0xff] %v12274_v43  ;;  %10400 = vmatmul.mubr.msk.bf16.vlgmr.msra.gmra.mxu0 %vm755_vm1, %v12057_v36  ;;  %v12292_v27 = vadd.f32 %v12178_v48, %v845_v10  ;;  %10446 = vmatmul.mubr.msk.f32.gmra.mxu1 %vm755_vm1, %v12150_v28  ;;  %v3261_v36 = vunpack.c.h.bf16 %v12252_v20  ;;  %v3262_v48 = vunpack.c.l.bf16 %v12281_v39  ;;  %v3753_v28 = vrot.slane %v3752_v14, 4  ;;  %16046 = vst [vmem:[#allocation19_spill] sm:$0xff] %v12321_v58 }
  0xeb   : > { %v12296_v55 = vpop.f32.mrf.mxu1  ;;  %10482 = vmatpush3.bf16.msra.mxu0 %v12117_v19  ;;  %10403 = vmatprep.mubr.msk.bf16.mxu0 %vm755_vm1, %v12071_v33  ;;  %v3763_v19 = vrot.slane %v3762_v26, 4  ;;  %v12338_v14 = vsel %vm11233_vm4, %v3739_v61, %v3743_v63  ;;  %v9185_v26 = vld [vmem:[%s11181_s23 + $0x34] sm:$0xf]  ;;  %v3773_v10 = vshll.u32 %v9184_v41, 16  ;;  %v4408_v63 = vunpack.c.l.bf16 %v12321_v58 }
  0xec   : > { %16044 = vst [vmem:[#allocation23_spill] sm:$0xff] %v12292_v27  ;;  %10448 = vmatprep.mubr.msk.f32.mxu1 %vm755_vm1, %v12152_v15  ;;  %10906 = vmatprep.subr.msk.bf16.mxu0 %vm804_vm0, %v12287_v0  ;;  %v12327_v15 = vsel %vm11233_vm4, %v3729_v34, %v12236_v25  ;;  %16049 = vst [vmem:[#allocation28_spill] sm:$0xff] %v12338_v14  ;;  %v12345_v25 = vmul.f32 %v3262_v48, %v3262_v48  ;;  %v9187_v48 = vld [vmem:[%s11181_s23 + $0x3c] sm:$0xf] }
  0xed   : > { %v12311_v12 = vpop.f32.mrf.mxu1  ;;  %v10153_v33 = vpop.f32.mrf.mxu0  ;;  %16047 = vst [vmem:[#allocation22_spill] sm:$0xff] %v12327_v15  ;;  %v12352_v34 = vsel %vm11233_vm4, %v3753_v28, %v12254_v44  ;;  %v12366_v41 = vmul.f32 %v4407_v9, %v4407_v9  ;;  %v4410_v44 = vunpack.c.l.bf16 %v12338_v14  ;;  %v3779_v28 = vshll.u32 %v9185_v26, 16 }
  0xee   : > { %v12330_v13 = vadd.f32 %v12196_v42, %v10153_v33  ;;  %10449 = vmatmul.mubr.msk.f32.gmra.mxu1 %vm755_vm1, %v12157_v6  ;;  %v12343_v42 = vmul.f32 %v3261_v36, %v3261_v36  ;;  %v12347_v6 = vmul.f32 %v3263_v18, %v3263_v18  ;;  %v9186_v36 = vld [vmem:[%s11181_s23 + $0x38] sm:$0x1]  ;;  %v4409_v33 = vunpack.c.l.bf16 %v12327_v15 }
  0xef   : > { %v12334_v23 = vpop.f32.mrf.mxu1  ;;  %v858_v62 = vpop.f32.mrf.mxu0  ;;  %10451 = vmatprep.mubr.msk.f32.mxu1 %vm755_vm1, %v12159_v51  ;;  %v12362_v51 = vsel %vm11233_vm4, %v3763_v19, %v3767_v11  ;;  %v4411_v11 = vunpack.c.l.bf16 %v12352_v34  ;;  %v3772_v9 = vrot.slane %v3770_v1, 4  ;;  %v3797_v1 = vshll.u32 %v9187_v48, 16 }
  0xf0   : > { %16048 = vst [vmem:[#allocation27_spill] sm:$0xff] %v12330_v13  ;;  %v12355_v46 = vadd.f32 %v12212_v8, %v858_v62  ;;  %16051 = vst [vmem:[#allocation31_spill] sm:$0xff] %v12362_v51  ;;  %v9188_v8 = vld [vmem:[%s11181_s23 + $0x40] sm:$0xf]  ;;  %v12391_v39 = vmul.f32 %v4408_v63, %v4408_v63 }
  0xf1   : > { %v12357_v61 = vpop.f32.mrf.mxu1  ;;  %v10154_v18 = vpop.f32.mrf.mxu0  ;;  %v3807_v43 = vshrl.u32 %v9188_v8, 16  ;;  %v12405_v63 = vmul.f32 %v4411_v11, %v4411_v11  ;;  %v9194_v11 = vld [vmem:[%s11181_s23 + $0x58] sm:$0xf] }
  0xf2   : > { %16050 = vst [vmem:[#allocation26_spill] sm:$0xff] %v12355_v46  ;;  %10404 = vmatmul.mubr.msk.bf16.gmra.mxu0 %vm755_vm1, %v12078_v17  ;;  %v12374_v62 = vadd.f32 %v12219_v53, %v10154_v18  ;;  %10452 = vmatmul.mubr.msk.f32.gmra.mxu1 %vm755_vm1, %v12165_v56  ;;  %v3775_v46 = vrot.slane %v3773_v10, 5  ;;  %v4412_v17 = vunpack.c.l.bf16 %v12362_v51  ;;  %v3783_v53 = vshrl.u32 %v9185_v26, 16 }
  0xf3   : > { %v12378_v19 = vpop.f32.mrf.mxu1  ;;  %v861_v13 = vpop.f32.mrf.mxu0  ;;  %10407 = vmatprep.mubr.msk.bf16.mxu0 %vm755_vm1, %v12091_v54  ;;  %10454 = vmatprep.mubr.msk.f32.mxu1 %vm755_vm1, %v12167_v29  ;;  %v3789_v18 = vshll.u32 %v9186_v36, 16  ;;  %v3803_v10 = vshll.u32 %v9188_v8, 16  ;;  %v12395_v29 = vmul.f32 %v4409_v33, %v4409_v33  ;;  %v12403_v36 = vmul.f32 %v4410_v44, %v4410_v44  ;;  %v9190_v33 = vld [vmem:[%s11181_s23 + $0x48] sm:$0xf]  ;;  %v9191_v54 = vld [vmem:[%s11181_s23 + $0x4c] sm:$0xf] }
  0xf4   : > { %16052 = vst [vmem:[#allocation2_spill] sm:$0xff] %v12374_v62  ;;  %v3794_v62 = vshrl.u32 %v9187_v48, 16  ;;  %v12387_v56 = vadd.f32 %v12231_v31, %v861_v13  ;;  %v3776_v48 = vor.u32 %v3775_v46, %v3772_v9  ;;  %v12407_v8 = vrot.slane %v3779_v28, 5  ;;  %v9193_v44 = vld [vmem:[%s11181_s23 + $0x54] sm:$0xf] }
  0xf5   : > { %v12389_v27 = vpop.f32.mrf.mxu1  ;;  %v12416_v26 = vmul.f32 %v4412_v17, %v4412_v17  ;;  %v12418_v14 = vrot.slane %v3789_v18, 5  ;;  %v3799_v9 = vrot.slane %v3797_v1, 5  ;;  %v12424_v58 = vrot.slane %v3803_v10, 5 }
  0xf6   : > { %16053 = vst [vmem:[#allocation30_spill] sm:$0xff] %v12387_v56  ;;  %v10157_v31 = vpop.f32.mrf.mxu0  ;;  %10455 = vmatmul.mubr.msk.f32.gmra.mxu1 %vm755_vm1, %v12171_v50  ;;  %v3785_v50 = vrot.slane %v3783_v53, 4  ;;  %v3796_v28 = vrot.slane %v3794_v62, 4  ;;  %v3809_v7 = vrot.slane %v3807_v43, 4  ;;  %v3821_v17 = vshll.u32 %v9190_v33, 16 }
  0xf7   : > { %v12401_v13 = vpop.f32.mrf.mxu1  ;;  %v12412_v56 = vadd.f32 %v12248_v3, %v10157_v31  ;;  %10457 = vmatprep.mubr.msk.f32.mxu1 %vm755_vm1, %v12180_v45  ;;  %16055 = vst [vmem:[#allocation4_spill] sm:$0xff] %v12416_v26  ;;  %v9189_v31 = vld [vmem:[%s11181_s23 + $0x44] sm:$0x1]  ;;  %v3818_v45 = vshrl.u32 %v9190_v33, 16  ;;  %v3831_v62 = vshrl.u32 %v9191_v54, 16  ;;  %v3842_v1 = vshrl.u32 %v9193_v44, 16 }
  0xf8   : > { %v874_v15 = vpop.f32.mrf.mxu0  ;;  %v3845_v43 = vshll.u32 %v9193_v44, 16  ;;  %v3851_v10 = vshll.u32 %v9194_v11, 16  ;;  %v3810_v44 = vor.u32 %v3809_v7, %v12424_v58  ;;  %v9192_v7 = vld [vmem:[%s11181_s23 + $0x50] sm:$0x1] }
  0xf9   : > { %16054 = vst [vmem:[#allocation33_spill] sm:$0xff] %v12412_v56  ;;  %v12422_v46 = vpop.f32.mrf.mxu1  ;;  %v12427_v3 = vadd.f32 %v12264_v21, %v874_v15  ;;  %v3827_v56 = vshll.u32 %v9191_v54, 16  ;;  %v3855_v15 = vshrl.u32 %v9194_v11, 16  ;;  %v3800_v54 = vor.u32 %v3799_v9, %v3796_v28  ;;  %v9197_v11 = vld [vmem:[%s11181_s23 + $0x64] sm:$0xf] }
  0xfa   : > { %10408 = vmatmul.mubr.msk.bf16.gmra.mxu0 %vm755_vm1, %v12097_v60  ;;  %v10158_v53 = vpop.f32.mrf.mxu0  ;;  %10458 = vmatmul.mubr.msk.f32.gmra.mxu1 %vm755_vm1, %v12182_v5  ;;  %v3777_v60 = vrot.slane %v3776_v48, 4  ;;  %v3786_v5 = vor.u32 %v3785_v50, %v12407_v8  ;;  %v3823_v48 = vrot.slane %v3821_v17, 5  ;;  %v3833_v28 = vrot.slane %v3831_v62, 4  ;;  %v9195_v17 = vld [vmem:[%s11181_s23 + $0x5c] sm:$0x1] }
  0xfb   : > { %16056 = vst [vmem:[#allocation5_spill] sm:$0xff] %v12427_v3  ;;  %v12434_v18 = vpop.f32.mrf.mxu1  ;;  %v12437_v21 = vadd.f32 %v12276_v38, %v10158_v53  ;;  %10411 = vmatprep.mubr.msk.bf16.mxu0 %vm755_vm1, %v12103_v2  ;;  %10460 = vmatprep.mubr.msk.f32.mxu1 %vm755_vm1, %v12191_v47  ;;  %v3813_v53 = vshll.u32 %v9189_v31, 16  ;;  %v3820_v47 = vrot.slane %v3818_v45, 4  ;;  %v12453_v50 = vrot.slane %v3827_v56, 5 }
  0xfc   : > { %v877_v33 = vpop.f32.mrf.mxu0  ;;  %v3844_v9 = vrot.slane %v3842_v1, 4  ;;  %v3847_v31 = vrot.slane %v3845_v43, 5  ;;  %v12459_v38 = vrot.slane %v3851_v10, 5  ;;  %v3857_v56 = vrot.slane %v3855_v15, 4 }
  0xfd   : > { %16057 = vst [vmem:[#allocation6_spill] sm:$0xff] %v12437_v21  ;;  %v9196_v21 = vld [vmem:[%s11181_s23 + $0x60] sm:$0xf]  ;;  %v12449_v2 = vadd.f32 %v12296_v55, %v877_v33  ;;  %v12451_v3 = vpop.f32.mrf.mxu1  ;;  %v3815_v62 = vrot.slane %v3813_v53, 5  ;;  %v3875_v1 = vshll.u32 %v9197_v11, 16  ;;  %v3879_v43 = vshrl.u32 %v9197_v11, 16 }
  0xfe   : > { %v10161_v26 = vpop.f32.mrf.mxu0  ;;  %10461 = vmatmul.mubr.msk.f32.gmra.mxu1 %vm755_vm1, %v12198_v22  ;;  %v3866_v33 = vshrl.u32 %v9196_v21, 16  ;;  %v3787_v22 = vrot.slane %v3786_v5, 4  ;;  %v3834_v5 = vor.u32 %v3833_v28, %v12453_v50  ;;  %v3848_v53 = vor.u32 %v3847_v31, %v3844_v9  ;;  %v9198_v28 = vld [vmem:[%s11181_s23 + $0x68] sm:$0x1] }
  0xff   : > { %16058 = vst [vmem:[#allocation7_spill] sm:$0xff] %v12449_v2  ;;  %v12462_v55 = vadd.f32 %v12311_v12, %v10161_v26  ;;  %10463 = vmatprep.mubr.msk.f32.mxu1 %vm755_vm1, %v12200_v4  ;;  %v12466_v45 = vpop.f32.mrf.mxu1  ;;  %v3869_v2 = vshll.u32 %v9196_v21, 16  ;;  %v3801_v26 = vrot.slane %v3800_v54, 4  ;;  %v3837_v4 = vshll.u32 %v9192_v7, 16 }
 0x100   : > { %v890_v51 = vpop.f32.mrf.mxu0  ;;  %v3824_v21 = vor.u32 %v3823_v48, %v3820_v47  ;;  %v3861_v11 = vshll.u32 %v9195_v17, 16  ;;  %v3868_v54 = vrot.slane %v3866_v33, 4  ;;  %v12493_v48 = vsel %vm11233_vm4, %v3777_v60, %v12407_v8  ;;  %v16063_v60 = vld [vmem:[#allocation12_spill] sm:$0xff] }
 0x101   : > { %16059 = vst [vmem:[#allocation11_spill] sm:$0xff] %v12462_v55  ;;  %v12470_v10 = vadd.f32 %v12334_v23, %v890_v51  ;;  %v12472_v12 = vpop.f32.mrf.mxu1  ;;  %v3811_v55 = vrot.slane %v3810_v44, 4  ;;  %v9199_v23 = vld [vmem:[%s11181_s23 + $0x6c] sm:$0xf]  ;;  %v3871_v44 = vrot.slane %v3869_v2, 5  ;;  %v12508_v2 = vsel %vm11233_vm4, %v3801_v26, %v12424_v58 }
 0x102   : > { %10412 = vmatmul.mubr.msk.bf16.gmra.mxu0 %vm755_vm1, %v12109_v32  ;;  %v10162_v15 = vpop.f32.mrf.mxu0  ;;  %10464 = vmatmul.mubr.msk.f32.gmra.mxu1 %vm755_vm1, %v12216_v30  ;;  %v3858_v30 = vor.u32 %v3857_v56, %v12459_v38  ;;  %v3890_v9 = vshrl.u32 %v9199_v23, 16  ;;  %v3893_v8 = vshll.u32 %v9199_v23, 16  ;;  %v3825_v56 = vrot.slane %v3824_v21, 4  ;;  %v16065_v23 = vld [vmem:[#allocation8_spill] sm:$0xff] }
 0x103   : > { %16060 = vst [vmem:[#allocation16_spill] sm:$0xff] %v12470_v10  ;;  %v12481_v51 = vadd.f32 %v12357_v61, %v10162_v15  ;;  %10415 = vmatprep.mubr.msk.bf16.mxu0 %vm755_vm1, %v12130_v49  ;;  %10466 = vmatprep.mubr.msk.f32.mxu1 %vm755_vm1, %v12233_v57  ;;  %v12487_v32 = vpop.f32.mrf.mxu1  ;;  %v12498_v61 = vsel %vm11233_vm4, %v3787_v22, %v12418_v14  ;;  %v12500_v49 = vrot.slane %v3875_v1, 5  ;;  %v3881_v57 = vrot.slane %v3879_v43, 4 }
 0x104   : > { %v893_v47 = vpop.f32.mrf.mxu0  ;;  %v12517_v14 = vsel %vm11233_vm4, %v3811_v55, %v3815_v62  ;;  %v3839_v17 = vrot.slane %v3837_v4, 5  ;;  %v3849_v58 = vrot.slane %v3848_v53, 4  ;;  %v3859_v33 = vrot.slane %v3858_v30, 4 }
 0x105   : > { %16061 = vst [vmem:[#allocation21_spill] sm:$0xff] %v12481_v51  ;;  %v12503_v7 = vadd.f32 %v12378_v19, %v893_v47  ;;  %v3835_v19 = vrot.slane %v3834_v5, 4  ;;  %v3863_v22 = vrot.slane %v3861_v11, 5  ;;  %v3872_v1 = vor.u32 %v3871_v44, %v3868_v54  ;;  %v9200_v5 = vld [vmem:[%s11181_s23 + $0x70] sm:$0xf] }
 0x106   : > { %10467 = vmatmul.mubr.msk.f32.gmra.mxu1 %vm755_vm1, %v16063_v60  ;;  %v12513_v31 = vpop.f32.mrf.mxu1  ;;  %v4413_v55 = vunpack.c.l.bf16 %v12493_v48  ;;  %v3882_v62 = vor.u32 %v3881_v57, %v12500_v49  ;;  %v3885_v21 = vshll.u32 %v9198_v28, 16  ;;  %v3892_v53 = vrot.slane %v3890_v9, 4  ;;  %v16067_v9 = vld [vmem:[#allocation13_spill] sm:$0xff]  ;;  %v12687_v51 = vld [vmem:[%s11181_s23 + $0xa0] sm:$0xf] }
 0x107   : > { %16062 = vst [vmem:[#allocation25_spill] sm:$0xff] %v12503_v7  ;;  %10469 = vmatprep.mubr.msk.f32.mxu1 %vm755_vm1, %v12256_v59  ;;  %v4414_v59 = vunpack.c.l.bf16 %v12498_v61  ;;  %v3895_v11 = vrot.slane %v3893_v8, 5  ;;  %v4415_v44 = vunpack.c.l.bf16 %v12508_v2  ;;  %v4416_v47 = vunpack.c.l.bf16 %v12517_v14 }
 0x108   : > { %v10165_v43 = vpop.f32.mrf.mxu0  ;;  %v12521_v26 = vpop.f32.mrf.mxu1  ;;  %v12547_v57 = vsel %vm11233_vm4, %v3835_v19, %v3839_v17  ;;  %v3873_v8 = vrot.slane %v3872_v1, 4  ;;  %v3887_v19 = vrot.slane %v3885_v21, 5  ;;  %v3899_v17 = vshll.u32 %v9200_v5, 16 }
 0x109   : > { %v12528_v4 = vadd.f32 %v12389_v27, %v10165_v43  ;;  %v12543_v27 = vsel %vm11233_vm4, %v3825_v56, %v12453_v50  ;;  %v12563_v50 = vsel %vm11233_vm4, %v3859_v33, %v3863_v22  ;;  %v3883_v56 = vrot.slane %v3882_v62, 4 }
 0x10a   : > { %10416 = vmatmul.mubr.msk.bf16.gmra.mxu0 %vm755_vm1, %v16065_v23  ;;  %v906_v30 = vpop.f32.mrf.mxu0  ;;  %10470 = vmatmul.mubr.msk.f32.gmra.mxu1 %vm755_vm1, %v12269_v16  ;;  %v12536_v54 = vpop.f32.mrf.mxu1  ;;  %v12559_v16 = vsel %vm11233_vm4, %v3849_v58, %v12459_v38  ;;  %16068 = vst [vmem:[#allocation12_spill] sm:$0xff] %v12563_v50  ;;  %v3903_v43 = vshrl.u32 %v9200_v5, 16  ;;  %v12570_v23 = vmul.f32 %v4413_v55, %v4413_v55  ;;  %v4417_v38 = vunpack.c.l.bf16 %v12543_v27 }
 0x10b   : > { %16064 = vst [vmem:[#allocation29_spill] sm:$0xff] %v12528_v4  ;;  %v12550_v28 = vadd.f32 %v12401_v13, %v906_v30  ;;  %10419 = vmatprep.mubr.msk.bf16.mxu0 %vm755_vm1, %v16067_v9  ;;  %10472 = vmatprep.mubr.msk.f32.mxu1 %vm755_vm1, %v12278_v37  ;;  %v3896_v58 = vor.u32 %v3895_v11, %v3892_v53  ;;  %v4418_v62 = vunpack.c.l.bf16 %v12547_v57  ;;  %v4420_v5 = vunpack.c.l.bf16 %v12563_v50 }
 0x10c   : > { %v10166_v60 = vpop.f32.mrf.mxu0  ;;  %v12565_v13 = vpop.f32.mrf.mxu1  ;;  %v12575_v33 = vmul.f32 %v4414_v59, %v4414_v59  ;;  %v12577_v22 = vmul.f32 %v4415_v44, %v4415_v44  ;;  %v12579_v1 = vmul.f32 %v4416_v47, %v4416_v47  ;;  %v12597_v53 = vsel %vm11233_vm4, %v3873_v8, %v12500_v49  ;;  %v9201_v44 = vld [vmem:[%s11181_s23 + $0x74] sm:$0x1]  ;;  %v9203_v59 = vld [vmem:[%s11181_s23 + $0x7c] sm:$0xf] }
 0x10d   : > { %16066 = vst [vmem:[#allocation32_spill] sm:$0xff] %v12550_v28  ;;  %v12568_v37 = vadd.f32 %v12422_v46, %v10166_v60  ;;  %v9202_v46 = vld [vmem:[%s11181_s23 + $0x78] sm:$0xf]  ;;  %16071 = vst [vmem:[#allocation34_spill] sm:$0xff] %v12597_v53  ;;  %v3901_v11 = vrot.slane %v3899_v17, 5  ;;  %v12606_v60 = vmul.f32 %v4417_v38, %v4417_v38  ;;  %v12622_v17 = vmul.f32 %v4418_v62, %v4418_v62  ;;  %v16075_v38 = vld [vmem:[#allocation15_spill] sm:$0xff] }
 0x10e   : > { %v909_v30 = vpop.f32.mrf.mxu0  ;;  %10473 = vmatmul.mubr.msk.f32.gmra.mxu1 %vm755_vm1, %v12313_v40  ;;  %v4419_v40 = vunpack.c.l.bf16 %v12559_v16  ;;  %v3914_v15 = vshrl.u32 %v9202_v46, 16  ;;  %v16074_v8 = vld [vmem:[#allocation9_spill] sm:$0xff] }
 0x10f   : > { %16069 = vst [vmem:[#allocation8_spill] sm:$0xff] %v12568_v37  ;;  %v12584_v55 = vadd.f32 %v12434_v18, %v909_v30  ;;  %10475 = vmatprep.mubr.msk.f32.mxu1 %vm755_vm1, %v12317_v52  ;;  %v12588_v21 = vpop.f32.mrf.mxu1  ;;  %v12601_v18 = vsel %vm11233_vm4, %v3883_v56, %v3887_v19  ;;  %v3905_v52 = vrot.slane %v3903_v43, 4  ;;  %v3897_v30 = vrot.slane %v3896_v58, 4 }
 0x110   : > { %16072 = vst [vmem:[#allocation35_spill] sm:$0xff] %v12601_v18  ;;  %v12618_v56 = vsel %vm804_vm0, %v12287_v0, 0  ;;  %v12630_v58 = vmul.f32 %v4419_v40, %v4419_v40  ;;  %v4422_v0 = vunpack.c.l.bf16 %v12601_v18  ;;  %v3923_v19 = vshll.u32 %v9203_v59, 16 }
 0x111   : > { %16070 = vst [vmem:[#allocation13_spill] sm:$0xff] %v12584_v55  ;;  %v10169_v47 = vpop.f32.mrf.mxu0  ;;  %v12604_v9 = vpop.f32.mrf.mxu1  ;;  %v3917_v55 = vshll.u32 %v9202_v46, 16  ;;  %v3909_v46 = vshll.u32 %v9201_v44, 16  ;;  %v12644_v40 = vsel %vm11233_vm4, %v3897_v30, %v3901_v11  ;;  %v3916_v37 = vrot.slane %v3914_v15, 4 }
 0x112   : > { %v12610_v49 = vadd.f32 %v12451_v3, %v10169_v47  ;;  %10420 = vmatmul.mubr.msk.bf16.gmra.mxu0 %vm755_vm1, %v16074_v8  ;;  %10476 = vmatmul.mubr.msk.f32.gmra.mxu1 %vm755_vm1, %v12343_v42  ;;  %v4421_v42 = vunpack.c.l.bf16 %v12597_v53  ;;  %v9205_v47 = vld [vmem:[%s11181_s23 + $0x84] sm:$0xf]  ;;  %v12638_v8 = vmul.f32 %v4420_v5, %v4420_v5  ;;  %v3927_v44 = vshrl.u32 %v9203_v59, 16  ;;  %v12654_v5 = vld [vmem:[%s11181_s23 + $0x88] sm:$0xf] }
 0x113   : > { %v922_v43 = vpop.f32.mrf.mxu0  ;;  %10423 = vmatprep.mubr.msk.bf16.mxu0 %vm755_vm1, %v16075_v38  ;;  %10478 = vmatprep.mubr.msk.f32.mxu1 %vm755_vm1, %v12345_v25  ;;  %v12628_v3 = vpop.f32.mrf.mxu1  ;;  %v3906_v38 = vor.u32 %v3905_v52, %v3901_v11  ;;  %v3919_v28 = vrot.slane %v3917_v55, 5  ;;  %16078 = vst [vmem:[#allocation37_spill] sm:$0xff] %v12654_v5  ;;  %v3938_v52 = vshrl.u32 %v9205_v47, 16  ;;  %v3941_v11 = vshll.u32 %v9205_v47, 16  ;;  %v12723_v53 = vld [vmem:[%s11181_s23 + $0x8c] sm:$0x1] }
 0x114   : > { %16073 = vst [vmem:[#allocation36_spill] sm:$0xff] %v12610_v49  ;;  %v12636_v62 = vadd.f32 %v12466_v45, %v922_v43  ;;  %v12664_v59 = vmul.f32 %v4422_v0, %v4422_v0  ;;  %v12666_v30 = vrot.slane %v3909_v46, 5  ;;  %v9208_v43 = vld [vmem:[%s11181_s23 + $0x90] sm:$0xf]  ;;  %v3929_v0 = vrot.slane %v3927_v44, 4  ;;  %v12703_v44 = vld [vmem:[%s15874_s2] sm:$0xff] }
 0x115   : > { %v10170_v49 = vpop.f32.mrf.mxu0  ;;  %v12640_v25 = vpop.f32.mrf.mxu1  ;;  %v12675_v45 = vrot.slane %v3906_v38, 4  ;;  %v3947_v46 = vshll.u32 %v12654_v5, 16  ;;  %v3951_v7 = vshrl.u32 %v12654_v5, 16  ;;  %v3943_v38 = vrot.slane %v3941_v11, 5  ;;  %16082 = vst [vmem:[#allocation41_spill] sm:$0xff] %v12703_v44  ;;  %16084 = vst [vmem:[#allocation43_spill] sm:$0xff] %v12723_v53 }
 0x116   : > { %16076 = vst [vmem:[#allocation9_spill] sm:$0xff] %v12636_v62  ;;  %v12647_v4 = vadd.f32 %v12472_v12, %v10170_v49  ;;  %10479 = vmatmul.mubr.msk.f32.gmra.mxu1 %vm755_vm1, %v12347_v6  ;;  %v12662_v6 = vmul.f32 %v4421_v42, %v4421_v42  ;;  %v12669_v49 = vld [vmem:[%s11181_s23 + $0x80] sm:$0x1]  ;;  %v12681_v12 = vld [vmem:[%s11181_s23 + $0x94] sm:$0xf]  ;;  %v3920_v62 = vor.u32 %v3919_v28, %v3916_v37  ;;  %v3965_v28 = vshll.u32 %v9208_v43, 16 }
 0x117   : > { %v925_v15 = vpop.f32.mrf.mxu0  ;;  %10517 = vmatprep.mubr.msk.f32.mxu1 %vm755_vm1, %v12366_v41  ;;  %v12658_v55 = vpop.f32.mrf.mxu1  ;;  %16079 = vst [vmem:[#allocation38_spill] sm:$0xff] %v12669_v49  ;;  %v9211_v42 = vld [vmem:[%s11181_s23 + $0x9c] sm:$0xf] }
 0x118   : > { %16077 = vst [vmem:[#allocation15_spill] sm:$0xff] %v12647_v4  ;;  %v12673_v47 = vadd.f32 %v12487_v32, %v925_v15  ;;  %v12678_v4 = vrot.slane %v3923_v19, 5  ;;  %v3940_v19 = vrot.slane %v3938_v52, 4  ;;  %v3962_v15 = vshrl.u32 %v9208_v43, 16 }
 0x119   : > { %v12693_v32 = vpop.f32.mrf.mxu1  ;;  %v3975_v52 = vshrl.u32 %v12681_v12, 16  ;;  %v3999_v43 = vshrl.u32 %v12687_v51, 16  ;;  %v3967_v50 = vrot.slane %v3965_v28, 5 }
 0x11a   : > { %16080 = vst [vmem:[#allocation39_spill] sm:$0xff] %v12673_v47  ;;  %v10173_v10 = vpop.f32.mrf.mxu0  ;;  %10424 = vmatmul.mubr.msk.bf16.gmra.mxu0 %vm755_vm1, %v12223_v24  ;;  %10518 = vmatmul.mubr.msk.f32.vlgmr.msra.gmra.mxu1 %vm755_vm1, %v12391_v39  ;;  %v3933_v24 = vshll.u32 %v12669_v49, 16  ;;  %v3971_v39 = vshll.u32 %v12681_v12, 16  ;;  %v3949_v47 = vrot.slane %v3947_v46, 5  ;;  %v3953_v49 = vrot.slane %v3951_v7, 4 }
 0x11b   : > { %v12696_v37 = vadd.f32 %v12513_v31, %v10173_v10  ;;  %10427 = vmatprep.mubr.msk.bf16.mxu0 %vm755_vm1, %v12252_v20  ;;  %10600 = vmatpush3.msra.mxu1 %v12703_v44  ;;  %v3986_v10 = vshrl.u32 %v9211_v42, 16  ;;  %v3989_v20 = vshll.u32 %v9211_v42, 16  ;;  %v3995_v31 = vshll.u32 %v12687_v51, 16 }
 0x11c   : > { %v938_v11 = vpop.f32.mrf.mxu0  ;;  %10520 = vmatprep.mubr.msk.f32.mxu1 %vm755_vm1, %v12395_v29  ;;  %10683 = vmatprep.subr.mxu1 %v12703_v44  ;;  %v3921_v29 = vrot.slane %v3920_v62, 4  ;;  %v3944_v42 = vor.u32 %v3943_v38, %v3940_v19  ;;  %v3964_v44 = vrot.slane %v3962_v15, 4  ;;  %v3935_v7 = vrot.slane %v3933_v24, 5 }
 0x11d   : > { %16081 = vst [vmem:[#allocation40_spill] sm:$0xff] %v12696_v37  ;;  %v12715_v41 = vadd.f32 %v12521_v26, %v938_v11  ;;  %v3930_v37 = vor.u32 %v3929_v0, %v12678_v4  ;;  %v12731_v0 = vld [vmem:[%s11181_s23 + $0x98] sm:$0x1]  ;;  %v12733_v46 = vrot.slane %v3971_v39, 5  ;;  %v3988_v38 = vrot.slane %v3986_v10, 4 }
 0x11e   : > { %v10174_v5 = vpop.f32.mrf.mxu0  ;;  %v12718_v18 = vpop.f32.mrf.mxu1  ;;  %10521 = vmatmul.mubr.msk.f32.gmra.mxu1 %vm755_vm1, %v12403_v36  ;;  %v3977_v36 = vrot.slane %v3975_v52, 4  ;;  %v3991_v11 = vrot.slane %v3989_v20, 5  ;;  %v12737_v15 = vrot.slane %v3995_v31, 5  ;;  %v4001_v28 = vrot.slane %v3999_v43, 4  ;;  %v9214_v39 = vld [vmem:[%s11181_s23 + $0xa8] sm:$0xf] }
 0x11f   : > { %16083 = vst [vmem:[#allocation42_spill] sm:$0xff] %v12715_v41  ;;  %v12726_v26 = vadd.f32 %v12536_v54, %v10174_v5  ;;  %10523 = vmatprep.mubr.msk.f32.mxu1 %vm755_vm1, %v12405_v63  ;;  %v12740_v54 = vld [vmem:[%s11181_s23 + $0xa4] sm:$0x1]  ;;  %v3931_v63 = vrot.slane %v3930_v37, 4  ;;  %v3954_v24 = vor.u32 %v3953_v49, %v3949_v47  ;;  %v16088_v20 = vld [vmem:[#allocation4_spill] sm:$0xff]  ;;  %v12762_v49 = vsel %vm11233_vm4, %v3921_v29, %v12678_v4 }
 0x120   : > { %v941_v62 = vpop.f32.mrf.mxu0  ;;  %v12735_v19 = vpop.f32.mrf.mxu1  ;;  %v16087_v41 = vld [vmem:[#allocation18_spill] sm:$0xff]  ;;  %v3945_v37 = vrot.slane %v3944_v42, 4  ;;  %v3968_v31 = vor.u32 %v3967_v50, %v3964_v44  ;;  %v16090_v43 = vld [vmem:[#allocation24_spill] sm:$0xff]  ;;  %v4005_v4 = vshll.u32 %v12740_v54, 16  ;;  %v12777_v29 = vld [vmem:[%s11181_s23 + $0xac] sm:$0xf]  ;;  %v4002_v42 = vor.u32 %v4001_v28, %v12737_v15 }
 0x121   : > { %16085 = vst [vmem:[#allocation44_spill] sm:$0xff] %v12726_v26  ;;  %v12743_v5 = vadd.f32 %v12565_v13, %v941_v62  ;;  %v3957_v26 = vshll.u32 %v12723_v53, 16  ;;  %v12757_v13 = vsel %vm11233_vm4, %v12675_v45, %v12666_v30  ;;  %v16091_v62 = vld [vmem:[#allocation19_spill] sm:$0xff]  ;;  %v3978_v45 = vor.u32 %v3977_v36, %v12733_v46 }
 0x122   : > { %v10177_v52 = vpop.f32.mrf.mxu0  ;;  %10428 = vmatmul.mubr.msk.bf16.gmra.mxu0 %vm755_vm1, %v16087_v41  ;;  %v12749_v10 = vpop.f32.mrf.mxu1  ;;  %10524 = vmatmul.mubr.msk.f32.gmra.mxu1 %vm755_vm1, %v16088_v20  ;;  %v3981_v30 = vshll.u32 %v12731_v0, 16  ;;  %v4013_v20 = vshll.u32 %v9214_v39, 16  ;;  %v3955_v36 = vrot.slane %v3954_v24, 4  ;;  %v4023_v28 = vshrl.u32 %v12777_v29, 16 }
 0x123   : > { %16086 = vst [vmem:[#allocation45_spill] sm:$0xff] %v12743_v5  ;;  %v12765_v41 = vadd.f32 %v12588_v21, %v10177_v52  ;;  %v16092_v5 = vcombine.low %v16090_v43, %v16091_v62  ;;  %10526 = vmatprep.mubr.msk.f32.mxu1 %vm755_vm1, %v12570_v23  ;;  %v3992_v21 = vor.u32 %v3991_v11, %v3988_v38  ;;  %v4010_v52 = vshrl.u32 %v9214_v39, 16 }
 0x124   : > { %v954_v50 = vpop.f32.mrf.mxu0  ;;  %v12779_v44 = vpop.f32.mrf.mxu1  ;;  %v12787_v23 = vsel %vm11233_vm4, %v3931_v63, %v3935_v7  ;;  %v3959_v43 = vrot.slane %v3957_v26, 5  ;;  %v12795_v38 = vsel %vm11233_vm4, %v3945_v37, %v3949_v47  ;;  %v3969_v11 = vrot.slane %v3968_v31, 4 }
 0x125   : > { %16089 = vst [vmem:[#allocation18_spill] sm:$0xff] %v12765_v41  ;;  %10483 = vmatprep.mubr.msk.bf16.mxu0 %vm755_vm1, %v16092_v5  ;;  %v12783_v5 = vadd.f32 %v12604_v9, %v954_v50  ;;  %v4019_v9 = vshll.u32 %v12777_v29, 16  ;;  %v3979_v26 = vrot.slane %v3978_v45, 4  ;;  %v3983_v63 = vrot.slane %v3981_v30, 5  ;;  %v12822_v30 = vld [vmem:[%s15873_s1 + $0x18] sm:$0xf] }
 0x126   : > { %v10178_v62 = vpop.f32.mrf.mxu0  ;;  %v12789_v41 = vpop.f32.mrf.mxu1  ;;  %10527 = vmatmul.mubr.msk.f32.gmra.mxu1 %vm755_vm1, %v12575_v33  ;;  %v4007_v24 = vrot.slane %v4005_v4, 5  ;;  %v3993_v50 = vrot.slane %v3992_v21, 4  ;;  %v4003_v47 = vrot.slane %v4002_v42, 4  ;;  %v4012_v37 = vrot.slane %v4010_v52, 4  ;;  %16097 = vst [vmem:[#allocation46_spill] sm:$0xff] %v12822_v30  ;;  %v16099_v21 = vld [vmem:[#allocation28_spill] sm:$0xff] }
 0x127   : > { %16093 = vst [vmem:[#allocation4_spill] sm:$0xff] %v12783_v5  ;;  %v12800_v7 = vadd.f32 %v12628_v3, %v10178_v62  ;;  %10529 = vmatprep.mubr.msk.f32.mxu1 %vm755_vm1, %v12577_v22  ;;  %v4015_v31 = vrot.slane %v4013_v20, 5  ;;  %v16096_v53 = vunpack.c.l.bf16 %v12644_v40  ;;  %v4424_v22 = vunpack.c.l.bf16 %v12757_v13 }
 0x128   : > { %v957_v39 = vpop.f32.mrf.mxu0  ;;  %v12804_v33 = vpop.f32.mrf.mxu1  ;;  %v12817_v45 = vsel %vm11233_vm4, %v3955_v36, %v3959_v43  ;;  %v4425_v52 = vunpack.c.l.bf16 %v12762_v49  ;;  %v4426_v20 = vunpack.c.l.bf16 %v12787_v23  ;;  %v12834_v36 = vrot.slane %v4019_v9, 5 }
 0x129   : > { %16094 = vst [vmem:[#allocation24_spill] sm:$0xff] %v12800_v7  ;;  %v12807_v5 = vadd.f32 %v12640_v25, %v957_v39  ;;  %v12812_v3 = vmul.f32 %v16096_v53, %v16096_v53  ;;  %v16098_v25 = vld [vmem:[#allocation22_spill] sm:$0xff]  ;;  %v4025_v43 = vrot.slane %v4023_v28, 4  ;;  %v16102_v39 = vld [vmem:[#allocation31_spill] sm:$0xff]  ;;  %v12852_v9 = vsel %vm11233_vm4, %v3979_v26, %v3983_v63 }
 0x12a   : > { %v10217_v4 = vpop.f32.mrf.mxu0  ;;  %v16100_v42 = vcombine.low %v16098_v25, %v16099_v21  ;;  %v12828_v53 = vpop.f32.mrf.mxu1  ;;  %10530 = vmatmul.mubr.msk.f32.gmra.mxu1 %vm755_vm1, %v12579_v1  ;;  %v16103_v25 = vcombine.low %v12352_v34, %v16102_v39  ;;  %v4427_v21 = vunpack.c.l.bf16 %v12795_v38  ;;  %v12848_v1 = vsel %vm11233_vm4, %v3969_v11, %v12733_v46 }
 0x12b   : > { %16095 = vst [vmem:[#allocation19_spill] sm:$0xff] %v12807_v5  ;;  %v12837_v62 = vadd.f32 %v12658_v55, %v10217_v4  ;;  %v12855_v55 = vld [vmem:[%s11181_s23 + $0xb0] sm:$0x1]  ;;  %10532 = vmatprep.mubr.msk.f32.mxu1 %vm755_vm1, %v12606_v60  ;;  %v4428_v34 = vunpack.c.l.bf16 %v12817_v45  ;;  %v12865_v46 = vsel %vm11233_vm4, %v3993_v50, %v12737_v15  ;;  %v12869_v11 = vsel %vm11233_vm4, %v4003_v47, %v4007_v24 }
 0x12c   : > { %10484 = vmatmul.mubr.msk.bf16.vlgmr.msra.gmra.mxu0 %vm755_vm1, %v16100_v42  ;;  %v1487_v28 = vpop.f32.mrf.mxu0  ;;  %v4016_v26 = vor.u32 %v4015_v31, %v4012_v37  ;;  %v12876_v60 = vmul.f32 %v4424_v22, %v4424_v22  ;;  %v4429_v24 = vunpack.c.l.bf16 %v12848_v1  ;;  %v4026_v47 = vor.u32 %v4025_v43, %v12834_v36  ;;  %v9217_v31 = vld [vmem:[%s11181_s23 + $0xb4] sm:$0xf] }
 0x12d   : > { %16101 = vst [vmem:[#allocation22_spill] sm:$0xff] %v12837_v62  ;;  %10566 = vmatpush3.bf16.msra.mxu0 %v12618_v56  ;;  %10487 = vmatprep.mubr.msk.bf16.mxu0 %vm755_vm1, %v16103_v25  ;;  %v12857_v56 = vpop.f32.mrf.mxu1  ;;  %v12874_v63 = vadd.f32 %v12693_v32, %v1487_v28  ;;  %v4430_v32 = vunpack.c.l.bf16 %v12852_v9  ;;  %v4029_v37 = vshll.u32 %v12855_v55, 16  ;;  %v12896_v39 = vmul.f32 %v4425_v52, %v4425_v52 }
 0x12e   : > { %10907 = vmatprep.subr.msk.bf16.mxu0 %vm804_vm0, %v12822_v30  ;;  %v10220_v50 = vpop.f32.mrf.mxu0  ;;  %10533 = vmatmul.mubr.msk.f32.gmra.mxu1 %vm755_vm1, %v12622_v17  ;;  %v4431_v17 = vunpack.c.l.bf16 %v12865_v46  ;;  %v4432_v25 = vunpack.c.l.bf16 %v12869_v11  ;;  %v12902_v43 = vmul.f32 %v4426_v20, %v4426_v20  ;;  %v12904_v15 = vmul.f32 %v4427_v21, %v4427_v21 }
 0x12f   : > { %16104 = vst [vmem:[#allocation28_spill] sm:$0xff] %v12874_v63  ;;  %v12882_v42 = vpop.f32.mrf.mxu1  ;;  %v12892_v22 = vadd.f32 %v12718_v18, %v10220_v50  ;;  %10535 = vmatprep.mubr.msk.f32.mxu1 %vm755_vm1, %v12630_v58  ;;  %v12906_v5 = vmul.f32 %v4428_v34, %v4428_v34  ;;  %v4017_v18 = vrot.slane %v4016_v26, 4  ;;  %v12909_v50 = vld [vmem:[%s11181_s23 + $0xb8] sm:$0xf]  ;;  %v4034_v7 = vshrl.u32 %v9217_v31, 16 }
 0x130   : > { %v1497_v28 = vpop.f32.mrf.mxu0  ;;  %v4037_v30 = vshll.u32 %v9217_v31, 16  ;;  %v16107_v20 = vcombine.low %v12493_v48, %v12498_v61  ;;  %v12927_v34 = vmul.f32 %v4430_v32, %v4430_v32  ;;  %v4027_v26 = vrot.slane %v4026_v47, 4  ;;  %v12944_v32 = vld [vmem:[%s11181_s23 + $0xbc] sm:$0x1] }
 0x131   : > { %16105 = vst [vmem:[#allocation31_spill] sm:$0xff] %v12892_v22  ;;  %v12900_v4 = vpop.f32.mrf.mxu1  ;;  %v12912_v58 = vadd.f32 %v12735_v19, %v1497_v28  ;;  %v9299_v22 = vld [vmem:[%s11181_s23 + $0x90] sm:$0xe]  ;;  %v12925_v19 = vmul.f32 %v4429_v24, %v4429_v24  ;;  %v4031_v31 = vrot.slane %v4029_v37, 5  ;;  %v16109_v48 = vcombine.low %v12508_v2, %v12517_v14  ;;  %v9220_v14 = vld [vmem:[%s11181_s23 + $0xc0] sm:$0xf] }
 0x132   : > { %v10223_v63 = vpop.f32.mrf.mxu0  ;;  %10536 = vmatmul.mubr.msk.f32.gmra.mxu1 %vm755_vm1, %v12638_v8  ;;  %v12938_v61 = vmul.f32 %v4431_v17, %v4431_v17  ;;  %v12940_v8 = vmul.f32 %v4432_v25, %v4432_v25  ;;  %v4043_v24 = vshll.u32 %v12909_v50, 16  ;;  %v12951_v2 = vsel %vm11233_vm4, %v4017_v18, %v12834_v36  ;;  %v12984_v18 = vld [vmem:[%s11181_s23 + $0xc4] sm:$0xf] }
 0x133   : > { %16106 = vst [vmem:[#allocation47_spill] sm:$0xff] %v12912_v58  ;;  %v12921_v21 = vpop.f32.mrf.mxu1  ;;  %v12930_v28 = vadd.f32 %v12749_v10, %v10223_v63  ;;  %10538 = vmatprep.mubr.msk.f32.mxu1 %vm755_vm1, %v12662_v6  ;;  %v9315_v10 = vrot.slane %v9299_v22, 9  ;;  %v4967_v6 = vrot.slane %v12681_v12, 5  ;;  %v4970_v63 = vrot.slane %v12731_v0, 5 }
 0x134   : > { %10488 = vmatmul.mubr.msk.bf16.gmra.mxu0 %vm755_vm1, %v16107_v20  ;;  %v1507_v47 = vpop.f32.mrf.mxu0  ;;  %v12959_v25 = vrot.slane %v4034_v7, 4  ;;  %v12961_v20 = vrot.slane %v4037_v30, 5  ;;  %v12970_v12 = vsel %vm11233_vm4, %v4027_v26, %v4031_v31  ;;  %v9300_v7 = vld [vmem:[%s11181_s23 + $0x9c] sm:$0xe]  ;;  %v4974_v30 = vrot.slane %v12687_v51, 5 }
 0x135   : > { %16108 = vst [vmem:[#allocation48_spill] sm:$0xff] %v12930_v28  ;;  %10491 = vmatprep.mubr.msk.bf16.mxu0 %vm755_vm1, %v16109_v48  ;;  %v12946_v37 = vpop.f32.mrf.mxu1  ;;  %v12957_v17 = vadd.f32 %v12779_v44, %v1507_v47  ;;  %v4047_v48 = vshrl.u32 %v12909_v50, 16  ;;  %v4969_v44 = vrot.slane %v4967_v6, 4  ;;  %v4058_v26 = vshrl.u32 %v9220_v14, 16 }
 0x136   : > { %v10226_v52 = vpop.f32.mrf.mxu0  ;;  %10539 = vmatmul.mubr.msk.f32.gmra.mxu1 %vm755_vm1, %v12664_v59  ;;  %v12981_v59 = vrot.slane %v4043_v24, 5  ;;  %v4061_v0 = vshll.u32 %v9220_v14, 16  ;;  %v12990_v51 = vsel %vm11743_vm7, %v9315_v10, %v4967_v6  ;;  %v9316_v58 = vrot.slane %v9300_v7, 9 }
 0x137   : > { %16110 = vst [vmem:[#allocation49_spill] sm:$0xff] %v12957_v17  ;;  %v12964_v28 = vpop.f32.mrf.mxu1  ;;  %v12976_v36 = vadd.f32 %v12789_v41, %v10226_v52  ;;  %10541 = vmatprep.mubr.msk.f32.mxu1 %vm755_vm1, %v12812_v3  ;;  %v12994_v41 = vsel %vm11743_vm7, %v4969_v44, %v4970_v63  ;;  %v4976_v3 = vrot.slane %v4974_v30, 4  ;;  %v9301_v52 = vld [vmem:[%s11181_s23 + $0xa8] sm:$0xe]  ;;  %v4049_v22 = vrot.slane %v4047_v48, 4 }
 0x138   : > { %v1517_v31 = vpop.f32.mrf.mxu0  ;;  %v16113_v14 = vcombine.low %v12543_v27, %v12547_v57  ;;  %v4067_v6 = vshll.u32 %v12984_v18, 16  ;;  %v4071_v63 = vshrl.u32 %v12984_v18, 16  ;;  %v4977_v48 = vrot.slane %v12740_v54, 5  ;;  %v16114_v27 = vld [vmem:[#allocation12_spill] sm:$0xff] }
 0x139   : > { %16111 = vst [vmem:[#allocation50_spill] sm:$0xff] %v12976_v36  ;;  %v12986_v47 = vpop.f32.mrf.mxu1  ;;  %v12998_v24 = vadd.f32 %v12804_v33, %v1517_v31  ;;  %v4040_v33 = vor.u32 %v12961_v20, %v12959_v25  ;;  %v16115_v57 = vcombine.low %v12559_v16, %v16114_v27  ;;  %v4981_v25 = vrot.slane %v12777_v29, 5  ;;  %v9302_v16 = vld [vmem:[%s11181_s23 + $0xb4] sm:$0xe]  ;;  %v16118_v36 = vld [vmem:[#allocation34_spill] sm:$0xff] }
 0x13a   : > { %v10229_v62 = vpop.f32.mrf.mxu0  ;;  %10542 = vmatmul.mubr.msk.f32.gmra.mxu1 %vm755_vm1, %v12876_v60  ;;  %v9317_v60 = vrot.slane %v9301_v52, 9  ;;  %v4984_v20 = vrot.slane %v12855_v55, 5  ;;  %v4060_v54 = vrot.slane %v4058_v26, 4  ;;  %v4050_v29 = vor.u32 %v4049_v22, %v12981_v59 }
 0x13b   : > { %v13006_v10 = vpop.f32.mrf.mxu1  ;;  %v13016_v44 = vadd.f32 %v12828_v53, %v10229_v62  ;;  %10544 = vmatprep.mubr.msk.f32.mxu1 %vm755_vm1, %v12896_v39  ;;  %v4063_v53 = vrot.slane %v4061_v0, 5  ;;  %v13030_v62 = vsel %vm11743_vm7, %v4976_v3, %v4977_v48  ;;  %v13040_v55 = vsel %vm11743_vm7, %v9316_v58, %v4974_v30  ;;  %v9222_v58 = vld [vmem:[%s11181_s23 + $0xc8] sm:$0x1] }
 0x13c   : > { %10492 = vmatmul.mubr.msk.bf16.gmra.mxu0 %vm755_vm1, %v16113_v14  ;;  %v1527_v7 = vpop.f32.mrf.mxu0  ;;  %16116 = vst [vmem:[#allocation12_spill] sm:$0xff] %v13030_v62  ;;  %v4988_v14 = vrot.slane %v12909_v50, 5  ;;  %v4983_v26 = vrot.slane %v4981_v25, 4  ;;  %v4069_v3 = vrot.slane %v4067_v6, 5  ;;  %v4073_v48 = vrot.slane %v4071_v63, 4  ;;  %v16119_v62 = vld [vmem:[#allocation35_spill] sm:$0xff] }
 0x13d   : > { %10495 = vmatprep.mubr.msk.bf16.mxu0 %vm755_vm1, %v16115_v57  ;;  %v13026_v31 = vpop.f32.mrf.mxu1  ;;  %v13035_v39 = vadd.f32 %v12857_v56, %v1527_v7  ;;  %v9303_v50 = vld [vmem:[%s11181_s23 + $0xc0] sm:$0xe]  ;;  %v13057_v30 = vsel %vm11743_vm7, %v9317_v60, %v4981_v25  ;;  %v9318_v6 = vrot.slane %v9302_v16, 9  ;;  %v4041_v7 = vrot.slane %v4040_v33, 4 }
 0x13e   : > { %v10232_v52 = vpop.f32.mrf.mxu0  ;;  %10545 = vmatmul.mubr.msk.f32.gmra.mxu1 %vm755_vm1, %v12902_v43  ;;  %v4990_v27 = vrot.slane %v4988_v14, 4  ;;  %v13061_v43 = vsel %vm11743_vm7, %v4983_v26, %v4984_v20  ;;  %v4064_v56 = vor.u32 %v4063_v53, %v4060_v54  ;;  %v16117_v60 = vshll.u32 %v12944_v32, 16 }
 0x13f   : > { %v13042_v0 = vpop.f32.mrf.mxu1  ;;  %v13050_v22 = vadd.f32 %v12882_v42, %v10232_v52  ;;  %10547 = vmatprep.mubr.msk.f32.mxu1 %vm755_vm1, %v12904_v15  ;;  %v4991_v15 = vrot.slane %v12944_v32, 5  ;;  %v9319_v20 = vrot.slane %v9303_v50, 9  ;;  %v4995_v16 = vrot.slane %v12984_v18, 5 }
 0x140   : > { %v1537_v63 = vpop.f32.mrf.mxu0  ;;  %v4055_v25 = vrot.slane %v16117_v60, 5  ;;  %v16120_v33 = vcombine.low %v16118_v36, %v16119_v62  ;;  %v4077_v53 = vshll.u32 %v9222_v58, 16  ;;  %v4998_v50 = vrot.slane %v9222_v58, 5 }
 0x141   : > { %v13063_v57 = vpop.f32.mrf.mxu1  ;;  %v13069_v52 = vadd.f32 %v12900_v4, %v1537_v63  ;;  %v4051_v4 = vrot.slane %v4050_v29, 4  ;;  %v13084_v32 = vsel %vm11743_vm7, %v4990_v27, %v4991_v15  ;;  %v16121_v36 = vcombine.low %v12644_v40, %v12757_v13 }
 0x142   : > { %v10235_v26 = vpop.f32.mrf.mxu0  ;;  %10548 = vmatmul.mubr.msk.f32.gmra.mxu1 %vm755_vm1, %v12906_v5  ;;  %v4074_v62 = vor.u32 %v4073_v48, %v4069_v3  ;;  %v9288_v5 = vld [vmem:[%s11181_s23 + $0xc] sm:$0xe]  ;;  %v13098_v29 = vsel %vm11743_vm7, %v9318_v6, %v4988_v14  ;;  %v4997_v27 = vrot.slane %v4995_v16, 4  ;;  %v13106_v40 = vsel %vm11233_vm4, %v4041_v7, %v12981_v59 }
 0x143   : > { %v13078_v54 = vpop.f32.mrf.mxu1  ;;  %v13087_v18 = vadd.f32 %v12921_v21, %v10235_v26  ;;  %10550 = vmatprep.mubr.msk.f32.mxu1 %vm755_vm1, %v12925_v19  ;;  %v4434_v21 = vunpack.c.l.bf16 %v12970_v12  ;;  %v4065_v13 = vrot.slane %v4064_v56, 4  ;;  %v16122_v14 = vunpack.c.l.bf16 %v12951_v2  ;;  %v11079_v26 = vld [vmem:[%s11181_s23 + $0x10] sm:$0xf] }
 0x144   : > { %10496 = vmatmul.mubr.msk.bf16.gmra.mxu0 %vm755_vm1, %v16120_v33  ;;  %v1547_v58 = vpop.f32.mrf.mxu0  ;;  %v13118_v15 = vsel %vm11743_vm7, %v9319_v20, %v4995_v16  ;;  %v13122_v60 = vsel %vm11743_vm7, %v4997_v27, %v4998_v50  ;;  %v9304_v7 = vrot.slane %v9288_v5, 9  ;;  %v4890_v33 = vrot.slane %v11079_v26, 5  ;;  %v9291_v19 = vld [vmem:[%s11181_s23 + $0x30] sm:$0xe] }
 0x145   : > { %10499 = vmatprep.mubr.msk.bf16.mxu0 %vm755_vm1, %v16121_v36  ;;  %v13100_v63 = vpop.f32.mrf.mxu1  ;;  %v13111_v48 = vadd.f32 %v12946_v37, %v1547_v58  ;;  %v4465_v6 = vmul.f32 %v16122_v14, %v16122_v14  ;;  %v13130_v37 = vsel %vm11233_vm4, %v4051_v4, %v4055_v25  ;;  %v4435_v50 = vunpack.c.l.bf16 %v13106_v40  ;;  %v9289_v14 = vld [vmem:[%s11181_s23 + $0x18] sm:$0xe] }
 0x146   : > { %v10238_v59 = vpop.f32.mrf.mxu0  ;;  %10551 = vmatmul.mubr.msk.f32.gmra.mxu1 %vm755_vm1, %v12927_v34  ;;  %v4075_v34 = vrot.slane %v4074_v62, 4  ;;  %v4079_v36 = vrot.slane %v4077_v53, 5  ;;  %v13145_v5 = vsel %vm11233_vm4, %v4065_v13, %v4069_v3  ;;  %v4466_v27 = vmul.f32 %v4434_v21, %v4434_v21  ;;  %v11080_v21 = vld [vmem:[%s11181_s23 + $0x14] sm:$0x1] }
 0x147   : > { %v13124_v56 = vpop.f32.mrf.mxu1  ;;  %v13136_v16 = vadd.f32 %v12964_v28, %v10238_v59  ;;  %10553 = vmatprep.mubr.msk.f32.mxu1 %vm755_vm1, %v12938_v61  ;;  %v4436_v61 = vunpack.c.l.bf16 %v13130_v37  ;;  %v16123_v62 = vcombine.low %v12762_v49, %v12787_v23  ;;  %v13161_v3 = vsel %vm11743_vm7, %v9304_v7, %v4890_v33  ;;  %v11081_v59 = vld [vmem:[%s11181_s23 + $0x1c] sm:$0xf] }
 0x148   : > { %v1557_v25 = vpop.f32.mrf.mxu0  ;;  %v4893_v13 = vrot.slane %v11080_v21, 5  ;;  %v4897_v26 = vrot.slane %v11081_v59, 5  ;;  %v16124_v23 = vcombine.low %v12795_v38, %v12817_v45  ;;  %v13176_v7 = vsel %vm11233_vm4, %v4075_v34, %v4079_v36  ;;  %v9290_v45 = vld [vmem:[%s11181_s23 + $0x24] sm:$0xe] }
 0x149   : > { %v13141_v4 = vpop.f32.mrf.mxu1  ;;  %v13148_v28 = vadd.f32 %v12986_v47, %v1557_v25  ;;  %v4892_v47 = vrot.slane %v4890_v33, 4  ;;  %v4437_v33 = vunpack.c.l.bf16 %v13145_v5  ;;  %v9236_v38 = vcombine.low %v12865_v46, %v12869_v11  ;;  %v11082_v11 = vld [vmem:[%s11181_s23 + $0x20] sm:$0x1] }
 0x14a   : > { %v10241_v58 = vpop.f32.mrf.mxu0  ;;  %10554 = vmatmul.mubr.msk.f32.gmra.mxu1 %vm755_vm1, %v12940_v8  ;;  %v4467_v8 = vmul.f32 %v4435_v50, %v4435_v50  ;;  %v4468_v50 = vmul.f32 %v4436_v61, %v4436_v61  ;;  %v5326_v34 = vunpack.c.l.bf16 %v13161_v3  ;;  %v9305_v36 = vrot.slane %v9289_v14, 9 }
 0x14b   : > { %v13155_v53 = vpop.f32.mrf.mxu1  ;;  %v13167_v49 = vadd.f32 %v13006_v10, %v10241_v58  ;;  %10556 = vmatprep.mubr.msk.f32.mxu1 %vm755_vm1, %v4465_v6  ;;  %v9235_v10 = vcombine.low %v12848_v1, %v12852_v9  ;;  %v4438_v1 = vunpack.c.l.bf16 %v13176_v7  ;;  %v13196_v9 = vsel %vm11743_vm7, %v4892_v47, %v4893_v13 }
 0x14c   : > { %10500 = vmatmul.mubr.msk.bf16.gmra.mxu0 %vm755_vm1, %v16123_v62  ;;  %v1567_v25 = vpop.f32.mrf.mxu0  ;;  %v4899_v46 = vrot.slane %v4897_v26, 4  ;;  %v4469_v14 = vmul.f32 %v4437_v33, %v4437_v33  ;;  %v9306_v59 = vrot.slane %v9290_v45, 9  ;;  %v5358_v13 = vmul.f32 %v5326_v34, %v5326_v34  ;;  %v11085_v34 = vld [vmem:[%s11181_s23 + $0x2c] sm:$0x1] }
 0x14d   : > { %10503 = vmatprep.mubr.msk.bf16.mxu0 %vm755_vm1, %v16124_v23  ;;  %v13181_v58 = vpop.f32.mrf.mxu1  ;;  %v13187_v6 = vadd.f32 %v13026_v31, %v1567_v25  ;;  %v4900_v31 = vrot.slane %v11082_v11, 5  ;;  %v11083_v23 = vld [vmem:[%s11181_s23 + $0x28] sm:$0xf]  ;;  %v13212_v11 = vsel %vm11743_vm7, %v9305_v36, %v4897_v26  ;;  %v4470_v45 = vmul.f32 %v4438_v1, %v4438_v1 }
 0x14e   : > { %v10244_v62 = vpop.f32.mrf.mxu0  ;;  %10557 = vmatmul.mubr.msk.f32.gmra.mxu1 %vm755_vm1, %v4466_v27  ;;  %v4904_v25 = vrot.slane %v11083_v23, 5  ;;  %v5327_v23 = vunpack.c.l.bf16 %v13196_v9  ;;  %v4907_v26 = vrot.slane %v11085_v34, 5  ;;  %v9307_v1 = vrot.slane %v9291_v19, 9  ;;  %v11087_v34 = vld [vmem:[%s11181_s23 + $0x40] sm:$0xf] }
 0x14f   : > { %v13190_v21 = vpop.f32.mrf.mxu1  ;;  %v13200_v61 = vadd.f32 %v13042_v0, %v10244_v62  ;;  %10559 = vmatprep.mubr.msk.f32.mxu1 %vm755_vm1, %v4467_v8  ;;  %v11084_v0 = vld [vmem:[%s11181_s23 + $0x34] sm:$0xf]  ;;  %v5354_v17 = vunpack.c.l.bf16 %v13098_v29 }
 0x150   : > { %v1577_v27 = vpop.f32.mrf.mxu0  ;;  %v4911_v62 = vrot.slane %v11084_v0, 5 }
 0x151   : > { %16125 = vst [vmem:[#allocation34_spill] sm:$0xff] %v13200_v61  ;;  %v13204_v20 = vpop.f32.mrf.mxu1  ;;  %v13208_v47 = vadd.f32 %v13063_v57, %v1577_v27  ;;  %v13222_v57 = vsel %vm11743_vm7, %v4899_v46, %v4900_v31  ;;  %v9237_v46 = vcombine.low %v12951_v2, %v12970_v12  ;;  %v5359_v2 = vmul.f32 %v5327_v23, %v5327_v23  ;;  %v11088_v23 = vld [vmem:[%s11181_s23 + $0x4c] sm:$0xf] }
 0x152   : > { %v10247_v8 = vpop.f32.mrf.mxu0  ;;  %10560 = vmatmul.mubr.msk.f32.gmra.mxu1 %vm755_vm1, %v4468_v50  ;;  %v4906_v50 = vrot.slane %v4904_v25, 4  ;;  %v9238_v12 = vcombine.low %v13106_v40, %v13130_v37  ;;  %v4925_v40 = vrot.slane %v11088_v23, 5 }
 0x153   : > { %16126 = vst [vmem:[#allocation35_spill] sm:$0xff] %v13208_v47  ;;  %v13216_v33 = vpop.f32.mrf.mxu1  ;;  %v13226_v36 = vadd.f32 %v13078_v54, %v10247_v8  ;;  %10562 = vmatprep.mubr.msk.f32.mxu1 %vm755_vm1, %v4469_v14  ;;  %v5328_v54 = vunpack.c.l.bf16 %v13212_v11  ;;  %v11086_v14 = vld [vmem:[%s11181_s23 + $0x38] sm:$0x1] }
 0x154   : > { %10504 = vmatmul.mubr.msk.bf16.gmra.mxu0 %vm755_vm1, %v9235_v10  ;;  %v13232_v10 = vsel %vm11743_vm7, %v9306_v59, %v4904_v25  ;;  %v1587_v27 = vpop.f32.mrf.mxu0  ;;  %v4914_v8 = vrot.slane %v11086_v14, 5  ;;  %v9292_v59 = vld [vmem:[%s11181_s23 + $0x3c] sm:$0xe]  ;;  %v4918_v25 = vrot.slane %v11087_v34, 5  ;;  %v13259_v34 = vsel %vm11743_vm7, %v4906_v50, %v4907_v26 }
 0x155   : > { %16127 = vst [vmem:[#allocation51_spill] sm:$0xff] %v13226_v36  ;;  %10507 = vmatprep.mubr.msk.bf16.mxu0 %vm755_vm1, %v9236_v38  ;;  %v13236_v31 = vpop.f32.mrf.mxu1  ;;  %v13240_v0 = vadd.f32 %v13100_v63, %v1587_v27  ;;  %v4913_v38 = vrot.slane %v4911_v62, 4  ;;  %v5329_v63 = vunpack.c.l.bf16 %v13222_v57  ;;  %v5330_v27 = vunpack.c.l.bf16 %v13232_v10 }
 0x156   : > { %v10250_v19 = vpop.f32.mrf.mxu0  ;;  %10563 = vmatmul.mubr.msk.f32.gmra.mxu1 %vm755_vm1, %v4470_v45  ;;  %v13263_v45 = vsel %vm11743_vm7, %v9307_v1, %v4911_v62  ;;  %v4920_v62 = vrot.slane %v4918_v25, 4  ;;  %v9309_v50 = vrot.slane %v9293_v35, 9  ;;  %v16134_v35 = vld [vmem:[#allocation41_spill] sm:$0xff] }
 0x157   : > { %16128 = vst [vmem:[#allocation52_spill] sm:$0xff] %v13240_v0  ;;  %v13245_v42 = vpop.f32.mrf.mxu1  ;;  %v13254_v14 = vadd.f32 %v13124_v56, %v10250_v19  ;;  %10601 = vmatprep.mubr.msk.f32.mxu1 %vm755_vm1, %v5358_v13  ;;  %v5360_v56 = vmul.f32 %v5328_v54, %v5328_v54  ;;  %v9308_v19 = vrot.slane %v9292_v59, 9  ;;  %v13276_v26 = vsel %vm11743_vm7, %v4913_v38, %v4914_v8  ;;  %v16132_v38 = vld [vmem:[#allocation22_spill] sm:$0xff]  ;;  %v11090_v0 = vld [vmem:[%s11181_s23 + $0x50] sm:$0x1] }
 0x158   : > { %v1597_v37 = vpop.f32.mrf.mxu0  ;;  %v5361_v54 = vmul.f32 %v5329_v63, %v5329_v63  ;;  %v5362_v59 = vmul.f32 %v5330_v27, %v5330_v27 }
 0x159   : > { %16129 = vst [vmem:[#allocation53_spill] sm:$0xff] %v13254_v14  ;;  %v13268_v36 = vpop.f32.mrf.mxu1  ;;  %v11089_v14 = vld [vmem:[%s11181_s23 + $0x44] sm:$0x1]  ;;  %v13272_v47 = vadd.f32 %v13141_v4, %v1597_v37  ;;  %v5332_v4 = vunpack.c.l.bf16 %v13263_v45 }
 0x15a   : > { %v4921_v13 = vrot.slane %v11089_v14, 5  ;;  %v10253_v1 = vpop.f32.mrf.mxu0  ;;  %10602 = vmatmul.mubr.msk.f32.vlgmr.msra.gmra.mxu1 %vm755_vm1, %v5359_v2  ;;  %v5331_v14 = vunpack.c.l.bf16 %v13259_v34  ;;  %v9294_v2 = vld [vmem:[%s11181_s23 + $0x54] sm:$0xe] }
 0x15b   : > { %16130 = vst [vmem:[#allocation54_spill] sm:$0xff] %v13272_v47  ;;  %v10351_v23 = vpop.f32.mrf.mxu1  ;;  %v13283_v37 = vadd.f32 %v13155_v53, %v10253_v1  ;;  %10684 = vmatpush3.msra.mxu1 %v16134_v35  ;;  %v4928_v47 = vrot.slane %v11090_v0, 5  ;;  %10604 = vmatprep.mubr.msk.f32.mxu1 %vm755_vm1, %v5360_v56  ;;  %v9321_v53 = vcombine.low %v13161_v3, %v13196_v9  ;;  %v5333_v1 = vunpack.c.l.bf16 %v13276_v26 }
 0x15c   : > { %10508 = vmatmul.mubr.msk.bf16.gmra.mxu0 %vm755_vm1, %v9237_v46  ;;  %v13286_v8 = vadd.f32 %v10351_v23, %v16132_v38  ;;  %v4927_v46 = vrot.slane %v4925_v40, 4  ;;  %v1607_v63 = vpop.f32.mrf.mxu0  ;;  %10767 = vmatprep.subr.mxu1 %v16134_v35  ;;  %v16136_v23 = vld [vmem:[#allocation28_spill] sm:$0xff]  ;;  %v13311_v56 = vsel %vm11743_vm7, %v4920_v62, %v4921_v13  ;;  %v13315_v3 = vsel %vm11743_vm7, %v9309_v50, %v4925_v40  ;;  %v11091_v35 = vld [vmem:[%s11181_s23 + $0x58] sm:$0xf]  ;;  %v16139_v13 = vld [vmem:[#allocation31_spill] sm:$0xff] }
 0x15d   : > { %16131 = vst [vmem:[#allocation55_spill] sm:$0xff] %v13283_v37  ;;  %10511 = vmatprep.mubr.msk.bf16.mxu0 %vm755_vm1, %v9238_v12  ;;  %v2682_v27 = vpop.f32.mrf.mxu1  ;;  %v13300_v12 = vsel %vm11743_vm7, %v9308_v19, %v4918_v25  ;;  %v13304_v0 = vadd.f32 %v13181_v58, %v1607_v63  ;;  %v5363_v25 = vmul.f32 %v5331_v14, %v5331_v14  ;;  %v9310_v58 = vrot.slane %v9294_v2, 9  ;;  %v16153_v37 = vld [vmem:[#allocation37_spill] sm:$0xff] }
 0x15e   : > { %16133 = vst [vmem:[#allocation22_spill] sm:$0xff] %v13286_v8  ;;  %v13307_v38 = vadd.f32 %v2682_v27, %v16136_v23  ;;  %v10256_v9 = vpop.f32.mrf.mxu0  ;;  %10605 = vmatmul.mubr.msk.f32.gmra.mxu1 %vm755_vm1, %v5361_v54  ;;  %v5364_v19 = vmul.f32 %v5332_v4, %v5332_v4  ;;  %v4932_v63 = vrot.slane %v11091_v35, 5  ;;  %v5334_v40 = vunpack.c.l.bf16 %v13300_v12  ;;  %v16141_v4 = vld [vmem:[#allocation46_spill] sm:$0xff] }
 0x15f   : > { %16135 = vst [vmem:[#allocation41_spill] sm:$0xff] %v13304_v0  ;;  %v10354_v61 = vpop.f32.mrf.mxu1  ;;  %v13320_v27 = vadd.f32 %v13190_v21, %v10256_v9  ;;  %10607 = vmatprep.mubr.msk.f32.mxu1 %vm755_vm1, %v5362_v59  ;;  %v13329_v50 = vsel %vm11743_vm7, %v4927_v46, %v4928_v47  ;;  %v13333_v2 = vsel %vm804_vm0, %v16141_v4, 0  ;;  %v5336_v59 = vunpack.c.l.bf16 %v13315_v3  ;;  %v9295_v23 = vld [vmem:[%s11181_s23 + $0x60] sm:$0xe]  ;;  %v16143_v47 = vld [vmem:[#allocation47_spill] sm:$0xff] }
 0x160   : > { %16137 = vst [vmem:[#allocation28_spill] sm:$0xff] %v13307_v38  ;;  %v13323_v62 = vadd.f32 %v10354_v61, %v16139_v13  ;;  %v1617_v54 = vpop.f32.mrf.mxu0  ;;  %v5335_v61 = vunpack.c.l.bf16 %v13311_v56  ;;  %v5365_v35 = vmul.f32 %v5333_v1, %v5333_v1  ;;  %v11092_v13 = vld [vmem:[%s11181_s23 + $0x5c] sm:$0x1]  ;;  %v16145_v38 = vcombine.low %v13145_v5, %v13176_v7  ;;  %v16147_v5 = vld [vmem:[#allocation48_spill] sm:$0xff] }
 0x161   : > { %16138 = vst [vmem:[#allocation56_spill] sm:$0xff] %v13320_v27  ;;  %v2692_v14 = vpop.f32.mrf.mxu1  ;;  %v13341_v9 = vadd.f32 %v13204_v20, %v1617_v54  ;;  %v5337_v8 = vunpack.c.l.bf16 %v13329_v50  ;;  %v13355_v20 = vsel %vm11743_vm7, %v9310_v58, %v4932_v63  ;;  %v4934_v1 = vrot.slane %v4932_v63, 4  ;;  %v11093_v54 = vld [vmem:[%s11181_s23 + $0x64] sm:$0xf] }
 0x162   : > { %16140 = vst [vmem:[#allocation31_spill] sm:$0xff] %v13323_v62  ;;  %v13344_v46 = vadd.f32 %v2692_v14, %v16143_v47  ;;  %v4935_v62 = vrot.slane %v11092_v13, 5  ;;  %v10259_v4 = vpop.f32.mrf.mxu0  ;;  %10608 = vmatmul.mubr.msk.f32.gmra.mxu1 %vm755_vm1, %v5363_v25  ;;  %v4939_v14 = vrot.slane %v11093_v54, 5  ;;  %v9311_v25 = vrot.slane %v9295_v23, 9  ;;  %v11095_v23 = vld [vmem:[%s11181_s23 + $0x7c] sm:$0xf] }
 0x163   : > { %16142 = vst [vmem:[#allocation46_spill] sm:$0xff] %v13341_v9  ;;  %v10357_v21 = vpop.f32.mrf.mxu1  ;;  %v13359_v47 = vadd.f32 %v13216_v33, %v10259_v4  ;;  %10610 = vmatprep.mubr.msk.f32.mxu1 %vm755_vm1, %v5364_v19  ;;  %v5367_v54 = vmul.f32 %v5335_v61, %v5335_v61  ;;  %v9296_v33 = vld [vmem:[%s11181_s23 + $0x6c] sm:$0xe]  ;;  %v11094_v4 = vld [vmem:[%s11181_s23 + $0x70] sm:$0xf]  ;;  %v5338_v19 = vunpack.c.l.bf16 %v13355_v20  ;;  %v5369_v61 = vmul.f32 %v5337_v8, %v5337_v8 }
 0x164   : > { %16144 = vst [vmem:[#allocation47_spill] sm:$0xff] %v13344_v46  ;;  %10512 = vmatmul.mubr.msk.bf16.gmra.mxu0 %vm755_vm1, %v16145_v38  ;;  %v13362_v7 = vadd.f32 %v10357_v21, %v16147_v5  ;;  %v5366_v38 = vmul.f32 %v5334_v40, %v5334_v40  ;;  %v1627_v58 = vpop.f32.mrf.mxu0  ;;  %v5368_v46 = vmul.f32 %v5336_v59, %v5336_v59  ;;  %v4946_v21 = vrot.slane %v11094_v4, 5  ;;  %v9297_v40 = vld [vmem:[%s11181_s23 + $0x78] sm:$0xe] }
 0x165   : > { %16146 = vst [vmem:[#allocation57_spill] sm:$0xff] %v13359_v47  ;;  %10567 = vmatprep.mubr.msk.bf16.mxu0 %vm755_vm1, %v9321_v53  ;;  %v2702_v13 = vpop.f32.mrf.mxu1  ;;  %v13371_v5 = vadd.f32 %v13236_v31, %v1627_v58  ;;  %v16150_v53 = vld [vmem:[#allocation49_spill] sm:$0xff]  ;;  %v4953_v47 = vrot.slane %v11095_v23, 5  ;;  %v13382_v59 = vsel %vm11743_vm7, %v4934_v1, %v4935_v62  ;;  %v4941_v31 = vrot.slane %v4939_v14, 4  ;;  %v11096_v58 = vld [vmem:[%s11181_s23 + $0x68] sm:$0x1] }
 0x166   : > { %16148 = vst [vmem:[#allocation48_spill] sm:$0xff] %v13362_v7  ;;  %v13374_v7 = vadd.f32 %v2702_v13, %v16150_v53  ;;  %v10262_v9 = vpop.f32.mrf.mxu0  ;;  %10611 = vmatmul.mubr.msk.f32.gmra.mxu1 %vm755_vm1, %v5365_v35  ;;  %v4942_v13 = vrot.slane %v11096_v58, 5  ;;  %v16152_v53 = vld [vmem:[#allocation50_spill] sm:$0xff]  ;;  %v13394_v35 = vsel %vm11743_vm7, %v9311_v25, %v4939_v14  ;;  %v9312_v8 = vrot.slane %v9296_v33, 9  ;;  %v11097_v1 = vld [vmem:[%s11181_s23 + $0x74] sm:$0x1] }
 0x167   : > { %16149 = vst [vmem:[#allocation58_spill] sm:$0xff] %v13371_v5  ;;  %v10360_v63 = vpop.f32.mrf.mxu1  ;;  %v13386_v4 = vadd.f32 %v13245_v42, %v10262_v9  ;;  %10613 = vmatprep.mubr.msk.f32.mxu1 %vm755_vm1, %v5366_v38  ;;  %v4948_v62 = vrot.slane %v4946_v21, 4  ;;  %v4949_v27 = vrot.slane %v11097_v1, 5  ;;  %v9313_v0 = vrot.slane %v9297_v40, 9  ;;  %v9298_v58 = vld [vmem:[%s11181_s23 + $0x84] sm:$0xe] }
 0x168   : > { %16151 = vst [vmem:[#allocation49_spill] sm:$0xff] %v13374_v7  ;;  %v13389_v7 = vadd.f32 %v10360_v63, %v16152_v53  ;;  %v1637_v23 = vpop.f32.mrf.mxu0  ;;  %v4960_v42 = vrot.slane %v16153_v37, 5  ;;  %v4955_v38 = vrot.slane %v4953_v47, 4  ;;  %v16154_v53 = vld [vmem:[#allocation38_spill] sm:$0xff]  ;;  %v13409_v25 = vld [vmem:[%s15873_s1 + $0x1c] sm:$0xf]  ;;  %v16155_v40 = vcombine.low %v13212_v11, %v13222_v57 }
 0x169   : > { %v2712_v5 = vpop.f32.mrf.mxu1  ;;  %v13400_v9 = vadd.f32 %v13268_v36, %v1637_v23  ;;  %v4956_v14 = vrot.slane %v16154_v53, 5  ;;  %v5370_v36 = vmul.f32 %v5338_v19, %v5338_v19  ;;  %v5340_v23 = vunpack.c.l.bf16 %v13394_v35  ;;  %v16156_v1 = vld [vmem:[#allocation17_spill] sm:$0xff] }
 0x16a   : > { %v13403_v63 = vadd.f32 %v2712_v5, %v12998_v24  ;;  %v10317_v33 = vpop.f32.mrf.mxu0  ;;  %10614 = vmatmul.mubr.msk.f32.gmra.mxu1 %vm755_vm1, %v5367_v54  ;;  %v5339_v24 = vunpack.c.l.bf16 %v13382_v59  ;;  %v13419_v5 = vsel %vm11743_vm7, %v4941_v31, %v4942_v13  ;;  %v16157_v57 = vcombine.low %v13232_v10, %v13259_v34  ;;  %v16158_v10 = vld [vmem:[#allocation43_spill] sm:$0xff] }
 0x16b   : > { %v10363_v37 = vpop.f32.mrf.mxu1  ;;  %v13423_v53 = vadd.f32 %v10317_v33, %v16156_v1  ;;  %v13435_v54 = vsel %vm11743_vm7, %v9312_v8, %v4946_v21  ;;  %v9314_v19 = vrot.slane %v9298_v58, 9  ;;  %10616 = vmatprep.mubr.msk.f32.mxu1 %vm755_vm1, %v5368_v46  ;;  %v4962_v33 = vrot.slane %v4960_v42, 4  ;;  %v16159_v21 = vld [vmem:[#allocation14_spill] sm:$0xff] }
 0x16c   : > { %10568 = vmatmul.mubr.msk.bf16.vlgmr.msra.gmra.mxu0 %vm755_vm1, %v16155_v40  ;;  %v13427_v11 = vadd.f32 %v10363_v37, %v13016_v44  ;;  %v2297_v31 = vpop.f32.mrf.mxu0  ;;  %v13442_v44 = vsel %vm11743_vm7, %v4948_v62, %v4949_v27  ;;  %v4963_v34 = vrot.slane %v16158_v10, 5  ;;  %v13455_v46 = vsel %vm11743_vm7, %v9313_v0, %v4953_v47 }
 0x16d   : > { %10650 = vmatpush3.bf16.msra.mxu0 %v13333_v2  ;;  %10571 = vmatprep.mubr.msk.bf16.mxu0 %vm755_vm1, %v16157_v57  ;;  %v2722_v13 = vpop.f32.mrf.mxu1  ;;  %v9325_v2 = vcombine.low %v13300_v12, %v13311_v56  ;;  %v13448_v8 = vadd.f32 %v2297_v31, %v16159_v21  ;;  %v13459_v12 = vsel %vm11743_vm7, %v4955_v38, %v4956_v14  ;;  %v5341_v40 = vunpack.c.l.bf16 %v13419_v5 }
 0x16e   : > { %10908 = vmatprep.subr.msk.bf16.mxu0 %vm804_vm0, %v13409_v25  ;;  %v13451_v58 = vadd.f32 %v2722_v13, %v13035_v39  ;;  %v10318_v56 = vpop.f32.mrf.mxu0  ;;  %10617 = vmatmul.mubr.msk.f32.gmra.mxu1 %vm755_vm1, %v5369_v61  ;;  %v5371_v62 = vmul.f32 %v5339_v24, %v5339_v24  ;;  %v5372_v37 = vmul.f32 %v5340_v23, %v5340_v23  ;;  %v5342_v1 = vunpack.c.l.bf16 %v13435_v54  ;;  %v16162_v39 = vld [vmem:[#allocation20_spill] sm:$0xff] }
 0x16f   : > { %16160 = vst [vmem:[#allocation50_spill] sm:$0xff] %v13448_v8  ;;  %v10366_v27 = vpop.f32.mrf.mxu1  ;;  %v13465_v57 = vadd.f32 %v10318_v56, %v16162_v39  ;;  %10619 = vmatprep.mubr.msk.f32.mxu1 %vm755_vm1, %v5370_v36  ;;  %v5343_v47 = vunpack.c.l.bf16 %v13442_v44  ;;  %v13474_v38 = vsel %vm11743_vm7, %v9314_v19, %v4960_v42  ;;  %v5344_v24 = vunpack.c.l.bf16 %v13455_v46 }
 0x170   : > { %16161 = vst [vmem:[#allocation37_spill] sm:$0xff] %v13451_v58  ;;  %v13468_v0 = vadd.f32 %v10366_v27, %v13050_v22  ;;  %v2300_v61 = vpop.f32.mrf.mxu0  ;;  %v5345_v23 = vunpack.c.l.bf16 %v13459_v12  ;;  %v13480_v31 = vsel %vm11743_vm7, %v4962_v33, %v4963_v34  ;;  %v16165_v22 = vld [vmem:[#allocation23_spill] sm:$0xff]  ;;  %v9326_v36 = vcombine.low %v13315_v3, %v13329_v50  ;;  %v16217_v58 = vld [vmem:[#allocation25_spill] sm:$0xff] }
 0x171   : > { %16163 = vst [vmem:[#allocation38_spill] sm:$0xff] %v13465_v57  ;;  %v2732_v14 = vpop.f32.mrf.mxu1  ;;  %v13483_v13 = vadd.f32 %v2300_v61, %v16165_v22  ;;  %v9327_v42 = vcombine.low %v13355_v20, %v13382_v59  ;;  %v16168_v21 = vcombine.low %v13263_v45, %v13276_v26  ;;  %v5373_v56 = vmul.f32 %v5341_v40, %v5341_v40  ;;  %v16169_v50 = vld [vmem:[#allocation27_spill] sm:$0xff]  ;;  %v13522_v22 = vld [vmem:[%s11181_s23 + $0x18] sm:$0xff]  }
 0x172   : > { %16164 = vst [vmem:[#allocation17_spill] sm:$0xff] %v13468_v0  ;;  %v13488_v10 = vadd.f32 %v2732_v14, %v13069_v52  ;;  %v10321_v19 = vpop.f32.mrf.mxu0  ;;  %10620 = vmatmul.mubr.msk.f32.gmra.mxu1 %vm755_vm1, %v5371_v62  ;;  %v5374_v3 = vmul.f32 %v5342_v1, %v5342_v1  ;;  %v5346_v52 = vunpack.c.l.bf16 %v13474_v38  ;;  %v5375_v45 = vmul.f32 %v5343_v47, %v5343_v47  ;;  %v16172_v14 = vld [vmem:[#allocation26_spill] sm:$0xff]  ;;  %v13617_v0 = vld [vmem:[%s11181_s23 + $0x54] sm:$0xff]   ;;  %v16195_v57 = vld [vmem:[#allocation7_spill] sm:$0xff] }
 0x173   : > { %16166 = vst [vmem:[#allocation43_spill] sm:$0xff] %v13483_v13  ;;  %v10369_v33 = vpop.f32.mrf.mxu1  ;;  %v13501_v27 = vadd.f32 %v10321_v19, %v16169_v50  ;;  %10622 = vmatprep.mubr.msk.f32.mxu1 %vm755_vm1, %v5372_v37  ;;  %v5347_v26 = vunpack.c.l.bf16 %v13480_v31  ;;  %v5376_v1 = vmul.f32 %v5344_v24, %v5344_v24  ;;  %v5377_v39 = vmul.f32 %v5345_v23, %v5345_v23 }
 0x174   : > { %16167 = vst [vmem:[#allocation14_spill] sm:$0xff] %v13488_v10  ;;  %10572 = vmatmul.mubr.msk.bf16.gmra.mxu0 %vm755_vm1, %v16168_v21  ;;  %v13504_v20 = vadd.f32 %v10369_v33, %v13087_v18  ;;  %v2313_v59 = vpop.f32.mrf.mxu0  ;;  %v5348_v37 = vunpack.c.l.bf16 %v12990_v51  ;;  %v5349_v47 = vunpack.c.l.bf16 %v12994_v41  ;;  %v5378_v24 = vmul.f32 %v5346_v52, %v5346_v52  ;;  %v16175_v33 = vld [vmem:[#allocation12_spill] sm:$0xff]  ;;  %16194 = vst [vmem:[#allocation64_spill] sm:$0xff] %v13617_v0 }
 0x175   : > { %16170 = vst [vmem:[#allocation20_spill] sm:$0xff] %v13501_v27  ;;  %10575 = vmatprep.mubr.msk.bf16.mxu0 %vm755_vm1, %v9325_v2  ;;  %v2742_v62 = vpop.f32.mrf.mxu1  ;;  %v13514_v18 = vadd.f32 %v2313_v59, %v16172_v14  ;;  %v5350_v23 = vunpack.c.l.bf16 %v13040_v55  ;;  %v5351_v50 = vunpack.c.l.bf16 %v16175_v33  ;;  %v5352_v59 = vunpack.c.l.bf16 %v13057_v30  ;;  %v16176_v14 = vld [vmem:[#allocation2_spill] sm:$0xff] }
 0x176   : > { %16171 = vst [vmem:[#allocation23_spill] sm:$0xff] %v13504_v20  ;;  %v13517_v2 = vadd.f32 %v2742_v62, %v13111_v48  ;;  %v10322_v19 = vpop.f32.mrf.mxu0  ;;  %10623 = vmatmul.mubr.msk.f32.gmra.mxu1 %vm755_vm1, %v5373_v56  ;;  %v13535_v40 = vmul.f32 %v5347_v26, %v5347_v26  ;;  %v5353_v34 = vunpack.c.l.bf16 %v13061_v43  ;;  %v5380_v26 = vmul.f32 %v5348_v37, %v5348_v37 }
 0x177   : > { %16173 = vst [vmem:[#allocation27_spill] sm:$0xff] %v13514_v18  ;;  %v10372_v21 = vpop.f32.mrf.mxu1  ;;  %v13529_v48 = vadd.f32 %v10322_v19, %v16176_v14  ;;  %10625 = vmatprep.mubr.msk.f32.mxu1 %vm755_vm1, %v5374_v3  ;;  %v5355_v19 = vunpack.c.l.bf16 %v13084_v32  ;;  %v6102_v14 = vunpack.c.l.bf16 %v13522_v22  ;;  %v13555_v18 = vmul.f32 %v5351_v50, %v5351_v50 }
 0x178   : > { %16174 = vst [vmem:[#allocation26_spill] sm:$0xff] %v13517_v2  ;;  %v13532_v62 = vadd.f32 %v10372_v21, %v13136_v16  ;;  %v2316_v52 = vpop.f32.mrf.mxu0  ;;  %v16179_v16 = vld [vmem:[#allocation30_spill] sm:$0xff]  ;;  %v13553_v2 = vmul.f32 %v5350_v23, %v5350_v23  ;;  %v13557_v20 = vmul.f32 %v5352_v59, %v5352_v59  ;;  %v13574_v23 = vld [vmem:[%s11181_s23 + $0x30] sm:$0xff]  }
 0x179   : > { %16177 = vst [vmem:[#allocation12_spill] sm:$0xff] %v13529_v48  ;;  %v2752_v61 = vpop.f32.mrf.mxu1  ;;  %v13544_v21 = vadd.f32 %v2316_v52, %v16179_v16  ;;  %v5356_v52 = vunpack.c.l.bf16 %v13118_v15  ;;  %v13576_v16 = vmul.f32 %v5353_v34, %v5353_v34 }
 0x17a   : > { %16178 = vst [vmem:[#allocation2_spill] sm:$0xff] %v13532_v62  ;;  %v13547_v3 = vadd.f32 %v2752_v61, %v13148_v28  ;;  %v13549_v62 = vmul.f32 %v5349_v47, %v5349_v47  ;;  %v10325_v56 = vpop.f32.mrf.mxu0  ;;  %10626 = vmatmul.mubr.msk.f32.gmra.mxu1 %vm755_vm1, %v5375_v45  ;;  %v13561_v28 = vld [vmem:[%s11181_s23 + $0x24] sm:$0xff]   ;;  %v16182_v61 = vld [vmem:[#allocation33_spill] sm:$0xff]  ;;  %v6103_v45 = vunpack.c.h.bf16 %v13522_v22 }
 0x17b   : > { %16180 = vst [vmem:[#allocation30_spill] sm:$0xff] %v13544_v21  ;;  %v10375_v48 = vpop.f32.mrf.mxu1  ;;  %v13564_v37 = vadd.f32 %v10325_v56, %v16182_v61  ;;  %10628 = vmatprep.mubr.msk.f32.mxu1 %vm755_vm1, %v5376_v1  ;;  %v13578_v56 = vmul.f32 %v5354_v17, %v5354_v17  ;;  %v13580_v61 = vmul.f32 %v5355_v19, %v5355_v19  ;;  %v6105_v34 = vunpack.c.h.bf16 %v13561_v28 }
 0x17c   : > { %16181 = vst [vmem:[#allocation59_spill] sm:$0xff] %v13547_v3  ;;  %10576 = vmatmul.mubr.msk.bf16.gmra.mxu0 %vm755_vm1, %v9326_v36  ;;  %v13567_v47 = vadd.f32 %v10375_v48, %v13167_v49  ;;  %v5357_v36 = vunpack.c.l.bf16 %v13122_v60  ;;  %v2329_v50 = vpop.f32.mrf.mxu0  ;;  %v13582_v49 = vmul.f32 %v6102_v14, %v6102_v14  ;;  %v13595_v17 = vmul.f32 %v5356_v52, %v5356_v52 }
 0x17d   : > { %16183 = vst [vmem:[#allocation33_spill] sm:$0xff] %v13564_v37  ;;  %10579 = vmatprep.mubr.msk.bf16.mxu0 %vm755_vm1, %v9327_v42  ;;  %v2762_v59 = vpop.f32.mrf.mxu1  ;;  %v16185_v42 = vld [vmem:[#allocation5_spill] sm:$0xff]  ;;  %v6106_v19 = vunpack.c.l.bf16 %v13574_v23  ;;  %v6107_v14 = vunpack.c.h.bf16 %v13574_v23 }
 0x17e   : > { %16184 = vst [vmem:[#allocation60_spill] sm:$0xff] %v13567_v47  ;;  %v13585_v48 = vadd.f32 %v2329_v50, %v16185_v42  ;;  %v13588_v1 = vadd.f32 %v2762_v59, %v13187_v6  ;;  %v6104_v47 = vunpack.c.l.bf16 %v13561_v28  ;;  %v13592_v37 = vld [vmem:[%s11181_s23 + $0x3c] sm:$0xff]   ;;  %v10326_v3 = vpop.f32.mrf.mxu0  ;;  %10629 = vmatmul.mubr.msk.f32.gmra.mxu1 %vm755_vm1, %v5377_v39  ;;  %v13601_v50 = vld [vmem:[%s11181_s23 + $0x48] sm:$0xff]   ;;  %v13612_v39 = vmul.f32 %v6103_v45, %v6103_v45 }
 0x17f   : > { %16188 = vst [vmem:[#allocation62_spill] sm:$0xff] %v13592_v37  ;;  %v10378_v21 = vpop.f32.mrf.mxu1  ;;  %16189 = vst [vmem:[#allocation63_spill] sm:$0xff] %v13601_v50  ;;  %v16190_v6 = vld [vmem:[#allocation6_spill] sm:$0xff]  ;;  %10631 = vmatprep.mubr.msk.f32.mxu1 %vm755_vm1, %v5378_v24  ;;  %v6108_v10 = vunpack.c.l.bf16 %v13592_v37  ;;  %v6109_v13 = vunpack.c.h.bf16 %v13592_v37  ;;  %v6110_v24 = vunpack.c.l.bf16 %v13601_v50  ;;  %v16199_v45 = vcombine.low %v13394_v35, %v13419_v5 }
 0x180   : > { %16186 = vst [vmem:[#allocation5_spill] sm:$0xff] %v13585_v48  ;;  %16187 = vst [vmem:[#allocation61_spill] sm:$0xff] %v13588_v1  ;;  %v13604_v59 = vadd.f32 %v10326_v3, %v16190_v6  ;;  %v16192_v42 = vld [vmem:[#allocation34_spill] sm:$0xff]  ;;  %v13610_v48 = vmul.f32 %v5357_v36, %v5357_v36  ;;  %v2332_v52 = vpop.f32.mrf.mxu0  ;;  %v16197_v6 = vld [vmem:[#allocation35_spill] sm:$0xff]  ;;  %v16204_v5 = vcombine.low %v13435_v54, %v13442_v44  ;;  %v6113_v44 = vunpack.c.h.bf16 %v13617_v0 }
 0x181   : > { %v13607_v1 = vadd.f32 %v10378_v21, %v16192_v42  ;;  %v2772_v27 = vpop.f32.mrf.mxu1  ;;  %v13620_v3 = vadd.f32 %v2332_v52, %v16195_v57  ;;  %v13625_v42 = vmul.f32 %v6104_v47, %v6104_v47  ;;  %v13634_v57 = vmul.f32 %v6105_v34, %v6105_v34 }
 0x182   : > { %16191 = vst [vmem:[#allocation6_spill] sm:$0xff] %v13604_v59  ;;  %v13623_v21 = vadd.f32 %v2772_v27, %v16197_v6  ;;  %v10329_v36 = vpop.f32.mrf.mxu0  ;;  %10632 = vmatmul.mubr.msk.f32.gmra.mxu1 %vm755_vm1, %v13535_v40  ;;  %v13636_v27 = vmul.f32 %v6106_v19, %v6106_v19  ;;  %v13638_v47 = vmul.f32 %v6107_v14, %v6107_v14  ;;  %v6111_v52 = vunpack.c.h.bf16 %v13601_v50  ;;  %v16200_v6 = vld [vmem:[#allocation11_spill] sm:$0xff]  ;;  %v13658_v19 = vld [vmem:[%s11181_s23 + $0x60] sm:$0xff]  }
 0x183   : > { %16193 = vst [vmem:[#allocation34_spill] sm:$0xff] %v13607_v1  ;;  %16196 = vst [vmem:[#allocation7_spill] sm:$0xff] %v13620_v3  ;;  %v10381_v1 = vpop.f32.mrf.mxu1  ;;  %v16202_v3 = vld [vmem:[#allocation51_spill] sm:$0xff]  ;;  %10634 = vmatprep.mubr.msk.f32.mxu1 %vm755_vm1, %v5380_v26  ;;  %v13654_v40 = vsel %vm804_vm0, %v13409_v25, 0  ;;  %v6112_v34 = vunpack.c.l.bf16 %v13617_v0  ;;  %v13665_v54 = vmul.f32 %v6109_v13, %v6109_v13  ;;  %v16207_v26 = vld [vmem:[#allocation16_spill] sm:$0xff]  ;;  %v6114_v13 = vunpack.c.l.bf16 %v13658_v19 }
 0x184   : > { %16198 = vst [vmem:[#allocation35_spill] sm:$0xff] %v13623_v21  ;;  %10580 = vmatmul.mubr.msk.bf16.gmra.mxu0 %vm755_vm1, %v16199_v45  ;;  %v13642_v21 = vadd.f32 %v10329_v36, %v16200_v6  ;;  %v13645_v35 = vadd.f32 %v10381_v1, %v16202_v3  ;;  %16205 = vst [vmem:[#allocation65_spill] sm:$0xff] %v13658_v19  ;;  %v13661_v14 = vld [vmem:[%s11181_s23 + $0x6c] sm:$0xff]   ;;  %v2345_v36 = vpop.f32.mrf.mxu0  ;;  %v13663_v3 = vmul.f32 %v6108_v10, %v6108_v10 }
 0x185   : > { %10583 = vmatprep.mubr.msk.bf16.mxu0 %vm755_vm1, %v16204_v5  ;;  %16206 = vst [vmem:[#allocation66_spill] sm:$0xff] %v13661_v14  ;;  %v2782_v1 = vpop.f32.mrf.mxu1  ;;  %v13669_v45 = vadd.f32 %v2345_v36, %v16207_v26  ;;  %v16209_v25 = vld [vmem:[#allocation52_spill] sm:$0xff]  ;;  %v13674_v5 = vmul.f32 %v6110_v24, %v6110_v24  ;;  %v13681_v10 = vmul.f32 %v6111_v52, %v6111_v52  ;;  %v6115_v0 = vunpack.c.h.bf16 %v13658_v19  ;;  %v16213_v24 = vld [vmem:[#allocation21_spill] sm:$0xff] }
 0x186   : > { %16201 = vst [vmem:[#allocation11_spill] sm:$0xff] %v13642_v21  ;;  %16203 = vst [vmem:[#allocation51_spill] sm:$0xff] %v13645_v35  ;;  %v13672_v6 = vadd.f32 %v2782_v1, %v16209_v25  ;;  %v13677_v35 = vld [vmem:[%s11181_s23 + $0x78] sm:$0xff]   ;;  %v10330_v21 = vpop.f32.mrf.mxu0  ;;  %10635 = vmatmul.mubr.msk.f32.gmra.mxu1 %vm755_vm1, %v13549_v62  ;;  %v6116_v36 = vunpack.c.l.bf16 %v13661_v14  ;;  %v13687_v1 = vld [vmem:[%s11181_s23 + $0x84] sm:$0xff]   ;;  %v13697_v62 = vmul.f32 %v6112_v34, %v6112_v34  ;;  %v6117_v52 = vunpack.c.h.bf16 %v13661_v14 }
 0x187   : > { %16208 = vst [vmem:[#allocation16_spill] sm:$0xff] %v13669_v45  ;;  %16211 = vst [vmem:[#allocation67_spill] sm:$0xff] %v13677_v35  ;;  %v10384_v59 = vpop.f32.mrf.mxu1  ;;  %v13690_v26 = vadd.f32 %v10330_v21, %v16213_v24  ;;  %v16215_v25 = vld [vmem:[#allocation53_spill] sm:$0xff]  ;;  %10637 = vmatprep.mubr.msk.f32.mxu1 %vm755_vm1, %v13553_v2  ;;  %v13700_v50 = vmul.f32 %v6113_v44, %v6113_v44  ;;  %v6118_v37 = vunpack.c.l.bf16 %v13677_v35  ;;  %v16219_v21 = vld [vmem:[#allocation54_spill] sm:$0xff]  ;;  %v6120_v2 = vunpack.c.l.bf16 %v13687_v1 }
 0x188   : > { %16210 = vst [vmem:[#allocation52_spill] sm:$0xff] %v13672_v6  ;;  %16212 = vst [vmem:[#allocation68_spill] sm:$0xff] %v13687_v1  ;;  %v13693_v6 = vadd.f32 %v10384_v59, %v16215_v25  ;;  %v2348_v45 = vpop.f32.mrf.mxu0  ;;  %v6119_v59 = vunpack.c.h.bf16 %v13677_v35  ;;  %v13712_v34 = vld [vmem:[%s11181_s23 + $0x90] sm:$0xff]   ;;  %v16222_v44 = vcombine.low %v13455_v46, %v13459_v12  ;;  %v16227_v12 = vcombine.low %v13474_v38, %v13480_v31  ;;  %v13766_v35 = vld [vmem:[%s11181_s23 + $0xa8] sm:$0xff]  }
 0x189   : > { %16214 = vst [vmem:[#allocation21_spill] sm:$0xff] %v13690_v26  ;;  %v2792_v19 = vpop.f32.mrf.mxu1  ;;  %v13704_v8 = vadd.f32 %v2348_v45, %v16217_v58  ;;  %16221 = vst [vmem:[#allocation69_spill] sm:$0xff] %v13712_v34  ;;  %v13720_v58 = vmul.f32 %v6114_v13, %v6114_v13  ;;  %v13724_v45 = vmul.f32 %v6116_v36, %v6116_v36  ;;  %v16225_v26 = vld [vmem:[#allocation55_spill] sm:$0xff]  ;;  %v16229_v38 = vld [vmem:[#allocation32_spill] sm:$0xff] }
 0x18a   : > { %16216 = vst [vmem:[#allocation53_spill] sm:$0xff] %v13693_v6  ;;  %v13707_v24 = vadd.f32 %v2792_v19, %v16219_v21  ;;  %v10333_v25 = vpop.f32.mrf.mxu0  ;;  %10638 = vmatmul.mubr.msk.f32.gmra.mxu1 %vm755_vm1, %v13555_v18  ;;  %v13722_v19 = vmul.f32 %v6115_v0, %v6115_v0  ;;  %v6121_v21 = vunpack.c.h.bf16 %v13687_v1  ;;  %v13739_v0 = vmul.f32 %v6117_v52, %v6117_v52  ;;  %v13742_v18 = vld [vmem:[%s11181_s23 + $0x9c] sm:$0xff]  }
 0x18b   : > { %16218 = vst [vmem:[#allocation25_spill] sm:$0xff] %v13704_v8  ;;  %v10387_v6 = vpop.f32.mrf.mxu1  ;;  %10640 = vmatprep.mubr.msk.f32.mxu1 %vm755_vm1, %v13557_v20  ;;  %16228 = vst [vmem:[#allocation70_spill] sm:$0xff] %v13742_v18  ;;  %v13755_v20 = vmul.f32 %v6119_v59, %v6119_v59  ;;  %v13757_v52 = vmul.f32 %v6120_v2, %v6120_v2  ;;  %v16237_v59 = vld [vmem:[#allocation56_spill] sm:$0xff] }
 0x18c   : > { %16220 = vst [vmem:[#allocation54_spill] sm:$0xff] %v13707_v24  ;;  %10584 = vmatmul.mubr.msk.bf16.gmra.mxu0 %vm755_vm1, %v16222_v44  ;;  %v16223_v24 = vld [vmem:[#allocation29_spill] sm:$0xff]  ;;  %v13731_v46 = vadd.f32 %v10387_v6, %v16225_v26  ;;  %v2361_v13 = vpop.f32.mrf.mxu0  ;;  %v6122_v6 = vunpack.c.l.bf16 %v13712_v34  ;;  %v6123_v26 = vunpack.c.h.bf16 %v13712_v34  ;;  %v6124_v34 = vunpack.c.l.bf16 %v13742_v18  ;;  %16234 = vst [vmem:[#allocation72_spill] sm:$0xff] %v13766_v35 }
 0x18d   : > { %v13728_v8 = vadd.f32 %v10333_v25, %v16223_v24  ;;  %10587 = vmatprep.mubr.msk.bf16.mxu0 %vm755_vm1, %v16227_v12  ;;  %v2802_v36 = vpop.f32.mrf.mxu1  ;;  %v13744_v24 = vmul.f32 %v6118_v37, %v6118_v37  ;;  %v9482_v25 = vld [vmem:[%s11181_s23 + $0x18] sm:$0xf]  ;;  %v13750_v31 = vadd.f32 %v2361_v13, %v16229_v38  ;;  %v13762_v37 = vmul.f32 %v6121_v21, %v6121_v21  ;;  %v16235_v13 = vld [vmem:[#allocation8_spill] sm:$0xff] }
 0x18e   : > { %16226 = vst [vmem:[#allocation55_spill] sm:$0xff] %v13731_v46  ;;  %v16231_v44 = vld [vmem:[#allocation41_spill] sm:$0xff]  ;;  %10641 = vmatmul.mubr.msk.f32.gmra.mxu1 %vm755_vm1, %v13576_v16  ;;  %v6568_v38 = vshrl.u32 %v9482_v25, 16 }
 0x18f   : > { %16224 = vst [vmem:[#allocation29_spill] sm:$0xff] %v13728_v8  ;;  %16230 = vst [vmem:[#allocation32_spill] sm:$0xff] %v13750_v31  ;;  %v13753_v12 = vadd.f32 %v2802_v36, %v16231_v44  ;;  %v9483_v46 = vld [vmem:[%s11181_s23 + $0x1c] sm:$0xf]  ;;  %v10334_v8 = vpop.f32.mrf.mxu0  ;;  %v10390_v1 = vpop.f32.mrf.mxu1  ;;  %10643 = vmatprep.mubr.msk.f32.mxu1 %vm755_vm1, %v13578_v56  ;;  %v6571_v44 = vshll.u32 %v9482_v25, 16  ;;  %v13778_v31 = vmul.f32 %v6123_v26, %v6123_v26  ;;  %v6126_v56 = vunpack.c.l.bf16 %v13766_v35  ;;  %v13789_v25 = vld [vmem:[%s11181_s23 + $0xb4] sm:$0xff]  }
 0x190   : > { %16233 = vst [vmem:[#allocation71_spill] sm:$0xff] %v13762_v37  ;;  %v13769_v36 = vadd.f32 %v10334_v8, %v16235_v13  ;;  %v13772_v2 = vadd.f32 %v10390_v1, %v16237_v59  ;;  %v6577_v14 = vshll.u32 %v9483_v46, 16  ;;  %v6581_v37 = vshrl.u32 %v9483_v46, 16  ;;  %v16239_v8 = vld [vmem:[#allocation13_spill] sm:$0xff]  ;;  %16243 = vst [vmem:[#allocation73_spill] sm:$0xff] %v13789_v25 }
 0x191   : > { %16232 = vst [vmem:[#allocation41_spill] sm:$0xff] %v13753_v12  ;;  %v2364_v16 = vpop.f32.mrf.mxu0  ;;  %v2812_v21 = vpop.f32.mrf.mxu1  ;;  %v13776_v12 = vmul.f32 %v6122_v6, %v6122_v6  ;;  %v6125_v59 = vunpack.c.h.bf16 %v13742_v18  ;;  %v16244_v26 = vcombine.low %v12990_v51, %v12994_v41  ;;  %v16250_v51 = vcombine.low %v13040_v55, %v16175_v33  ;;  %v16253_v55 = vld [vmem:[#allocation58_spill] sm:$0xff] }
 0x192   : > { %16236 = vst [vmem:[#allocation8_spill] sm:$0xff] %v13769_v36  ;;  %16238 = vst [vmem:[#allocation56_spill] sm:$0xff] %v13772_v2  ;;  %v13781_v13 = vadd.f32 %v2364_v16, %v16239_v8  ;;  %v16241_v36 = vld [vmem:[#allocation46_spill] sm:$0xff]  ;;  %10644 = vmatmul.mubr.msk.f32.gmra.mxu1 %vm755_vm1, %v13580_v61  ;;  %v6127_v16 = vunpack.c.h.bf16 %v13766_v35  ;;  %v16246_v8 = vld [vmem:[#allocation36_spill] sm:$0xff]  ;;  %v6570_v41 = vrot.slane %v6568_v38, 4  ;;  %v6573_v61 = vrot.slane %v6571_v44, 5 }
 0x193   : > { %v13784_v1 = vadd.f32 %v2812_v21, %v16241_v36  ;;  %v9485_v2 = vld [vmem:[%s11181_s23 + $0x24] sm:$0xf]  ;;  %v10337_v6 = vpop.f32.mrf.mxu0  ;;  %v10393_v46 = vpop.f32.mrf.mxu1  ;;  %v13798_v36 = vmul.f32 %v6124_v34, %v6124_v34  ;;  %v9486_v21 = vld [vmem:[%s11181_s23 + $0x28] sm:$0xf]  ;;  %10646 = vmatprep.mubr.msk.f32.mxu1 %vm755_vm1, %v13595_v17  ;;  %v9484_v35 = vld [vmem:[%s11181_s23 + $0x20] sm:$0x1] }
 0x194   : > { %16240 = vst [vmem:[#allocation13_spill] sm:$0xff] %v13781_v13  ;;  %10588 = vmatmul.mubr.msk.bf16.gmra.mxu0 %vm755_vm1, %v16244_v26  ;;  %v13803_v18 = vadd.f32 %v10337_v6, %v16246_v8  ;;  %v6583_v6 = vrot.slane %v6581_v37, 4  ;;  %v6592_v8 = vshrl.u32 %v9485_v2, 16  ;;  %v6605_v17 = vshrl.u32 %v9486_v21, 16 }
 0x195   : > { %16242 = vst [vmem:[#allocation46_spill] sm:$0xff] %v13784_v1  ;;  %16245 = vst [vmem:[#allocation74_spill] sm:$0xff] %v13798_v36  ;;  %v16248_v1 = vld [vmem:[#allocation57_spill] sm:$0xff]  ;;  %10591 = vmatprep.mubr.msk.bf16.mxu0 %vm755_vm1, %v16250_v51  ;;  %v2377_v34 = vpop.f32.mrf.mxu0  ;;  %v2822_v26 = vpop.f32.mrf.mxu1  ;;  %v13815_v36 = vrot.slane %v6577_v14, 5  ;;  %v6601_v51 = vshll.u32 %v9486_v21, 16  ;;  %v13825_v14 = vmul.f32 %v6125_v59, %v6125_v59  ;;  %v13827_v37 = vmul.f32 %v6126_v56, %v6126_v56 }
 0x196   : > { %16247 = vst [vmem:[#allocation36_spill] sm:$0xff] %v13803_v18  ;;  %v13806_v13 = vadd.f32 %v10393_v46, %v16248_v1  ;;  %v6595_v18 = vshll.u32 %v9485_v2, 16  ;;  %v16251_v1 = vld [vmem:[#allocation9_spill] sm:$0xff]  ;;  %v13821_v33 = vadd.f32 %v2822_v26, %v16253_v55  ;;  %10647 = vmatmul.mubr.msk.f32.gmra.mxu1 %vm755_vm1, %v13610_v48  ;;  %v6128_v2 = vunpack.c.l.bf16 %v13789_v25  ;;  %v13842_v48 = vld [vmem:[%s11181_s23 + $0xc0] sm:$0xff]   ;;  %v9488_v56 = vld [vmem:[%s11181_s23 + $0x30] sm:$0xf] }
 0x197   : > { %v13818_v46 = vadd.f32 %v2377_v34, %v16251_v1  ;;  %v10338_v38 = vpop.f32.mrf.mxu0  ;;  %v10396_v44 = vpop.f32.mrf.mxu1  ;;  %16255 = vst [vmem:[#allocation75_spill] sm:$0xff] %v13827_v37  ;;  %v6129_v34 = vunpack.c.h.bf16 %v13789_v25  ;;  %v16256_v1 = vld [vmem:[#allocation15_spill] sm:$0xff]  ;;  %10685 = vmatprep.mubr.msk.f32.mxu1 %vm755_vm1, %v13582_v49  ;;  %v13839_v21 = vmul.f32 %v6127_v16, %v6127_v16  ;;  %16259 = vst [vmem:[#allocation77_spill] sm:$0xff] %v13842_v48  ;;  %v6587_v59 = vshll.u32 %v9484_v35, 16 }
 0x198   : > { %16249 = vst [vmem:[#allocation57_spill] sm:$0xff] %v13806_v13  ;;  %16254 = vst [vmem:[#allocation58_spill] sm:$0xff] %v13821_v33  ;;  %v13832_v26 = vadd.f32 %v10338_v38, %v16256_v1  ;;  %v13835_v55 = vadd.f32 %v10396_v44, %v13386_v4  ;;  %v6574_v13 = vor.u32 %v6573_v61, %v6570_v41  ;;  %v6594_v37 = vrot.slane %v6592_v8, 4  ;;  %v16260_v1 = vld [vmem:[#allocation39_spill] sm:$0xff]  ;;  %v16263_v8 = vld [vmem:[#allocation40_spill] sm:$0xff] }
 0x199   : > { %16252 = vst [vmem:[#allocation9_spill] sm:$0xff] %v13818_v46  ;;  %v2380_v33 = vpop.f32.mrf.mxu0  ;;  %v2832_v46 = vpop.f32.mrf.mxu1  ;;  %v6584_v25 = vor.u32 %v6583_v6, %v13815_v36  ;;  %v6597_v38 = vrot.slane %v6595_v18, 5  ;;  %v9487_v49 = vld [vmem:[%s11181_s23 + $0x2c] sm:$0x1]  ;;  %v13853_v16 = vrot.slane %v6601_v51, 5  ;;  %v6607_v44 = vrot.slane %v6605_v17, 4 }
 0x19a   : > { %16257 = vst [vmem:[#allocation15_spill] sm:$0xff] %v13832_v26  ;;  %16258 = vst [vmem:[#allocation76_spill] sm:$0xff] %v13835_v55  ;;  %v13847_v26 = vadd.f32 %v2380_v33, %v16260_v1  ;;  %v13850_v4 = vadd.f32 %v2832_v46, %v13400_v9  ;;  %v16262_v55 = vcombine.low %v13057_v30, %v13061_v43  ;;  %10686 = vmatmul.mubr.msk.f32.vlgmr.msra.gmra.mxu1 %vm755_vm1, %v13612_v39  ;;  %v16265_v33 = vld [vmem:[#allocation22_spill] sm:$0xff] }
 0x19b   : > { %v10341_v35 = vpop.f32.mrf.mxu0  ;;  %v10435_v41 = vpop.f32.mrf.mxu1  ;;  %v13861_v18 = vmul.f32 %v6128_v2, %v6128_v2  ;;  %v6130_v9 = vunpack.c.l.bf16 %v13842_v48  ;;  %v6616_v61 = vshrl.u32 %v9488_v56, 16  ;;  %v6619_v6 = vshll.u32 %v9488_v56, 16  ;;  %v13877_v43 = vld [vmem:[%s15874_s2] sm:$0xff]  ;;  %v9489_v2 = vld [vmem:[%s11181_s23 + $0x34] sm:$0xf]  ;;  %10688 = vmatprep.mubr.msk.f32.mxu1 %vm755_vm1, %v13625_v42 }
 0x19c   : > { %16261 = vst [vmem:[#allocation39_spill] sm:$0xff] %v13850_v4  ;;  %10592 = vmatmul.mubr.msk.bf16.gmra.mxu0 %vm755_vm1, %v16262_v55  ;;  %v13865_v46 = vadd.f32 %v10341_v35, %v16263_v8  ;;  %v13868_v51 = vadd.f32 %v10435_v41, %v16265_v33  ;;  %v16267_v30 = vcombine.low %v13098_v29, %v13084_v32  ;;  %16268 = vst [vmem:[#allocation78_spill] sm:$0xff] %v13877_v43  ;;  %v13887_v32 = vld [vmem:[%s11181_s23 + $0xcc] sm:$0xff]   ;;  %v16270_v8 = vld [vmem:[#allocation42_spill] sm:$0xff] }
 0x19d   : > { %10768 = vmatpush3.msra.mxu1 %v13877_v43  ;;  %v13880_v39 = vmul.f32 %v6129_v34, %v6129_v34  ;;  %v6131_v17 = vunpack.c.h.bf16 %v13842_v48  ;;  %v2393_v55 = vpop.f32.mrf.mxu0  ;;  %v3458_v56 = vpop.f32.mrf.mxu1  ;;  %16269 = vst [vmem:[#allocation79_spill] sm:$0xff] %v13887_v32  ;;  %v6575_v29 = vrot.slane %v6574_v13, 4  ;;  %v6585_v1 = vrot.slane %v6584_v25, 4  ;;  %v16271_v34 = vld [vmem:[#allocation28_spill] sm:$0xff] }
 0x19e   : > { %16264 = vst [vmem:[#allocation40_spill] sm:$0xff] %v13865_v46  ;;  %16266 = vst [vmem:[#allocation22_spill] sm:$0xff] %v13868_v51  ;;  %10595 = vmatprep.mubr.msk.bf16.mxu0 %vm755_vm1, %v16267_v30  ;;  %v6589_v35 = vrot.slane %v6587_v59, 5  ;;  %10851 = vmatprep.subr.mxu1 %v13877_v43  ;;  %v6611_v41 = vshll.u32 %v9487_v49, 16  ;;  %v13891_v33 = vadd.f32 %v2393_v55, %v16270_v8  ;;  %v6618_v42 = vrot.slane %v6616_v61, 4  ;;  %v16272_v43 = vld [vmem:[#allocation44_spill] sm:$0xff] }
 0x19f   : > { %v13894_v30 = vadd.f32 %v3458_v56, %v16271_v34  ;;  %v6598_v48 = vor.u32 %v6597_v38, %v6594_v37  ;;  %v6608_v51 = vor.u32 %v6607_v44, %v13853_v16  ;;  %v10342_v46 = vpop.f32.mrf.mxu0  ;;  %v10438_v4 = vpop.f32.mrf.mxu1  ;;  %10689 = vmatmul.mubr.msk.f32.gmra.mxu1 %vm755_vm1, %v13634_v57  ;;  %v6621_v13 = vrot.slane %v6619_v6, 5  ;;  %v16273_v55 = vld [vmem:[#allocation31_spill] sm:$0xff] }
 0x1a0   : > { %v6625_v25 = vshll.u32 %v9489_v2, 16  ;;  %v6629_v59 = vshrl.u32 %v9489_v2, 16  ;;  %v13900_v49 = vadd.f32 %v10342_v46, %v16272_v43  ;;  %v13903_v8 = vadd.f32 %v10438_v4, %v16273_v55  ;;  %10691 = vmatprep.mubr.msk.f32.mxu1 %vm755_vm1, %v13636_v27  ;;  %v16275_v27 = vld [vmem:[#allocation45_spill] sm:$0xff]  ;;  %v16276_v43 = vld [vmem:[#allocation47_spill] sm:$0xff] }
 0x1a1   : > { %v13907_v37 = vmul.f32 %v6130_v9, %v6130_v9  ;;  %v6132_v38 = vunpack.c.l.bf16 %v13887_v32  ;;  %v2396_v44 = vpop.f32.mrf.mxu0  ;;  %v3468_v56 = vpop.f32.mrf.mxu1  ;;  %v13910_v57 = vmul.f32 %v6131_v17, %v6131_v17  ;;  %v6133_v61 = vunpack.c.h.bf16 %v13887_v32 }
 0x1a2   : > { %v13916_v46 = vsel %vm11233_vm4, %v6575_v29, %v13815_v36  ;;  %v13920_v4 = vsel %vm11233_vm4, %v6585_v1, %v6589_v35  ;;  %v13923_v9 = vadd.f32 %v2396_v44, %v16275_v27  ;;  %v13926_v2 = vadd.f32 %v3468_v56, %v16276_v43  ;;  %v16278_v56 = vld [vmem:[#allocation18_spill] sm:$0xff] }
 0x1a3   : > { %v6599_v17 = vrot.slane %v6598_v48, 4  ;;  %v6613_v34 = vrot.slane %v6611_v41, 5  ;;  %v10345_v55 = vpop.f32.mrf.mxu0  ;;  %v16277_v32 = vcombine.low %v13118_v15, %v13122_v60  ;;  %v10441_v36 = vpop.f32.mrf.mxu1  ;;  %10692 = vmatmul.mubr.msk.f32.gmra.mxu1 %vm755_vm1, %v13638_v47  ;;  %v6609_v29 = vrot.slane %v6608_v51, 4  ;;  %v16279_v48 = vld [vmem:[#allocation48_spill] sm:$0xff]  ;;  %v9490_v60 = vld [vmem:[%s11181_s23 + $0x38] sm:$0x1] }
 0x1a4   : > { %v6622_v1 = vor.u32 %v6621_v13, %v6618_v42  ;;  %v6627_v35 = vrot.slane %v6625_v25, 5  ;;  %v6631_v44 = vrot.slane %v6629_v59, 4  ;;  %v13935_v27 = vadd.f32 %v10345_v55, %v16278_v56  ;;  %10694 = vmatprep.mubr.msk.f32.mxu1 %vm755_vm1, %v13663_v3  ;;  %v9491_v25 = vld [vmem:[%s11181_s23 + $0x3c] sm:$0xf]  ;;  %v16281_v59 = vld [vmem:[#allocation4_spill] sm:$0xff] }
 0x1a5   : > { %10596 = vmatmul.mubr.msk.bf16.gmra.mxu0 %vm755_vm1, %v16277_v32  ;;  %v13938_v41 = vadd.f32 %v10441_v36, %v16279_v48  ;;  %v13944_v15 = vmul.f32 %v6132_v38, %v6132_v38  ;;  %v2409_v47 = vpop.f32.mrf.mxu0  ;;  %v3478_v51 = vpop.f32.mrf.mxu1  ;;  %v13947_v32 = vmul.f32 %v6133_v61, %v6133_v61  ;;  %v7277_v42 = vunpack.c.l.bf16 %v13916_v46  ;;  %v16283_v55 = vld [vmem:[#allocation49_spill] sm:$0xff]  ;;  %v9492_v38 = vld [vmem:[%s11181_s23 + $0x40] sm:$0xf] }
 0x1a6   : > { %10651 = vmatprep.mubr.msk.bf16.mxu0 %vm755_vm1, %v13522_v22  ;;  %v7278_v13 = vunpack.c.l.bf16 %v13920_v4  ;;  %v13953_v43 = vadd.f32 %v2409_v47, %v16281_v59  ;;  %v13956_v22 = vadd.f32 %v3478_v51, %v16283_v55  ;;  %v13961_v3 = vsel %vm11233_vm4, %v6599_v17, %v13853_v16  ;;  %v16287_v51 = vld [vmem:[#allocation24_spill] sm:$0xff] }
 0x1a7   : > { %16280 = vst [vmem:[#allocation42_spill] sm:$0xff] %v13938_v41  ;;  %16285 = vst [vmem:[#allocation31_spill] sm:$0xff] %v13961_v3  ;;  %v10346_v36 = vpop.f32.mrf.mxu0  ;;  %v10444_v61 = vpop.f32.mrf.mxu1  ;;  %10695 = vmatmul.mubr.msk.f32.gmra.mxu1 %vm755_vm1, %v13665_v54  ;;  %v13968_v56 = vsel %vm11233_vm4, %v6609_v29, %v6613_v34  ;;  %v6623_v48 = vrot.slane %v6622_v1, 4  ;;  %v6632_v47 = vor.u32 %v6631_v44, %v6627_v35  ;;  %v6635_v59 = vshll.u32 %v9490_v60, 16  ;;  %v16289_v44 = vld [vmem:[#allocation19_spill] sm:$0xff] }
 0x1a8   : > { %16282 = vst [vmem:[#allocation28_spill] sm:$0xff] %v13953_v43  ;;  %16284 = vst [vmem:[#allocation44_spill] sm:$0xff] %v13956_v22  ;;  %v13971_v55 = vadd.f32 %v10346_v36, %v16287_v51  ;;  %v13974_v16 = vadd.f32 %v10444_v61, %v13389_v7  ;;  %10697 = vmatprep.mubr.msk.f32.mxu1 %vm755_vm1, %v13674_v5  ;;  %v6640_v17 = vshrl.u32 %v9491_v25, 16  ;;  %v6643_v22 = vshll.u32 %v9491_v25, 16 }
 0x1a9   : > { %16286 = vst [vmem:[#allocation3_spill] sm:$0xff] %v13968_v56  ;;  %v2412_v54 = vpop.f32.mrf.mxu0  ;;  %v3488_v43 = vpop.f32.mrf.mxu1  ;;  %v13978_v41 = vmul.f32 %v7277_v42, %v7277_v42  ;;  %v13980_v34 = vmul.f32 %v7278_v13, %v7278_v13  ;;  %v6649_v29 = vshll.u32 %v9492_v38, 16  ;;  %v6653_v1 = vshrl.u32 %v9492_v38, 16  ;;  %v13994_v42 = vld [vmem:[%s15873_s1 + $0x20] sm:$0xf] }
 0x1aa   : > { %16288 = vst [vmem:[#allocation45_spill] sm:$0xff] %v13974_v16  ;;  %v13983_v60 = vadd.f32 %v2412_v54, %v16289_v44  ;;  %v13986_v7 = vadd.f32 %v3488_v43, %v13403_v63  ;;  %v7279_v36 = vunpack.c.l.bf16 %v13961_v3  ;;  %v9494_v13 = vld [vmem:[%s11181_s23 + $0x48] sm:$0xf]  ;;  %v7280_v63 = vunpack.c.l.bf16 %v13968_v56  ;;  %v9495_v54 = vld [vmem:[%s11181_s23 + $0x4c] sm:$0xf] }
 0x1ab   : > { %v10401_v25 = vpop.f32.mrf.mxu0  ;;  %v10447_v38 = vpop.f32.mrf.mxu1  ;;  %10698 = vmatmul.mubr.msk.f32.gmra.mxu1 %vm755_vm1, %v13681_v10  ;;  %v14004_v43 = vsel %vm11233_vm4, %v6623_v48, %v6627_v35  ;;  %v6633_v61 = vrot.slane %v6632_v47, 4  ;;  %v6637_v51 = vrot.slane %v6635_v59, 5  ;;  %v6642_v10 = vrot.slane %v6640_v17, 4  ;;  %v9501_v3 = vld [vmem:[%s11181_s23 + $0x64] sm:$0xf] }
 0x1ac   : > { %16290 = vst [vmem:[#allocation47_spill] sm:$0xff] %v13983_v60  ;;  %16291 = vst [vmem:[#allocation18_spill] sm:$0xff] %v13986_v7  ;;  %v14008_v44 = vadd.f32 %v10401_v25, %v13423_v53  ;;  %v6645_v5 = vrot.slane %v6643_v22, 5  ;;  %10700 = vmatprep.mubr.msk.f32.mxu1 %vm755_vm1, %v13697_v62  ;;  %v14018_v48 = vrot.slane %v6649_v29, 5  ;;  %v6655_v53 = vrot.slane %v6653_v1, 4  ;;  %v16296_v25 = vld [vmem:[#allocation37_spill] sm:$0xff] }
 0x1ad   : > { %10652 = vmatmul.mubr.msk.bf16.vlgmr.msra.gmra.mxu0 %vm755_vm1, %v13561_v28  ;;  %v14012_v28 = vadd.f32 %v10447_v38, %v13427_v11  ;;  %v3073_v7 = vpop.f32.mrf.mxu0  ;;  %v3498_v35 = vpop.f32.mrf.mxu1  ;;  %v6667_v47 = vshll.u32 %v9494_v13, 16  ;;  %v16294_v11 = vld [vmem:[#allocation50_spill] sm:$0xff]  ;;  %v6673_v17 = vshll.u32 %v9495_v54, 16  ;;  %v6677_v38 = vshrl.u32 %v9495_v54, 16 }
 0x1ae   : > { %16292 = vst [vmem:[#allocation48_spill] sm:$0xff] %v14008_v44  ;;  %10734 = vmatpush3.bf16.msra.mxu0 %v13654_v40  ;;  %10655 = vmatprep.mubr.msk.bf16.mxu0 %vm755_vm1, %v13574_v23  ;;  %v6664_v40 = vshrl.u32 %v9494_v13, 16  ;;  %v14023_v59 = vadd.f32 %v3073_v7, %v16294_v11  ;;  %v14026_v23 = vadd.f32 %v3498_v35, %v16296_v25  ;;  %v9493_v22 = vld [vmem:[%s11181_s23 + $0x44] sm:$0x1]  ;;  %v7281_v35 = vunpack.c.l.bf16 %v14004_v43 }
 0x1af   : > { %16293 = vst [vmem:[#allocation4_spill] sm:$0xff] %v14012_v28  ;;  %10909 = vmatprep.subr.msk.bf16.mxu0 %vm804_vm0, %v13994_v42  ;;  %v10402_v62 = vpop.f32.mrf.mxu0  ;;  %v10450_v29 = vpop.f32.mrf.mxu1  ;;  %10701 = vmatmul.mubr.msk.f32.gmra.mxu1 %vm755_vm1, %v13700_v50  ;;  %v14033_v13 = vmul.f32 %v7279_v36, %v7279_v36  ;;  %v14035_v7 = vmul.f32 %v7280_v63, %v7280_v63  ;;  %v16298_v11 = vld [vmem:[#allocation38_spill] sm:$0xff]  ;;  %v9497_v36 = vld [vmem:[%s11181_s23 + $0x54] sm:$0xf]  ;;  %v9498_v63 = vld [vmem:[%s11181_s23 + $0x58] sm:$0xf] }
 0x1b0   : > { %16295 = vst [vmem:[#allocation49_spill] sm:$0xff] %v14023_v59  ;;  %16297 = vst [vmem:[#allocation24_spill] sm:$0xff] %v14026_v23  ;;  %v14039_v25 = vadd.f32 %v10402_v62, %v16298_v11  ;;  %v16300_v23 = vld [vmem:[#allocation17_spill] sm:$0xff]  ;;  %10703 = vmatprep.mubr.msk.f32.mxu1 %vm755_vm1, %v13720_v58  ;;  %v14048_v50 = vsel %vm11233_vm4, %v6633_v61, %v6637_v51  ;;  %v6646_v54 = vor.u32 %v6645_v5, %v6642_v10  ;;  %v16306_v51 = vld [vmem:[#allocation62_spill] sm:$0xff] }
 0x1b1   : > { %v14042_v59 = vadd.f32 %v10450_v29, %v16300_v23  ;;  %v3076_v1 = vpop.f32.mrf.mxu0  ;;  %v3508_v28 = vpop.f32.mrf.mxu1  ;;  %v6656_v44 = vor.u32 %v6655_v53, %v14018_v48  ;;  %v6659_v62 = vshll.u32 %v9493_v22, 16  ;;  %v6666_v11 = vrot.slane %v6664_v40, 4  ;;  %v16302_v23 = vld [vmem:[#allocation43_spill] sm:$0xff]  ;;  %v9496_v53 = vld [vmem:[%s11181_s23 + $0x50] sm:$0x1] }
 0x1b2   : > { %16299 = vst [vmem:[#allocation19_spill] sm:$0xff] %v14039_v25  ;;  %v6669_v25 = vrot.slane %v6667_v47, 5  ;;  %v14054_v29 = vadd.f32 %v3076_v1, %v16302_v23  ;;  %v14059_v56 = vrot.slane %v6673_v17, 5  ;;  %v6679_v61 = vrot.slane %v6677_v38, 4  ;;  %v16307_v23 = vld [vmem:[#allocation20_spill] sm:$0xff]  ;;  %v16311_v38 = vld [vmem:[#allocation63_spill] sm:$0xff] }
 0x1b3   : > { %16301 = vst [vmem:[#allocation50_spill] sm:$0xff] %v14042_v59  ;;  %v16304_v59 = vld [vmem:[#allocation14_spill] sm:$0xff]  ;;  %v10405_v5 = vpop.f32.mrf.mxu0  ;;  %v10453_v10 = vpop.f32.mrf.mxu1  ;;  %10704 = vmatmul.mubr.msk.f32.gmra.mxu1 %vm755_vm1, %v13722_v19  ;;  %v6688_v40 = vshrl.u32 %v9497_v36, 16  ;;  %v6691_v47 = vshll.u32 %v9497_v36, 16  ;;  %v6697_v22 = vshll.u32 %v9498_v63, 16  ;;  %v6701_v1 = vshrl.u32 %v9498_v63, 16 }
 0x1b4   : > { %16303 = vst [vmem:[#allocation37_spill] sm:$0xff] %v14054_v29  ;;  %v14057_v58 = vadd.f32 %v3508_v28, %v16304_v59  ;;  %v14067_v28 = vadd.f32 %v10405_v5, %v16307_v23  ;;  %v16309_v59 = vld [vmem:[#allocation23_spill] sm:$0xff]  ;;  %10706 = vmatprep.mubr.msk.f32.mxu1 %vm755_vm1, %v13724_v45  ;;  %v14076_v19 = vmul.f32 %v7281_v35, %v7281_v35  ;;  %v6647_v63 = vrot.slane %v6646_v54, 4 }
 0x1b5   : > { %10656 = vmatmul.mubr.msk.bf16.gmra.mxu0 %vm755_vm1, %v16306_v51  ;;  %v14070_v17 = vadd.f32 %v10453_v10, %v16309_v59  ;;  %v7282_v51 = vunpack.c.l.bf16 %v14048_v50  ;;  %v3089_v36 = vpop.f32.mrf.mxu0  ;;  %v6657_v29 = vrot.slane %v6656_v44, 4  ;;  %v6661_v5 = vrot.slane %v6659_v62, 5  ;;  %v16312_v10 = vld [vmem:[#allocation27_spill] sm:$0xff] }
 0x1b6   : > { %16305 = vst [vmem:[#allocation38_spill] sm:$0xff] %v14057_v58  ;;  %16308 = vst [vmem:[#allocation17_spill] sm:$0xff] %v14067_v28  ;;  %10659 = vmatprep.mubr.msk.bf16.mxu0 %vm755_vm1, %v16311_v38  ;;  %v3518_v58 = vpop.f32.mrf.mxu1  ;;  %v6670_v23 = vor.u32 %v6669_v25, %v6666_v11  ;;  %v9500_v28 = vld [vmem:[%s11181_s23 + $0x60] sm:$0xf]  ;;  %v14081_v59 = vadd.f32 %v3089_v36, %v16312_v10  ;;  %v6680_v45 = vor.u32 %v6679_v61, %v14059_v56  ;;  %v16316_v11 = vld [vmem:[#allocation12_spill] sm:$0xff] }
 0x1b7   : > { %16310 = vst [vmem:[#allocation43_spill] sm:$0xff] %v14070_v17  ;;  %v16314_v17 = vld [vmem:[#allocation26_spill] sm:$0xff]  ;;  %v6683_v35 = vshll.u32 %v9496_v53, 16  ;;  %v10406_v60 = vpop.f32.mrf.mxu0  ;;  %10707 = vmatmul.mubr.msk.f32.gmra.mxu1 %vm755_vm1, %v13739_v0  ;;  %v6690_v44 = vrot.slane %v6688_v40, 4  ;;  %v6693_v54 = vrot.slane %v6691_v47, 5  ;;  %v14090_v25 = vrot.slane %v6697_v22, 5 }
 0x1b8   : > { %16313 = vst [vmem:[#allocation14_spill] sm:$0xff] %v14081_v59  ;;  %v14084_v38 = vadd.f32 %v3518_v58, %v16314_v17  ;;  %v10456_v16 = vpop.f32.mrf.mxu1  ;;  %v6703_v62 = vrot.slane %v6701_v1, 4  ;;  %v14093_v36 = vadd.f32 %v10406_v60, %v16316_v11  ;;  %v16318_v10 = vld [vmem:[#allocation2_spill] sm:$0xff]  ;;  %10709 = vmatprep.mubr.msk.f32.mxu1 %vm755_vm1, %v13744_v24  ;;  %v9499_v61 = vld [vmem:[%s11181_s23 + $0x5c] sm:$0x1]  ;;  %v6712_v53 = vshrl.u32 %v9500_v28, 16 }
 0x1b9   : > { %v14096_v58 = vadd.f32 %v10456_v16, %v16318_v10  ;;  %v6715_v17 = vshll.u32 %v9500_v28, 16  ;;  %v14104_v0 = vsel %vm11233_vm4, %v6647_v63, %v14018_v48  ;;  %v14108_v60 = vsel %vm11233_vm4, %v6657_v29, %v6661_v5  ;;  %v16320_v47 = vld [vmem:[#allocation30_spill] sm:$0xff]  ;;  %v16322_v24 = vld [vmem:[#allocation59_spill] sm:$0xff] }
 0x1ba   : > { %16315 = vst [vmem:[#allocation62_spill] sm:$0xff] %v14084_v38  ;;  %16317 = vst [vmem:[#allocation20_spill] sm:$0xff] %v14093_v36  ;;  %v3092_v38 = vpop.f32.mrf.mxu0  ;;  %v3528_v59 = vpop.f32.mrf.mxu1  ;;  %v6721_v40 = vshll.u32 %v9501_v3, 16  ;;  %v6725_v16 = vshrl.u32 %v9501_v3, 16  ;;  %v6671_v28 = vrot.slane %v6670_v23, 4  ;;  %v6681_v11 = vrot.slane %v6680_v45, 4 }
 0x1bb   : > { %16319 = vst [vmem:[#allocation23_spill] sm:$0xff] %v14096_v58  ;;  %v14111_v22 = vadd.f32 %v3092_v38, %v16320_v47  ;;  %v14114_v1 = vadd.f32 %v3528_v59, %v16322_v24  ;;  %v16324_v58 = vld [vmem:[#allocation64_spill] sm:$0xff]  ;;  %10710 = vmatmul.mubr.msk.f32.gmra.mxu1 %vm755_vm1, %v13755_v20  ;;  %v6685_v29 = vrot.slane %v6683_v35, 5  ;;  %v6694_v63 = vor.u32 %v6693_v54, %v6690_v44  ;;  %v16325_v38 = vld [vmem:[#allocation33_spill] sm:$0xff] }
 0x1bc   : > { %v10409_v10 = vpop.f32.mrf.mxu0  ;;  %v10459_v48 = vpop.f32.mrf.mxu1  ;;  %v6704_v3 = vor.u32 %v6703_v62, %v14090_v25  ;;  %v6707_v5 = vshll.u32 %v9499_v61, 16  ;;  %v16327_v59 = vld [vmem:[#allocation60_spill] sm:$0xff]  ;;  %v16329_v45 = vld [vmem:[#allocation65_spill] sm:$0xff]  ;;  %10712 = vmatprep.mubr.msk.f32.mxu1 %vm755_vm1, %v13757_v52  ;;  %v6714_v20 = vrot.slane %v6712_v53, 4  ;;  %v6717_v35 = vrot.slane %v6715_v17, 5  ;;  %v16339_v52 = vld [vmem:[#allocation34_spill] sm:$0xff] }
 0x1bd   : > { %16321 = vst [vmem:[#allocation63_spill] sm:$0xff] %v14111_v22  ;;  %16323 = vst [vmem:[#allocation27_spill] sm:$0xff] %v14114_v1  ;;  %10660 = vmatmul.mubr.msk.bf16.gmra.mxu0 %vm755_vm1, %v16324_v58  ;;  %v14122_v47 = vadd.f32 %v10409_v10, %v16325_v38  ;;  %v14125_v23 = vadd.f32 %v10459_v48, %v16327_v59  ;;  %v14131_v62 = vmul.f32 %v7282_v51, %v7282_v51  ;;  %v16330_v10 = vld [vmem:[#allocation5_spill] sm:$0xff]  ;;  %v9502_v53 = vld [vmem:[%s11181_s23 + $0x68] sm:$0x1] }
 0x1be   : > { %10663 = vmatprep.mubr.msk.bf16.mxu0 %vm755_vm1, %v16329_v45  ;;  %v3105_v44 = vpop.f32.mrf.mxu0  ;;  %v3538_v54 = vpop.f32.mrf.mxu1  ;;  %v7283_v58 = vunpack.c.l.bf16 %v14104_v0  ;;  %v14134_v61 = vrot.slane %v6721_v40, 5  ;;  %v6727_v24 = vrot.slane %v6725_v16, 4  ;;  %v16332_v38 = vld [vmem:[#allocation61_spill] sm:$0xff]  ;;  %v7284_v45 = vunpack.c.l.bf16 %v14108_v60  ;;  %v9503_v17 = vld [vmem:[%s11181_s23 + $0x6c] sm:$0xf]  ;;  %v16367_v36 = vld [vmem:[#allocation68_spill] sm:$0xff] }
 0x1bf   : > { %16326 = vst [vmem:[#allocation26_spill] sm:$0xff] %v14122_v47  ;;  %16328 = vst [vmem:[#allocation12_spill] sm:$0xff] %v14125_v23  ;;  %v14137_v48 = vadd.f32 %v3105_v44, %v16330_v10  ;;  %v14140_v59 = vadd.f32 %v3538_v54, %v16332_v38  ;;  %v16334_v47 = vld [vmem:[#allocation71_spill] sm:$0xff]  ;;  %v14152_v40 = vsel %vm11233_vm4, %v6671_v28, %v14059_v56  ;;  %v6695_v44 = vrot.slane %v6694_v63, 4  ;;  %v16337_v10 = vld [vmem:[#allocation6_spill] sm:$0xff] }
 0x1c0   : > { %v10410_v51 = vpop.f32.mrf.mxu0  ;;  %v10462_v23 = vpop.f32.mrf.mxu1  ;;  %10713 = vmatmul.mubr.msk.f32.gmra.mxu1 %vm755_vm1, %v16334_v47  ;;  %16335 = vst [vmem:[#allocation59_spill] sm:$0xff] %v14152_v40  ;;  %v14156_v16 = vsel %vm11233_vm4, %v6681_v11, %v6685_v29  ;;  %v6709_v54 = vrot.slane %v6707_v5, 5  ;;  %v6705_v47 = vrot.slane %v6704_v3, 4  ;;  %v6728_v28 = vor.u32 %v6727_v24, %v14134_v61  ;;  %v16341_v5 = vld [vmem:[#allocation7_spill] sm:$0xff] }
 0x1c1   : > { %16331 = vst [vmem:[#allocation2_spill] sm:$0xff] %v14137_v48  ;;  %16333 = vst [vmem:[#allocation30_spill] sm:$0xff] %v14140_v59  ;;  %v14159_v38 = vadd.f32 %v10410_v51, %v16337_v10  ;;  %v14162_v59 = vadd.f32 %v10462_v23, %v16339_v52  ;;  %10715 = vmatprep.mubr.msk.f32.mxu1 %vm755_vm1, %v13776_v12  ;;  %v6718_v48 = vor.u32 %v6717_v35, %v6714_v20  ;;  %v16343_v51 = vld [vmem:[#allocation35_spill] sm:$0xff]  ;;  %v16345_v20 = vld [vmem:[#allocation66_spill] sm:$0xff] }
 0x1c2   : > { %16336 = vst [vmem:[#allocation64_spill] sm:$0xff] %v14156_v16  ;;  %v3108_v1 = vpop.f32.mrf.mxu0  ;;  %v3548_v56 = vpop.f32.mrf.mxu1  ;;  %v6731_v11 = vshll.u32 %v9502_v53, 16  ;;  %v6736_v29 = vshrl.u32 %v9503_v17, 16  ;;  %v6739_v63 = vshll.u32 %v9503_v17, 16  ;;  %v14175_v12 = vmul.f32 %v7283_v58, %v7283_v58  ;;  %v9504_v53 = vld [vmem:[%s11181_s23 + $0x70] sm:$0xf] }
 0x1c3   : > { %16338 = vst [vmem:[#allocation33_spill] sm:$0xff] %v14159_v38  ;;  %16340 = vst [vmem:[#allocation60_spill] sm:$0xff] %v14162_v59  ;;  %v14168_v22 = vadd.f32 %v3108_v1, %v16341_v5  ;;  %v14171_v10 = vadd.f32 %v3548_v56, %v16343_v51  ;;  %v14181_v24 = vmul.f32 %v7284_v45, %v7284_v45  ;;  %v7285_v1 = vunpack.c.l.bf16 %v14152_v40  ;;  %v16347_v17 = vld [vmem:[#allocation11_spill] sm:$0xff] }
 0x1c4   : > { %v10413_v3 = vpop.f32.mrf.mxu0  ;;  %v10465_v35 = vpop.f32.mrf.mxu1  ;;  %10716 = vmatmul.mubr.msk.f32.gmra.mxu1 %vm755_vm1, %v13778_v31  ;;  %v7286_v52 = vunpack.c.l.bf16 %v14156_v16  ;;  %v14188_v58 = vsel %vm11233_vm4, %v6695_v44, %v14090_v25  ;;  %v16349_v5 = vld [vmem:[#allocation51_spill] sm:$0xff]  ;;  %v16352_v31 = vld [vmem:[#allocation74_spill] sm:$0xff]  ;;  %v14203_v45 = vsel %vm11233_vm4, %v6705_v47, %v6709_v54  ;;  %v6719_v23 = vrot.slane %v6718_v48, 4  ;;  %v9506_v25 = vld [vmem:[%s11181_s23 + $0x78] sm:$0xf] }
 0x1c5   : > { %16342 = vst [vmem:[#allocation65_spill] sm:$0xff] %v14168_v22  ;;  %16344 = vst [vmem:[#allocation5_spill] sm:$0xff] %v14171_v10  ;;  %10664 = vmatmul.mubr.msk.bf16.gmra.mxu0 %vm755_vm1, %v16345_v20  ;;  %v14192_v56 = vadd.f32 %v10413_v3, %v16347_v17  ;;  %v14195_v51 = vadd.f32 %v10465_v35, %v16349_v5  ;;  %v16351_v20 = vld [vmem:[#allocation67_spill] sm:$0xff]  ;;  %10718 = vmatprep.mubr.msk.f32.mxu1 %vm755_vm1, %v16352_v31  ;;  %v6729_v22 = vrot.slane %v6728_v28, 4  ;;  %v16354_v35 = vld [vmem:[#allocation16_spill] sm:$0xff] }
 0x1c6   : > { %16346 = vst [vmem:[#allocation61_spill] sm:$0xff] %v14188_v58  ;;  %10667 = vmatprep.mubr.msk.bf16.mxu0 %vm755_vm1, %v16351_v20  ;;  %16353 = vst [vmem:[#allocation34_spill] sm:$0xff] %v14203_v45  ;;  %v3121_v44 = vpop.f32.mrf.mxu0  ;;  %v3558_v10 = vpop.f32.mrf.mxu1  ;;  %v6733_v3 = vrot.slane %v6731_v11, 5  ;;  %v6738_v17 = vrot.slane %v6736_v29, 4  ;;  %v6745_v31 = vshll.u32 %v9504_v53, 16  ;;  %v6749_v59 = vshrl.u32 %v9504_v53, 16 }
 0x1c7   : > { %16348 = vst [vmem:[#allocation71_spill] sm:$0xff] %v14192_v56  ;;  %16350 = vst [vmem:[#allocation6_spill] sm:$0xff] %v14195_v51  ;;  %v6741_v56 = vrot.slane %v6739_v63, 5  ;;  %v14207_v5 = vadd.f32 %v3121_v44, %v16354_v35  ;;  %v16356_v51 = vld [vmem:[#allocation52_spill] sm:$0xff]  ;;  %v14214_v48 = vmul.f32 %v7285_v1, %v7285_v1  ;;  %v14216_v47 = vmul.f32 %v7286_v52, %v7286_v52  ;;  %v16358_v29 = vld [vmem:[#allocation21_spill] sm:$0xff] }
 0x1c8   : > { %v14210_v20 = vadd.f32 %v3558_v10, %v16356_v51  ;;  %v10414_v38 = vpop.f32.mrf.mxu0  ;;  %v10468_v54 = vpop.f32.mrf.mxu1  ;;  %10719 = vmatmul.mubr.msk.f32.gmra.mxu1 %vm755_vm1, %v13825_v14  ;;  %v6760_v28 = vshrl.u32 %v9506_v25, 16  ;;  %v6763_v11 = vshll.u32 %v9506_v25, 16  ;;  %v16360_v44 = vld [vmem:[#allocation53_spill] sm:$0xff]  ;;  %v16362_v10 = vld [vmem:[#allocation75_spill] sm:$0xff]  ;;  %v7287_v53 = vunpack.c.l.bf16 %v14188_v58  ;;  %v16365_v14 = vld [vmem:[#allocation54_spill] sm:$0xff] }
 0x1c9   : > { %16355 = vst [vmem:[#allocation7_spill] sm:$0xff] %v14207_v5  ;;  %v14219_v63 = vadd.f32 %v10414_v38, %v16358_v29  ;;  %v14222_v35 = vadd.f32 %v10468_v54, %v16360_v44  ;;  %10721 = vmatprep.mubr.msk.f32.mxu1 %vm755_vm1, %v16362_v10  ;;  %v9507_v1 = vld [vmem:[%s11181_s23 + $0x7c] sm:$0xf]  ;;  %v7288_v25 = vunpack.c.l.bf16 %v14203_v45  ;;  %v14234_v38 = vsel %vm11233_vm4, %v6719_v23, %v14134_v61  ;;  %v9505_v61 = vld [vmem:[%s11181_s23 + $0x74] sm:$0x1] }
 0x1ca   : > { %16357 = vst [vmem:[#allocation35_spill] sm:$0xff] %v14210_v20  ;;  %v3124_v52 = vpop.f32.mrf.mxu0  ;;  %v3568_v51 = vpop.f32.mrf.mxu1  ;;  %v14238_v54 = vsel %vm11233_vm4, %v6729_v22, %v6733_v3  ;;  %v6742_v29 = vor.u32 %v6741_v56, %v6738_v17  ;;  %v16363_v44 = vld [vmem:[#allocation25_spill] sm:$0xff]  ;;  %v6751_v20 = vrot.slane %v6749_v59, 4  ;;  %v6762_v22 = vrot.slane %v6760_v28, 4  ;;  %v16377_v58 = vld [vmem:[#allocation8_spill] sm:$0xff] }
 0x1cb   : > { %16359 = vst [vmem:[#allocation66_spill] sm:$0xff] %v14219_v63  ;;  %16361 = vst [vmem:[#allocation11_spill] sm:$0xff] %v14222_v35  ;;  %v14241_v10 = vadd.f32 %v3124_v52, %v16363_v44  ;;  %v14244_v35 = vadd.f32 %v3568_v51, %v16365_v14  ;;  %v6747_v63 = vrot.slane %v6745_v31, 5  ;;  %v6765_v23 = vrot.slane %v6763_v11, 5  ;;  %v16368_v17 = vld [vmem:[#allocation29_spill] sm:$0xff]  ;;  %v16370_v14 = vld [vmem:[#allocation55_spill] sm:$0xff] }
 0x1cc   : > { %v10417_v5 = vpop.f32.mrf.mxu0  ;;  %v10471_v16 = vpop.f32.mrf.mxu1  ;;  %10722 = vmatmul.mubr.msk.f32.gmra.mxu1 %vm755_vm1, %v13839_v21  ;;  %v6769_v56 = vshll.u32 %v9507_v1, 16  ;;  %v6773_v3 = vshrl.u32 %v9507_v1, 16  ;;  %v16372_v59 = vld [vmem:[#allocation69_spill] sm:$0xff]  ;;  %v14263_v21 = vsel %vm804_vm0, %v13994_v42, 0  ;;  %v14267_v11 = vmul.f32 %v7287_v53, %v7287_v53  ;;  %v9509_v44 = vld [vmem:[%s11181_s23 + $0x84] sm:$0xf] }
 0x1cd   : > { %16364 = vst [vmem:[#allocation51_spill] sm:$0xff] %v14241_v10  ;;  %16366 = vst [vmem:[#allocation67_spill] sm:$0xff] %v14244_v35  ;;  %10668 = vmatmul.mubr.msk.bf16.gmra.mxu0 %vm755_vm1, %v16367_v36  ;;  %v14252_v52 = vadd.f32 %v10417_v5, %v16368_v17  ;;  %v14255_v31 = vadd.f32 %v10471_v16, %v16370_v14  ;;  %10724 = vmatprep.mubr.msk.f32.mxu1 %vm755_vm1, %v13861_v18  ;;  %v7289_v1 = vunpack.c.l.bf16 %v14234_v38  ;;  %v16373_v17 = vld [vmem:[#allocation32_spill] sm:$0xff]  ;;  %v16375_v42 = vld [vmem:[#allocation41_spill] sm:$0xff] }
 0x1ce   : > { %10671 = vmatprep.mubr.msk.bf16.mxu0 %vm755_vm1, %v16372_v59  ;;  %v3137_v28 = vpop.f32.mrf.mxu0  ;;  %v3578_v5 = vpop.f32.mrf.mxu1  ;;  %v14269_v16 = vmul.f32 %v7288_v25, %v7288_v25  ;;  %v7290_v51 = vunpack.c.l.bf16 %v14238_v54  ;;  %v6743_v59 = vrot.slane %v6742_v29, 4  ;;  %v6755_v36 = vshll.u32 %v9505_v61, 16  ;;  %v9508_v29 = vld [vmem:[%s11181_s23 + $0x80] sm:$0x1] }
 0x1cf   : > { %16369 = vst [vmem:[#allocation74_spill] sm:$0xff] %v14252_v52  ;;  %16371 = vst [vmem:[#allocation16_spill] sm:$0xff] %v14255_v31  ;;  %v14275_v18 = vadd.f32 %v3137_v28, %v16373_v17  ;;  %v14278_v14 = vadd.f32 %v3578_v5, %v16375_v42  ;;  %v9510_v31 = vld [vmem:[%s11181_s23 + $0x88] sm:$0xf]  ;;  %v6752_v25 = vor.u32 %v6751_v20, %v6747_v63  ;;  %v6771_v10 = vrot.slane %v6769_v56, 5  ;;  %v16379_v28 = vld [vmem:[#allocation56_spill] sm:$0xff] }
 0x1d0   : > { %v10418_v52 = vpop.f32.mrf.mxu0  ;;  %v10474_v53 = vpop.f32.mrf.mxu1  ;;  %10725 = vmatmul.mubr.msk.f32.gmra.mxu1 %vm755_vm1, %v13880_v39  ;;  %v6766_v35 = vor.u32 %v6765_v23, %v6762_v22  ;;  %v6775_v45 = vrot.slane %v6773_v3, 4  ;;  %v6784_v61 = vshrl.u32 %v9509_v44, 16  ;;  %v6787_v5 = vshll.u32 %v9509_v44, 16  ;;  %v16381_v23 = vld [vmem:[#allocation13_spill] sm:$0xff]  ;;  %v16383_v3 = vld [vmem:[#allocation46_spill] sm:$0xff] }
 0x1d1   : > { %16374 = vst [vmem:[#allocation52_spill] sm:$0xff] %v14275_v18  ;;  %16376 = vst [vmem:[#allocation21_spill] sm:$0xff] %v14278_v14  ;;  %v14284_v40 = vadd.f32 %v10418_v52, %v16377_v58  ;;  %v14287_v17 = vadd.f32 %v10474_v53, %v16379_v28  ;;  %10727 = vmatprep.mubr.msk.f32.mxu1 %vm755_vm1, %v13907_v37  ;;  %v14292_v39 = vmul.f32 %v7289_v1, %v7289_v1  ;;  %v9512_v53 = vld [vmem:[%s11181_s23 + $0x90] sm:$0xf]  ;;  %v16385_v1 = vld [vmem:[#allocation70_spill] sm:$0xff] }
 0x1d2   : > { %v3140_v42 = vpop.f32.mrf.mxu0  ;;  %v3588_v14 = vpop.f32.mrf.mxu1  ;;  %v14294_v20 = vmul.f32 %v7290_v51, %v7290_v51  ;;  %v6793_v22 = vshll.u32 %v9510_v31, 16  ;;  %v6797_v58 = vshrl.u32 %v9510_v31, 16  ;;  %v14304_v37 = vsel %vm11233_vm4, %v6743_v59, %v6747_v63  ;;  %v16388_v63 = vld [vmem:[#allocation57_spill] sm:$0xff]  ;;  %v16390_v59 = vld [vmem:[#allocation72_spill] sm:$0xff] }
 0x1d3   : > { %16378 = vst [vmem:[#allocation53_spill] sm:$0xff] %v14284_v40  ;;  %16380 = vst [vmem:[#allocation75_spill] sm:$0xff] %v14287_v17  ;;  %v14297_v56 = vadd.f32 %v3140_v42, %v16381_v23  ;;  %v14300_v52 = vadd.f32 %v3588_v14, %v16383_v3  ;;  %v6757_v44 = vrot.slane %v6755_v36, 5  ;;  %v6753_v31 = vrot.slane %v6752_v25, 4  ;;  %v9513_v14 = vld [vmem:[%s11181_s23 + $0x94] sm:$0xf] }
 0x1d4   : > { %v10421_v28 = vpop.f32.mrf.mxu0  ;;  %v10477_v51 = vpop.f32.mrf.mxu1  ;;  %10728 = vmatmul.mubr.msk.f32.gmra.mxu1 %vm755_vm1, %v13910_v57  ;;  %v6767_v42 = vrot.slane %v6766_v35, 4  ;;  %v6776_v23 = vor.u32 %v6775_v45, %v6771_v10  ;;  %v16386_v3 = vld [vmem:[#allocation36_spill] sm:$0xff]  ;;  %v6789_v57 = vrot.slane %v6787_v5, 5  ;;  %v14322_v45 = vrot.slane %v6793_v22, 5 }
 0x1d5   : > { %16382 = vst [vmem:[#allocation25_spill] sm:$0xff] %v14297_v56  ;;  %16384 = vst [vmem:[#allocation54_spill] sm:$0xff] %v14300_v52  ;;  %10672 = vmatmul.mubr.msk.bf16.gmra.mxu0 %vm755_vm1, %v16385_v1  ;;  %v6779_v56 = vshll.u32 %v9508_v29, 16  ;;  %v14313_v52 = vadd.f32 %v10421_v28, %v16386_v3  ;;  %v14316_v36 = vadd.f32 %v10477_v51, %v16388_v63  ;;  %10730 = vmatprep.mubr.msk.f32.mxu1 %vm755_vm1, %v13944_v15  ;;  %v16391_v28 = vld [vmem:[#allocation9_spill] sm:$0xff]  ;;  %v16392_v51 = vld [vmem:[#allocation58_spill] sm:$0xff] }
 0x1d6   : > { %10675 = vmatprep.mubr.msk.bf16.mxu0 %vm755_vm1, %v16390_v59  ;;  %v6786_v1 = vrot.slane %v6784_v61, 4  ;;  %v3153_v25 = vpop.f32.mrf.mxu0  ;;  %v3598_v35 = vpop.f32.mrf.mxu1  ;;  %v6799_v29 = vrot.slane %v6797_v58, 4  ;;  %v6808_v17 = vshrl.u32 %v9512_v53, 16  ;;  %v6811_v40 = vshll.u32 %v9512_v53, 16  ;;  %v16393_v53 = vld [vmem:[#allocation15_spill] sm:$0xff] }
 0x1d7   : > { %16387 = vst [vmem:[#allocation68_spill] sm:$0xff] %v14313_v52  ;;  %16389 = vst [vmem:[#allocation29_spill] sm:$0xff] %v14316_v36  ;;  %v14325_v3 = vadd.f32 %v3153_v25, %v16391_v28  ;;  %v14328_v63 = vadd.f32 %v3598_v35, %v16392_v51  ;;  %v9511_v36 = vld [vmem:[%s11181_s23 + $0x8c] sm:$0x1]  ;;  %v6817_v59 = vshll.u32 %v9513_v14, 16  ;;  %v6821_v52 = vshrl.u32 %v9513_v14, 16 }
 0x1d8   : > { %v10422_v18 = vpop.f32.mrf.mxu0  ;;  %v10480_v15 = vpop.f32.mrf.mxu1  ;;  %10731 = vmatmul.mubr.msk.f32.gmra.mxu1 %vm755_vm1, %v13947_v32  ;;  %v14335_v61 = vsel %vm11233_vm4, %v6753_v31, %v6757_v44  ;;  %v7291_v5 = vunpack.c.l.bf16 %v14304_v37  ;;  %v6777_v22 = vrot.slane %v6776_v23, 4  ;;  %v6781_v58 = vrot.slane %v6779_v56, 5  ;;  %v16394_v35 = vld [vmem:[#allocation76_spill] sm:$0xff] }
 0x1d9   : > { %v14339_v25 = vadd.f32 %v10422_v18, %v16393_v53  ;;  %v14342_v28 = vadd.f32 %v10480_v15, %v16394_v35  ;;  %10769 = vmatprep.mubr.msk.f32.mxu1 %vm755_vm1, %v13978_v41  ;;  %v14348_v32 = vsel %vm11233_vm4, %v6767_v42, %v6771_v10  ;;  %v6790_v14 = vor.u32 %v6789_v57, %v6786_v1  ;;  %v16396_v15 = vld [vmem:[#allocation39_spill] sm:$0xff]  ;;  %v16398_v42 = vld [vmem:[#allocation73_spill] sm:$0xff]  ;;  %v16399_v57 = vld [vmem:[#allocation40_spill] sm:$0xff] }
 0x1da   : > { %v3156_v44 = vpop.f32.mrf.mxu0  ;;  %v3608_v31 = vpop.f32.mrf.mxu1  ;;  %v6800_v51 = vor.u32 %v6799_v29, %v14322_v45  ;;  %v6803_v56 = vshll.u32 %v9511_v36, 16  ;;  %v6810_v23 = vrot.slane %v6808_v17, 4  ;;  %v6813_v18 = vrot.slane %v6811_v40, 5  ;;  %v9514_v36 = vld [vmem:[%s11181_s23 + $0x98] sm:$0x1] }
 0x1db   : > { %16395 = vst [vmem:[#allocation55_spill] sm:$0xff] %v14342_v28  ;;  %v14352_v53 = vadd.f32 %v3156_v44, %v13847_v26  ;;  %v14355_v35 = vadd.f32 %v3608_v31, %v16396_v15  ;;  %v14357_v41 = vrot.slane %v6817_v59, 5  ;;  %v6823_v28 = vrot.slane %v6821_v52, 4  ;;  %v16401_v59 = vld [vmem:[#allocation22_spill] sm:$0xff]  ;;  %v16403_v31 = vld [vmem:[#allocation77_spill] sm:$0xff] }
 0x1dc   : > { %v10425_v10 = vpop.f32.mrf.mxu0  ;;  %v10519_v1 = vpop.f32.mrf.mxu1  ;;  %10770 = vmatmul.mubr.msk.f32.vlgmr.msra.gmra.mxu1 %vm755_vm1, %v13980_v34  ;;  %v7292_v40 = vunpack.c.l.bf16 %v14335_v61  ;;  %v14366_v17 = vmul.f32 %v7291_v5, %v7291_v5  ;;  %v16404_v34 = vld [vmem:[#allocation78_spill] sm:$0xff]  ;;  %v7293_v15 = vunpack.c.l.bf16 %v14348_v32  ;;  %v14383_v5 = vsel %vm11233_vm4, %v6777_v22, %v6781_v58 }
 0x1dd   : > { %16397 = vst [vmem:[#allocation69_spill] sm:$0xff] %v14355_v35  ;;  %10676 = vmatmul.mubr.msk.bf16.gmra.mxu0 %vm755_vm1, %v16398_v42  ;;  %v14372_v29 = vadd.f32 %v10425_v10, %v16399_v57  ;;  %v14375_v44 = vadd.f32 %v10519_v1, %v16401_v59  ;;  %10852 = vmatpush3.msra.mxu1 %v16404_v34  ;;  %v9515_v42 = vld [vmem:[%s11181_s23 + $0x9c] sm:$0xf]  ;;  %v9516_v26 = vld [vmem:[%s11181_s23 + $0xa0] sm:$0xf]  ;;  %v6791_v10 = vrot.slane %v6790_v14, 4 }
 0x1de   : > { %10679 = vmatprep.mubr.msk.bf16.mxu0 %vm755_vm1, %v16403_v31  ;;  %v3169_v52 = vpop.f32.mrf.mxu0  ;;  %v4633_v35 = vpop.f32.mrf.mxu1  ;;  %10772 = vmatprep.mubr.msk.f32.mxu1 %vm755_vm1, %v14033_v13  ;;  %v6801_v1 = vrot.slane %v6800_v51, 4  ;;  %v6805_v57 = vrot.slane %v6803_v56, 5  ;;  %v6814_v59 = vor.u32 %v6813_v18, %v6810_v23  ;;  %v6824_v22 = vor.u32 %v6823_v28, %v14357_v41 }
 0x1df   : > { %16400 = vst [vmem:[#allocation32_spill] sm:$0xff] %v14372_v29  ;;  %16402 = vst [vmem:[#allocation41_spill] sm:$0xff] %v14375_v44  ;;  %v14390_v31 = vadd.f32 %v3169_v52, %v13891_v33  ;;  %v14393_v34 = vadd.f32 %v4633_v35, %v13894_v30  ;;  %v6827_v58 = vshll.u32 %v9514_v36, 16  ;;  %v6832_v13 = vshrl.u32 %v9515_v42, 16  ;;  %v9518_v52 = vld [vmem:[%s11181_s23 + $0xa8] sm:$0xf] }
 0x1e0   : > { %v10426_v44 = vpop.f32.mrf.mxu0  ;;  %v10522_v29 = vpop.f32.mrf.mxu1  ;;  %10773 = vmatmul.mubr.msk.f32.gmra.mxu1 %vm755_vm1, %v14035_v7  ;;  %v6835_v14 = vshll.u32 %v9515_v42, 16  ;;  %v6841_v51 = vshll.u32 %v9516_v26, 16  ;;  %v6845_v56 = vshrl.u32 %v9516_v26, 16  ;;  %v14406_v30 = vmul.f32 %v7292_v40, %v7292_v40 }
 0x1e1   : > { %v14399_v23 = vadd.f32 %v10426_v44, %v13900_v49  ;;  %v14402_v33 = vadd.f32 %v10522_v29, %v13903_v8  ;;  %10775 = vmatprep.mubr.msk.f32.mxu1 %vm755_vm1, %v14076_v19  ;;  %v7294_v28 = vunpack.c.l.bf16 %v14383_v5  ;;  %v14409_v35 = vmul.f32 %v7293_v15, %v7293_v15  ;;  %v16405_v15 = vld [vmem:[#allocation79_spill] sm:$0xff] }
 0x1e2   : > { %v3172_v18 = vpop.f32.mrf.mxu0  ;;  %v4643_v7 = vpop.f32.mrf.mxu1  ;;  %v14414_v26 = vsel %vm11233_vm4, %v6791_v10, %v14322_v45  ;;  %v14418_v49 = vsel %vm11233_vm4, %v6801_v1, %v6805_v57  ;;  %v6815_v8 = vrot.slane %v6814_v59, 4  ;;  %v6825_v36 = vrot.slane %v6824_v22, 4  ;;  %v16406_v57 = vld [vmem:[#allocation42_spill] sm:$0xff] }
 0x1e3   : > { %v14422_v19 = vadd.f32 %v3172_v18, %v13923_v9  ;;  %v14425_v40 = vadd.f32 %v4643_v7, %v13926_v2  ;;  %v6829_v29 = vrot.slane %v6827_v58, 5  ;;  %v6834_v42 = vrot.slane %v6832_v13, 4  ;;  %v14448_v58 = vld [vmem:[%s11181_s23 + $0xa4] sm:$0x1]  ;;  %v16410_v7 = vld [vmem:[#allocation28_spill] sm:$0xff] }
 0x1e4   : > { %v10429_v44 = vpop.f32.mrf.mxu0  ;;  %v10525_v45 = vpop.f32.mrf.mxu1  ;;  %10776 = vmatmul.mubr.msk.f32.gmra.mxu1 %vm755_vm1, %v14131_v62  ;;  %v6837_v10 = vrot.slane %v6835_v14, 5  ;;  %v14431_v1 = vrot.slane %v6841_v51, 5  ;;  %v6847_v9 = vrot.slane %v6845_v56, 4  ;;  %v16407_v22 = vcombine.low %v13916_v46, %v13920_v4  ;;  %16408 = vst [vmem:[#allocation8_spill] sm:$0xff] %v14448_v58  ;;  %v14456_v4 = vld [vmem:[%s11181_s23 + $0xac] sm:$0xf] }
 0x1e5   : > { %10680 = vmatmul.mubr.msk.bf16.gmra.mxu0 %vm755_vm1, %v16405_v15  ;;  %v14434_v2 = vadd.f32 %v10429_v44, %v13935_v27  ;;  %v14437_v59 = vadd.f32 %v10525_v45, %v16406_v57  ;;  %10778 = vmatprep.mubr.msk.f32.mxu1 %vm755_vm1, %v14175_v12  ;;  %v14445_v62 = vmul.f32 %v7294_v28, %v7294_v28  ;;  %v6856_v13 = vshrl.u32 %v9518_v52, 16  ;;  %v16412_v28 = vld [vmem:[#allocation44_spill] sm:$0xff] }
 0x1e6   : > { %10735 = vmatprep.mubr.msk.bf16.mxu0 %vm755_vm1, %v16407_v22  ;;  %v3185_v14 = vpop.f32.mrf.mxu0  ;;  %v4653_v27 = vpop.f32.mrf.mxu1  ;;  %v7295_v56 = vunpack.c.l.bf16 %v14414_v26  ;;  %16409 = vst [vmem:[#allocation56_spill] sm:$0xff] %v14456_v4  ;;  %v6859_v18 = vshll.u32 %v9518_v52, 16  ;;  %v7296_v15 = vunpack.c.l.bf16 %v14418_v49  ;;  %v14468_v45 = vsel %vm11233_vm4, %v6815_v8, %v14357_v41  ;;  %v9521_v57 = vld [vmem:[%s11181_s23 + $0xb4] sm:$0xf]  ;;  %v16415_v41 = vld [vmem:[#allocation45_spill] sm:$0xff] }
 0x1e7   : > { %v14459_v12 = vadd.f32 %v3185_v14, %v16410_v7  ;;  %v14462_v44 = vadd.f32 %v4653_v27, %v16412_v28  ;;  %v14475_v52 = vsel %vm11233_vm4, %v6825_v36, %v6829_v29  ;;  %v6838_v14 = vor.u32 %v6837_v10, %v6834_v42 }
 0x1e8   : > { %v10430_v22 = vpop.f32.mrf.mxu0  ;;  %v10528_v51 = vpop.f32.mrf.mxu1  ;;  %10779 = vmatmul.mubr.msk.f32.gmra.mxu1 %vm755_vm1, %v14181_v24  ;;  %v6848_v27 = vor.u32 %v6847_v9, %v14431_v1  ;;  %v6851_v7 = vshll.u32 %v14448_v58, 16  ;;  %v6858_v46 = vrot.slane %v6856_v13, 4  ;;  %v6865_v24 = vshll.u32 %v14456_v4, 16  ;;  %v16417_v58 = vld [vmem:[#allocation47_spill] sm:$0xff] }
 0x1e9   : > { %16411 = vst [vmem:[#allocation13_spill] sm:$0xff] %v14459_v12  ;;  %16413 = vst [vmem:[#allocation46_spill] sm:$0xff] %v14462_v44  ;;  %v14480_v28 = vadd.f32 %v10430_v22, %v13971_v55  ;;  %v14483_v8 = vadd.f32 %v10528_v51, %v16415_v41  ;;  %10781 = vmatprep.mubr.msk.f32.mxu1 %vm755_vm1, %v14214_v48  ;;  %v6861_v29 = vrot.slane %v6859_v18, 5  ;;  %v6869_v42 = vshrl.u32 %v14456_v4, 16  ;;  %v16419_v22 = vld [vmem:[#allocation18_spill] sm:$0xff]  ;;  %v16430_v12 = vld [vmem:[#allocation49_spill] sm:$0xff] }
 0x1ea   : > { %v3188_v44 = vpop.f32.mrf.mxu0  ;;  %v4663_v36 = vpop.f32.mrf.mxu1  ;;  %v6880_v10 = vshrl.u32 %v9521_v57, 16  ;;  %v6883_v9 = vshll.u32 %v9521_v57, 16  ;;  %v14495_v41 = vmul.f32 %v7295_v56, %v7295_v56  ;;  %v14497_v48 = vmul.f32 %v7296_v15, %v7296_v15  ;;  %v16425_v15 = vld [vmem:[#allocation48_spill] sm:$0xff] }
 0x1eb   : > { %16414 = vst [vmem:[#allocation70_spill] sm:$0xff] %v14480_v28  ;;  %16416 = vst [vmem:[#allocation36_spill] sm:$0xff] %v14483_v8  ;;  %v14490_v55 = vadd.f32 %v3188_v44, %v16417_v58  ;;  %v14493_v51 = vadd.f32 %v4663_v36, %v16419_v22  ;;  %v16421_v8 = vld [vmem:[#allocation31_spill] sm:$0xff]  ;;  %v7297_v58 = vunpack.c.l.bf16 %v14468_v45  ;;  %v7298_v44 = vunpack.c.l.bf16 %v14475_v52  ;;  %v14508_v36 = vld [vmem:[%s11181_s23 + $0xb8] sm:$0xf] }
 0x1ec   : > { %v10485_v13 = vpop.f32.mrf.mxu0  ;;  %v16422_v28 = vld [vmem:[#allocation3_spill] sm:$0xff]  ;;  %v10531_v4 = vpop.f32.mrf.mxu1  ;;  %10782 = vmatmul.mubr.msk.f32.gmra.mxu1 %vm755_vm1, %v14216_v47  ;;  %v6839_v57 = vrot.slane %v6838_v14, 4  ;;  %v6853_v56 = vrot.slane %v6851_v7, 5  ;;  %16424 = vst [vmem:[#allocation9_spill] sm:$0xff] %v14508_v36  ;;  %v16429_v47 = vcombine.low %v14004_v43, %v14048_v50  ;;  %v9524_v14 = vld [vmem:[%s11181_s23 + $0xc0] sm:$0xf] }
 0x1ed   : > { %16418 = vst [vmem:[#allocation57_spill] sm:$0xff] %v14490_v55  ;;  %16420 = vst [vmem:[#allocation72_spill] sm:$0xff] %v14493_v51  ;;  %v16423_v18 = vcombine.low %v16421_v8, %v16422_v28  ;;  %v14511_v22 = vadd.f32 %v10485_v13, %v16425_v15  ;;  %v16427_v28 = vld [vmem:[#allocation4_spill] sm:$0xff]  ;;  %v6867_v51 = vrot.slane %v6865_v24, 5  ;;  %10784 = vmatprep.mubr.msk.f32.mxu1 %vm755_vm1, %v14267_v11  ;;  %v6871_v15 = vrot.slane %v6869_v42, 4  ;;  %v16433_v42 = vld [vmem:[#allocation19_spill] sm:$0xff] }
 0x1ee   : > { %v14515_v8 = vadd.f32 %v10531_v4, %v16427_v28  ;;  %v4248_v7 = vpop.f32.mrf.mxu0  ;;  %v4673_v55 = vpop.f32.mrf.mxu1  ;;  %v6862_v13 = vor.u32 %v6861_v29, %v6858_v46  ;;  %v16431_v28 = vld [vmem:[#allocation24_spill] sm:$0xff]  ;;  %v6889_v50 = vshll.u32 %v14508_v36, 16  ;;  %v14537_v11 = vmul.f32 %v7297_v58, %v7297_v58  ;;  %v14559_v58 = vld [vmem:[%s11181_s23 + $0xc4] sm:$0xf] }
 0x1ef   : > { %10736 = vmatmul.mubr.msk.bf16.vlgmr.msra.gmra.mxu0 %vm755_vm1, %v16423_v18  ;;  %16426 = vst [vmem:[#allocation58_spill] sm:$0xff] %v14511_v22  ;;  %v6849_v18 = vrot.slane %v6848_v27, 4  ;;  %v6882_v22 = vrot.slane %v6880_v10, 4  ;;  %v14525_v4 = vadd.f32 %v4248_v7, %v16430_v12  ;;  %v14531_v43 = vld [vmem:[%s11181_s23 + $0xb0] sm:$0x1]  ;;  %v6893_v27 = vshrl.u32 %v14508_v36, 16 }
 0x1f0   : > { %10818 = vmatpush3.bf16.msra.mxu0 %v14263_v21  ;;  %16428 = vst [vmem:[#allocation15_spill] sm:$0xff] %v14515_v8  ;;  %10739 = vmatprep.mubr.msk.bf16.mxu0 %vm755_vm1, %v16429_v47  ;;  %v6885_v21 = vrot.slane %v6883_v9, 5  ;;  %v14528_v8 = vadd.f32 %v4673_v55, %v16431_v28  ;;  %16432 = vst [vmem:[#allocation76_spill] sm:$0xff] %v14531_v43  ;;  %v10486_v24 = vpop.f32.mrf.mxu0  ;;  %v10534_v47 = vpop.f32.mrf.mxu1  ;;  %v14539_v46 = vmul.f32 %v7298_v44, %v7298_v44  ;;  %v16435_v9 = vld [vmem:[#allocation50_spill] sm:$0xff] }
 0x1f1   : > { %10785 = vmatmul.mubr.msk.f32.gmra.mxu1 %vm755_vm1, %v14269_v16  ;;  %v6904_v12 = vshrl.u32 %v9524_v14, 16  ;;  %v6907_v29 = vshll.u32 %v9524_v14, 16  ;;  %v14542_v10 = vadd.f32 %v10486_v24, %v16433_v42  ;;  %v14545_v55 = vadd.f32 %v10534_v47, %v16435_v9  ;;  %v16439_v36 = vld [vmem:[#allocation38_spill] sm:$0xff] }
 0x1f2   : > { %10787 = vmatprep.mubr.msk.f32.mxu1 %vm755_vm1, %v14292_v39  ;;  %v14552_v7 = vsel %vm11233_vm4, %v6839_v57, %v14431_v1  ;;  %v14556_v16 = vsel %vm11233_vm4, %v6849_v18, %v6853_v56  ;;  %v4251_v44 = vpop.f32.mrf.mxu0  ;;  %v4683_v14 = vpop.f32.mrf.mxu1  ;;  %v6863_v28 = vrot.slane %v6862_v13, 4  ;;  %v6872_v24 = vor.u32 %v6871_v15, %v6867_v51  ;;  %v16437_v39 = vld [vmem:[#allocation37_spill] sm:$0xff] }
 0x1f3   : > { %16434 = vst [vmem:[#allocation39_spill] sm:$0xff] %v14542_v10  ;;  %16436 = vst [vmem:[#allocation73_spill] sm:$0xff] %v14545_v55  ;;  %v6875_v47 = vshll.u32 %v14531_v43, 16  ;;  %v6886_v42 = vor.u32 %v6885_v21, %v6882_v22  ;;  %v14563_v9 = vadd.f32 %v4251_v44, %v16437_v39  ;;  %v14566_v1 = vadd.f32 %v4683_v14, %v16439_v36  ;;  %v14575_v13 = vld [vmem:[%s11181_s23 + $0xbc] sm:$0x1]  ;;  %v16445_v44 = vld [vmem:[#allocation43_spill] sm:$0xff] }
 0x1f4   : > { %v6891_v57 = vrot.slane %v6889_v50, 5  ;;  %v6895_v55 = vrot.slane %v6893_v27, 4  ;;  %v10489_v56 = vpop.f32.mrf.mxu0  ;;  %v16441_v18 = vcombine.low %v14104_v0, %v14108_v60  ;;  %v10537_v10 = vpop.f32.mrf.mxu1  ;;  %16442 = vst [vmem:[#allocation77_spill] sm:$0xff] %v14575_v13  ;;  %v6906_v22 = vrot.slane %v6904_v12, 4  ;;  %v16443_v50 = vld [vmem:[#allocation17_spill] sm:$0xff]  ;;  %v16447_v60 = vld [vmem:[#allocation59_spill] sm:$0xff] }
 0x1f5   : > { %16438 = vst [vmem:[#allocation40_spill] sm:$0xff] %v14563_v9  ;;  %16440 = vst [vmem:[#allocation22_spill] sm:$0xff] %v14566_v1  ;;  %10788 = vmatmul.mubr.msk.f32.gmra.mxu1 %vm755_vm1, %v14294_v20  ;;  %v6909_v15 = vrot.slane %v6907_v29, 5  ;;  %v6913_v21 = vshll.u32 %v14559_v58, 16  ;;  %v6917_v36 = vshrl.u32 %v14559_v58, 16  ;;  %v14580_v27 = vadd.f32 %v10489_v56, %v16443_v50  ;;  %v16448_v14 = vld [vmem:[#allocation64_spill] sm:$0xff] }
 0x1f6   : > { %v14583_v0 = vadd.f32 %v10537_v10, %v16445_v44  ;;  %v16449_v39 = vcombine.low %v16447_v60, %v16448_v14  ;;  %10790 = vmatprep.mubr.msk.f32.mxu1 %vm755_vm1, %v14366_v17  ;;  %v7299_v20 = vunpack.c.l.bf16 %v14552_v7  ;;  %v7300_v12 = vunpack.c.l.bf16 %v14556_v16  ;;  %v4264_v29 = vpop.f32.mrf.mxu0  ;;  %v16450_v60 = vld [vmem:[#allocation14_spill] sm:$0xff] }
 0x1f7   : > { %10740 = vmatmul.mubr.msk.bf16.gmra.mxu0 %vm755_vm1, %v16441_v18  ;;  %16444 = vst [vmem:[#allocation78_spill] sm:$0xff] %v14580_v27  ;;  %v4693_v18 = vpop.f32.mrf.mxu1  ;;  %v14595_v56 = vsel %vm11233_vm4, %v6863_v28, %v6867_v51  ;;  %v6873_v10 = vrot.slane %v6872_v24, 4  ;;  %v6877_v44 = vrot.slane %v6875_v47, 5  ;;  %v14600_v14 = vadd.f32 %v4264_v29, %v16450_v60  ;;  %v9527_v27 = vld [vmem:[%s11181_s23 + $0xcc] sm:$0xf]  ;;  %v16454_v29 = vld [vmem:[#allocation20_spill] sm:$0xff] }
 0x1f8   : > { %16446 = vst [vmem:[#allocation79_spill] sm:$0xff] %v14583_v0  ;;  %10743 = vmatprep.mubr.msk.bf16.mxu0 %vm755_vm1, %v16449_v39  ;;  %v16452_v39 = vld [vmem:[#allocation62_spill] sm:$0xff]  ;;  %v6896_v43 = vor.u32 %v6895_v55, %v6891_v57  ;;  %v6899_v0 = vshll.u32 %v14575_v13, 16  ;;  %v10490_v1 = vpop.f32.mrf.mxu0  ;;  %v6887_v51 = vrot.slane %v6886_v42, 4  ;;  %v6910_v28 = vor.u32 %v6909_v15, %v6906_v22  ;;  %v14622_v13 = vld [vmem:[%s11181_s23 + $0xc8] sm:$0x1] }
 0x1f9   : > { %16451 = vst [vmem:[#allocation42_spill] sm:$0xff] %v14600_v14  ;;  %v14603_v17 = vadd.f32 %v4693_v18, %v16452_v39  ;;  %v10540_v9 = vpop.f32.mrf.mxu1  ;;  %10791 = vmatmul.mubr.msk.f32.gmra.mxu1 %vm755_vm1, %v14406_v30  ;;  %v6915_v24 = vrot.slane %v6913_v21, 5  ;;  %v6919_v47 = vrot.slane %v6917_v36, 4  ;;  %v14610_v60 = vadd.f32 %v10490_v1, %v16454_v29  ;;  %v16456_v18 = vld [vmem:[#allocation23_spill] sm:$0xff]  ;;  %v14630_v15 = vld [vmem:[%s11181_s23 + $0xd0] sm:$0xf] }
 0x1fa   : > { %v14613_v39 = vadd.f32 %v10540_v9, %v16456_v18  ;;  %10793 = vmatprep.mubr.msk.f32.mxu1 %vm755_vm1, %v14409_v35  ;;  %v14617_v55 = vmul.f32 %v7299_v20, %v7299_v20  ;;  %v14619_v50 = vmul.f32 %v7300_v12, %v7300_v12  ;;  %v4267_v30 = vpop.f32.mrf.mxu0  ;;  %v7301_v22 = vunpack.c.l.bf16 %v14595_v56  ;;  %v16458_v36 = vld [vmem:[#allocation63_spill] sm:$0xff] }
 0x1fb   : > { %16453 = vst [vmem:[#allocation28_spill] sm:$0xff] %v14603_v17  ;;  %16455 = vst [vmem:[#allocation44_spill] sm:$0xff] %v14610_v60  ;;  %v4703_v42 = vpop.f32.mrf.mxu1  ;;  %v14627_v1 = vsel %vm11233_vm4, %v6873_v10, %v6877_v44  ;;  %v6928_v9 = vshrl.u32 %v9527_v27, 16  ;;  %v6931_v21 = vshll.u32 %v9527_v27, 16  ;;  %v14633_v35 = vadd.f32 %v4267_v30, %v16458_v36  ;;  %v16459_v20 = vld [vmem:[#allocation27_spill] sm:$0xff]  ;;  %v16460_v60 = vld [vmem:[#allocation61_spill] sm:$0xff] }
 0x1fc   : > { %16457 = vst [vmem:[#allocation45_spill] sm:$0xff] %v14613_v39  ;;  %v14636_v12 = vadd.f32 %v4703_v42, %v16459_v20  ;;  %v6897_v29 = vrot.slane %v6896_v43, 4  ;;  %v6901_v18 = vrot.slane %v6899_v0, 5  ;;  %v10493_v39 = vpop.f32.mrf.mxu0  ;;  %v16461_v17 = vld [vmem:[#allocation34_spill] sm:$0xff]  ;;  %v14646_v27 = vsel %vm11233_vm4, %v6887_v51, %v6891_v57  ;;  %v16465_v36 = vld [vmem:[#allocation12_spill] sm:$0xff] }
 0x1fd   : > { %v16462_v14 = vcombine.low %v16460_v60, %v16461_v17  ;;  %v10543_v10 = vpop.f32.mrf.mxu1  ;;  %10794 = vmatmul.mubr.msk.f32.gmra.mxu1 %vm755_vm1, %v14445_v62  ;;  %v6911_v44 = vrot.slane %v6910_v28, 4  ;;  %v6920_v30 = vor.u32 %v6919_v47, %v6915_v24  ;;  %v6923_v42 = vshll.u32 %v14622_v13, 16  ;;  %v16463_v43 = vld [vmem:[#allocation26_spill] sm:$0xff] }
 0x1fe   : > { %v14650_v0 = vadd.f32 %v10493_v39, %v16463_v43  ;;  %v14653_v20 = vadd.f32 %v10543_v10, %v16465_v36  ;;  %10796 = vmatprep.mubr.msk.f32.mxu1 %vm755_vm1, %v14495_v41  ;;  %v6937_v62 = vshll.u32 %v14630_v15, 16  ;;  %v6941_v57 = vshrl.u32 %v14630_v15, 16  ;;  %v4280_v17 = vpop.f32.mrf.mxu0  ;;  %v16468_v10 = vld [vmem:[#allocation2_spill] sm:$0xff] }
 0x1ff   : > { %10744 = vmatmul.mubr.msk.bf16.gmra.mxu0 %vm755_vm1, %v16462_v14  ;;  %v16467_v14 = vcombine.low %v14234_v38, %v14238_v54  ;;  %v4713_v51 = vpop.f32.mrf.mxu1  ;;  %v14663_v28 = vmul.f32 %v7301_v22, %v7301_v22  ;;  %v7302_v47 = vunpack.c.l.bf16 %v14627_v1  ;;  %v6930_v60 = vrot.slane %v6928_v9, 4  ;;  %v16470_v54 = vld [vmem:[#allocation30_spill] sm:$0xff] }
 0x200   : > { %16464 = vst [vmem:[#allocation47_spill] sm:$0xff] %v14650_v0  ;;  %16466 = vst [vmem:[#allocation18_spill] sm:$0xff] %v14653_v20  ;;  %v6933_v39 = vrot.slane %v6931_v21, 5  ;;  %v14667_v38 = vadd.f32 %v4280_v17, %v16468_v10  ;;  %v14670_v43 = vadd.f32 %v4713_v51, %v16470_v54  ;;  %v14674_v41 = vsel %vm11233_vm4, %v6897_v29, %v6901_v18  ;;  %v9609_v10 = vld [vmem:[%s11181_s23 + $0xc0] sm:$0xe]  ;;  %v16472_v54 = vld [vmem:[#allocation33_spill] sm:$0xff] }
 0x201   : > { %10747 = vmatprep.mubr.msk.bf16.mxu0 %vm755_vm1, %v16467_v14  ;;  %v7303_v36 = vunpack.c.l.bf16 %v14646_v27  ;;  %v10494_v14 = vpop.f32.mrf.mxu0  ;;  %v10546_v22 = vpop.f32.mrf.mxu1  ;;  %10797 = vmatmul.mubr.msk.f32.gmra.mxu1 %vm755_vm1, %v14497_v48  ;;  %v14681_v9 = vsel %vm11233_vm4, %v6911_v44, %v6915_v24  ;;  %v6921_v21 = vrot.slane %v6920_v30, 4  ;;  %v6925_v17 = vrot.slane %v6923_v42, 5  ;;  %v16474_v29 = vld [vmem:[#allocation60_spill] sm:$0xff] }
 0x202   : > { %16469 = vst [vmem:[#allocation31_spill] sm:$0xff] %v14667_v38  ;;  %16471 = vst [vmem:[#allocation3_spill] sm:$0xff] %v14670_v43  ;;  %v7858_v51 = vrot.slane %v14559_v58, 5  ;;  %v14686_v43 = vadd.f32 %v10494_v14, %v16472_v54  ;;  %v14689_v18 = vadd.f32 %v10546_v22, %v16474_v29  ;;  %10799 = vmatprep.mubr.msk.f32.mxu1 %vm755_vm1, %v14537_v11  ;;  %v9529_v48 = vld [vmem:[%s11181_s23 + $0xd4] sm:$0x1]  ;;  %v6939_v38 = vrot.slane %v6937_v62, 5 }
 0x203   : > { %v6943_v20 = vrot.slane %v6941_v57, 4  ;;  %v4283_v24 = vpop.f32.mrf.mxu0  ;;  %v4723_v44 = vpop.f32.mrf.mxu1  ;;  %v14694_v30 = vmul.f32 %v7302_v47, %v7302_v47  ;;  %v6934_v58 = vor.u32 %v6933_v39, %v6930_v60  ;;  %v16475_v14 = vld [vmem:[#allocation65_spill] sm:$0xff]  ;;  %v14703_v29 = vmul.f32 %v7303_v36, %v7303_v36  ;;  %v9610_v62 = vld [vmem:[%s11181_s23 + $0xcc] sm:$0xe] }
 0x204   : > { %16473 = vst [vmem:[#allocation48_spill] sm:$0xff] %v14686_v43  ;;  %v7860_v0 = vrot.slane %v7858_v51, 4  ;;  %v14698_v54 = vadd.f32 %v4283_v24, %v16475_v14  ;;  %v16476_v43 = vld [vmem:[#allocation5_spill] sm:$0xff]  ;;  %v9625_v11 = vrot.slane %v9609_v10, 9  ;;  %v16477_v47 = vcombine.low %v14304_v37, %v14335_v61  ;;  %v16478_v10 = vld [vmem:[#allocation71_spill] sm:$0xff]  ;;  %v16480_v37 = vld [vmem:[#allocation6_spill] sm:$0xff] }
 0x205   : > { %v14701_v22 = vadd.f32 %v4723_v44, %v16476_v43  ;;  %v10497_v57 = vpop.f32.mrf.mxu0  ;;  %v10549_v42 = vpop.f32.mrf.mxu1  ;;  %10800 = vmatmul.mubr.msk.f32.gmra.mxu1 %vm755_vm1, %v14539_v46  ;;  %v7305_v60 = vunpack.c.l.bf16 %v14681_v9  ;;  %v14715_v39 = vsel %vm11233_vm4, %v6921_v21, %v6925_v17  ;;  %v6947_v43 = vshll.u32 %v9529_v48, 16  ;;  %v9595_v21 = vld [vmem:[%s11181_s23 + $0x18] sm:$0xe] }
 0x206   : > { %v7861_v36 = vrot.slane %v14622_v13, 5  ;;  %v14719_v24 = vadd.f32 %v10497_v57, %v16478_v10  ;;  %v14722_v61 = vadd.f32 %v10549_v42, %v16480_v37  ;;  %v16482_v44 = vcombine.low %v14348_v32, %v14383_v5  ;;  %10802 = vmatprep.mubr.msk.f32.mxu1 %vm755_vm1, %v14617_v55  ;;  %v16486_v5 = vld [vmem:[#allocation35_spill] sm:$0xff]  ;;  %v11099_v55 = vld [vmem:[%s11181_s23 + $0x1c] sm:$0xf] }
 0x207   : > { %10748 = vmatmul.mubr.msk.bf16.gmra.mxu0 %vm755_vm1, %v16477_v47  ;;  %v6944_v46 = vor.u32 %v6943_v20, %v6939_v38  ;;  %v7865_v17 = vrot.slane %v14630_v15, 5  ;;  %v4296_v13 = vpop.f32.mrf.mxu0  ;;  %v4733_v14 = vpop.f32.mrf.mxu1  ;;  %v6935_v47 = vrot.slane %v6934_v58, 4  ;;  %v9626_v42 = vrot.slane %v9610_v62, 9 }
 0x208   : > { %16479 = vst [vmem:[#allocation4_spill] sm:$0xff] %v14719_v24  ;;  %16481 = vst [vmem:[#allocation49_spill] sm:$0xff] %v14722_v61  ;;  %10751 = vmatprep.mubr.msk.bf16.mxu0 %vm755_vm1, %v16482_v44  ;;  %v14734_v10 = vsel %vm11743_vm7, %v7860_v0, %v7861_v36  ;;  %v7868_v37 = vrot.slane %v9529_v48, 5  ;;  %v16485_v61 = vld [vmem:[#allocation7_spill] sm:$0xff]  ;;  %v14740_v44 = vadd.f32 %v4733_v14, %v16486_v5  ;;  %v7760_v20 = vrot.slane %v11099_v55, 5 }
 0x209   : > { %16484 = vst [vmem:[#allocation24_spill] sm:$0xff] %v14734_v10  ;;  %v14737_v32 = vadd.f32 %v4296_v13, %v16485_v61  ;;  %v14745_v15 = vsel %vm11743_vm7, %v9625_v11, %v7858_v51  ;;  %v10498_v58 = vpop.f32.mrf.mxu0  ;;  %v10552_v24 = vpop.f32.mrf.mxu1  ;;  %10803 = vmatmul.mubr.msk.f32.gmra.mxu1 %vm755_vm1, %v14619_v50  ;;  %v6949_v0 = vrot.slane %v6947_v43, 5  ;;  %v9611_v48 = vrot.slane %v9595_v21, 9  ;;  %v16488_v61 = vld [vmem:[#allocation66_spill] sm:$0xff]  ;;  %v16489_v14 = vld [vmem:[#allocation11_spill] sm:$0xff] }
 0x20a   : > { %16487 = vst [vmem:[#allocation19_spill] sm:$0xff] %v14745_v15  ;;  %v7867_v62 = vrot.slane %v7865_v17, 4  ;;  %v14752_v13 = vadd.f32 %v10498_v58, %v16488_v61  ;;  %v14755_v5 = vadd.f32 %v10552_v24, %v16489_v14  ;;  %10805 = vmatprep.mubr.msk.f32.mxu1 %vm755_vm1, %v14663_v28  ;;  %v6945_v51 = vrot.slane %v6944_v46, 4  ;;  %v11100_v11 = vld [vmem:[%s11181_s23 + $0x20] sm:$0x1]  ;;  %v16491_v28 = vld [vmem:[#allocation51_spill] sm:$0xff] }
 0x20b   : > { %v7763_v55 = vrot.slane %v11100_v11, 5  ;;  %v4299_v50 = vpop.f32.mrf.mxu0  ;;  %v4743_v43 = vpop.f32.mrf.mxu1  ;;  %v14762_v21 = vsel %vm11233_vm4, %v6935_v47, %v6939_v38  ;;  %v11101_v36 = vld [vmem:[%s11181_s23 + $0x28] sm:$0xf]  ;;  %v14767_v58 = vsel %vm11743_vm7, %v9626_v42, %v7865_v17  ;;  %v7762_v11 = vrot.slane %v7760_v20, 4  ;;  %v9596_v15 = vld [vmem:[%s11181_s23 + $0x24] sm:$0xe] }
 0x20c   : > { %v7767_v10 = vrot.slane %v11101_v36, 5  ;;  %v14771_v24 = vsel %vm11743_vm7, %v7867_v62, %v7868_v37  ;;  %v14774_v46 = vadd.f32 %v4299_v50, %v16491_v28  ;;  %v16492_v61 = vld [vmem:[#allocation67_spill] sm:$0xff]  ;;  %v16493_v17 = vcombine.low %v14414_v26, %v14418_v49  ;;  %v16495_v28 = vld [vmem:[#allocation74_spill] sm:$0xff]  ;;  %v16496_v26 = vld [vmem:[#allocation16_spill] sm:$0xff] }
 0x20d   : > { %16490 = vst [vmem:[#allocation50_spill] sm:$0xff] %v14771_v24  ;;  %v14777_v14 = vadd.f32 %v4743_v43, %v16492_v61  ;;  %v10501_v47 = vpop.f32.mrf.mxu0  ;;  %v9542_v42 = vcombine.low %v14552_v7, %v14556_v16  ;;  %v10555_v37 = vpop.f32.mrf.mxu1  ;;  %10806 = vmatmul.mubr.msk.f32.gmra.mxu1 %vm755_vm1, %v14694_v30  ;;  %v16494_v62 = vunpack.c.l.bf16 %v14674_v41  ;;  %v7337_v50 = vmul.f32 %v7305_v60, %v7305_v60  ;;  %v9597_v60 = vld [vmem:[%s11181_s23 + $0x30] sm:$0xe] }
 0x20e   : > { %v7306_v43 = vunpack.c.l.bf16 %v14715_v39  ;;  %v14795_v61 = vadd.f32 %v10501_v47, %v16495_v28  ;;  %v14798_v49 = vadd.f32 %v10555_v37, %v16496_v26  ;;  %v16497_v7 = vcombine.low %v14468_v45, %v14475_v52  ;;  %10808 = vmatprep.mubr.msk.f32.mxu1 %vm755_vm1, %v14703_v29  ;;  %v16498_v26 = vld [vmem:[#allocation52_spill] sm:$0xff]  ;;  %v16500_v29 = vld [vmem:[#allocation21_spill] sm:$0xff] }
 0x20f   : > { %10752 = vmatmul.mubr.msk.bf16.gmra.mxu0 %vm755_vm1, %v16493_v17  ;;  %v7336_v36 = vmul.f32 %v16494_v62, %v16494_v62  ;;  %v14808_v16 = vsel %vm11233_vm4, %v6945_v51, %v6949_v0  ;;  %v7307_v30 = vunpack.c.l.bf16 %v14762_v21  ;;  %v4312_v47 = vpop.f32.mrf.mxu0  ;;  %v4753_v17 = vpop.f32.mrf.mxu1  ;;  %v14814_v37 = vsel %vm11743_vm7, %v9611_v48, %v7760_v20  ;;  %v11102_v62 = vld [vmem:[%s11181_s23 + $0x2c] sm:$0x1]  ;;  %v11103_v51 = vld [vmem:[%s11181_s23 + $0x34] sm:$0xf] }
 0x210   : > { %10755 = vmatprep.mubr.msk.bf16.mxu0 %vm755_vm1, %v16497_v7  ;;  %v9612_v45 = vrot.slane %v9596_v15, 9  ;;  %v7769_v52 = vrot.slane %v7767_v10, 4  ;;  %v7770_v28 = vrot.slane %v11102_v62, 5  ;;  %v14818_v7 = vadd.f32 %v4312_v47, %v16498_v26  ;;  %v16502_v62 = vld [vmem:[#allocation53_spill] sm:$0xff] }
 0x211   : > { %v14821_v6 = vadd.f32 %v4753_v17, %v16500_v29  ;;  %v14825_v0 = vsel %vm11743_vm7, %v7762_v11, %v7763_v55  ;;  %v7774_v38 = vrot.slane %v11103_v51, 5  ;;  %v10502_v24 = vpop.f32.mrf.mxu0  ;;  %v10558_v20 = vpop.f32.mrf.mxu1  ;;  %10809 = vmatmul.mubr.msk.f32.gmra.mxu1 %vm755_vm1, %v7336_v36  ;;  %v9543_v15 = vcombine.low %v14595_v56, %v14627_v1  ;;  %v16504_v29 = vld [vmem:[#allocation75_spill] sm:$0xff]  ;;  %v9598_v36 = vld [vmem:[%s11181_s23 + $0x3c] sm:$0xe] }
 0x212   : > { %16499 = vst [vmem:[#allocation37_spill] sm:$0xff] %v14818_v7  ;;  %v7338_v48 = vmul.f32 %v7306_v43, %v7306_v43  ;;  %v7308_v47 = vunpack.c.l.bf16 %v14808_v16  ;;  %v9613_v17 = vrot.slane %v9597_v60, 9  ;;  %v14833_v26 = vadd.f32 %v10502_v24, %v16502_v62  ;;  %10811 = vmatprep.mubr.msk.f32.mxu1 %vm755_vm1, %v7337_v50  ;;  %v16506_v43 = vld [vmem:[#allocation25_spill] sm:$0xff]  ;;  %v16507_v50 = vld [vmem:[#allocation54_spill] sm:$0xff] }
 0x213   : > { %16501 = vst [vmem:[#allocation38_spill] sm:$0xff] %v14821_v6  ;;  %v14836_v55 = vadd.f32 %v10558_v20, %v16504_v29  ;;  %v7339_v11 = vmul.f32 %v7307_v30, %v7307_v30  ;;  %v8196_v51 = vunpack.c.l.bf16 %v14814_v37  ;;  %v4315_v6 = vpop.f32.mrf.mxu0  ;;  %v4763_v7 = vpop.f32.mrf.mxu1  ;;  %v8197_v56 = vunpack.c.l.bf16 %v14825_v0  ;;  %v11104_v62 = vld [vmem:[%s11181_s23 + $0x38] sm:$0x1] }
 0x214   : > { %16503 = vst [vmem:[#allocation17_spill] sm:$0xff] %v14833_v26  ;;  %v14844_v1 = vsel %vm11743_vm7, %v9612_v45, %v7767_v10  ;;  %v14848_v24 = vsel %vm11743_vm7, %v7769_v52, %v7770_v28  ;;  %v14851_v60 = vadd.f32 %v4315_v6, %v16506_v43  ;;  %v14854_v30 = vadd.f32 %v4763_v7, %v16507_v50  ;;  %v11105_v28 = vld [vmem:[%s11181_s23 + $0x40] sm:$0xf]  ;;  %v16508_v7 = vld [vmem:[#allocation68_spill] sm:$0xff]  ;;  %v16509_v50 = vld [vmem:[#allocation29_spill] sm:$0xff] }
 0x215   : > { %16505 = vst [vmem:[#allocation43_spill] sm:$0xff] %v14836_v55  ;;  %v7776_v20 = vrot.slane %v7774_v38, 4  ;;  %v7777_v29 = vrot.slane %v11104_v62, 5  ;;  %v10505_v55 = vpop.f32.mrf.mxu0  ;;  %v10561_v26 = vpop.f32.mrf.mxu1  ;;  %10812 = vmatmul.mubr.msk.f32.gmra.mxu1 %vm755_vm1, %v7338_v48  ;;  %v7340_v10 = vmul.f32 %v7308_v47, %v7308_v47  ;;  %v14861_v45 = vsel %vm11743_vm7, %v9613_v17, %v7774_v38 }
 0x216   : > { %v9614_v52 = vrot.slane %v9598_v36, 9  ;;  %v7781_v6 = vrot.slane %v11105_v28, 5  ;;  %v14865_v43 = vadd.f32 %v10505_v55, %v16508_v7  ;;  %v14868_v62 = vadd.f32 %v10561_v26, %v16509_v50  ;;  %10814 = vmatprep.mubr.msk.f32.mxu1 %vm755_vm1, %v7339_v11  ;;  %v9599_v28 = vld [vmem:[%s11181_s23 + $0x48] sm:$0xe] }
 0x217   : > { %10756 = vmatmul.mubr.msk.bf16.gmra.mxu0 %vm755_vm1, %v9542_v42  ;;  %v8228_v42 = vmul.f32 %v8196_v51, %v8196_v51  ;;  %v8198_v48 = vunpack.c.l.bf16 %v14844_v1  ;;  %v4328_v47 = vpop.f32.mrf.mxu0  ;;  %v9544_v38 = vcombine.low %v14646_v27, %v14674_v41  ;;  %v4773_v17 = vpop.f32.mrf.mxu1  ;;  %v8229_v36 = vmul.f32 %v8197_v56, %v8197_v56 }
 0x218   : > { %10759 = vmatprep.mubr.msk.bf16.mxu0 %vm755_vm1, %v9543_v15  ;;  %v9545_v55 = vcombine.low %v14681_v9, %v14715_v39  ;;  %v8199_v26 = vunpack.c.l.bf16 %v14848_v24  ;;  %v14880_v15 = vadd.f32 %v4328_v47, %v14325_v3  ;;  %v14883_v11 = vadd.f32 %v4773_v17, %v14328_v63  ;;  %v11106_v39 = vld [vmem:[%s11181_s23 + $0x44] sm:$0x1]  ;;  %v11107_v63 = vld [vmem:[%s11181_s23 + $0x4c] sm:$0xf] }
 0x219   : > { %v8200_v51 = vunpack.c.l.bf16 %v14861_v45  ;;  %v14888_v27 = vsel %vm11743_vm7, %v7776_v20, %v7777_v29  ;;  %v10506_v41 = vpop.f32.mrf.mxu0  ;;  %v10564_v56 = vpop.f32.mrf.mxu1  ;;  %10815 = vmatmul.mubr.msk.f32.gmra.mxu1 %vm755_vm1, %v7340_v10  ;;  %v14893_v9 = vsel %vm11743_vm7, %v9614_v52, %v7781_v6  ;;  %v7783_v3 = vrot.slane %v7781_v6, 4  ;;  %v16512_v17 = vld [vmem:[#allocation55_spill] sm:$0xff] }
 0x21a   : > { %16510 = vst [vmem:[#allocation59_spill] sm:$0xff] %v14880_v15  ;;  %16511 = vst [vmem:[#allocation64_spill] sm:$0xff] %v14883_v11  ;;  %v7784_v7 = vrot.slane %v11106_v39, 5  ;;  %v7788_v50 = vrot.slane %v11107_v63, 5  ;;  %v14898_v47 = vadd.f32 %v10506_v41, %v14339_v25  ;;  %v14901_v20 = vadd.f32 %v10564_v56, %v16512_v17  ;;  %10853 = vmatprep.mubr.msk.f32.mxu1 %vm755_vm1, %v8228_v42  ;;  %v9600_v39 = vld [vmem:[%s11181_s23 + $0x54] sm:$0xe] }
 0x21b   : > { %v8230_v29 = vmul.f32 %v8198_v48, %v8198_v48  ;;  %v9615_v10 = vrot.slane %v9599_v28, 9  ;;  %v4331_v11 = vpop.f32.mrf.mxu0  ;;  %v4783_v15 = vpop.f32.mrf.mxu1  ;;  %v8231_v52 = vmul.f32 %v8199_v26, %v8199_v26  ;;  %v8201_v6 = vunpack.c.l.bf16 %v14888_v27  ;;  %v16515_v25 = vld [vmem:[#allocation69_spill] sm:$0xff] }
 0x21c   : > { %16513 = vst [vmem:[#allocation14_spill] sm:$0xff] %v14901_v20  ;;  %v14907_v63 = vadd.f32 %v4331_v11, %v14352_v53  ;;  %v14910_v41 = vadd.f32 %v4783_v15, %v16515_v25  ;;  %v8232_v56 = vmul.f32 %v8200_v51, %v8200_v51  ;;  %v8202_v17 = vunpack.c.l.bf16 %v14893_v9  ;;  %v11108_v20 = vld [vmem:[%s11181_s23 + $0x50] sm:$0x1]  ;;  %v11109_v11 = vld [vmem:[%s11181_s23 + $0x58] sm:$0xf] }
 0x21d   : > { %v10509_v42 = vpop.f32.mrf.mxu0  ;;  %v10603_v48 = vpop.f32.mrf.mxu1  ;;  %10854 = vmatmul.mubr.msk.f32.vlgmr.msra.gmra.mxu1 %vm755_vm1, %v8229_v36  ;;  %v14917_v26 = vsel %vm11743_vm7, %v7783_v3, %v7784_v7  ;;  %v7790_v28 = vrot.slane %v7788_v50, 4  ;;  %v7791_v53 = vrot.slane %v11108_v20, 5  ;;  %v16517_v15 = vld [vmem:[#allocation32_spill] sm:$0xff]  ;;  %v16518_v25 = vld [vmem:[#allocation41_spill] sm:$0xff]  ;;  %v9616_v36 = vrot.slane %v9600_v39, 9 }
 0x21e   : > { %16514 = vst [vmem:[#allocation62_spill] sm:$0xff] %v14907_v63  ;;  %16516 = vst [vmem:[#allocation20_spill] sm:$0xff] %v14910_v41  ;;  %v7795_v63 = vrot.slane %v11109_v11, 5  ;;  %v14922_v51 = vadd.f32 %v10509_v42, %v16517_v15  ;;  %v14925_v41 = vadd.f32 %v10603_v48, %v16518_v25  ;;  %10856 = vmatprep.mubr.msk.f32.mxu1 %vm755_vm1, %v8230_v29 }
 0x21f   : > { %10760 = vmatmul.mubr.msk.bf16.gmra.mxu0 %vm755_vm1, %v9544_v38  ;;  %v14931_v38 = vsel %vm11743_vm7, %v9615_v10, %v7788_v50  ;;  %v4344_v3 = vpop.f32.mrf.mxu0  ;;  %v9546_v7 = vcombine.low %v14762_v21, %v14808_v16  ;;  %v5552_v20 = vpop.f32.mrf.mxu1  ;;  %v9628_v42 = vcombine.low %v14814_v37, %v14825_v0  ;;  %v8233_v48 = vmul.f32 %v8201_v6, %v8201_v6  ;;  %v9601_v10 = vld [vmem:[%s11181_s23 + $0x60] sm:$0xe] }
 0x220   : > { %10763 = vmatprep.mubr.msk.bf16.mxu0 %vm755_vm1, %v9545_v55  ;;  %v14938_v11 = vadd.f32 %v4344_v3, %v14390_v31  ;;  %v14941_v55 = vadd.f32 %v5552_v20, %v14393_v34  ;;  %v8203_v50 = vunpack.c.l.bf16 %v14917_v26  ;;  %v8234_v29 = vmul.f32 %v8202_v17, %v8202_v17  ;;  %v11110_v34 = vld [vmem:[%s11181_s23 + $0x5c] sm:$0x1]  ;;  %v11111_v17 = vld [vmem:[%s11181_s23 + $0x64] sm:$0xf] }
 0x221   : > { %v10510_v39 = vpop.f32.mrf.mxu0  ;;  %v10606_v15 = vpop.f32.mrf.mxu1  ;;  %10857 = vmatmul.mubr.msk.f32.gmra.mxu1 %vm755_vm1, %v8231_v52  ;;  %v8204_v21 = vunpack.c.l.bf16 %v14931_v38  ;;  %v14949_v16 = vsel %vm11743_vm7, %v7790_v28, %v7791_v53  ;;  %v7797_v31 = vrot.slane %v7795_v63, 4  ;;  %v7798_v37 = vrot.slane %v11110_v34, 5 }
 0x222   : > { %v14953_v0 = vadd.f32 %v10510_v39, %v14399_v23  ;;  %v14956_v6 = vadd.f32 %v10606_v15, %v14402_v33  ;;  %10859 = vmatprep.mubr.msk.f32.mxu1 %vm755_vm1, %v8232_v56  ;;  %v14961_v52 = vsel %vm11743_vm7, %v9616_v36, %v7795_v63  ;;  %v7802_v28 = vrot.slane %v11111_v17, 5  ;;  %v9602_v33 = vld [vmem:[%s11181_s23 + $0x6c] sm:$0xe]  ;;  %v11112_v15 = vld [vmem:[%s11181_s23 + $0x70] sm:$0xf] }
 0x223   : > { %v4347_v53 = vpop.f32.mrf.mxu0  ;;  %v5562_v25 = vpop.f32.mrf.mxu1  ;;  %v9617_v3 = vrot.slane %v9601_v10, 9  ;;  %v8235_v39 = vmul.f32 %v8203_v50, %v8203_v50  ;;  %v7809_v56 = vrot.slane %v11112_v15, 5  ;;  %v8236_v36 = vmul.f32 %v8204_v21, %v8204_v21 }
 0x224   : > { %v14965_v20 = vadd.f32 %v4347_v53, %v14422_v19  ;;  %v14968_v23 = vadd.f32 %v5562_v25, %v14425_v40  ;;  %v8205_v10 = vunpack.c.l.bf16 %v14949_v16  ;;  %v14977_v19 = vsel %vm11743_vm7, %v7797_v31, %v7798_v37  ;;  %v11114_v25 = vld [vmem:[%s11181_s23 + $0x7c] sm:$0xf] }
 0x225   : > { %v10513_v34 = vpop.f32.mrf.mxu0  ;;  %v10609_v63 = vpop.f32.mrf.mxu1  ;;  %10860 = vmatmul.mubr.msk.f32.gmra.mxu1 %vm755_vm1, %v8233_v48  ;;  %v8206_v40 = vunpack.c.l.bf16 %v14961_v52  ;;  %v11113_v48 = vld [vmem:[%s11181_s23 + $0x68] sm:$0x1]  ;;  %v9629_v31 = vcombine.low %v14844_v1, %v14848_v24  ;;  %v7816_v15 = vrot.slane %v11114_v25, 5  ;;  %v16527_v25 = vld [vmem:[#allocation70_spill] sm:$0xff] }
 0x226   : > { %16519 = vst [vmem:[#allocation23_spill] sm:$0xff] %v14965_v20  ;;  %16520 = vst [vmem:[#allocation63_spill] sm:$0xff] %v14968_v23  ;;  %v14981_v50 = vadd.f32 %v10513_v34, %v14434_v2  ;;  %v14984_v17 = vadd.f32 %v10609_v63, %v14437_v59  ;;  %10862 = vmatprep.mubr.msk.f32.mxu1 %vm755_vm1, %v8234_v29  ;;  %v7805_v21 = vrot.slane %v11113_v48, 5  ;;  %v9618_v59 = vrot.slane %v9602_v33, 9  ;;  %v16523_v34 = vld [vmem:[#allocation13_spill] sm:$0xff]  ;;  %v16525_v29 = vld [vmem:[#allocation46_spill] sm:$0xff] }
 0x227   : > { %10764 = vmatmul.mubr.msk.bf16.gmra.mxu0 %vm755_vm1, %v9546_v7  ;;  %v7804_v7 = vrot.slane %v7802_v28, 4  ;;  %v4360_v53 = vpop.f32.mrf.mxu0  ;;  %v5572_v37 = vpop.f32.mrf.mxu1  ;;  %v14993_v2 = vsel %vm11743_vm7, %v9617_v3, %v7802_v28  ;;  %v11115_v48 = vld [vmem:[%s11181_s23 + $0x74] sm:$0x1]  ;;  %v9603_v23 = vld [vmem:[%s11181_s23 + $0x78] sm:$0xe]  ;;  %v9630_v28 = vcombine.low %v14861_v45, %v14888_v27  ;;  %v8237_v3 = vmul.f32 %v8205_v10, %v8205_v10 }
 0x228   : > { %16521 = vst [vmem:[#allocation27_spill] sm:$0xff] %v14981_v50  ;;  %16522 = vst [vmem:[#allocation61_spill] sm:$0xff] %v14984_v17  ;;  %10819 = vmatprep.mubr.msk.bf16.mxu0 %vm755_vm1, %v9628_v42  ;;  %v14997_v42 = vadd.f32 %v4360_v53, %v16523_v34  ;;  %v15000_v63 = vadd.f32 %v5572_v37, %v16525_v29  ;;  %v7811_v17 = vrot.slane %v7809_v56, 4  ;;  %v7812_v50 = vrot.slane %v11115_v48, 5  ;;  %v16529_v34 = vld [vmem:[#allocation36_spill] sm:$0xff] }
 0x229   : > { %v10514_v1 = vpop.f32.mrf.mxu0  ;;  %v10612_v24 = vpop.f32.mrf.mxu1  ;;  %10863 = vmatmul.mubr.msk.f32.gmra.mxu1 %vm755_vm1, %v8235_v39  ;;  %v8207_v33 = vunpack.c.l.bf16 %v14977_v19  ;;  %v8238_v53 = vmul.f32 %v8206_v40, %v8206_v40  ;;  %v8208_v48 = vunpack.c.l.bf16 %v14993_v2  ;;  %v15018_v39 = vsel %vm11743_vm7, %v7804_v7, %v7805_v21  ;;  %v9604_v45 = vld [vmem:[%s11181_s23 + $0x84] sm:$0xe]  ;;  %v11117_v21 = vld [vmem:[%s11181_s23 + $0x88] sm:$0xf] }
 0x22a   : > { %16524 = vst [vmem:[#allocation34_spill] sm:$0xff] %v14997_v42  ;;  %16526 = vst [vmem:[#allocation26_spill] sm:$0xff] %v15000_v63  ;;  %v15009_v37 = vadd.f32 %v10514_v1, %v16527_v25  ;;  %v15012_v29 = vadd.f32 %v10612_v24, %v16529_v34  ;;  %10865 = vmatprep.mubr.msk.f32.mxu1 %vm755_vm1, %v8236_v36  ;;  %v15023_v40 = vsel %vm11743_vm7, %v9618_v59, %v7809_v56  ;;  %v16531_v34 = vld [vmem:[#allocation57_spill] sm:$0xff]  ;;  %v16532_v36 = vld [vmem:[#allocation72_spill] sm:$0xff] }
 0x22b   : > { %v4363_v27 = vpop.f32.mrf.mxu0  ;;  %v5582_v10 = vpop.f32.mrf.mxu1  ;;  %v9619_v1 = vrot.slane %v9603_v23, 9  ;;  %v7818_v25 = vrot.slane %v7816_v15, 4  ;;  %v15034_v7 = vsel %vm11743_vm7, %v7811_v17, %v7812_v50  ;;  %v7823_v42 = vrot.slane %v11117_v21, 5  ;;  %v16534_v50 = vld [vmem:[#allocation15_spill] sm:$0xff] }
 0x22c   : > { %16528 = vst [vmem:[#allocation12_spill] sm:$0xff] %v15009_v37  ;;  %16530 = vst [vmem:[#allocation2_spill] sm:$0xff] %v15012_v29  ;;  %v11116_v37 = vld [vmem:[%s11181_s23 + $0x80] sm:$0x1]  ;;  %v15027_v29 = vadd.f32 %v4363_v27, %v16531_v34  ;;  %v15030_v63 = vadd.f32 %v5582_v10, %v16532_v36  ;;  %v9631_v23 = vcombine.low %v14893_v9, %v14917_v26  ;;  %v9620_v27 = vrot.slane %v9604_v45, 9 }
 0x22d   : > { %v7819_v24 = vrot.slane %v11116_v37, 5  ;;  %v10569_v20 = vpop.f32.mrf.mxu0  ;;  %v10615_v56 = vpop.f32.mrf.mxu1  ;;  %10866 = vmatmul.mubr.msk.f32.gmra.mxu1 %vm755_vm1, %v8237_v3  ;;  %v8239_v59 = vmul.f32 %v8207_v33, %v8207_v33  ;;  %v8209_v37 = vunpack.c.l.bf16 %v15018_v39  ;;  %v16533_v10 = vld [vmem:[#allocation58_spill] sm:$0xff]  ;;  %v8210_v9 = vunpack.c.l.bf16 %v15023_v40  ;;  %v9605_v26 = vld [vmem:[%s11181_s23 + $0x90] sm:$0xe] }
 0x22e   : > { %v15043_v34 = vadd.f32 %v10569_v20, %v16533_v10  ;;  %v15046_v17 = vadd.f32 %v10615_v56, %v16534_v50  ;;  %10868 = vmatprep.mubr.msk.f32.mxu1 %vm755_vm1, %v8238_v53  ;;  %v9632_v45 = vcombine.low %v14931_v38, %v14949_v16  ;;  %v8211_v20 = vunpack.c.l.bf16 %v15034_v7  ;;  %v11118_v56 = vld [vmem:[%s11181_s23 + $0x8c] sm:$0x1] }
 0x22f   : > { %10820 = vmatmul.mubr.msk.bf16.vlgmr.msra.gmra.mxu0 %vm755_vm1, %v9629_v31  ;;  %v8240_v31 = vmul.f32 %v8208_v48, %v8208_v48  ;;  %v5167_v3 = vpop.f32.mrf.mxu0  ;;  %v5592_v33 = vpop.f32.mrf.mxu1  ;;  %v15057_v36 = vsel %vm11743_vm7, %v9619_v1, %v7816_v15  ;;  %v7825_v21 = vrot.slane %v7823_v42, 4  ;;  %v7826_v10 = vrot.slane %v11118_v56, 5  ;;  %v16537_v50 = vld [vmem:[#allocation39_spill] sm:$0xff] }
 0x230   : > { %10823 = vmatprep.mubr.msk.bf16.mxu0 %vm755_vm1, %v9630_v28  ;;  %v15061_v28 = vsel %vm11743_vm7, %v7818_v25, %v7819_v24  ;;  %v15064_v53 = vadd.f32 %v5167_v3, %v14525_v4  ;;  %v15067_v48 = vadd.f32 %v5592_v33, %v14528_v8  ;;  %v8241_v15 = vmul.f32 %v8209_v37, %v8209_v37  ;;  %v11119_v24 = vld [vmem:[%s11181_s23 + $0x94] sm:$0xf]  ;;  %v16539_v8 = vld [vmem:[#allocation73_spill] sm:$0xff] }
 0x231   : > { %v10570_v38 = vpop.f32.mrf.mxu0  ;;  %v10618_v16 = vpop.f32.mrf.mxu1  ;;  %10869 = vmatmul.mubr.msk.f32.gmra.mxu1 %vm755_vm1, %v8239_v59  ;;  %v15073_v1 = vsel %vm11743_vm7, %v9620_v27, %v7823_v42  ;;  %v9621_v25 = vrot.slane %v9605_v26, 9  ;;  %v7830_v4 = vrot.slane %v11119_v24, 5  ;;  %v8242_v56 = vmul.f32 %v8210_v9, %v8210_v9  ;;  %v9606_v26 = vld [vmem:[%s11181_s23 + $0x9c] sm:$0xe]  ;;  %v16541_v24 = vld [vmem:[#allocation40_spill] sm:$0xff] }
 0x232   : > { %16535 = vst [vmem:[#allocation30_spill] sm:$0xff] %v15064_v53  ;;  %16536 = vst [vmem:[#allocation33_spill] sm:$0xff] %v15067_v48  ;;  %v15077_v3 = vadd.f32 %v10570_v38, %v16537_v50  ;;  %v15080_v33 = vadd.f32 %v10618_v16, %v16539_v8  ;;  %10871 = vmatprep.mubr.msk.f32.mxu1 %vm755_vm1, %v8240_v31  ;;  %v8212_v48 = vunpack.c.l.bf16 %v15057_v36  ;;  %v8213_v27 = vunpack.c.l.bf16 %v15061_v28  ;;  %v16543_v38 = vld [vmem:[#allocation22_spill] sm:$0xff] }
 0x233   : > { %v5170_v59 = vpop.f32.mrf.mxu0  ;;  %v5602_v37 = vpop.f32.mrf.mxu1  ;;  %v8243_v42 = vmul.f32 %v8211_v20, %v8211_v20  ;;  %v15094_v31 = vsel %vm11743_vm7, %v7825_v21, %v7826_v10  ;;  %v8214_v9 = vunpack.c.l.bf16 %v15073_v1  ;;  %v15101_v20 = vsel %vm11743_vm7, %v9621_v25, %v7830_v4  ;;  %v16545_v21 = vld [vmem:[#allocation78_spill] sm:$0xff] }
 0x234   : > { %16538 = vst [vmem:[#allocation60_spill] sm:$0xff] %v15077_v3  ;;  %16540 = vst [vmem:[#allocation65_spill] sm:$0xff] %v15080_v33  ;;  %v15087_v53 = vadd.f32 %v5170_v59, %v16541_v24  ;;  %v15090_v50 = vadd.f32 %v5602_v37, %v16543_v38  ;;  %v7832_v59 = vrot.slane %v7830_v4, 4  ;;  %v11120_v24 = vld [vmem:[%s11181_s23 + $0x98] sm:$0x1]  ;;  %v9633_v4 = vcombine.low %v14961_v52, %v14977_v19 }
 0x235   : > { %v10573_v16 = vpop.f32.mrf.mxu0  ;;  %v10621_v8 = vpop.f32.mrf.mxu1  ;;  %10872 = vmatmul.mubr.msk.f32.gmra.mxu1 %vm755_vm1, %v8241_v15  ;;  %v7833_v37 = vrot.slane %v11120_v24, 5  ;;  %v11121_v38 = vld [vmem:[%s11181_s23 + $0xa0] sm:$0xf]  ;;  %v9622_v15 = vrot.slane %v9606_v26, 9  ;;  %v9634_v24 = vcombine.low %v14993_v2, %v15018_v39  ;;  %v16553_v2 = vld [vmem:[#allocation8_spill] sm:$0xff] }
 0x236   : > { %16542 = vst [vmem:[#allocation5_spill] sm:$0xff] %v15087_v53  ;;  %16544 = vst [vmem:[#allocation71_spill] sm:$0xff] %v15090_v50  ;;  %v7837_v50 = vrot.slane %v11121_v38, 5  ;;  %v15106_v10 = vadd.f32 %v10573_v16, %v16545_v21  ;;  %v16547_v53 = vld [vmem:[#allocation79_spill] sm:$0xff]  ;;  %10874 = vmatprep.mubr.msk.f32.mxu1 %vm755_vm1, %v8242_v56  ;;  %v8245_v38 = vmul.f32 %v8213_v27, %v8213_v27  ;;  %v8215_v16 = vunpack.c.l.bf16 %v15094_v31  ;;  %v16554_v27 = vld [vmem:[#allocation56_spill] sm:$0xff] }
 0x237   : > { %10824 = vmatmul.mubr.msk.bf16.gmra.mxu0 %vm755_vm1, %v9631_v23  ;;  %v15109_v33 = vadd.f32 %v10621_v8, %v16547_v53  ;;  %v8244_v23 = vmul.f32 %v8212_v48, %v8212_v48  ;;  %v5183_v25 = vpop.f32.mrf.mxu0  ;;  %v5612_v3 = vpop.f32.mrf.mxu1  ;;  %v9607_v21 = vld [vmem:[%s11181_s23 + $0xa8] sm:$0xe]  ;;  %v16549_v53 = vld [vmem:[#allocation42_spill] sm:$0xff]  ;;  %v8246_v48 = vmul.f32 %v8214_v9, %v8214_v9  ;;  %v8216_v56 = vunpack.c.l.bf16 %v15101_v20  ;;  %v16556_v9 = vld [vmem:[#allocation45_spill] sm:$0xff] }
 0x238   : > { %16546 = vst [vmem:[#allocation6_spill] sm:$0xff] %v15106_v10  ;;  %10827 = vmatprep.mubr.msk.bf16.mxu0 %vm755_vm1, %v9632_v45  ;;  %v15120_v8 = vadd.f32 %v5183_v25, %v16549_v53  ;;  %v16551_v45 = vld [vmem:[#allocation28_spill] sm:$0xff]  ;;  %v15129_v52 = vsel %vm11743_vm7, %v7832_v59, %v7833_v37  ;;  %v7839_v19 = vrot.slane %v7837_v50, 4  ;;  %v7840_v39 = vrot.slane %v16553_v2, 5 }
 0x239   : > { %16548 = vst [vmem:[#allocation10_spill] sm:$0xff] %v15109_v33  ;;  %v15123_v33 = vadd.f32 %v5612_v3, %v16551_v45  ;;  %v10574_v26 = vpop.f32.mrf.mxu0  ;;  %v10624_v10 = vpop.f32.mrf.mxu1  ;;  %10875 = vmatmul.mubr.msk.f32.gmra.mxu1 %vm755_vm1, %v8243_v42  ;;  %v7844_v25 = vrot.slane %v16554_v27, 5  ;;  %v16555_v53 = vld [vmem:[#allocation44_spill] sm:$0xff]  ;;  %v15142_v42 = vsel %vm11743_vm7, %v9622_v15, %v7837_v50  ;;  %v9623_v59 = vrot.slane %v9607_v21, 9 }
 0x23a   : > { %16550 = vst [vmem:[#allocation7_spill] sm:$0xff] %v15120_v8  ;;  %v15134_v3 = vadd.f32 %v10574_v26, %v16555_v53  ;;  %v15137_v45 = vadd.f32 %v10624_v10, %v16556_v9  ;;  %10877 = vmatprep.mubr.msk.f32.mxu1 %vm755_vm1, %v8244_v23  ;;  %v8247_v8 = vmul.f32 %v8215_v16, %v8215_v16  ;;  %v8217_v10 = vunpack.c.l.bf16 %v15129_v52  ;;  %v9608_v53 = vld [vmem:[%s11181_s23 + $0xb4] sm:$0xe] }
 0x23b   : > { %16552 = vst [vmem:[#allocation35_spill] sm:$0xff] %v15123_v33  ;;  %v5186_v37 = vpop.f32.mrf.mxu0  ;;  %v5622_v33 = vpop.f32.mrf.mxu1  ;;  %v8248_v26 = vmul.f32 %v8216_v56, %v8216_v56  ;;  %v15156_v50 = vsel %vm11743_vm7, %v7839_v19, %v7840_v39  ;;  %v7846_v15 = vrot.slane %v7844_v25, 4  ;;  %v16558_v16 = vld [vmem:[#allocation76_spill] sm:$0xff]  ;;  %v16561_v56 = vld [vmem:[#allocation18_spill] sm:$0xff]  ;;  %v9638_v57 = vcombine.low %v15101_v20, %v15129_v52 }
 0x23c   : > { %v15145_v2 = vadd.f32 %v5186_v37, %v14633_v35  ;;  %v15148_v27 = vadd.f32 %v5622_v33, %v14636_v12  ;;  %v8218_v35 = vunpack.c.l.bf16 %v15142_v42  ;;  %v7847_v12 = vrot.slane %v16558_v16, 5  ;;  %v16559_v33 = vld [vmem:[#allocation47_spill] sm:$0xff] }
 0x23d   : > { %v10577_v9 = vpop.f32.mrf.mxu0  ;;  %v10627_v23 = vpop.f32.mrf.mxu1  ;;  %10878 = vmatmul.mubr.msk.f32.gmra.mxu1 %vm755_vm1, %v8245_v38  ;;  %v16563_v38 = vld [vmem:[#allocation9_spill] sm:$0xff]  ;;  %v9635_v16 = vcombine.low %v15023_v40, %v15034_v7 }
 0x23e   : > { %16557 = vst [vmem:[#allocation66_spill] sm:$0xff] %v15148_v27  ;;  %v15161_v21 = vadd.f32 %v10577_v9, %v16559_v33  ;;  %v15164_v37 = vadd.f32 %v10627_v23, %v16561_v56  ;;  %10880 = vmatprep.mubr.msk.f32.mxu1 %vm755_vm1, %v8246_v48  ;;  %v7851_v19 = vrot.slane %v16563_v38, 5  ;;  %v9624_v9 = vrot.slane %v9608_v53, 9  ;;  %v16564_v33 = vld [vmem:[#allocation31_spill] sm:$0xff]  ;;  %v16566_v53 = vld [vmem:[#allocation48_spill] sm:$0xff] }
 0x23f   : > { %10828 = vmatmul.mubr.msk.bf16.gmra.mxu0 %vm755_vm1, %v9633_v4  ;;  %v15170_v4 = vsel %vm11743_vm7, %v9623_v59, %v7844_v25  ;;  %v5199_v39 = vpop.f32.mrf.mxu0  ;;  %v5632_v27 = vpop.f32.mrf.mxu1  ;;  %v16565_v23 = vld [vmem:[#allocation3_spill] sm:$0xff]  ;;  %v8249_v48 = vmul.f32 %v8217_v10, %v8217_v10  ;;  %v8219_v38 = vunpack.c.l.bf16 %v15156_v50  ;;  %v15188_v7 = vsel %vm11743_vm7, %v7846_v15, %v7847_v12 }
 0x240   : > { %16560 = vst [vmem:[#allocation11_spill] sm:$0xff] %v15161_v21  ;;  %16562 = vst [vmem:[#allocation51_spill] sm:$0xff] %v15164_v37  ;;  %10831 = vmatprep.mubr.msk.bf16.mxu0 %vm755_vm1, %v9634_v24  ;;  %v15176_v21 = vadd.f32 %v5199_v39, %v16564_v33  ;;  %v15179_v56 = vadd.f32 %v5632_v27, %v16565_v23  ;;  %v9636_v24 = vcombine.low %v15057_v36, %v15061_v28  ;;  %v16567_v28 = vld [vmem:[#allocation77_spill] sm:$0xff] }
 0x241   : > { %v10578_v25 = vpop.f32.mrf.mxu0  ;;  %v10630_v59 = vpop.f32.mrf.mxu1  ;;  %10881 = vmatmul.mubr.msk.f32.gmra.mxu1 %vm755_vm1, %v8247_v8  ;;  %v8250_v37 = vmul.f32 %v8218_v35, %v8218_v35  ;;  %v8220_v40 = vunpack.c.l.bf16 %v15170_v4  ;;  %v7853_v36 = vrot.slane %v7851_v19, 4  ;;  %v7854_v8 = vrot.slane %v16567_v28, 5 }
 0x242   : > { %v15191_v27 = vadd.f32 %v10578_v25, %v16566_v53  ;;  %v15194_v39 = vadd.f32 %v10630_v59, %v14689_v18  ;;  %10883 = vmatprep.mubr.msk.f32.mxu1 %vm755_vm1, %v8248_v26  ;;  %v15200_v35 = vsel %vm11743_vm7, %v9624_v9, %v7851_v19  ;;  %v8251_v26 = vmul.f32 %v8219_v38, %v8219_v38  ;;  %v16568_v53 = vld [vmem:[#allocation4_spill] sm:$0xff]  ;;  %v16569_v19 = vld [vmem:[#allocation49_spill] sm:$0xff] }
 0x243   : > { %v5202_v10 = vpop.f32.mrf.mxu0  ;;  %v5642_v33 = vpop.f32.mrf.mxu1  ;;  %v8252_v25 = vmul.f32 %v8220_v40, %v8220_v40  ;;  %v8221_v59 = vunpack.c.l.bf16 %v15188_v7 }
 0x244   : > { %v15203_v15 = vadd.f32 %v5202_v10, %v14698_v54  ;;  %v15206_v12 = vadd.f32 %v5642_v33, %v14701_v22  ;;  %v15221_v54 = vsel %vm11743_vm7, %v7853_v36, %v7854_v8  ;;  %v8222_v22 = vunpack.c.l.bf16 %v15200_v35 }
 0x245   : > { %v10581_v23 = vpop.f32.mrf.mxu0  ;;  %v10633_v18 = vpop.f32.mrf.mxu1  ;;  %10884 = vmatmul.mubr.msk.f32.gmra.mxu1 %vm755_vm1, %v8249_v48  ;;  %v9637_v10 = vcombine.low %v15073_v1, %v15094_v31  ;;  %v8223_v36 = vunpack.c.l.bf16 %v15221_v54  ;;  %v16570_v1 = vld [vmem:[#allocation19_spill] sm:$0xff] }
 0x246   : > { %v15212_v28 = vadd.f32 %v10581_v23, %v16568_v53  ;;  %v15215_v9 = vadd.f32 %v10633_v18, %v16569_v19  ;;  %10886 = vmatprep.mubr.msk.f32.mxu1 %vm755_vm1, %v8250_v37  ;;  %v8253_v37 = vmul.f32 %v8221_v59, %v8221_v59  ;;  %v8224_v31 = vunpack.c.l.bf16 %v16570_v1  ;;  %v16571_v59 = vld [vmem:[#allocation24_spill] sm:$0xff] }
 0x247   : > { %10832 = vmatmul.mubr.msk.bf16.gmra.mxu0 %vm755_vm1, %v9635_v16  ;;  %v5215_v16 = vpop.f32.mrf.mxu0  ;;  %v5652_v48 = vpop.f32.mrf.mxu1 }
 0x248   : > { %10835 = vmatprep.mubr.msk.bf16.mxu0 %vm755_vm1, %v9636_v24  ;;  %v15225_v38 = vadd.f32 %v5215_v16, %v14737_v32  ;;  %v15228_v40 = vadd.f32 %v5652_v48, %v14740_v44  ;;  %v8254_v44 = vmul.f32 %v8222_v22, %v8222_v22  ;;  %v16572_v48 = vld [vmem:[#allocation37_spill] sm:$0xff] }
 0x249   : > { %v10582_v24 = vpop.f32.mrf.mxu0  ;;  %v10636_v33 = vpop.f32.mrf.mxu1  ;;  %10887 = vmatmul.mubr.msk.f32.gmra.mxu1 %vm755_vm1, %v8251_v26 }
 0x24a   : > { %v15237_v8 = vadd.f32 %v10582_v24, %v14752_v13  ;;  %v15240_v32 = vadd.f32 %v10636_v33, %v14755_v5  ;;  %10889 = vmatprep.mubr.msk.f32.mxu1 %vm755_vm1, %v8252_v25  ;;  %v8255_v5 = vmul.f32 %v8223_v36, %v8223_v36  ;;  %v8225_v25 = vunpack.c.l.bf16 %v16571_v59  ;;  %v16573_v24 = vld [vmem:[#allocation38_spill] sm:$0xff] }
 0x24b   : > { %v5218_v23 = vpop.f32.mrf.mxu0  ;;  %v5662_v18 = vpop.f32.mrf.mxu1  ;;  %v16574_v36 = vld [vmem:[#allocation50_spill] sm:$0xff] }
 0x24c   : > { %v15245_v26 = vadd.f32 %v5218_v23, %v14774_v46  ;;  %v15248_v20 = vadd.f32 %v5662_v18, %v14777_v14  ;;  %v8256_v46 = vmul.f32 %v8224_v31, %v8224_v31  ;;  %v8226_v14 = vunpack.c.l.bf16 %v14767_v58  ;;  %v16575_v31 = vld [vmem:[#allocation17_spill] sm:$0xff]  ;;  %v16576_v18 = vld [vmem:[#allocation43_spill] sm:$0xff] }
 0x24d   : > { %v10585_v52 = vpop.f32.mrf.mxu0  ;;  %v10639_v13 = vpop.f32.mrf.mxu1  ;;  %10890 = vmatmul.mubr.msk.f32.gmra.mxu1 %vm755_vm1, %v8253_v37 }
 0x24e   : > { %v15254_v53 = vadd.f32 %v10585_v52, %v14795_v61  ;;  %v15257_v19 = vadd.f32 %v10639_v13, %v14798_v49  ;;  %10892 = vmatprep.mubr.msk.f32.mxu1 %vm755_vm1, %v8254_v44  ;;  %v9639_v61 = vcombine.low %v15142_v42, %v15156_v50  ;;  %v8227_v44 = vunpack.c.l.bf16 %v16574_v36 }
 0x24f   : > { %10836 = vmatmul.mubr.msk.bf16.gmra.mxu0 %vm755_vm1, %v9637_v10  ;;  %v5231_v22 = vpop.f32.mrf.mxu0  ;;  %v5672_v16 = vpop.f32.mrf.mxu1  ;;  %v9640_v13 = vcombine.low %v15170_v4, %v15188_v7  ;;  %v16577_v7 = vld [vmem:[#allocation59_spill] sm:$0xff] }
 0x250   : > { %10839 = vmatprep.mubr.msk.bf16.mxu0 %vm755_vm1, %v9638_v57  ;;  %v15263_v10 = vadd.f32 %v5231_v22, %v16572_v48  ;;  %v15266_v33 = vadd.f32 %v5672_v16, %v16573_v24  ;;  %v8257_v57 = vmul.f32 %v8225_v25, %v8225_v25  ;;  %v8258_v22 = vmul.f32 %v8226_v14, %v8226_v14 }
 0x251   : > { %v10586_v49 = vpop.f32.mrf.mxu0  ;;  %v10642_v37 = vpop.f32.mrf.mxu1  ;;  %10893 = vmatmul.mubr.msk.f32.gmra.mxu1 %vm755_vm1, %v8255_v5  ;;  %v8259_v24 = vmul.f32 %v8227_v44, %v8227_v44  ;;  %v16579_v44 = vld [vmem:[#allocation14_spill] sm:$0xff] }
 0x252   : > { %v15273_v23 = vadd.f32 %v10586_v49, %v16575_v31  ;;  %v15276_v52 = vadd.f32 %v10642_v37, %v16576_v18  ;;  %10895 = vmatprep.mubr.msk.f32.mxu1 %vm755_vm1, %v8256_v46  ;;  %v9641_v37 = vcombine.low %v15200_v35, %v15221_v54 }
 0x253   : > { %v5234_v42 = vpop.f32.mrf.mxu0  ;;  %v5682_v50 = vpop.f32.mrf.mxu1 }
 0x254   : > { %v15282_v16 = vadd.f32 %v5234_v42, %v14851_v60  ;;  %v15285_v5 = vadd.f32 %v5682_v50, %v14854_v30  ;;  %v16581_v50 = vld [vmem:[#allocation20_spill] sm:$0xff] }
 0x255   : > { %v10589_v25 = vpop.f32.mrf.mxu0  ;;  %v10645_v48 = vpop.f32.mrf.mxu1  ;;  %10896 = vmatmul.mubr.msk.f32.gmra.mxu1 %vm755_vm1, %v8257_v57 }
 0x256   : > { %v15290_v46 = vadd.f32 %v10589_v25, %v14865_v43  ;;  %v15293_v4 = vadd.f32 %v10645_v48, %v14868_v62  ;;  %10898 = vmatprep.mubr.msk.f32.mxu1 %vm755_vm1, %v8258_v22  ;;  %v16580_v22 = vld [vmem:[#allocation62_spill] sm:$0xff] }
 0x257   : > { %10840 = vmatmul.mubr.msk.bf16.gmra.mxu0 %vm755_vm1, %v9639_v61  ;;  %v5247_v60 = vpop.f32.mrf.mxu0  ;;  %v5692_v30 = vpop.f32.mrf.mxu1  ;;  %v16578_v61 = vld [vmem:[#allocation64_spill] sm:$0xff] }
 0x258   : > { %10843 = vmatprep.mubr.msk.bf16.mxu0 %vm755_vm1, %v9640_v13  ;;  %v15298_v14 = vadd.f32 %v5247_v60, %v16577_v7  ;;  %v15301_v49 = vadd.f32 %v5692_v30, %v16578_v61 }
 0x259   : > { %v10590_v43 = vpop.f32.mrf.mxu0  ;;  %v10648_v57 = vpop.f32.mrf.mxu1  ;;  %10899 = vmatmul.mubr.msk.f32.gmra.mxu1 %vm755_vm1, %v8259_v24  ;;  %v16582_v24 = vcombine.low %v16570_v1, %v16571_v59  ;;  %v16583_v59 = vld [vmem:[#allocation23_spill] sm:$0xff] }
 0x25a   : > { %v15307_v62 = vadd.f32 %v10590_v43, %v14898_v47  ;;  %v15310_v31 = vadd.f32 %v10648_v57, %v16579_v44 }
 0x25b   : > { %v5250_v18 = vpop.f32.mrf.mxu0  ;;  %v5702_v13 = vpop.f32.mrf.mxu1 }
 0x25c   : > { %v15313_v42 = vadd.f32 %v5250_v18, %v16580_v22  ;;  %v15316_v25 = vadd.f32 %v5702_v13, %v16581_v50  ;;  %v16584_v18 = vld [vmem:[#allocation63_spill] sm:$0xff] }
 0x25d   : > { %v10593_v48 = vpop.f32.mrf.mxu0  ;;  %v10687_v35 = vpop.f32.mrf.mxu1 }
 0x25e   : > { %v15320_v54 = vadd.f32 %v10593_v48, %v14922_v51  ;;  %v15323_v47 = vadd.f32 %v10687_v35, %v14925_v41 }
 0x25f   : > { %10844 = vmatmul.mubr.msk.bf16.gmra.mxu0 %vm755_vm1, %v9641_v37  ;;  %v5263_v60 = vpop.f32.mrf.mxu0  ;;  %v6328_v30 = vpop.f32.mrf.mxu1 }
 0x260   : > { %10847 = vmatprep.mubr.msk.bf16.mxu0 %vm755_vm1, %v16582_v24  ;;  %v15330_v7 = vadd.f32 %v5263_v60, %v14938_v11  ;;  %v15333_v61 = vadd.f32 %v6328_v30, %v14941_v55  ;;  %v16586_v55 = vcombine.low %v14767_v58, %v16574_v36  ;;  %v16589_v60 = vld [vmem:[#allocation34_spill] sm:$0xff]  ;;  %v16591_v58 = vld [vmem:[#allocation12_spill] sm:$0xff] }
 0x261   : > { %v10594_v37 = vpop.f32.mrf.mxu0  ;;  %v10690_v43 = vpop.f32.mrf.mxu1 }
 0x262   : > { %v15336_v51 = vadd.f32 %v10594_v37, %v14953_v0  ;;  %v15339_v41 = vadd.f32 %v10690_v43, %v14956_v6  ;;  %v16587_v0 = vld [vmem:[#allocation27_spill] sm:$0xff]  ;;  %v16588_v6 = vld [vmem:[#allocation61_spill] sm:$0xff]  ;;  %v16590_v37 = vld [vmem:[#allocation26_spill] sm:$0xff] }
 0x263   : > { %v5266_v57 = vpop.f32.mrf.mxu0  ;;  %v6338_v1 = vpop.f32.mrf.mxu1 }
 0x264   : > { %v15342_v44 = vadd.f32 %v5266_v57, %v16583_v59  ;;  %v15345_v13 = vadd.f32 %v6338_v1, %v16584_v18  ;;  %v16592_v59 = vld [vmem:[#allocation2_spill] sm:$0xff] }
 0x265   : > { %v10597_v11 = vpop.f32.mrf.mxu0  ;;  %v10693_v22 = vpop.f32.mrf.mxu1 }
 0x266   : > { %16585 = vst [vmem:[#allocation67_spill] sm:$0xff] %v15345_v13  ;;  %v15352_v50 = vadd.f32 %v10597_v11, %v16587_v0  ;;  %v15355_v48 = vadd.f32 %v10693_v22, %v16588_v6 }
 0x267   : > { %10848 = vmatmul.mubr.msk.bf16.gmra.mxu0 %vm755_vm1, %v16586_v55  ;;  %v5279_v35 = vpop.f32.mrf.mxu0  ;;  %v6348_v24 = vpop.f32.mrf.mxu1 }
 0x268   : > { %v15358_v30 = vadd.f32 %v5279_v35, %v16589_v60  ;;  %v15361_v43 = vadd.f32 %v6348_v24, %v16590_v37 }
 0x269   : > { %v10598_v57 = vpop.f32.mrf.mxu0  ;;  %v10696_v1 = vpop.f32.mrf.mxu1 }
 0x26a   : > { %v15364_v36 = vadd.f32 %v10598_v57, %v16591_v58  ;;  %v15367_v18 = vadd.f32 %v10696_v1, %v16592_v59  ;;  %v16597_v1 = vld [vmem:[#allocation30_spill] sm:$0xff]  ;;  %v16599_v59 = vld [vmem:[#allocation33_spill] sm:$0xff] }
 0x26b   : > { %v5282_v11 = vpop.f32.mrf.mxu0  ;;  %v6358_v55 = vpop.f32.mrf.mxu1 }
 0x26c   : > { %v15370_v22 = vadd.f32 %v5282_v11, %v15027_v29  ;;  %v15373_v0 = vadd.f32 %v6358_v55, %v15030_v63  ;;  %v16601_v63 = vld [vmem:[#allocation60_spill] sm:$0xff] }
 0x26d   : > { %v10653_v6 = vpop.f32.mrf.mxu0  ;;  %v10699_v35 = vpop.f32.mrf.mxu1 }
 0x26e   : > { %16593 = vst [vmem:[#allocation74_spill] sm:$0xff] %v15370_v22  ;;  %16594 = vst [vmem:[#allocation16_spill] sm:$0xff] %v15373_v0  ;;  %v15376_v24 = vadd.f32 %v10653_v6, %v15043_v34  ;;  %v15379_v60 = vadd.f32 %v10699_v35, %v15046_v17  ;;  %v16603_v0 = vld [vmem:[#allocation65_spill] sm:$0xff] }
 0x26f   : > { %v5943_v37 = vpop.f32.mrf.mxu0  ;;  %v6368_v57 = vpop.f32.mrf.mxu1  ;;  %v16605_v17 = vld [vmem:[#allocation5_spill] sm:$0xff] }
 0x270   : > { %16595 = vst [vmem:[#allocation52_spill] sm:$0xff] %v15376_v24  ;;  %16596 = vst [vmem:[#allocation21_spill] sm:$0xff] %v15379_v60  ;;  %v15382_v58 = vadd.f32 %v5943_v37, %v16597_v1  ;;  %v15385_v13 = vadd.f32 %v6368_v57, %v16599_v59  ;;  %v16607_v60 = vld [vmem:[#allocation71_spill] sm:$0xff]  ;;  %v16609_v57 = vld [vmem:[#allocation6_spill] sm:$0xff] }
 0x271   : > { %v10654_v29 = vpop.f32.mrf.mxu0  ;;  %v10702_v11 = vpop.f32.mrf.mxu1 }
 0x272   : > { %16598 = vst [vmem:[#allocation53_spill] sm:$0xff] %v15382_v58  ;;  %16600 = vst [vmem:[#allocation75_spill] sm:$0xff] %v15385_v13  ;;  %v15388_v55 = vadd.f32 %v10654_v29, %v16601_v63  ;;  %v15391_v22 = vadd.f32 %v10702_v11, %v16603_v0  ;;  %v16610_v58 = vld [vmem:[#allocation10_spill] sm:$0xff]  ;;  %v16611_v0 = vld [vmem:[#allocation7_spill] sm:$0xff] }
 0x273   : > { %v5946_v34 = vpop.f32.mrf.mxu0  ;;  %v6378_v6 = vpop.f32.mrf.mxu1 }
 0x274   : > { %16602 = vst [vmem:[#allocation25_spill] sm:$0xff] %v15388_v55  ;;  %16604 = vst [vmem:[#allocation54_spill] sm:$0xff] %v15391_v22  ;;  %v15394_v35 = vadd.f32 %v5946_v34, %v16605_v17  ;;  %v15397_v24 = vadd.f32 %v6378_v6, %v16607_v60  ;;  %v16613_v55 = vld [vmem:[#allocation35_spill] sm:$0xff] }
 0x275   : > { %v10657_v37 = vpop.f32.mrf.mxu0  ;;  %v10705_v1 = vpop.f32.mrf.mxu1 }
 0x276   : > { %16606 = vst [vmem:[#allocation68_spill] sm:$0xff] %v15394_v35  ;;  %16608 = vst [vmem:[#allocation29_spill] sm:$0xff] %v15397_v24  ;;  %v15400_v59 = vadd.f32 %v10657_v37, %v16609_v57  ;;  %v15403_v13 = vadd.f32 %v10705_v1, %v16610_v58  ;;  %v16614_v1 = vld [vmem:[#allocation66_spill] sm:$0xff] }
 0x277   : > { %v5959_v29 = vpop.f32.mrf.mxu0  ;;  %v6388_v63 = vpop.f32.mrf.mxu1 }
 0x278   : > { %v15406_v11 = vadd.f32 %v5959_v29, %v16611_v0  ;;  %v15409_v22 = vadd.f32 %v6388_v63, %v16613_v55  ;;  %v16615_v55 = vld [vmem:[#allocation11_spill] sm:$0xff] }
 0x279   : > { %v10658_v34 = vpop.f32.mrf.mxu0  ;;  %v10708_v17 = vpop.f32.mrf.mxu1 }
 0x27a   : > { %16612 = vst [vmem:[#allocation55_spill] sm:$0xff] %v15406_v11  ;;  %v15412_v60 = vadd.f32 %v10658_v34, %v15134_v3  ;;  %v15415_v6 = vadd.f32 %v10708_v17, %v15137_v45  ;;  %v16616_v11 = vld [vmem:[#allocation51_spill] sm:$0xff] }
 0x27b   : > { %v5962_v37 = vpop.f32.mrf.mxu0  ;;  %v6398_v57 = vpop.f32.mrf.mxu1 }
 0x27c   : > { %v15418_v58 = vadd.f32 %v5962_v37, %v15145_v2  ;;  %v15421_v24 = vadd.f32 %v6398_v57, %v16614_v1 }
 0x27d   : > { %v10661_v29 = vpop.f32.mrf.mxu0  ;;  %v10711_v0 = vpop.f32.mrf.mxu1 }
 0x27e   : > { %v15424_v63 = vadd.f32 %v10661_v29, %v16615_v55  ;;  %v15427_v35 = vadd.f32 %v10711_v0, %v16616_v11 }
 0x27f   : > { %v5975_v3 = vpop.f32.mrf.mxu0  ;;  %v6408_v34 = vpop.f32.mrf.mxu1 }
 0x280   : > { %v15430_v45 = vadd.f32 %v5975_v3, %v15176_v21  ;;  %v15433_v17 = vadd.f32 %v6408_v34, %v15179_v56 }
 0x281   : > { %v10662_v2 = vpop.f32.mrf.mxu0  ;;  %v10714_v37 = vpop.f32.mrf.mxu1 }
 0x282   : > { %v15436_v57 = vadd.f32 %v10662_v2, %v15191_v27  ;;  %v15439_v1 = vadd.f32 %v10714_v37, %v15194_v39 }
 0x283   : > { %v5978_v29 = vpop.f32.mrf.mxu0  ;;  %v6418_v55 = vpop.f32.mrf.mxu1 }
 0x284   : > { %v15442_v11 = vadd.f32 %v5978_v29, %v15203_v15  ;;  %v15445_v0 = vadd.f32 %v6418_v55, %v15206_v12 }
 0x285   : > { %v10665_v21 = vpop.f32.mrf.mxu0  ;;  %v10717_v3 = vpop.f32.mrf.mxu1 }
 0x286   : > { %v15448_v56 = vadd.f32 %v10665_v21, %v15212_v28  ;;  %v15451_v34 = vadd.f32 %v10717_v3, %v15215_v9 }
 0x287   : > { %v5991_v27 = vpop.f32.mrf.mxu0  ;;  %v6428_v2 = vpop.f32.mrf.mxu1 }
 0x288   : > { %v15454_v39 = vadd.f32 %v5991_v27, %v15225_v38  ;;  %v15457_v37 = vadd.f32 %v6428_v2, %v15228_v40 }
 0x289   : > { %v10666_v15 = vpop.f32.mrf.mxu0  ;;  %v10720_v29 = vpop.f32.mrf.mxu1 }
 0x28a   : > { %v15460_v12 = vadd.f32 %v10666_v15, %v15237_v8  ;;  %v15463_v55 = vadd.f32 %v10720_v29, %v15240_v32 }
 0x28b   : > { %v5994_v28 = vpop.f32.mrf.mxu0  ;;  %v6438_v21 = vpop.f32.mrf.mxu1 }
 0x28c   : > { %16617 = vst [vmem:[#allocation69_spill] sm:$0xff] %v15460_v12  ;;  %v15466_v9 = vadd.f32 %v5994_v28, %v15245_v26  ;;  %v15469_v3 = vadd.f32 %v6438_v21, %v15248_v20 }
 0x28d   : > { %v10669_v38 = vpop.f32.mrf.mxu0  ;;  %v10723_v27 = vpop.f32.mrf.mxu1 }
 0x28e   : > { %16618 = vst [vmem:[#allocation32_spill] sm:$0xff] %v15466_v9  ;;  %16619 = vst [vmem:[#allocation41_spill] sm:$0xff] %v15469_v3  ;;  %v15472_v40 = vadd.f32 %v10669_v38, %v15254_v53  ;;  %v15475_v2 = vadd.f32 %v10723_v27, %v15257_v19 }
 0x28f   : > { %v6007_v8 = vpop.f32.mrf.mxu0  ;;  %v6448_v15 = vpop.f32.mrf.mxu1 }
 0x290   : > { %v15478_v32 = vadd.f32 %v6007_v8, %v15263_v10  ;;  %v15481_v29 = vadd.f32 %v6448_v15, %v15266_v33 }
 0x291   : > { %v10670_v26 = vpop.f32.mrf.mxu0  ;;  %v10726_v28 = vpop.f32.mrf.mxu1 }
 0x292   : > { %16620 = vst [vmem:[#allocation13_spill] sm:$0xff] %v15478_v32  ;;  %v15484_v20 = vadd.f32 %v10670_v26, %v15273_v23  ;;  %v15487_v21 = vadd.f32 %v10726_v28, %v15276_v52 }
 0x293   : > { %v6010_v53 = vpop.f32.mrf.mxu0  ;;  %v6458_v38 = vpop.f32.mrf.mxu1 }
 0x294   : > { %16621 = vst [vmem:[#allocation46_spill] sm:$0xff] %v15484_v20  ;;  %v15490_v19 = vadd.f32 %v6010_v53, %v15282_v16  ;;  %v15493_v27 = vadd.f32 %v6458_v38, %v15285_v5 }
 0x295   : > { %v10673_v10 = vpop.f32.mrf.mxu0  ;;  %v10729_v8 = vpop.f32.mrf.mxu1 }
 0x296   : > { %16622 = vst [vmem:[#allocation70_spill] sm:$0xff] %v15490_v19  ;;  %16623 = vst [vmem:[#allocation36_spill] sm:$0xff] %v15493_v27  ;;  %v15496_v33 = vadd.f32 %v10673_v10, %v15290_v46  ;;  %v15499_v15 = vadd.f32 %v10729_v8, %v15293_v4 }
 0x297   : > { %v6023_v23 = vpop.f32.mrf.mxu0  ;;  %v6468_v26 = vpop.f32.mrf.mxu1 }
 0x298   : > { %v15502_v52 = vadd.f32 %v6023_v23, %v15298_v14  ;;  %v15505_v28 = vadd.f32 %v6468_v26, %v15301_v49 }
 0x299   : > { %v10674_v16 = vpop.f32.mrf.mxu0  ;;  %v10732_v53 = vpop.f32.mrf.mxu1 }
 0x29a   : > { %16624 = vst [vmem:[#allocation57_spill] sm:$0xff] %v15502_v52  ;;  %v15508_v5 = vadd.f32 %v10674_v16, %v15307_v62  ;;  %v15511_v38 = vadd.f32 %v10732_v53, %v15310_v31 }
 0x29b   : > { %v6026_v46 = vpop.f32.mrf.mxu0  ;;  %v6478_v10 = vpop.f32.mrf.mxu1 }
 0x29c   : > { %16625 = vst [vmem:[#allocation72_spill] sm:$0xff] %v15508_v5  ;;  %v15514_v4 = vadd.f32 %v6026_v46, %v15313_v42  ;;  %v15517_v8 = vadd.f32 %v6478_v10, %v15316_v25 }
 0x29d   : > { %v10677_v14 = vpop.f32.mrf.mxu0  ;;  %v10771_v23 = vpop.f32.mrf.mxu1 }
 0x29e   : > { %16626 = vst [vmem:[#allocation58_spill] sm:$0xff] %v15514_v4  ;;  %16627 = vst [vmem:[#allocation15_spill] sm:$0xff] %v15517_v8  ;;  %v15520_v49 = vadd.f32 %v10677_v14, %v15320_v54  ;;  %v15523_v26 = vadd.f32 %v10771_v23, %v15323_v47  ;;  %v16638_v8 = vld [vmem:[#allocation54_spill] sm:$0xff] }
 0x29f   : > { %v6039_v62 = vpop.f32.mrf.mxu0  ;;  %v7503_v16 = vpop.f32.mrf.mxu1 }
 0x2a0   : > { %v15526_v31 = vadd.f32 %v6039_v62, %v15330_v7  ;;  %v15529_v53 = vadd.f32 %v7503_v16, %v15333_v61 }
 0x2a1   : > { %v10678_v42 = vpop.f32.mrf.mxu0  ;;  %v10774_v46 = vpop.f32.mrf.mxu1 }
 0x2a2   : > { %16628 = vst [vmem:[#allocation39_spill] sm:$0xff] %v15526_v31  ;;  %v15532_v25 = vadd.f32 %v10678_v42, %v15336_v51  ;;  %v15535_v10 = vadd.f32 %v10774_v46, %v15339_v41 }
 0x2a3   : > { %v6042_v54 = vpop.f32.mrf.mxu0  ;;  %v15537_v14 = vpop.f32.mrf.mxu1 }
 0x2a4   : > { %16629 = vst [vmem:[#allocation73_spill] sm:$0xff] %v15532_v25  ;;  %v15540_v47 = vadd.f32 %v6042_v54, %v15342_v44 }
 0x2a5   : > { %v10681_v23 = vpop.f32.mrf.mxu0  ;;  %v10777_v7 = vpop.f32.mrf.mxu1 }
 0x2a6   : > { %16630 = vst [vmem:[#allocation40_spill] sm:$0xff] %v15540_v47  ;;  %v15543_v62 = vadd.f32 %v10681_v23, %v15352_v50  ;;  %v15546_v61 = vadd.f32 %v10777_v7, %v15355_v48  ;;  %v16633_v48 = vld [vmem:[#allocation74_spill] sm:$0xff] }
 0x2a7   : > { %v6055_v16 = vpop.f32.mrf.mxu0  ;;  %v7523_v51 = vpop.f32.mrf.mxu1 }
 0x2a8   : > { %v15549_v42 = vadd.f32 %v6055_v16, %v15358_v30  ;;  %v15552_v41 = vadd.f32 %v7523_v51, %v15361_v43  ;;  %v16635_v16 = vld [vmem:[#allocation52_spill] sm:$0xff]  ;;  %v16636_v43 = vld [vmem:[#allocation21_spill] sm:$0xff] }
 0x2a9   : > { %v10682_v46 = vpop.f32.mrf.mxu0  ;;  %v10780_v25 = vpop.f32.mrf.mxu1 }
 0x2aa   : > { %16631 = vst [vmem:[#allocation22_spill] sm:$0xff] %v15549_v42  ;;  %v15555_v44 = vadd.f32 %v10682_v46, %v15364_v36  ;;  %v15558_v54 = vadd.f32 %v10780_v25, %v15367_v18  ;;  %v16637_v46 = vld [vmem:[#allocation75_spill] sm:$0xff] }
 0x2ab   : > { %v6058_v50 = vpop.f32.mrf.mxu0  ;;  %v15560_v23 = vpop.f32.mrf.mxu1 }
 0x2ac   : > { %16632 = vst [vmem:[#allocation78_spill] sm:$0xff] %v15555_v44  ;;  %v15563_v7 = vadd.f32 %v6058_v50, %v16633_v48 }
 0x2ad   : > { %v10783_v30 = vpop.f32.mrf.mxu1 }
 0x2ae   : > { %16634 = vst [vmem:[#allocation79_spill] sm:$0xff] %v15563_v7  ;;  %v15569_v51 = vadd.f32 %v10783_v30, %v16636_v43 }
 0x2af   : > { %v10737_v47 = vpop.f32.mrf.mxu0  ;;  %v7543_v36 = vpop.f32.mrf.mxu1 }
 0x2b0   : > { %v15566_v42 = vadd.f32 %v10737_v47, %v16635_v16  ;;  %v15574_v18 = vadd.f32 %v7543_v36, %v16637_v46 }
 0x2b1   : > { %v15571_v31 = vpop.f32.mrf.mxu0  ;;  %v10786_v44 = vpop.f32.mrf.mxu1 }
 0x2b2   : > { %v15579_v50 = vadd.f32 %v10786_v44, %v16638_v8 }
 0x2b3   : > { %v15576_v25 = vpop.f32.mrf.mxu0  ;;  %v15583_v7 = vpop.f32.mrf.mxu1 }
 0x2b5   : > { %v15581_v48 = vpop.f32.mrf.mxu0  ;;  %v10789_v16 = vpop.f32.mrf.mxu1 }
 0x2b6   : > { %v15589_v43 = vadd.f32 %v10789_v16, %v15403_v13 }
 0x2b7   : > { %v10741_v47 = vpop.f32.mrf.mxu0  ;;  %v7563_v46 = vpop.f32.mrf.mxu1 }
 0x2b8   : > { %v15586_v30 = vadd.f32 %v10741_v47, %v15400_v59  ;;  %v15594_v4 = vadd.f32 %v7563_v46, %v15409_v22 }
 0x2b9   : > { %v15591_v36 = vpop.f32.mrf.mxu0  ;;  %v10792_v44 = vpop.f32.mrf.mxu1 }
 0x2ba   : > { %v15599_v5 = vadd.f32 %v10792_v44, %v15415_v6 }
 0x2bb   : > { %v15596_v8 = vpop.f32.mrf.mxu0  ;;  %v15603_v27 = vpop.f32.mrf.mxu1 }
 0x2bd   : > { %v15601_v52 = vpop.f32.mrf.mxu0  ;;  %v10795_v47 = vpop.f32.mrf.mxu1 }
 0x2be   : > { %v15609_v16 = vadd.f32 %v10795_v47, %v15427_v35 }
 0x2bf   : > { %v10745_v59 = vpop.f32.mrf.mxu0  ;;  %v7583_v46 = vpop.f32.mrf.mxu1 }
 0x2c0   : > { %v15606_v13 = vadd.f32 %v10745_v59, %v15424_v63  ;;  %16639 = vst [vmem:[#allocation42_spill] sm:$0xff] %v15609_v16  ;;  %v15614_v19 = vadd.f32 %v7583_v46, %v15433_v17 }
 0x2c1   : > { %v15611_v22 = vpop.f32.mrf.mxu0  ;;  %v10798_v44 = vpop.f32.mrf.mxu1 }
 0x2c2   : > { %v15619_v20 = vadd.f32 %v10798_v44, %v15439_v1 }
 0x2c3   : > { %v15616_v6 = vpop.f32.mrf.mxu0  ;;  %v15623_v3 = vpop.f32.mrf.mxu1 }
 0x2c4   : > { %16640 = vst [vmem:[#allocation28_spill] sm:$0xff] %v15619_v20 }
 0x2c5   : > { %v15621_v32 = vpop.f32.mrf.mxu0  ;;  %v10801_v59 = vpop.f32.mrf.mxu1 }
 0x2c6   : > { %v15629_v47 = vadd.f32 %v10801_v59, %v15451_v34 }
 0x2c7   : > { %v10749_v63 = vpop.f32.mrf.mxu0  ;;  %v7603_v46 = vpop.f32.mrf.mxu1 }
 0x2c8   : > { %v15626_v35 = vadd.f32 %v10749_v63, %v15448_v56  ;;  %16641 = vst [vmem:[#allocation8_spill] sm:$0xff] %v15629_v47  ;;  %v15634_v9 = vadd.f32 %v7603_v46, %v15457_v37 }
 0x2c9   : > { %v15631_v17 = vpop.f32.mrf.mxu0  ;;  %v10804_v44 = vpop.f32.mrf.mxu1 }
 0x2ca   : > { %16642 = vst [vmem:[#allocation56_spill] sm:$0xff] %v15634_v9  ;;  %v15639_v12 = vadd.f32 %v10804_v44, %v15463_v55 }
 0x2cb   : > { %v15636_v1 = vpop.f32.mrf.mxu0  ;;  %v15643_v16 = vpop.f32.mrf.mxu1 }
 0x2cc   : > { %16643 = vst [vmem:[#allocation44_spill] sm:$0xff] %v15639_v12  ;;  %16644 = vst [vmem:[#allocation45_spill] sm:$0xff] %v15643_v16 }
 0x2cd   : > { %v15641_v20 = vpop.f32.mrf.mxu0  ;;  %v10807_v63 = vpop.f32.mrf.mxu1 }
 0x2ce   : > { %v15649_v59 = vadd.f32 %v10807_v63, %v15475_v2 }
 0x2cf   : > { %v10753_v56 = vpop.f32.mrf.mxu0  ;;  %v7623_v46 = vpop.f32.mrf.mxu1 }
 0x2d0   : > { %v15646_v34 = vadd.f32 %v10753_v56, %v15472_v40  ;;  %16645 = vst [vmem:[#allocation76_spill] sm:$0xff] %v15649_v59  ;;  %v15654_v47 = vadd.f32 %v7623_v46, %v15481_v29 }
 0x2d1   : > { %v15651_v37 = vpop.f32.mrf.mxu0  ;;  %v10810_v44 = vpop.f32.mrf.mxu1 }
 0x2d2   : > { %16646 = vst [vmem:[#allocation47_spill] sm:$0xff] %v15654_v47  ;;  %v15659_v12 = vadd.f32 %v10810_v44, %v15487_v21 }
 0x2d3   : > { %v15656_v55 = vpop.f32.mrf.mxu0  ;;  %v15663_v9 = vpop.f32.mrf.mxu1 }
 0x2d4   : > { %16647 = vst [vmem:[#allocation18_spill] sm:$0xff] %v15659_v12  ;;  %16648 = vst [vmem:[#allocation9_spill] sm:$0xff] %v15663_v9 }
 0x2d5   : > { %v15661_v16 = vpop.f32.mrf.mxu0  ;;  %v10813_v56 = vpop.f32.mrf.mxu1 }
 0x2d6   : > { %v15669_v63 = vadd.f32 %v10813_v56, %v15499_v15 }
 0x2d7   : > { %v10757_v40 = vpop.f32.mrf.mxu0  ;;  %v7643_v46 = vpop.f32.mrf.mxu1 }
 0x2d8   : > { %v15666_v2 = vadd.f32 %v10757_v40, %v15496_v33  ;;  %16650 = vst [vmem:[#allocation3_spill] sm:$0xff] %v15669_v63  ;;  %v15674_v59 = vadd.f32 %v7643_v46, %v15505_v28 }
 0x2d9   : > { %v15671_v29 = vpop.f32.mrf.mxu0  ;;  %v10816_v44 = vpop.f32.mrf.mxu1 }
 0x2da   : > { %16649 = vst [vmem:[#allocation31_spill] sm:$0xff] %v15666_v2  ;;  %16651 = vst [vmem:[#allocation48_spill] sm:$0xff] %v15674_v59  ;;  %v15679_v12 = vadd.f32 %v10816_v44, %v15511_v38 }
 0x2db   : > { %v15676_v21 = vpop.f32.mrf.mxu0  ;;  %v15683_v47 = vpop.f32.mrf.mxu1 }
 0x2dc   : > { %16652 = vst [vmem:[#allocation77_spill] sm:$0xff] %v15676_v21  ;;  %16653 = vst [vmem:[#allocation4_spill] sm:$0xff] %v15679_v12  ;;  %v16659_v21 = vld [vmem:[#allocation67_spill] sm:$0xff] }
 0x2dd   : > { %v15681_v9 = vpop.f32.mrf.mxu0  ;;  %16655 = vst [vmem:[#allocation19_spill] sm:$0xff] %v15683_v47  ;;  %v10855_v40 = vpop.f32.mrf.mxu1  ;;  %v7664_v38 = vadd.f32 %v15537_v14, %v16659_v21 }
 0x2de   : > { %16654 = vst [vmem:[#allocation49_spill] sm:$0xff] %v15681_v9 }
 0x2df   : > { %v10761_v33 = vpop.f32.mrf.mxu0  ;;  %v8422_v63 = vpop.f32.mrf.mxu1 }
 0x2e0   : > { %v15686_v15 = vadd.f32 %v10761_v33, %v15520_v49  ;;  %v8581_v28 = vadd.f32 %v8422_v63, %v15529_v53  ;;  %v8582_v49 = vadd.f32 %v10855_v40, %v15523_v26 }
 0x2e1   : > { %v15688_v56 = vpop.f32.mrf.mxu0  ;;  %v10858_v59 = vpop.f32.mrf.mxu1 }
 0x2e2   : > { %16656 = vst [vmem:[#allocation24_spill] sm:$0xff] %v15686_v15  ;;  %16657 = vst [vmem:[#allocation37_spill] sm:$0xff] %v15688_v56  ;;  %v8613_v44 = vadd.f32 1e-06, %v8581_v28  ;;  %v8584_v12 = vadd.f32 %v10858_v59, %v15535_v10  ;;  %v8614_v21 = vadd.f32 1e-06, %v8582_v49 }
 0x2e3   : > { %v15691_v46 = vpop.f32.mrf.mxu0  ;;  %v8432_v9 = vpop.f32.mrf.mxu1  ;;  %v16663_v49 = vld [vmem:[#allocation53_spill] sm:$0xff] }
 0x2e4   : > { %16658 = vst [vmem:[#allocation38_spill] sm:$0xff] %v15691_v46  ;;  %v8616_v33 = vadd.f32 1e-06, %v8584_v12  ;;  %v8583_v15 = vadd.f32 %v8432_v9, %v7664_v38  ;;  %10999 = vrsqrt.f32 %v8613_v44  ;;  %v16661_v12 = vld [vmem:[#allocation16_spill] sm:$0xff] }
 0x2e5   : > { %v15696_v47 = vpop.f32.mrf.mxu0  ;;  %v10861_v2 = vpop.f32.mrf.mxu1  ;;  %v7668_v9 = vadd.f32 %v15560_v23, %v16661_v12  ;;  %v16665_v12 = vld [vmem:[#allocation68_spill] sm:$0xff] }
 0x2e6   : > { %v8615_v63 = vadd.f32 1e-06, %v8583_v15  ;;  %11001 = vrsqrt.f32 %v8616_v33  ;;  %v8586_v40 = vadd.f32 %v10861_v2, %v15546_v61  ;;  %v16664_v2 = vld [vmem:[#allocation25_spill] sm:$0xff] }
 0x2e7   : > { %v10765_v56 = vpop.f32.mrf.mxu0  ;;  %v8442_v14 = vpop.f32.mrf.mxu1 }
 0x2e8   : > { %v15700_v53 = vadd.f32 %v10765_v56, %v15543_v62  ;;  %11003 = vrsqrt.f32 %v8615_v63  ;;  %v8585_v10 = vadd.f32 %v8442_v14, %v15552_v41  ;;  %v7245_v41 = vadd.f32 %v15571_v31, %v16663_v49 }
 0x2e9   : > { %v15702_v46 = vpop.f32.mrf.mxu0  ;;  %v10864_v26 = vpop.f32.mrf.mxu1  ;;  %11005 = vrsqrt.f32 %v8614_v21  ;;  %v8618_v14 = vadd.f32 1e-06, %v8586_v40  ;;  %v7246_v31 = vadd.f32 %v15581_v48, %v16665_v12 }
 0x2ea   : > { %v8617_v62 = vadd.f32 1e-06, %v8585_v10  ;;  %v8588_v56 = vadd.f32 %v10864_v26, %v15558_v54  ;;  %v7248_v10 = vadd.f32 %v15576_v25, %v16664_v2 }
 0x2eb   : > { %v15705_v59 = vpop.f32.mrf.mxu0  ;;  %v8452_v28 = vpop.f32.mrf.mxu1 }
 0x2ec   : > { %16660 = vst [vmem:[#allocation50_spill] sm:$0xff] %v15705_v59  ;;  %v8620_v38 = vadd.f32 1e-06, %v8588_v56  ;;  %v8587_v44 = vadd.f32 %v8452_v28, %v7668_v9  ;;  %11007 = vrsqrt.f32 %v8617_v62 }
 0x2ed   : > { %v15711_v15 = vpop.f32.mrf.mxu0  ;;  %v10867_v63 = vpop.f32.mrf.mxu1 }
 0x2ee   : > { %16662 = vst [vmem:[#allocation17_spill] sm:$0xff] %v15711_v15  ;;  %v8619_v61 = vadd.f32 1e-06, %v8587_v44  ;;  %11009 = vrsqrt.f32 %v8620_v38 }
 0x2ef   : > { %v10821_v33 = vpop.f32.mrf.mxu0  ;;  %v8462_v54 = vpop.f32.mrf.mxu1 }
 0x2f0   : > { %v8166_v59 = vadd.f32 %v10821_v33, %v15566_v42  ;;  %11011 = vrsqrt.f32 %v8619_v61  ;;  %v8589_v40 = vadd.f32 %v8462_v54, %v15574_v18  ;;  %v16666_v42 = vld [vmem:[#allocation29_spill] sm:$0xff] }
 0x2f1   : > { %v8037_v23 = vpop.f32.mrf.mxu0  ;;  %v10870_v56 = vpop.f32.mrf.mxu1  ;;  %v7672_v62 = vadd.f32 %v15583_v7, %v16666_v42  ;;  %11013 = vrsqrt.f32 %v8618_v14  ;;  %v16667_v7 = vld [vmem:[#allocation55_spill] sm:$0xff] }
 0x2f2   : > { %v8679_v21 = vand.u32 2147483647, %v8166_v59  ;;  %v8164_v26 = vadd.f32 %v8037_v23, %v7245_v41  ;;  %v11000_v44 = vpop.eup %10999  ;;  %v8590_v41 = vadd.f32 %v10867_v63, %v15569_v51  ;;  %v8621_v33 = vadd.f32 1e-06, %v8589_v40 }
 0x2f3   : > { %v10822_v9 = vpop.f32.mrf.mxu0  ;;  %v8592_v61 = vadd.f32 %v10870_v56, %v15579_v50  ;;  %v8472_v48 = vpop.f32.mrf.mxu1  ;;  %v7249_v14 = vadd.f32 %v15591_v36, %v16667_v7 }
 0x2f4   : > { %v8677_v28 = vand.u32 2147483647, %v8164_v26  ;;  %v8167_v38 = vadd.f32 %v10822_v9, %v7248_v10  ;;  %v8711_v49 = vmul.f32 %v8679_v21, %v8166_v59  ;;  %v11002_v23 = vpop.eup %11001  ;;  %v8591_v12 = vadd.f32 %v8472_v48, %v7672_v62 }
 0x2f5   : > { %v8040_v25 = vpop.f32.mrf.mxu0  ;;  %v11004_v15 = vpop.eup %11003  ;;  %v7252_v10 = vadd.f32 %v15596_v8, %v15412_v60  ;;  %11015 = vrsqrt.f32 %v8621_v33  ;;  %v8624_v50 = vadd.f32 1e-06, %v8592_v61  ;;  %v8622_v9 = vadd.f32 1e-06, %v8590_v41 }
 0x2f6   : > { %v8709_v2 = vmul.f32 %v8677_v28, %v8164_v26  ;;  %v8680_v18 = vand.u32 2147483647, %v8167_v38  ;;  %v8165_v54 = vadd.f32 %v8040_v25, %v7246_v31  ;;  %v10873_v59 = vpop.f32.mrf.mxu1  ;;  %v8743_v63 = vmul.f32 %v11004_v15, %v8711_v49  ;;  %v11006_v28 = vpop.eup %11005 }
 0x2f7   : > { %v10825_v51 = vpop.f32.mrf.mxu0  ;;  %11017 = vrsqrt.f32 %v8624_v50  ;;  %v8623_v60 = vadd.f32 1e-06, %v8591_v12 }
 0x2f8   : > { %v8741_v21 = vmul.f32 %v11000_v44, %v8709_v2  ;;  %v8712_v26 = vmul.f32 %v8680_v18, %v8167_v38  ;;  %v8678_v31 = vand.u32 2147483647, %v8165_v54  ;;  %v8170_v36 = vadd.f32 %v10825_v51, %v15586_v30  ;;  %v8482_v8 = vpop.f32.mrf.mxu1  ;;  %8775 = vst.msk [vmem:[%s15733_s21 + $0x10] sm:$0xff] %vm755_vm1, %v8743_v63 }
 0x2f9   : > { %v8053_v40 = vpop.f32.mrf.mxu0  ;;  %v8593_v15 = vadd.f32 %v8482_v8, %v15594_v4  ;;  %v7250_v38 = vadd.f32 %v15601_v52, %v15418_v58  ;;  %v7676_v30 = vadd.f32 %v15603_v27, %v15421_v24  ;;  %11019 = vrsqrt.f32 %v8623_v60 }
 0x2fa   : > { %8773 = vst.msk [vmem:[%s15733_s21] sm:$0xff] %vm755_vm1, %v8741_v21  ;;  %v8744_v56 = vmul.f32 %v11002_v23, %v8712_v26  ;;  %v8710_v42 = vmul.f32 %v8678_v31, %v8165_v54  ;;  %v8168_v62 = vadd.f32 %v8053_v40, %v7249_v14  ;;  %v8683_v44 = vand.u32 2147483647, %v8170_v36  ;;  %v10876_v25 = vpop.f32.mrf.mxu1  ;;  %v11008_v23 = vpop.eup %11007 }
 0x2fb   : > { %v10826_v49 = vpop.f32.mrf.mxu0  ;;  %v8625_v48 = vadd.f32 1e-06, %v8593_v15  ;;  %v7253_v4 = vadd.f32 %v15611_v22, %v15430_v45  ;;  %11021 = vrsqrt.f32 %v8622_v9  ;;  %v8594_v52 = vadd.f32 %v10873_v59, %v15589_v43  ;;  %v11010_v2 = vpop.eup %11009 }
 0x2fc   : > { %8776 = vst.msk [vmem:[%s15733_s21 + $0x18] sm:$0xff] %vm755_vm1, %v8744_v56  ;;  %v8742_v41 = vmul.f32 %v11006_v28, %v8710_v42  ;;  %v8681_v33 = vand.u32 2147483647, %v8168_v62  ;;  %v8171_v61 = vadd.f32 %v10826_v49, %v7252_v10  ;;  %v8596_v24 = vadd.f32 %v10876_v25, %v15599_v5  ;;  %v8492_v27 = vpop.f32.mrf.mxu1 }
 0x2fd   : > { %v8056_v58 = vpop.f32.mrf.mxu0  ;;  %v8715_v18 = vmul.f32 %v8683_v44, %v8170_v36  ;;  %v11012_v14 = vpop.eup %11011  ;;  %v7256_v10 = vadd.f32 %v15616_v6, %v15436_v57  ;;  %11023 = vrsqrt.f32 %v8625_v48  ;;  %v8595_v43 = vadd.f32 %v8492_v27, %v7676_v30 }
 0x2fe   : > { %8774 = vst.msk [vmem:[%s15733_s21 + $0x8] sm:$0xff] %vm755_vm1, %v8742_v41  ;;  %v8713_v54 = vmul.f32 %v8681_v33, %v8168_v62  ;;  %v8684_v12 = vand.u32 2147483647, %v8171_v61  ;;  %v8169_v7 = vadd.f32 %v8056_v58, %v7250_v38  ;;  %v8628_v45 = vadd.f32 1e-06, %v8596_v24  ;;  %v10879_v22 = vpop.f32.mrf.mxu1  ;;  %v11014_v21 = vpop.eup %11013  ;;  %v16669_v41 = vld [vmem:[#allocation28_spill] sm:$0xff] }
 0x2ff   : > { %v10829_v51 = vpop.f32.mrf.mxu0  ;;  %v8747_v5 = vmul.f32 %v11012_v14, %v8715_v18  ;;  %v8626_v26 = vadd.f32 1e-06, %v8594_v52  ;;  %v8627_v36 = vadd.f32 1e-06, %v8595_v43  ;;  %v7254_v56 = vadd.f32 %v15621_v32, %v15442_v11  ;;  %v16668_v11 = vld [vmem:[#allocation42_spill] sm:$0xff] }
 0x300   : > { %v8745_v50 = vmul.f32 %v11008_v23, %v8713_v54  ;;  %v8716_v59 = vmul.f32 %v8684_v12, %v8171_v61  ;;  %v8682_v63 = vand.u32 2147483647, %v8169_v7  ;;  %v8174_v31 = vadd.f32 %v10829_v51, %v15606_v13  ;;  %v8502_v57 = vpop.f32.mrf.mxu1  ;;  %v16670_v12 = vld [vmem:[#allocation69_spill] sm:$0xff] }
 0x301   : > { %v8069_v9 = vpop.f32.mrf.mxu0  ;;  %11025 = vrsqrt.f32 %v8628_v45  ;;  %8779 = vst.msk [vmem:[%s15733_s21 + $0x30] sm:$0xff] %vm755_vm1, %v8747_v5  ;;  %v8597_v8 = vadd.f32 %v8502_v57, %v15614_v19  ;;  %v7257_v49 = vadd.f32 %v15631_v17, %v15454_v39  ;;  %v7680_v19 = vadd.f32 %v15623_v3, %v15445_v0  ;;  %v16673_v57 = vld [vmem:[#allocation41_spill] sm:$0xff] }
 0x302   : > { %8777 = vst.msk [vmem:[%s15733_s21 + $0x20] sm:$0xff] %vm755_vm1, %v8745_v50  ;;  %v8748_v6 = vmul.f32 %v11010_v2, %v8716_v59  ;;  %v8714_v40 = vmul.f32 %v8682_v63, %v8169_v7  ;;  %v8172_v60 = vadd.f32 %v8069_v9, %v7253_v4  ;;  %v8687_v42 = vand.u32 2147483647, %v8174_v31  ;;  %v10882_v13 = vpop.f32.mrf.mxu1  ;;  %v11016_v15 = vpop.eup %11015  ;;  %v16671_v63 = vld [vmem:[#allocation32_spill] sm:$0xff] }
 0x303   : > { %v10830_v62 = vpop.f32.mrf.mxu0  ;;  %11027 = vrsqrt.f32 %v8627_v36  ;;  %v8629_v44 = vadd.f32 1e-06, %v8597_v8  ;;  %v8598_v32 = vadd.f32 %v10879_v22, %v16668_v11  ;;  %v8600_v33 = vadd.f32 %v10882_v13, %v16669_v41  ;;  %v16677_v11 = vld [vmem:[#allocation13_spill] sm:$0xff] }
 0x304   : > { %8780 = vst.msk [vmem:[%s15733_s21 + $0x38] sm:$0xff] %vm755_vm1, %v8748_v6  ;;  %v8746_v28 = vmul.f32 %v11014_v21, %v8714_v40  ;;  %v8685_v38 = vand.u32 2147483647, %v8172_v60  ;;  %v8175_v30 = vadd.f32 %v10830_v62, %v7256_v10  ;;  %v8512_v61 = vpop.f32.mrf.mxu1  ;;  %v11018_v48 = vpop.eup %11017  ;;  %11029 = vrsqrt.f32 %v8626_v26  ;;  %v16672_v26 = vld [vmem:[#allocation56_spill] sm:$0xff]  ;;  %v16674_v6 = vld [vmem:[#allocation45_spill] sm:$0xff] }
 0x305   : > { %v8072_v25 = vpop.f32.mrf.mxu0  ;;  %v8719_v52 = vmul.f32 %v8687_v42, %v8174_v31  ;;  %11031 = vrsqrt.f32 %v8629_v44  ;;  %v8632_v39 = vadd.f32 1e-06, %v8600_v33  ;;  %v8599_v17 = vadd.f32 %v8512_v61, %v7680_v19  ;;  %v16675_v42 = vld [vmem:[#allocation8_spill] sm:$0xff] }
 0x306   : > { %8778 = vst.msk [vmem:[%s15733_s21 + $0x28] sm:$0xff] %vm755_vm1, %v8746_v28  ;;  %v8717_v23 = vmul.f32 %v8685_v38, %v8172_v60  ;;  %v8688_v4 = vand.u32 2147483647, %v8175_v30  ;;  %v8173_v58 = vadd.f32 %v8072_v25, %v7254_v56  ;;  %v10885_v0 = vpop.f32.mrf.mxu1  ;;  %v11020_v3 = vpop.eup %11019  ;;  %v7260_v7 = vadd.f32 %v15636_v1, %v16670_v12 }
 0x307   : > { %v10833_v24 = vpop.f32.mrf.mxu0  ;;  %v8751_v14 = vmul.f32 %v11020_v3, %v8719_v52  ;;  %v8630_v10 = vadd.f32 1e-06, %v8598_v32  ;;  %v8631_v45 = vadd.f32 1e-06, %v8599_v17  ;;  %11033 = vrsqrt.f32 %v8632_v39  ;;  %v16678_v39 = vld [vmem:[#allocation46_spill] sm:$0xff] }
 0x308   : > { %v8749_v27 = vmul.f32 %v11016_v15, %v8717_v23  ;;  %v8720_v2 = vmul.f32 %v8688_v4, %v8175_v30  ;;  %v8686_v18 = vand.u32 2147483647, %v8173_v58  ;;  %v8178_v54 = vadd.f32 %v10833_v24, %v15626_v35  ;;  %v8522_v43 = vpop.f32.mrf.mxu1  ;;  %v11022_v22 = vpop.eup %11021  ;;  %v16676_v15 = vld [vmem:[#allocation44_spill] sm:$0xff] }
 0x309   : > { %v8085_v51 = vpop.f32.mrf.mxu0  ;;  %v7258_v21 = vadd.f32 %v15641_v20, %v16671_v63  ;;  %8783 = vst.msk [vmem:[%s15733_s21 + $0x50] sm:$0xff] %vm755_vm1, %v8751_v14  ;;  %11035 = vrsqrt.f32 %v8631_v45  ;;  %v8601_v31 = vadd.f32 %v8522_v43, %v16672_v26  ;;  %v7684_v40 = vadd.f32 %v16674_v6, %v16673_v57  ;;  %v16679_v14 = vld [vmem:[#allocation70_spill] sm:$0xff] }
 0x30a   : > { %8781 = vst.msk [vmem:[%s15733_s21 + $0x40] sm:$0xff] %vm755_vm1, %v8749_v27  ;;  %v8752_v5 = vmul.f32 %v11018_v48, %v8720_v2  ;;  %v8718_v50 = vmul.f32 %v8686_v18, %v8173_v58  ;;  %v8176_v59 = vadd.f32 %v8085_v51, %v7257_v49  ;;  %v8691_v35 = vand.u32 2147483647, %v8178_v54  ;;  %v10888_v9 = vpop.f32.mrf.mxu1  ;;  %v11024_v36 = vpop.eup %11023  ;;  %v16680_v51 = vld [vmem:[#allocation47_spill] sm:$0xff] }
 0x30b   : > { %v10834_v1 = vpop.f32.mrf.mxu0  ;;  %11037 = vrsqrt.f32 %v8630_v10  ;;  %v8602_v62 = vadd.f32 %v10885_v0, %v16675_v42  ;;  %v8633_v13 = vadd.f32 1e-06, %v8601_v31  ;;  %v8604_v28 = vadd.f32 %v10888_v9, %v16676_v15  ;;  %v16684_v9 = vld [vmem:[#allocation18_spill] sm:$0xff] }
 0x30c   : > { %8784 = vst.msk [vmem:[%s15733_s21 + $0x58] sm:$0xff] %vm755_vm1, %v8752_v5  ;;  %v8750_v60 = vmul.f32 %v11022_v22, %v8718_v50  ;;  %v8689_v8 = vand.u32 2147483647, %v8176_v59  ;;  %v8179_v56 = vadd.f32 %v10834_v1, %v7260_v7  ;;  %v8532_v38 = vpop.f32.mrf.mxu1  ;;  %v7261_v32 = vadd.f32 %v15651_v37, %v16677_v11  ;;  %v16681_v5 = vld [vmem:[#allocation36_spill] sm:$0xff]  ;;  %v16682_v50 = vld [vmem:[#allocation9_spill] sm:$0xff] }
 0x30d   : > { %v8088_v20 = vpop.f32.mrf.mxu0  ;;  %v8603_v25 = vadd.f32 %v8532_v38, %v7684_v40  ;;  %v8723_v41 = vmul.f32 %v8691_v35, %v8178_v54  ;;  %11039 = vrsqrt.f32 %v8633_v13  ;;  %v8636_v61 = vadd.f32 1e-06, %v8604_v28  ;;  %v16683_v1 = vld [vmem:[#allocation76_spill] sm:$0xff] }
 0x30e   : > { %v11026_v30 = vpop.eup %11025  ;;  %8782 = vst.msk [vmem:[%s15733_s21 + $0x48] sm:$0xff] %vm755_vm1, %v8750_v60  ;;  %v8721_v44 = vmul.f32 %v8689_v8, %v8176_v59  ;;  %v8692_v49 = vand.u32 2147483647, %v8179_v56  ;;  %v8177_v19 = vadd.f32 %v8088_v20, %v7258_v21  ;;  %v10891_v48 = vpop.f32.mrf.mxu1  ;;  %v7264_v17 = vadd.f32 %v15656_v55, %v16678_v39  ;;  %v16685_v20 = vld [vmem:[#allocation57_spill] sm:$0xff]  ;;  %v16687_v11 = vld [vmem:[#allocation72_spill] sm:$0xff]  ;;  %v16689_v39 = vld [vmem:[#allocation58_spill] sm:$0xff] }
 0x30f   : > { %v10837_v33 = vpop.f32.mrf.mxu0  ;;  %v8634_v3 = vadd.f32 1e-06, %v8602_v62  ;;  %v8635_v37 = vadd.f32 1e-06, %v8603_v25  ;;  %11041 = vrsqrt.f32 %v8636_v61  ;;  %v7262_v10 = vadd.f32 %v15661_v16, %v16679_v14 }
 0x310   : > { %v11028_v23 = vpop.eup %11027  ;;  %v8753_v4 = vmul.f32 %v11024_v36, %v8721_v44  ;;  %v8724_v58 = vmul.f32 %v8692_v49, %v8179_v56  ;;  %v8690_v52 = vand.u32 2147483647, %v8177_v19  ;;  %v8182_v24 = vadd.f32 %v10837_v33, %v15646_v34  ;;  %v8542_v2 = vpop.f32.mrf.mxu1 }
 0x311   : > { %v8755_v0 = vmul.f32 %v11028_v23, %v8723_v41  ;;  %v8101_v27 = vpop.f32.mrf.mxu0  ;;  %v11030_v7 = vpop.eup %11029  ;;  %11043 = vrsqrt.f32 %v8635_v37  ;;  %v8605_v45 = vadd.f32 %v8542_v2, %v16680_v51  ;;  %v7688_v59 = vadd.f32 %v16682_v50, %v16681_v5  ;;  %v16691_v37 = vld [vmem:[#allocation48_spill] sm:$0xff] }
 0x312   : > { %8785 = vst.msk [vmem:[%s15733_s21 + $0x60] sm:$0xff] %vm755_vm1, %v8753_v4  ;;  %v8756_v18 = vmul.f32 %v11026_v30, %v8724_v58  ;;  %v8722_v54 = vmul.f32 %v8690_v52, %v8177_v19  ;;  %v8180_v12 = vadd.f32 %v8101_v27, %v7261_v32  ;;  %v8695_v34 = vand.u32 2147483647, %v8182_v24  ;;  %v10894_v43 = vpop.f32.mrf.mxu1  ;;  %v11032_v22 = vpop.eup %11031  ;;  %v16686_v19 = vld [vmem:[#allocation31_spill] sm:$0xff]  ;;  %v16688_v32 = vld [vmem:[#allocation77_spill] sm:$0xff]  ;;  %v16695_v5 = vld [vmem:[#allocation4_spill] sm:$0xff] }
 0x313   : > { %8787 = vst.msk [vmem:[%s15733_s21 + $0x70] sm:$0xff] %vm755_vm1, %v8755_v0  ;;  %v10838_v55 = vpop.f32.mrf.mxu0  ;;  %11045 = vrsqrt.f32 %v8634_v3  ;;  %v8606_v26 = vadd.f32 %v10891_v48, %v16683_v1  ;;  %v8637_v31 = vadd.f32 1e-06, %v8605_v45  ;;  %v8608_v36 = vadd.f32 %v10894_v43, %v16684_v9  ;;  %v16694_v45 = vld [vmem:[#allocation3_spill] sm:$0xff] }
 0x314   : > { %8788 = vst.msk [vmem:[%s15733_s21 + $0x78] sm:$0xff] %vm755_vm1, %v8756_v18  ;;  %v8754_v63 = vmul.f32 %v11030_v7, %v8722_v54  ;;  %v8693_v21 = vand.u32 2147483647, %v8180_v12  ;;  %v8183_v35 = vadd.f32 %v10838_v55, %v7264_v17  ;;  %v8552_v57 = vpop.f32.mrf.mxu1  ;;  %v11034_v56 = vpop.eup %11033  ;;  %v7265_v42 = vadd.f32 %v15671_v29, %v16685_v20  ;;  %v16690_v17 = vld [vmem:[#allocation49_spill] sm:$0xff]  ;;  %v16693_v7 = vld [vmem:[#allocation19_spill] sm:$0xff]  ;;  %v16698_v20 = vld [vmem:[#allocation24_spill] sm:$0xff] }
 0x315   : > { %v8104_v16 = vpop.f32.mrf.mxu0  ;;  %v8607_v8 = vadd.f32 %v8552_v57, %v7688_v59  ;;  %v8727_v62 = vmul.f32 %v8695_v34, %v8182_v24  ;;  %11047 = vrsqrt.f32 %v8637_v31  ;;  %v8640_v15 = vadd.f32 1e-06, %v8608_v36  ;;  %v16697_v31 = vld [vmem:[#allocation37_spill] sm:$0xff] }
 0x316   : > { %8786 = vst.msk [vmem:[%s15733_s21 + $0x68] sm:$0xff] %vm755_vm1, %v8754_v63  ;;  %v8725_v6 = vmul.f32 %v8693_v21, %v8180_v12  ;;  %v8696_v40 = vand.u32 2147483647, %v8183_v35  ;;  %v8181_v60 = vadd.f32 %v8104_v16, %v7262_v10  ;;  %v10897_v28 = vpop.f32.mrf.mxu1  ;;  %v11036_v38 = vpop.eup %11035  ;;  %v7268_v41 = vadd.f32 %v16688_v32, %v16687_v11  ;;  %v16692_v12 = vld [vmem:[#allocation15_spill] sm:$0xff] }
 0x317   : > { %v10841_v13 = vpop.f32.mrf.mxu0  ;;  %v8759_v33 = vmul.f32 %v11036_v38, %v8727_v62  ;;  %v8638_v61 = vadd.f32 1e-06, %v8606_v26  ;;  %v8639_v29 = vadd.f32 1e-06, %v8607_v8  ;;  %11049 = vrsqrt.f32 %v8640_v15  ;;  %v16696_v26 = vld [vmem:[#allocation39_spill] sm:$0xff]  ;;  %v16699_v62 = vld [vmem:[#allocation73_spill] sm:$0xff] }
 0x318   : > { %v8757_v30 = vmul.f32 %v11032_v22, %v8725_v6  ;;  %v8728_v44 = vmul.f32 %v8696_v40, %v8183_v35  ;;  %v8694_v49 = vand.u32 2147483647, %v8181_v60  ;;  %v8186_v25 = vadd.f32 %v10841_v13, %v16686_v19  ;;  %v8562_v23 = vpop.f32.mrf.mxu1  ;;  %v11038_v4 = vpop.eup %11037  ;;  %v16700_v13 = vld [vmem:[#allocation38_spill] sm:$0xff] }
 0x319   : > { %v8117_v48 = vpop.f32.mrf.mxu0  ;;  %v7266_v0 = vadd.f32 %v16690_v17, %v16689_v39  ;;  %8791 = vst.msk [vmem:[%s15733_s21 + $0x90] sm:$0xff] %vm755_vm1, %v8759_v33  ;;  %11051 = vrsqrt.f32 %v8639_v29  ;;  %v8609_v2 = vadd.f32 %v8562_v23, %v16691_v37  ;;  %v7692_v14 = vadd.f32 %v16693_v7, %v16692_v12 }
 0x31a   : > { %8789 = vst.msk [vmem:[%s15733_s21 + $0x80] sm:$0xff] %vm755_vm1, %v8757_v30  ;;  %v8760_v58 = vmul.f32 %v11034_v56, %v8728_v44  ;;  %v8726_v52 = vmul.f32 %v8694_v49, %v8181_v60  ;;  %v8184_v24 = vadd.f32 %v8117_v48, %v7265_v42  ;;  %v8699_v3 = vand.u32 2147483647, %v8186_v25  ;;  %v10900_v18 = vpop.f32.mrf.mxu1  ;;  %v11040_v54 = vpop.eup %11039 }
 0x31b   : > { %v10842_v27 = vpop.f32.mrf.mxu0  ;;  %11053 = vrsqrt.f32 %v8638_v61  ;;  %v8610_v43 = vadd.f32 %v10897_v28, %v16694_v45  ;;  %v8641_v22 = vadd.f32 1e-06, %v8609_v2  ;;  %v8612_v50 = vadd.f32 %v10900_v18, %v16695_v5  ;;  %v16701_v61 = vld [vmem:[#allocation40_spill] sm:$0xff] }
 0x31c   : > { %8792 = vst.msk [vmem:[%s15733_s21 + $0x98] sm:$0xff] %vm755_vm1, %v8760_v58  ;;  %v8758_v10 = vmul.f32 %v11038_v4, %v8726_v52  ;;  %v8697_v34 = vand.u32 2147483647, %v8184_v24  ;;  %v8187_v55 = vadd.f32 %v10842_v27, %v7268_v41  ;;  %v8572_v59 = vpop.f32.mrf.mxu1  ;;  %v11042_v1 = vpop.eup %11041  ;;  %v7269_v9 = vadd.f32 %v16697_v31, %v16696_v26 }
 0x31d   : > { %v8120_v51 = vpop.f32.mrf.mxu0  ;;  %v8611_v16 = vadd.f32 %v8572_v59, %v7692_v14  ;;  %v8731_v36 = vmul.f32 %v8699_v3, %v8186_v25  ;;  %11055 = vrsqrt.f32 %v8641_v22  ;;  %v8644_v6 = vadd.f32 1e-06, %v8612_v50  ;;  %v16705_v59 = vld [vmem:[#allocation79_spill] sm:$0xff] }
 0x31e   : > { %8790 = vst.msk [vmem:[%s15733_s21 + $0x88] sm:$0xff] %vm755_vm1, %v8758_v10  ;;  %v8729_v63 = vmul.f32 %v8697_v34, %v8184_v24  ;;  %v8700_v21 = vand.u32 2147483647, %v8187_v55  ;;  %v8185_v35 = vadd.f32 %v8120_v51, %v7266_v0  ;;  %v11044_v40 = vpop.eup %11043  ;;  %v7272_v15 = vadd.f32 %v16700_v13, %v16699_v62  ;;  %v16702_v0 = vld [vmem:[#allocation22_spill] sm:$0xff] }
 0x31f   : > { %v10845_v57 = vpop.f32.mrf.mxu0  ;;  %v8763_v28 = vmul.f32 %v11044_v40, %v8731_v36  ;;  %v8642_v38 = vadd.f32 1e-06, %v8610_v43  ;;  %v8643_v44 = vadd.f32 1e-06, %v8611_v16  ;;  %11057 = vrsqrt.f32 %v8644_v6  ;;  %v16703_v34 = vld [vmem:[#allocation78_spill] sm:$0xff] }
 0x320   : > { %v8761_v60 = vmul.f32 %v11040_v54, %v8729_v63  ;;  %v8732_v8 = vmul.f32 %v8700_v21, %v8187_v55  ;;  %v8698_v56 = vand.u32 2147483647, %v8185_v35  ;;  %v8190_v42 = vadd.f32 %v10845_v57, %v16698_v20  ;;  %v11046_v49 = vpop.eup %11045  ;;  %v16704_v55 = vld [vmem:[#allocation50_spill] sm:$0xff]  ;;  %v16706_v63 = vld [vmem:[#allocation17_spill] sm:$0xff] }
 0x321   : > { %v8133_v30 = vpop.f32.mrf.mxu0  ;;  %8795 = vst.msk [vmem:[%s15733_s21 + $0xb0] sm:$0xff] %vm755_vm1, %v8763_v28  ;;  %11059 = vrsqrt.f32 %v8643_v44  ;;  %v7270_v48 = vadd.f32 %v15696_v47, %v16701_v61  ;;  %v7273_v3 = vadd.f32 %v15702_v46, %v16702_v0  ;;  %v7276_v51 = vadd.f32 %v16704_v55, %v16703_v34 }
 0x322   : > { %8793 = vst.msk [vmem:[%s15733_s21 + $0xa0] sm:$0xff] %vm755_vm1, %v8761_v60  ;;  %v8764_v19 = vmul.f32 %v11042_v1, %v8732_v8  ;;  %v8730_v25 = vmul.f32 %v8698_v56, %v8185_v35  ;;  %v8188_v11 = vadd.f32 %v8133_v30, %v7269_v9  ;;  %v8703_v32 = vand.u32 2147483647, %v8190_v42  ;;  %v11048_v33 = vpop.eup %11047 }
 0x323   : > { %v10846_v41 = vpop.f32.mrf.mxu0  ;;  %11061 = vrsqrt.f32 %v8642_v38 }
 0x324   : > { %8796 = vst.msk [vmem:[%s15733_s21 + $0xb8] sm:$0xff] %vm755_vm1, %v8764_v19  ;;  %v8762_v29 = vmul.f32 %v11046_v49, %v8730_v25  ;;  %v8701_v23 = vand.u32 2147483647, %v8188_v11  ;;  %v8191_v4 = vadd.f32 %v10846_v41, %v7272_v15  ;;  %v11050_v17 = vpop.eup %11049  ;;  %v8735_v27 = vmul.f32 %v8703_v32, %v8190_v42 }
 0x325   : > { %v8136_v58 = vpop.f32.mrf.mxu0 }
 0x326   : > { %8794 = vst.msk [vmem:[%s15733_s21 + $0xa8] sm:$0xff] %vm755_vm1, %v8762_v29  ;;  %v8733_v52 = vmul.f32 %v8701_v23, %v8188_v11  ;;  %v8704_v24 = vand.u32 2147483647, %v8191_v4  ;;  %v8189_v39 = vadd.f32 %v8136_v58, %v7270_v48  ;;  %v11052_v37 = vpop.eup %11051 }
 0x327   : > { %v10849_v47 = vpop.f32.mrf.mxu0  ;;  %v8767_v7 = vmul.f32 %v11052_v37, %v8735_v27 }
 0x328   : > { %v8765_v2 = vmul.f32 %v11048_v33, %v8733_v52  ;;  %v8736_v18 = vmul.f32 %v8704_v24, %v8191_v4  ;;  %v8702_v54 = vand.u32 2147483647, %v8189_v39  ;;  %v8194_v12 = vadd.f32 %v10849_v47, %v15700_v53  ;;  %v11054_v10 = vpop.eup %11053 }
 0x329   : > { %v8149_v14 = vpop.f32.mrf.mxu0  ;;  %8799 = vst.msk [vmem:[%s15733_s21 + $0xd0] sm:$0xff] %vm755_vm1, %v8767_v7  ;;  %v7274_v53 = vadd.f32 %v16706_v63, %v16705_v59 }
 0x32a   : > { %8797 = vst.msk [vmem:[%s15733_s21 + $0xc0] sm:$0xff] %vm755_vm1, %v8765_v2  ;;  %v8768_v46 = vmul.f32 %v11050_v17, %v8736_v18  ;;  %v8734_v45 = vmul.f32 %v8702_v54, %v8189_v39  ;;  %v8192_v43 = vadd.f32 %v8149_v14, %v7273_v3  ;;  %v8707_v22 = vand.u32 2147483647, %v8194_v12  ;;  %v11056_v50 = vpop.eup %11055 }
 0x32b   : > { %v10850_v5 = vpop.f32.mrf.mxu0 }
 0x32c   : > { %8800 = vst.msk [vmem:[%s15733_s21 + $0xd8] sm:$0xff] %vm755_vm1, %v8768_v46  ;;  %v8766_v21 = vmul.f32 %v11054_v10, %v8734_v45  ;;  %v8705_v35 = vand.u32 2147483647, %v8192_v43  ;;  %v8195_v16 = vadd.f32 %v10850_v5, %v7276_v51  ;;  %v11058_v36 = vpop.eup %11057  ;;  %v8739_v57 = vmul.f32 %v8707_v22, %v8194_v12 }
 0x32d   : > { %v8152_v1 = vpop.f32.mrf.mxu0 }
 0x32e   : > { %8798 = vst.msk [vmem:[%s15733_s21 + $0xc8] sm:$0xff] %vm755_vm1, %v8766_v21  ;;  %v8737_v26 = vmul.f32 %v8705_v35, %v8192_v43  ;;  %v8708_v31 = vand.u32 2147483647, %v8195_v16  ;;  %v8193_v9 = vadd.f32 %v8152_v1, %v7274_v53  ;;  %v11060_v6 = vpop.eup %11059 }
 0x32f   : > { %v8771_v56 = vmul.f32 %v11060_v6, %v8739_v57 }
 0x330   : > { %v8769_v40 = vmul.f32 %v11056_v50, %v8737_v26  ;;  %v8740_v60 = vmul.f32 %v8708_v31, %v8195_v16  ;;  %v8706_v8 = vand.u32 2147483647, %v8193_v9  ;;  %v11062_v62 = vpop.eup %11061 }
 0x331   : > { %8803 = vst.msk [vmem:[%s15733_s21 + $0xf0] sm:$0xff] %vm755_vm1, %v8771_v56 }
 0x332   : > { %8801 = vst.msk [vmem:[%s15733_s21 + $0xe0] sm:$0xff] %vm755_vm1, %v8769_v40  ;;  %v8772_v20 = vmul.f32 %v11058_v36, %v8740_v60  ;;  %v8738_v42 = vmul.f32 %v8706_v8, %v8193_v9 }
 0x334   : > { %8804 = vst.msk [vmem:[%s15733_s21 + $0xf8] sm:$0xff] %vm755_vm1, %v8772_v20  ;;  %v8770_v13 = vmul.f32 %v11062_v62, %v8738_v42 }
 0x336   : > { %8802 = vst.msk [vmem:[%s15733_s21 + $0xe8] sm:$0xff] %vm755_vm1, %v8770_v13 }
 0x337 PF: > { %s13_s12 = sadd.s32 1, %s11128_s12  }
 0x338   : > { %p10_p4 = scmp.ge.s32.totalorder %s13_s12, 4  }
 0x33a   :  { %12 = sbr.rel (!%p10_p4) target bundleno = 1 (0x1), region = 72 }

</bundles_post_ra>
